<compile_context>
chip_gen: v5e
topology: v5e:2x2
jax: 0.10.0
libtpu: 0.0.40
codegen_flags: <defaults>
</compile_context>

<pallas_src>
import jax
import jax.numpy as jnp
from jax.experimental import pallas as pl
from jax.experimental.pallas import tpu as pltpu


# ---------------------------------------------------------------------------
# Fused forward kernel
# ---------------------------------------------------------------------------
def _rnn_fused_kernel(x_ref, fcw_ref, fcb_ref,
                      wih0_ref, whh0_ref, b0_ref,
                      w1cat_ref, b1_ref,
                      outw_ref, outb_ref,
                      o_ref,
                      g0_ref):
    H = whh0_ref.shape[0]              # 128
    Bp = o_ref.shape[0] // 4           # padded batch (multiple of 8)
    T = x_ref.shape[0] // Bp           # 120

    # ---- Stage 1: Linear(180->128) + folded BatchNorm + LeakyReLU, whole sequence at once ----
    x = x_ref[...].astype(jnp.bfloat16)
    z = jnp.dot(x, fcw_ref[...], preferred_element_type=jnp.float32) + fcb_ref[...]
    act = jnp.where(z > 0, z, 0.01 * z)                       # LeakyReLU(0.01), f32

    # ---- Stage 2: hoisted input->hidden projection of LSTM layer 0 for all T*Bp rows ----
    g0_ref[...] = (jnp.dot(act.astype(jnp.bfloat16), wih0_ref[...],
                           preferred_element_type=jnp.float32) + b0_ref[...])

    whh0 = whh0_ref[...]               # (128, 512) bf16
    w1c = w1cat_ref[...]               # (256, 512) bf16  == [Wih1; Whh1]
    b1 = b1_ref[...]                   # (1, 512)  f32

    def gates_to_hc(gates, c):
        i = jax.nn.sigmoid(gates[:, 0:H])
        f = jax.nn.sigmoid(gates[:, H:2 * H])
        g = jnp.tanh(gates[:, 2 * H:3 * H])
        o = jax.nn.sigmoid(gates[:, 3 * H:4 * H])
        c_new = f * c + i * g
        h_new = o * jnp.tanh(c_new)
        return h_new, c_new

    def two_layer_step(g_in0, h0, c0, h1, c1):
        # layer 0: input projection already precomputed (g_in0 includes bias)
        gates0 = g_in0 + jnp.dot(h0.astype(jnp.bfloat16), whh0,
                                 preferred_element_type=jnp.float32)
        h0, c0 = gates_to_hc(gates0, c0)
        # layer 1: fused [x, h] @ [Wih; Whh]  (K = 256 fills the MXU depth)
        xh = jnp.concatenate([h0, h1], axis=1).astype(jnp.bfloat16)
        gates1 = jnp.dot(xh, w1c, preferred_element_type=jnp.float32) + b1
        h1, c1 = gates_to_hc(gates1, c1)
        return h0, c0, h1, c1

    zeros = jnp.zeros((Bp, H), jnp.float32)

    # ---- Pass 1: T-step recurrence; only the final top-layer hidden is needed ----
    def body(t, carry):
        h0, c0, h1, c1 = carry
        start = pl.multiple_of(t * Bp, 8)
        g_in0 = g0_ref[pl.ds(start, Bp), :]
        return two_layer_step(g_in0, h0, c0, h1, c1)

    _, _, last, _ = jax.lax.fori_loop(0, T, body, (zeros, zeros, zeros, zeros))

    # ---- Pass 2: 4 steps, constant input = `last`, fresh zero state, same weights ----
    g_in2 = (jnp.dot(last.astype(jnp.bfloat16), wih0_ref[...],
                     preferred_element_type=jnp.float32) + b0_ref[...])
    h0 = c0 = h1 = c1 = zeros
    outs = []
    for _ in range(4):
        h0, c0, h1, c1 = two_layer_step(g_in2, h0, c0, h1, c1)
        outs.append(h1)
    y = jnp.concatenate(outs, axis=0)                          # (4*Bp, H), rows ordered (t, b)

    # ---- Final Linear(128 -> 10), padded to lane-dense 128-wide output ----
    o_ref[...] = (jnp.dot(y.astype(jnp.bfloat16), outw_ref[...],
                          preferred_element_type=jnp.float32) + outb_ref[...])


# ---------------------------------------------------------------------------
# One-time parameter preparation (BN fold, transposes, bias sums, bf16, padding)
# ---------------------------------------------------------------------------
def prepare_params(p, eps=1e-5):
    scale = p["bn_gamma"] / jnp.sqrt(p["bn_var"] + eps)
    shift = p["bn_beta"] - p["bn_mean"] * scale
    H = p["w_hh0"].shape[1]            # 128
    n_out = p["out_w"].shape[0]        # 10

    fcw = (p["fc_w"] * scale[:, None]).T.astype(jnp.bfloat16)           # (180, 128)
    fcb = (p["fc_b"] * scale + shift)[None, :].astype(jnp.float32)      # (1, 128)

    wih0 = p["w_ih0"].T.astype(jnp.bfloat16)                            # (128, 512)
    whh0 = p["w_hh0"].T.astype(jnp.bfloat16)                            # (128, 512)
    b0 = (p["b_ih0"] + p["b_hh0"])[None, :].astype(jnp.float32)         # (1, 512)

    w1cat = jnp.concatenate([p["w_ih1"].T, p["w_hh1"].T],
                            axis=0).astype(jnp.bfloat16)                # (256, 512)
    b1 = (p["b_ih1"] + p["b_hh1"])[None, :].astype(jnp.float32)         # (1, 512)

    outw = jnp.zeros((H, H), jnp.float32).at[:, :n_out].set(p["out_w"].T)
    outb = jnp.zeros((1, H), jnp.float32).at[:, :n_out].set(p["out_b"][None, :])

    return {"fcw": fcw, "fcb": fcb,
            "wih0": wih0, "whh0": whh0, "b0": b0,
            "w1cat": w1cat, "b1": b1,
            "outw": outw.astype(jnp.bfloat16), "outb": outb}


# ---------------------------------------------------------------------------
# Forward pass matching RNN.forward
# ---------------------------------------------------------------------------
def rnn_forward(x, prep, n_out=10):
    H = 128
    # x.reshape(-1,180,120).permute(0,2,1) -> time-major (T, B, 180) so each timestep is a
    # contiguous slab and no transpose is needed between the FC and the LSTM.
    x = x.reshape(-1, 180, 120)
    B = x.shape[0]
    T = x.shape[2]
    x_tm = jnp.transpose(x, (2, 0, 1))                                  # (T, B, 180)

    Bp = ((B + 7) // 8) * 8                                             # sublane-align batch
    if Bp != B:
        x_tm = jnp.pad(x_tm, ((0, 0), (0, Bp - B), (0, 0)))
    x_flat = x_tm.reshape(T * Bp, 180).astype(jnp.float32)

    out_pad = pl.pallas_call(
        _rnn_fused_kernel,
        out_shape=jax.ShapeDtypeStruct((4 * Bp, H), jnp.float32),
        grid=(1,),
        in_specs=[
            pl.BlockSpec(x_flat.shape, lambda i: (0, 0)),
            pl.BlockSpec(prep["fcw"].shape, lambda i: (0, 0)),
            pl.BlockSpec(prep["fcb"].shape, lambda i: (0, 0)),
            pl.BlockSpec(prep["wih0"].shape, lambda i: (0, 0)),
            pl.BlockSpec(prep["whh0"].shape, lambda i: (0, 0)),
            pl.BlockSpec(prep["b0"].shape, lambda i: (0, 0)),
            pl.BlockSpec(prep["w1cat"].shape, lambda i: (0, 0)),
            pl.BlockSpec(prep["b1"].shape, lambda i: (0, 0)),
            pl.BlockSpec(prep["outw"].shape, lambda i: (0, 0)),
            pl.BlockSpec(prep["outb"].shape, lambda i: (0, 0)),
        ],
        out_specs=pl.BlockSpec((4 * Bp, H), lambda i: (0, 0)),
        scratch_shapes=[pltpu.VMEM((T * Bp, 4 * H), jnp.float32)],      # hoisted layer-0 gates
        compiler_params=pltpu.CompilerParams(dimension_semantics=("arbitrary",)),
    )(x_flat, prep["fcw"], prep["fcb"], prep["wih0"], prep["whh0"], prep["b0"],
      prep["w1cat"], prep["b1"], prep["outw"], prep["outb"])

    # (4*Bp, 128) rows ordered (t, b) -> (B, 4, n_out)
    out = out_pad.reshape(4, Bp, H)[:, :B, :n_out]
    return jnp.transpose(out, (1, 0, 2))


# ---------------------------------------------------------------------------
# Parameters (deterministic synthetic init, shapes from the PyTorch __init__)
# ---------------------------------------------------------------------------
def init_params(key):
    ks = jax.random.split(key, 16)

    def nrm(k, shape, s=0.05):
        return jax.random.normal(k, shape, jnp.float32) * s

    p = {}
    p["fc_w"] = nrm(ks[0], (128, 180))            # nn.Linear(180, 128)
    p["fc_b"] = nrm(ks[1], (128,))
    p["bn_gamma"] = jax.random.uniform(ks[2], (128,), jnp.float32, 0.5, 1.5)
    p["bn_beta"] = nrm(ks[3], (128,))
    p["bn_mean"] = nrm(ks[4], (128,))
    p["bn_var"] = jax.random.uniform(ks[5], (128,), jnp.float32, 0.5, 1.5)
    p["w_ih0"] = nrm(ks[6], (512, 128))           # LSTM layer 0
    p["w_hh0"] = nrm(ks[7], (512, 128))
    p["b_ih0"] = nrm(ks[8], (512,))
    p["b_hh0"] = nrm(ks[9], (512,))
    p["w_ih1"] = nrm(ks[10], (512, 128))          # LSTM layer 1
    p["w_hh1"] = nrm(ks[11], (512, 128))
    p["b_ih1"] = nrm(ks[12], (512,))
    p["b_hh1"] = nrm(ks[13], (512,))
    p["out_w"] = nrm(ks[14], (10, 128))           # nn.Linear(128, 10)
    p["out_b"] = nrm(ks[15], (10,))
    return p


if __name__ == "__main__":
    key = jax.random.PRNGKey(0)
    pkey, xkey = jax.random.split(key)
    params = init_params(pkey)
    prep = prepare_params(params)                 # one-time: BN fold, transposes, bf16, padding
    x = jax.random.normal(xkey, (2, 180, 120), jnp.float32)

    fwd = jax.jit(rnn_forward, static_argnames=("n_out",))
    out = fwd(x, prep, n_out=10)
    jax.block_until_ready(out)
    assert out.shape == (2, 4, 10) and out.dtype == jnp.float32
    assert bool(jnp.all(jnp.isfinite(out)))
    print("KERNEL_OK")
</pallas_src>

<mosaic_0001>
module attributes {stable_mosaic.version = 11 : i64} {
  func.func @_rnn_fused_kernel(%arg0: i32, %arg1: memref<960x180xf32, #tpu.memory_space<vmem>>, %arg2: memref<180x128xbf16, #tpu.memory_space<vmem>>, %arg3: memref<1x128xf32, #tpu.memory_space<vmem>>, %arg4: memref<128x512xbf16, #tpu.memory_space<vmem>>, %arg5: memref<128x512xbf16, #tpu.memory_space<vmem>>, %arg6: memref<1x512xf32, #tpu.memory_space<vmem>>, %arg7: memref<256x512xbf16, #tpu.memory_space<vmem>>, %arg8: memref<1x512xf32, #tpu.memory_space<vmem>>, %arg9: memref<128x128xbf16, #tpu.memory_space<vmem>>, %arg10: memref<1x128xf32, #tpu.memory_space<vmem>>, %arg11: memref<32x128xf32, #tpu.memory_space<vmem>>, %arg12: memref<960x512xf32, #tpu.memory_space<vmem>>) attributes {dimension_semantics = [#tpu.dimension_semantics<arbitrary>], iteration_bounds = array<i64: 1>, scalar_prefetch = 0 : i64, scratch_operands = 1 : i64, tpu.core_type = #tpu.core_type<tc>, window_params = [{pipeline_mode = #tpu.pipeline_mode<synchronous>, transform_indices = @transform_0, window_bounds = array<i64: 960, 180>}, {pipeline_mode = #tpu.pipeline_mode<synchronous>, transform_indices = @transform_1, window_bounds = array<i64: 180, 128>}, {pipeline_mode = #tpu.pipeline_mode<synchronous>, transform_indices = @transform_2, window_bounds = array<i64: 1, 128>}, {pipeline_mode = #tpu.pipeline_mode<synchronous>, transform_indices = @transform_3, window_bounds = array<i64: 128, 512>}, {pipeline_mode = #tpu.pipeline_mode<synchronous>, transform_indices = @transform_4, window_bounds = array<i64: 128, 512>}, {pipeline_mode = #tpu.pipeline_mode<synchronous>, transform_indices = @transform_5, window_bounds = array<i64: 1, 512>}, {pipeline_mode = #tpu.pipeline_mode<synchronous>, transform_indices = @transform_6, window_bounds = array<i64: 256, 512>}, {pipeline_mode = #tpu.pipeline_mode<synchronous>, transform_indices = @transform_7, window_bounds = array<i64: 1, 512>}, {pipeline_mode = #tpu.pipeline_mode<synchronous>, transform_indices = @transform_8, window_bounds = array<i64: 128, 128>}, {pipeline_mode = #tpu.pipeline_mode<synchronous>, transform_indices = @transform_9, window_bounds = array<i64: 1, 128>}, {pipeline_mode = #tpu.pipeline_mode<synchronous>, transform_indices = @transform_10, window_bounds = array<i64: 32, 128>}]} {
    %c0 = arith.constant 0 : index
    %c0_0 = arith.constant 0 : index
    %0 = vector.load %arg1[%c0, %c0_0] : memref<960x180xf32, #tpu.memory_space<vmem>>, vector<960x180xf32>
    %1 = arith.truncf %0 : vector<960x180xf32> to vector<960x180xbf16>
    %c0_1 = arith.constant 0 : index
    %c0_2 = arith.constant 0 : index
    %2 = vector.load %arg2[%c0_1, %c0_2] : memref<180x128xbf16, #tpu.memory_space<vmem>>, vector<180x128xbf16>
    %cst = arith.constant dense<0.000000e+00> : vector<960x128xf32>
    %3 = tpu.matmul %1, %2, %cst {dimension_numbers = #tpu.dot_dimension_numbers<[1], [0], [0], [1], [0, 0, 1, 1], [], []>} : vector<960x180xbf16>, vector<180x128xbf16>, vector<960x128xf32> -> vector<960x128xf32>
    %c0_3 = arith.constant 0 : index
    %c0_4 = arith.constant 0 : index
    %4 = vector.load %arg3[%c0_3, %c0_4] : memref<1x128xf32, #tpu.memory_space<vmem>>, vector<1x128xf32>
    %5 = vector.broadcast %4 : vector<1x128xf32> to vector<960x128xf32>
    %6 = arith.addf %3, %5 : vector<960x128xf32>
    %cst_5 = arith.constant 0.000000e+00 : f32
    %7 = vector.broadcast %cst_5 : f32 to vector<960x128xf32>
    %8 = arith.cmpf ogt, %6, %7 : vector<960x128xf32>
    %cst_6 = arith.constant 0.00999999977 : f32
    %9 = vector.broadcast %cst_6 : f32 to vector<960x128xf32>
    %10 = arith.mulf %9, %6 : vector<960x128xf32>
    %11 = arith.select %8, %6, %10 : vector<960x128xi1>, vector<960x128xf32>
    %12 = arith.truncf %11 : vector<960x128xf32> to vector<960x128xbf16>
    %c0_7 = arith.constant 0 : index
    %c0_8 = arith.constant 0 : index
    %13 = vector.load %arg4[%c0_7, %c0_8] : memref<128x512xbf16, #tpu.memory_space<vmem>>, vector<128x512xbf16>
    %cst_9 = arith.constant dense<0.000000e+00> : vector<960x512xf32>
    %14 = tpu.matmul %12, %13, %cst_9 {dimension_numbers = #tpu.dot_dimension_numbers<[1], [0], [0], [1], [0, 0, 1, 1], [], []>} : vector<960x128xbf16>, vector<128x512xbf16>, vector<960x512xf32> -> vector<960x512xf32>
    %c0_10 = arith.constant 0 : index
    %c0_11 = arith.constant 0 : index
    %15 = vector.load %arg6[%c0_10, %c0_11] : memref<1x512xf32, #tpu.memory_space<vmem>>, vector<1x512xf32>
    %16 = vector.broadcast %15 : vector<1x512xf32> to vector<960x512xf32>
    %17 = arith.addf %14, %16 : vector<960x512xf32>
    %c0_12 = arith.constant 0 : index
    %c0_13 = arith.constant 0 : index
    %18 = vector.load %arg12[%c0_12, %c0_13] : memref<960x512xf32, #tpu.memory_space<vmem>>, vector<960x512xf32>
    tpu.vector_store %arg12[%c0_12, %c0_13], %17 {strides = array<i32>} : memref<960x512xf32, #tpu.memory_space<vmem>>, vector<960x512xf32>,
    %c0_14 = arith.constant 0 : index
    %c0_15 = arith.constant 0 : index
    %19 = vector.load %arg5[%c0_14, %c0_15] : memref<128x512xbf16, #tpu.memory_space<vmem>>, vector<128x512xbf16>
    %c0_16 = arith.constant 0 : index
    %c0_17 = arith.constant 0 : index
    %20 = vector.load %arg7[%c0_16, %c0_17] : memref<256x512xbf16, #tpu.memory_space<vmem>>, vector<256x512xbf16>
    %c0_18 = arith.constant 0 : index
    %c0_19 = arith.constant 0 : index
    %21 = vector.load %arg8[%c0_18, %c0_19] : memref<1x512xf32, #tpu.memory_space<vmem>>, vector<1x512xf32>
    %cst_20 = arith.constant 0.000000e+00 : f32
    %22 = vector.broadcast %cst_20 : f32 to vector<8x128xf32>
    %c0_i32 = arith.constant 0 : i32
    %c120_i32 = arith.constant 120 : i32
    %23 = arith.addi %c0_i32, %c120_i32 : i32
    %c1_i32 = arith.constant 1 : i32
    %24:4 = scf.for %arg13 = %c0_i32 to %23 step %c1_i32 iter_args(%arg14 = %22, %arg15 = %22, %arg16 = %22, %arg17 = %22) -> (vector<8x128xf32>, vector<8x128xf32>, vector<8x128xf32>, vector<8x128xf32>)  : i32 {
      %c8_i32 = arith.constant 8 : i32
      %271 = arith.muli %arg13, %c8_i32 : i32
      %272 = tpu.assume_multiple %271, 8 : i32
      %273 = arith.index_cast %272 : i32 to index
      %c0_66 = arith.constant 0 : index
      %274 = vector.load %arg12[%273, %c0_66] : memref<960x512xf32, #tpu.memory_space<vmem>>, vector<8x512xf32>
      %275 = arith.truncf %arg14 : vector<8x128xf32> to vector<8x128xbf16>
      %cst_67 = arith.constant dense<0.000000e+00> : vector<8x512xf32>
      %276 = tpu.matmul %275, %19, %cst_67 {dimension_numbers = #tpu.dot_dimension_numbers<[1], [0], [0], [1], [0, 0, 1, 1], [], []>} : vector<8x128xbf16>, vector<128x512xbf16>, vector<8x512xf32> -> vector<8x512xf32>
      %277 = arith.addf %274, %276 : vector<8x512xf32>
      %278 = vector.extract_strided_slice %277 {offsets = [0, 0], sizes = [8, 128], strides = [1, 1]} : vector<8x512xf32> to vector<8x128xf32>
      %279 = arith.negf %278 : vector<8x128xf32>
      %280 = math.exp %279 : vector<8x128xf32>
      %cst_68 = arith.constant 1.000000e+00 : f32
      %281 = vector.broadcast %cst_68 : f32 to vector<8x128xf32>
      %282 = arith.addf %281, %280 : vector<8x128xf32>
      %283 = arith.divf %281, %282 : vector<8x128xf32>
      %284 = vector.extract_strided_slice %277 {offsets = [0, 128], sizes = [8, 128], strides = [1, 1]} : vector<8x512xf32> to vector<8x128xf32>
      %285 = arith.negf %284 : vector<8x128xf32>
      %286 = math.exp %285 : vector<8x128xf32>
      %cst_69 = arith.constant 1.000000e+00 : f32
      %287 = vector.broadcast %cst_69 : f32 to vector<8x128xf32>
      %288 = arith.addf %287, %286 : vector<8x128xf32>
      %289 = arith.divf %287, %288 : vector<8x128xf32>
      %290 = vector.extract_strided_slice %277 {offsets = [0, 256], sizes = [8, 128], strides = [1, 1]} : vector<8x512xf32> to vector<8x128xf32>
      %291 = math.tanh %290 : vector<8x128xf32>
      %292 = vector.extract_strided_slice %277 {offsets = [0, 384], sizes = [8, 128], strides = [1, 1]} : vector<8x512xf32> to vector<8x128xf32>
      %293 = arith.negf %292 : vector<8x128xf32>
      %294 = math.exp %293 : vector<8x128xf32>
      %cst_70 = arith.constant 1.000000e+00 : f32
      %295 = vector.broadcast %cst_70 : f32 to vector<8x128xf32>
      %296 = arith.addf %295, %294 : vector<8x128xf32>
      %297 = arith.divf %295, %296 : vector<8x128xf32>
      %298 = arith.mulf %289, %arg15 : vector<8x128xf32>
      %299 = arith.mulf %283, %291 : vector<8x128xf32>
      %300 = arith.addf %298, %299 : vector<8x128xf32>
      %301 = math.tanh %300 : vector<8x128xf32>
      %302 = arith.mulf %297, %301 : vector<8x128xf32>
      %303 = tpu.concatenate %302, %arg16 in 1 : vector<8x128xf32>, vector<8x128xf32> -> vector<8x256xf32>
      %304 = arith.truncf %303 : vector<8x256xf32> to vector<8x256xbf16>
      %cst_71 = arith.constant dense<0.000000e+00> : vector<8x512xf32>
      %305 = tpu.matmul %304, %20, %cst_71 {dimension_numbers = #tpu.dot_dimension_numbers<[1], [0], [0], [1], [0, 0, 1, 1], [], []>} : vector<8x256xbf16>, vector<256x512xbf16>, vector<8x512xf32> -> vector<8x512xf32>
      %306 = vector.broadcast %21 : vector<1x512xf32> to vector<8x512xf32>
      %307 = arith.addf %305, %306 : vector<8x512xf32>
      %308 = vector.extract_strided_slice %307 {offsets = [0, 0], sizes = [8, 128], strides = [1, 1]} : vector<8x512xf32> to vector<8x128xf32>
      %309 = arith.negf %308 : vector<8x128xf32>
      %310 = math.exp %309 : vector<8x128xf32>
      %cst_72 = arith.constant 1.000000e+00 : f32
      %311 = vector.broadcast %cst_72 : f32 to vector<8x128xf32>
      %312 = arith.addf %311, %310 : vector<8x128xf32>
      %313 = arith.divf %311, %312 : vector<8x128xf32>
      %314 = vector.extract_strided_slice %307 {offsets = [0, 128], sizes = [8, 128], strides = [1, 1]} : vector<8x512xf32> to vector<8x128xf32>
      %315 = arith.negf %314 : vector<8x128xf32>
      %316 = math.exp %315 : vector<8x128xf32>
      %cst_73 = arith.constant 1.000000e+00 : f32
      %317 = vector.broadcast %cst_73 : f32 to vector<8x128xf32>
      %318 = arith.addf %317, %316 : vector<8x128xf32>
      %319 = arith.divf %317, %318 : vector<8x128xf32>
      %320 = vector.extract_strided_slice %307 {offsets = [0, 256], sizes = [8, 128], strides = [1, 1]} : vector<8x512xf32> to vector<8x128xf32>
      %321 = math.tanh %320 : vector<8x128xf32>
      %322 = vector.extract_strided_slice %307 {offsets = [0, 384], sizes = [8, 128], strides = [1, 1]} : vector<8x512xf32> to vector<8x128xf32>
      %323 = arith.negf %322 : vector<8x128xf32>
      %324 = math.exp %323 : vector<8x128xf32>
      %cst_74 = arith.constant 1.000000e+00 : f32
      %325 = vector.broadcast %cst_74 : f32 to vector<8x128xf32>
      %326 = arith.addf %325, %324 : vector<8x128xf32>
      %327 = arith.divf %325, %326 : vector<8x128xf32>
      %328 = arith.mulf %319, %arg17 : vector<8x128xf32>
      %329 = arith.mulf %313, %321 : vector<8x128xf32>
      %330 = arith.addf %328, %329 : vector<8x128xf32>
      %331 = math.tanh %330 : vector<8x128xf32>
      %332 = arith.mulf %327, %331 : vector<8x128xf32>
      scf.yield %302, %300, %332, %330 : vector<8x128xf32>, vector<8x128xf32>, vector<8x128xf32>, vector<8x128xf32>
    }
    %c120_i32_21 = arith.constant 120 : i32
    %25 = arith.truncf %24#2 : vector<8x128xf32> to vector<8x128xbf16>
    %c0_22 = arith.constant 0 : index
    %c0_23 = arith.constant 0 : index
    %26 = vector.load %arg4[%c0_22, %c0_23] : memref<128x512xbf16, #tpu.memory_space<vmem>>, vector<128x512xbf16>
    %cst_24 = arith.constant dense<0.000000e+00> : vector<8x512xf32>
    %27 = tpu.matmul %25, %26, %cst_24 {dimension_numbers = #tpu.dot_dimension_numbers<[1], [0], [0], [1], [0, 0, 1, 1], [], []>} : vector<8x128xbf16>, vector<128x512xbf16>, vector<8x512xf32> -> vector<8x512xf32>
    %c0_25 = arith.constant 0 : index
    %c0_26 = arith.constant 0 : index
    %28 = vector.load %arg6[%c0_25, %c0_26] : memref<1x512xf32, #tpu.memory_space<vmem>>, vector<1x512xf32>
    %29 = vector.broadcast %28 : vector<1x512xf32> to vector<8x512xf32>
    %30 = arith.addf %27, %29 : vector<8x512xf32>
    %31 = arith.truncf %22 : vector<8x128xf32> to vector<8x128xbf16>
    %cst_27 = arith.constant dense<0.000000e+00> : vector<8x512xf32>
    %32 = tpu.matmul %31, %19, %cst_27 {dimension_numbers = #tpu.dot_dimension_numbers<[1], [0], [0], [1], [0, 0, 1, 1], [], []>} : vector<8x128xbf16>, vector<128x512xbf16>, vector<8x512xf32> -> vector<8x512xf32>
    %33 = arith.addf %30, %32 : vector<8x512xf32>
    %34 = vector.extract_strided_slice %33 {offsets = [0, 0], sizes = [8, 128], strides = [1, 1]} : vector<8x512xf32> to vector<8x128xf32>
    %35 = arith.negf %34 : vector<8x128xf32>
    %36 = math.exp %35 : vector<8x128xf32>
    %cst_28 = arith.constant 1.000000e+00 : f32
    %37 = vector.broadcast %cst_28 : f32 to vector<8x128xf32>
    %38 = arith.addf %37, %36 : vector<8x128xf32>
    %39 = arith.divf %37, %38 : vector<8x128xf32>
    %40 = vector.extract_strided_slice %33 {offsets = [0, 128], sizes = [8, 128], strides = [1, 1]} : vector<8x512xf32> to vector<8x128xf32>
    %41 = arith.negf %40 : vector<8x128xf32>
    %42 = math.exp %41 : vector<8x128xf32>
    %cst_29 = arith.constant 1.000000e+00 : f32
    %43 = vector.broadcast %cst_29 : f32 to vector<8x128xf32>
    %44 = arith.addf %43, %42 : vector<8x128xf32>
    %45 = arith.divf %43, %44 : vector<8x128xf32>
    %46 = vector.extract_strided_slice %33 {offsets = [0, 256], sizes = [8, 128], strides = [1, 1]} : vector<8x512xf32> to vector<8x128xf32>
    %47 = math.tanh %46 : vector<8x128xf32>
    %48 = vector.extract_strided_slice %33 {offsets = [0, 384], sizes = [8, 128], strides = [1, 1]} : vector<8x512xf32> to vector<8x128xf32>
    %49 = arith.negf %48 : vector<8x128xf32>
    %50 = math.exp %49 : vector<8x128xf32>
    %cst_30 = arith.constant 1.000000e+00 : f32
    %51 = vector.broadcast %cst_30 : f32 to vector<8x128xf32>
    %52 = arith.addf %51, %50 : vector<8x128xf32>
    %53 = arith.divf %51, %52 : vector<8x128xf32>
    %54 = arith.mulf %45, %22 : vector<8x128xf32>
    %55 = arith.mulf %39, %47 : vector<8x128xf32>
    %56 = arith.addf %54, %55 : vector<8x128xf32>
    %57 = math.tanh %56 : vector<8x128xf32>
    %58 = arith.mulf %53, %57 : vector<8x128xf32>
    %59 = tpu.concatenate %58, %22 in 1 : vector<8x128xf32>, vector<8x128xf32> -> vector<8x256xf32>
    %60 = arith.truncf %59 : vector<8x256xf32> to vector<8x256xbf16>
    %cst_31 = arith.constant dense<0.000000e+00> : vector<8x512xf32>
    %61 = tpu.matmul %60, %20, %cst_31 {dimension_numbers = #tpu.dot_dimension_numbers<[1], [0], [0], [1], [0, 0, 1, 1], [], []>} : vector<8x256xbf16>, vector<256x512xbf16>, vector<8x512xf32> -> vector<8x512xf32>
    %62 = vector.broadcast %21 : vector<1x512xf32> to vector<8x512xf32>
    %63 = arith.addf %61, %62 : vector<8x512xf32>
    %64 = vector.extract_strided_slice %63 {offsets = [0, 0], sizes = [8, 128], strides = [1, 1]} : vector<8x512xf32> to vector<8x128xf32>
    %65 = arith.negf %64 : vector<8x128xf32>
    %66 = math.exp %65 : vector<8x128xf32>
    %cst_32 = arith.constant 1.000000e+00 : f32
    %67 = vector.broadcast %cst_32 : f32 to vector<8x128xf32>
    %68 = arith.addf %67, %66 : vector<8x128xf32>
    %69 = arith.divf %67, %68 : vector<8x128xf32>
    %70 = vector.extract_strided_slice %63 {offsets = [0, 128], sizes = [8, 128], strides = [1, 1]} : vector<8x512xf32> to vector<8x128xf32>
    %71 = arith.negf %70 : vector<8x128xf32>
    %72 = math.exp %71 : vector<8x128xf32>
    %cst_33 = arith.constant 1.000000e+00 : f32
    %73 = vector.broadcast %cst_33 : f32 to vector<8x128xf32>
    %74 = arith.addf %73, %72 : vector<8x128xf32>
    %75 = arith.divf %73, %74 : vector<8x128xf32>
    %76 = vector.extract_strided_slice %63 {offsets = [0, 256], sizes = [8, 128], strides = [1, 1]} : vector<8x512xf32> to vector<8x128xf32>
    %77 = math.tanh %76 : vector<8x128xf32>
    %78 = vector.extract_strided_slice %63 {offsets = [0, 384], sizes = [8, 128], strides = [1, 1]} : vector<8x512xf32> to vector<8x128xf32>
    %79 = arith.negf %78 : vector<8x128xf32>
    %80 = math.exp %79 : vector<8x128xf32>
    %cst_34 = arith.constant 1.000000e+00 : f32
    %81 = vector.broadcast %cst_34 : f32 to vector<8x128xf32>
    %82 = arith.addf %81, %80 : vector<8x128xf32>
    %83 = arith.divf %81, %82 : vector<8x128xf32>
    %84 = arith.mulf %75, %22 : vector<8x128xf32>
    %85 = arith.mulf %69, %77 : vector<8x128xf32>
    %86 = arith.addf %84, %85 : vector<8x128xf32>
    %87 = math.tanh %86 : vector<8x128xf32>
    %88 = arith.mulf %83, %87 : vector<8x128xf32>
    %89 = arith.truncf %58 : vector<8x128xf32> to vector<8x128xbf16>
    %cst_35 = arith.constant dense<0.000000e+00> : vector<8x512xf32>
    %90 = tpu.matmul %89, %19, %cst_35 {dimension_numbers = #tpu.dot_dimension_numbers<[1], [0], [0], [1], [0, 0, 1, 1], [], []>} : vector<8x128xbf16>, vector<128x512xbf16>, vector<8x512xf32> -> vector<8x512xf32>
    %91 = arith.addf %30, %90 : vector<8x512xf32>
    %92 = vector.extract_strided_slice %91 {offsets = [0, 0], sizes = [8, 128], strides = [1, 1]} : vector<8x512xf32> to vector<8x128xf32>
    %93 = arith.negf %92 : vector<8x128xf32>
    %94 = math.exp %93 : vector<8x128xf32>
    %cst_36 = arith.constant 1.000000e+00 : f32
    %95 = vector.broadcast %cst_36 : f32 to vector<8x128xf32>
    %96 = arith.addf %95, %94 : vector<8x128xf32>
    %97 = arith.divf %95, %96 : vector<8x128xf32>
    %98 = vector.extract_strided_slice %91 {offsets = [0, 128], sizes = [8, 128], strides = [1, 1]} : vector<8x512xf32> to vector<8x128xf32>
    %99 = arith.negf %98 : vector<8x128xf32>
    %100 = math.exp %99 : vector<8x128xf32>
    %cst_37 = arith.constant 1.000000e+00 : f32
    %101 = vector.broadcast %cst_37 : f32 to vector<8x128xf32>
    %102 = arith.addf %101, %100 : vector<8x128xf32>
    %103 = arith.divf %101, %102 : vector<8x128xf32>
    %104 = vector.extract_strided_slice %91 {offsets = [0, 256], sizes = [8, 128], strides = [1, 1]} : vector<8x512xf32> to vector<8x128xf32>
    %105 = math.tanh %104 : vector<8x128xf32>
    %106 = vector.extract_strided_slice %91 {offsets = [0, 384], sizes = [8, 128], strides = [1, 1]} : vector<8x512xf32> to vector<8x128xf32>
    %107 = arith.negf %106 : vector<8x128xf32>
    %108 = math.exp %107 : vector<8x128xf32>
    %cst_38 = arith.constant 1.000000e+00 : f32
    %109 = vector.broadcast %cst_38 : f32 to vector<8x128xf32>
    %110 = arith.addf %109, %108 : vector<8x128xf32>
    %111 = arith.divf %109, %110 : vector<8x128xf32>
    %112 = arith.mulf %103, %56 : vector<8x128xf32>
    %113 = arith.mulf %97, %105 : vector<8x128xf32>
    %114 = arith.addf %112, %113 : vector<8x128xf32>
    %115 = math.tanh %114 : vector<8x128xf32>
    %116 = arith.mulf %111, %115 : vector<8x128xf32>
    %117 = tpu.concatenate %116, %88 in 1 : vector<8x128xf32>, vector<8x128xf32> -> vector<8x256xf32>
    %118 = arith.truncf %117 : vector<8x256xf32> to vector<8x256xbf16>
    %cst_39 = arith.constant dense<0.000000e+00> : vector<8x512xf32>
    %119 = tpu.matmul %118, %20, %cst_39 {dimension_numbers = #tpu.dot_dimension_numbers<[1], [0], [0], [1], [0, 0, 1, 1], [], []>} : vector<8x256xbf16>, vector<256x512xbf16>, vector<8x512xf32> -> vector<8x512xf32>
    %120 = vector.broadcast %21 : vector<1x512xf32> to vector<8x512xf32>
    %121 = arith.addf %119, %120 : vector<8x512xf32>
    %122 = vector.extract_strided_slice %121 {offsets = [0, 0], sizes = [8, 128], strides = [1, 1]} : vector<8x512xf32> to vector<8x128xf32>
    %123 = arith.negf %122 : vector<8x128xf32>
    %124 = math.exp %123 : vector<8x128xf32>
    %cst_40 = arith.constant 1.000000e+00 : f32
    %125 = vector.broadcast %cst_40 : f32 to vector<8x128xf32>
    %126 = arith.addf %125, %124 : vector<8x128xf32>
    %127 = arith.divf %125, %126 : vector<8x128xf32>
    %128 = vector.extract_strided_slice %121 {offsets = [0, 128], sizes = [8, 128], strides = [1, 1]} : vector<8x512xf32> to vector<8x128xf32>
    %129 = arith.negf %128 : vector<8x128xf32>
    %130 = math.exp %129 : vector<8x128xf32>
    %cst_41 = arith.constant 1.000000e+00 : f32
    %131 = vector.broadcast %cst_41 : f32 to vector<8x128xf32>
    %132 = arith.addf %131, %130 : vector<8x128xf32>
    %133 = arith.divf %131, %132 : vector<8x128xf32>
    %134 = vector.extract_strided_slice %121 {offsets = [0, 256], sizes = [8, 128], strides = [1, 1]} : vector<8x512xf32> to vector<8x128xf32>
    %135 = math.tanh %134 : vector<8x128xf32>
    %136 = vector.extract_strided_slice %121 {offsets = [0, 384], sizes = [8, 128], strides = [1, 1]} : vector<8x512xf32> to vector<8x128xf32>
    %137 = arith.negf %136 : vector<8x128xf32>
    %138 = math.exp %137 : vector<8x128xf32>
    %cst_42 = arith.constant 1.000000e+00 : f32
    %139 = vector.broadcast %cst_42 : f32 to vector<8x128xf32>
    %140 = arith.addf %139, %138 : vector<8x128xf32>
    %141 = arith.divf %139, %140 : vector<8x128xf32>
    %142 = arith.mulf %133, %86 : vector<8x128xf32>
    %143 = arith.mulf %127, %135 : vector<8x128xf32>
    %144 = arith.addf %142, %143 : vector<8x128xf32>
    %145 = math.tanh %144 : vector<8x128xf32>
    %146 = arith.mulf %141, %145 : vector<8x128xf32>
    %147 = arith.truncf %116 : vector<8x128xf32> to vector<8x128xbf16>
    %cst_43 = arith.constant dense<0.000000e+00> : vector<8x512xf32>
    %148 = tpu.matmul %147, %19, %cst_43 {dimension_numbers = #tpu.dot_dimension_numbers<[1], [0], [0], [1], [0, 0, 1, 1], [], []>} : vector<8x128xbf16>, vector<128x512xbf16>, vector<8x512xf32> -> vector<8x512xf32>
    %149 = arith.addf %30, %148 : vector<8x512xf32>
    %150 = vector.extract_strided_slice %149 {offsets = [0, 0], sizes = [8, 128], strides = [1, 1]} : vector<8x512xf32> to vector<8x128xf32>
    %151 = arith.negf %150 : vector<8x128xf32>
    %152 = math.exp %151 : vector<8x128xf32>
    %cst_44 = arith.constant 1.000000e+00 : f32
    %153 = vector.broadcast %cst_44 : f32 to vector<8x128xf32>
    %154 = arith.addf %153, %152 : vector<8x128xf32>
    %155 = arith.divf %153, %154 : vector<8x128xf32>
    %156 = vector.extract_strided_slice %149 {offsets = [0, 128], sizes = [8, 128], strides = [1, 1]} : vector<8x512xf32> to vector<8x128xf32>
    %157 = arith.negf %156 : vector<8x128xf32>
    %158 = math.exp %157 : vector<8x128xf32>
    %cst_45 = arith.constant 1.000000e+00 : f32
    %159 = vector.broadcast %cst_45 : f32 to vector<8x128xf32>
    %160 = arith.addf %159, %158 : vector<8x128xf32>
    %161 = arith.divf %159, %160 : vector<8x128xf32>
    %162 = vector.extract_strided_slice %149 {offsets = [0, 256], sizes = [8, 128], strides = [1, 1]} : vector<8x512xf32> to vector<8x128xf32>
    %163 = math.tanh %162 : vector<8x128xf32>
    %164 = vector.extract_strided_slice %149 {offsets = [0, 384], sizes = [8, 128], strides = [1, 1]} : vector<8x512xf32> to vector<8x128xf32>
    %165 = arith.negf %164 : vector<8x128xf32>
    %166 = math.exp %165 : vector<8x128xf32>
    %cst_46 = arith.constant 1.000000e+00 : f32
    %167 = vector.broadcast %cst_46 : f32 to vector<8x128xf32>
    %168 = arith.addf %167, %166 : vector<8x128xf32>
    %169 = arith.divf %167, %168 : vector<8x128xf32>
    %170 = arith.mulf %161, %114 : vector<8x128xf32>
    %171 = arith.mulf %155, %163 : vector<8x128xf32>
    %172 = arith.addf %170, %171 : vector<8x128xf32>
    %173 = math.tanh %172 : vector<8x128xf32>
    %174 = arith.mulf %169, %173 : vector<8x128xf32>
    %175 = tpu.concatenate %174, %146 in 1 : vector<8x128xf32>, vector<8x128xf32> -> vector<8x256xf32>
    %176 = arith.truncf %175 : vector<8x256xf32> to vector<8x256xbf16>
    %cst_47 = arith.constant dense<0.000000e+00> : vector<8x512xf32>
    %177 = tpu.matmul %176, %20, %cst_47 {dimension_numbers = #tpu.dot_dimension_numbers<[1], [0], [0], [1], [0, 0, 1, 1], [], []>} : vector<8x256xbf16>, vector<256x512xbf16>, vector<8x512xf32> -> vector<8x512xf32>
    %178 = vector.broadcast %21 : vector<1x512xf32> to vector<8x512xf32>
    %179 = arith.addf %177, %178 : vector<8x512xf32>
    %180 = vector.extract_strided_slice %179 {offsets = [0, 0], sizes = [8, 128], strides = [1, 1]} : vector<8x512xf32> to vector<8x128xf32>
    %181 = arith.negf %180 : vector<8x128xf32>
    %182 = math.exp %181 : vector<8x128xf32>
    %cst_48 = arith.constant 1.000000e+00 : f32
    %183 = vector.broadcast %cst_48 : f32 to vector<8x128xf32>
    %184 = arith.addf %183, %182 : vector<8x128xf32>
    %185 = arith.divf %183, %184 : vector<8x128xf32>
    %186 = vector.extract_strided_slice %179 {offsets = [0, 128], sizes = [8, 128], strides = [1, 1]} : vector<8x512xf32> to vector<8x128xf32>
    %187 = arith.negf %186 : vector<8x128xf32>
    %188 = math.exp %187 : vector<8x128xf32>
    %cst_49 = arith.constant 1.000000e+00 : f32
    %189 = vector.broadcast %cst_49 : f32 to vector<8x128xf32>
    %190 = arith.addf %189, %188 : vector<8x128xf32>
    %191 = arith.divf %189, %190 : vector<8x128xf32>
    %192 = vector.extract_strided_slice %179 {offsets = [0, 256], sizes = [8, 128], strides = [1, 1]} : vector<8x512xf32> to vector<8x128xf32>
    %193 = math.tanh %192 : vector<8x128xf32>
    %194 = vector.extract_strided_slice %179 {offsets = [0, 384], sizes = [8, 128], strides = [1, 1]} : vector<8x512xf32> to vector<8x128xf32>
    %195 = arith.negf %194 : vector<8x128xf32>
    %196 = math.exp %195 : vector<8x128xf32>
    %cst_50 = arith.constant 1.000000e+00 : f32
    %197 = vector.broadcast %cst_50 : f32 to vector<8x128xf32>
    %198 = arith.addf %197, %196 : vector<8x128xf32>
    %199 = arith.divf %197, %198 : vector<8x128xf32>
    %200 = arith.mulf %191, %144 : vector<8x128xf32>
    %201 = arith.mulf %185, %193 : vector<8x128xf32>
    %202 = arith.addf %200, %201 : vector<8x128xf32>
    %203 = math.tanh %202 : vector<8x128xf32>
    %204 = arith.mulf %199, %203 : vector<8x128xf32>
    %205 = arith.truncf %174 : vector<8x128xf32> to vector<8x128xbf16>
    %cst_51 = arith.constant dense<0.000000e+00> : vector<8x512xf32>
    %206 = tpu.matmul %205, %19, %cst_51 {dimension_numbers = #tpu.dot_dimension_numbers<[1], [0], [0], [1], [0, 0, 1, 1], [], []>} : vector<8x128xbf16>, vector<128x512xbf16>, vector<8x512xf32> -> vector<8x512xf32>
    %207 = arith.addf %30, %206 : vector<8x512xf32>
    %208 = vector.extract_strided_slice %207 {offsets = [0, 0], sizes = [8, 128], strides = [1, 1]} : vector<8x512xf32> to vector<8x128xf32>
    %209 = arith.negf %208 : vector<8x128xf32>
    %210 = math.exp %209 : vector<8x128xf32>
    %cst_52 = arith.constant 1.000000e+00 : f32
    %211 = vector.broadcast %cst_52 : f32 to vector<8x128xf32>
    %212 = arith.addf %211, %210 : vector<8x128xf32>
    %213 = arith.divf %211, %212 : vector<8x128xf32>
    %214 = vector.extract_strided_slice %207 {offsets = [0, 128], sizes = [8, 128], strides = [1, 1]} : vector<8x512xf32> to vector<8x128xf32>
    %215 = arith.negf %214 : vector<8x128xf32>
    %216 = math.exp %215 : vector<8x128xf32>
    %cst_53 = arith.constant 1.000000e+00 : f32
    %217 = vector.broadcast %cst_53 : f32 to vector<8x128xf32>
    %218 = arith.addf %217, %216 : vector<8x128xf32>
    %219 = arith.divf %217, %218 : vector<8x128xf32>
    %220 = vector.extract_strided_slice %207 {offsets = [0, 256], sizes = [8, 128], strides = [1, 1]} : vector<8x512xf32> to vector<8x128xf32>
    %221 = math.tanh %220 : vector<8x128xf32>
    %222 = vector.extract_strided_slice %207 {offsets = [0, 384], sizes = [8, 128], strides = [1, 1]} : vector<8x512xf32> to vector<8x128xf32>
    %223 = arith.negf %222 : vector<8x128xf32>
    %224 = math.exp %223 : vector<8x128xf32>
    %cst_54 = arith.constant 1.000000e+00 : f32
    %225 = vector.broadcast %cst_54 : f32 to vector<8x128xf32>
    %226 = arith.addf %225, %224 : vector<8x128xf32>
    %227 = arith.divf %225, %226 : vector<8x128xf32>
    %228 = arith.mulf %219, %172 : vector<8x128xf32>
    %229 = arith.mulf %213, %221 : vector<8x128xf32>
    %230 = arith.addf %228, %229 : vector<8x128xf32>
    %231 = math.tanh %230 : vector<8x128xf32>
    %232 = arith.mulf %227, %231 : vector<8x128xf32>
    %233 = tpu.concatenate %232, %204 in 1 : vector<8x128xf32>, vector<8x128xf32> -> vector<8x256xf32>
    %234 = arith.truncf %233 : vector<8x256xf32> to vector<8x256xbf16>
    %cst_55 = arith.constant dense<0.000000e+00> : vector<8x512xf32>
    %235 = tpu.matmul %234, %20, %cst_55 {dimension_numbers = #tpu.dot_dimension_numbers<[1], [0], [0], [1], [0, 0, 1, 1], [], []>} : vector<8x256xbf16>, vector<256x512xbf16>, vector<8x512xf32> -> vector<8x512xf32>
    %236 = vector.broadcast %21 : vector<1x512xf32> to vector<8x512xf32>
    %237 = arith.addf %235, %236 : vector<8x512xf32>
    %238 = vector.extract_strided_slice %237 {offsets = [0, 0], sizes = [8, 128], strides = [1, 1]} : vector<8x512xf32> to vector<8x128xf32>
    %239 = arith.negf %238 : vector<8x128xf32>
    %240 = math.exp %239 : vector<8x128xf32>
    %cst_56 = arith.constant 1.000000e+00 : f32
    %241 = vector.broadcast %cst_56 : f32 to vector<8x128xf32>
    %242 = arith.addf %241, %240 : vector<8x128xf32>
    %243 = arith.divf %241, %242 : vector<8x128xf32>
    %244 = vector.extract_strided_slice %237 {offsets = [0, 128], sizes = [8, 128], strides = [1, 1]} : vector<8x512xf32> to vector<8x128xf32>
    %245 = arith.negf %244 : vector<8x128xf32>
    %246 = math.exp %245 : vector<8x128xf32>
    %cst_57 = arith.constant 1.000000e+00 : f32
    %247 = vector.broadcast %cst_57 : f32 to vector<8x128xf32>
    %248 = arith.addf %247, %246 : vector<8x128xf32>
    %249 = arith.divf %247, %248 : vector<8x128xf32>
    %250 = vector.extract_strided_slice %237 {offsets = [0, 256], sizes = [8, 128], strides = [1, 1]} : vector<8x512xf32> to vector<8x128xf32>
    %251 = math.tanh %250 : vector<8x128xf32>
    %252 = vector.extract_strided_slice %237 {offsets = [0, 384], sizes = [8, 128], strides = [1, 1]} : vector<8x512xf32> to vector<8x128xf32>
    %253 = arith.negf %252 : vector<8x128xf32>
    %254 = math.exp %253 : vector<8x128xf32>
    %cst_58 = arith.constant 1.000000e+00 : f32
    %255 = vector.broadcast %cst_58 : f32 to vector<8x128xf32>
    %256 = arith.addf %255, %254 : vector<8x128xf32>
    %257 = arith.divf %255, %256 : vector<8x128xf32>
    %258 = arith.mulf %249, %202 : vector<8x128xf32>
    %259 = arith.mulf %243, %251 : vector<8x128xf32>
    %260 = arith.addf %258, %259 : vector<8x128xf32>
    %261 = math.tanh %260 : vector<8x128xf32>
    %262 = arith.mulf %257, %261 : vector<8x128xf32>
    %263 = tpu.concatenate %88, %146, %204, %262 in 0 : vector<8x128xf32>, vector<8x128xf32>, vector<8x128xf32>, vector<8x128xf32> -> vector<32x128xf32>
    %264 = arith.truncf %263 : vector<32x128xf32> to vector<32x128xbf16>
    %c0_59 = arith.constant 0 : index
    %c0_60 = arith.constant 0 : index
    %265 = vector.load %arg9[%c0_59, %c0_60] : memref<128x128xbf16, #tpu.memory_space<vmem>>, vector<128x128xbf16>
    %cst_61 = arith.constant dense<0.000000e+00> : vector<32x128xf32>
    %266 = tpu.matmul %264, %265, %cst_61 {dimension_numbers = #tpu.dot_dimension_numbers<[1], [0], [0], [1], [0, 0, 1, 1], [], []>} : vector<32x128xbf16>, vector<128x128xbf16>, vector<32x128xf32> -> vector<32x128xf32>
    %c0_62 = arith.constant 0 : index
    %c0_63 = arith.constant 0 : index
    %267 = vector.load %arg10[%c0_62, %c0_63] : memref<1x128xf32, #tpu.memory_space<vmem>>, vector<1x128xf32>
    %268 = vector.broadcast %267 : vector<1x128xf32> to vector<32x128xf32>
    %269 = arith.addf %266, %268 : vector<32x128xf32>
    %c0_64 = arith.constant 0 : index
    %c0_65 = arith.constant 0 : index
    %270 = vector.load %arg11[%c0_64, %c0_65] : memref<32x128xf32, #tpu.memory_space<vmem>>, vector<32x128xf32>
    tpu.vector_store %arg11[%c0_64, %c0_65], %269 {strides = array<i32>} : memref<32x128xf32, #tpu.memory_space<vmem>>, vector<32x128xf32>,
    return
  }
  func.func @transform_0(%arg0: i32) -> (i32, i32) {
    %c0_i32 = arith.constant 0 : i32
    %c0_i32_0 = arith.constant 0 : i32
    %c0_i32_1 = arith.constant 0 : i32
    return %c0_i32, %c0_i32_0 : i32, i32
  }
  func.func @transform_1(%arg0: i32) -> (i32, i32) {
    %c0_i32 = arith.constant 0 : i32
    %c0_i32_0 = arith.constant 0 : i32
    %c0_i32_1 = arith.constant 0 : i32
    return %c0_i32, %c0_i32_0 : i32, i32
  }
  func.func @transform_2(%arg0: i32) -> (i32, i32) {
    %c0_i32 = arith.constant 0 : i32
    %c0_i32_0 = arith.constant 0 : i32
    %c0_i32_1 = arith.constant 0 : i32
    return %c0_i32, %c0_i32_0 : i32, i32
  }
  func.func @transform_3(%arg0: i32) -> (i32, i32) {
    %c0_i32 = arith.constant 0 : i32
    %c0_i32_0 = arith.constant 0 : i32
    %c0_i32_1 = arith.constant 0 : i32
    return %c0_i32, %c0_i32_0 : i32, i32
  }
  func.func @transform_4(%arg0: i32) -> (i32, i32) {
    %c0_i32 = arith.constant 0 : i32
    %c0_i32_0 = arith.constant 0 : i32
    %c0_i32_1 = arith.constant 0 : i32
    return %c0_i32, %c0_i32_0 : i32, i32
  }
  func.func @transform_5(%arg0: i32) -> (i32, i32) {
    %c0_i32 = arith.constant 0 : i32
    %c0_i32_0 = arith.constant 0 : i32
    %c0_i32_1 = arith.constant 0 : i32
    return %c0_i32, %c0_i32_0 : i32, i32
  }
  func.func @transform_6(%arg0: i32) -> (i32, i32) {
    %c0_i32 = arith.constant 0 : i32
    %c0_i32_0 = arith.constant 0 : i32
    %c0_i32_1 = arith.constant 0 : i32
    return %c0_i32, %c0_i32_0 : i32, i32
  }
  func.func @transform_7(%arg0: i32) -> (i32, i32) {
    %c0_i32 = arith.constant 0 : i32
    %c0_i32_0 = arith.constant 0 : i32
    %c0_i32_1 = arith.constant 0 : i32
    return %c0_i32, %c0_i32_0 : i32, i32
  }
  func.func @transform_8(%arg0: i32) -> (i32, i32) {
    %c0_i32 = arith.constant 0 : i32
    %c0_i32_0 = arith.constant 0 : i32
    %c0_i32_1 = arith.constant 0 : i32
    return %c0_i32, %c0_i32_0 : i32, i32
  }
  func.func @transform_9(%arg0: i32) -> (i32, i32) {
    %c0_i32 = arith.constant 0 : i32
    %c0_i32_0 = arith.constant 0 : i32
    %c0_i32_1 = arith.constant 0 : i32
    return %c0_i32, %c0_i32_0 : i32, i32
  }
  func.func @transform_10(%arg0: i32) -> (i32, i32) {
    %c0_i32 = arith.constant 0 : i32
    %c0_i32_0 = arith.constant 0 : i32
    %c0_i32_1 = arith.constant 0 : i32
    return %c0_i32, %c0_i32_0 : i32, i32
  }
}

</mosaic_0001>

<bundles_post_ra>
// kernel: rnn_forward.1
= control target key start
LH: loop header
LB: loop body
LE: loop exit
PB: predicated region body
PF: predicated region fallthrough
CT: control target
= control target key end

     0   :  { %vm673_vm0 = vcmask 1041408   ;;  %vm492_vm1 = vcmask 424960   ;;  %s12437_s14 = smov 0   ;;  %s13982_s1 = inlined_call_operand.vmem [shape: bf16[180,128], index: 1, kind: input, shape index: {}]   ;;  %s13983_s8 = inlined_call_operand.vmem [shape: bf16[128,128], index: 8, kind: input, shape index: {}]   ;;  %s13984_s9 = inlined_call_operand.vmem [shape: f32[1,128], index: 9, kind: input, shape index: {}]   ;;  %s13985_s10 = inlined_call_operand.vmem [shape: f32[32,128], index: 10, kind: output, shape index: {}]   ;;  %s13986_s0 = inlined_call_operand.vmem [shape: f32[960,180], index: 0, kind: input, shape index: {}]   ;;  %s13987_s3 = inlined_call_operand.vmem [shape: bf16[128,512], index: 3, kind: input, shape index: {}]   ;;  %s13988_s2 = inlined_call_operand.vmem [shape: f32[1,128], index: 2, kind: input, shape index: {}]   ;;  %s13989_s5 = inlined_call_operand.vmem [shape: f32[1,512], index: 5, kind: input, shape index: {}]   ;;  %s13990_s4 = inlined_call_operand.vmem [shape: bf16[128,512], index: 4, kind: input, shape index: {}]   ;;  %s13991_s6 = inlined_call_operand.vmem [shape: bf16[256,512], index: 6, kind: input, shape index: {}]   ;;  %s13992_s7 = inlined_call_operand.vmem [shape: f32[1,512], index: 7, kind: input, shape index: {}]  }
   0x1   :  { %v7740_v0 = vld [vmem:[%s13982_s1 + $0x38] sm:$0xff]  ;;  %v7739_v4 = vld [vmem:[%s13982_s1 + $0x30] sm:$0xff]  ;;  %v7738_v7 = vld [vmem:[%s13982_s1 + $0x28] sm:$0xff] }
   0x2   :  { %v418_v1 = vld [vmem:[%s13982_s1 + $0x58] sm:$0x3]  ;;  %677 = vmatpush.bf16.msra.mxu0 %v7740_v0  ;;  %8009 = vmatpush.bf16.msra.mxu2 %v7740_v0  ;;  %v7743_v6 = vld [vmem:[%s13982_s1 + $0x50] sm:$0xff]  ;;  %v7742_v8 = vld [vmem:[%s13982_s1 + $0x48] sm:$0xff] }
   0x3   :  { %v468_v2 = vunpack.c.l.b16 %v418_v1  ;;  %v7737_v9 = vld [vmem:[%s13982_s1 + $0x20] sm:$0xff]  ;;  %v37_v11 = vld [vmem:[%s13986_s0 + $0x8] sm:$0xff]  ;;  %v7775_v13 = vld [vmem:[%s13987_s3 + $0xf4] sm:$0xf0] }
   0x4   :  { %v7741_v10 = vld [vmem:[%s13982_s1 + $0x40] sm:$0xff]  ;;  %v6766_v12 = vld [vmem:[%s13987_s3 + $0xe8] sm:$0xf]  ;;  %v39_v14 = vld [vmem:[%s13986_s0 + $0x18] sm:$0xff] }
   0x5   :  { %v480_v3 = vpack.c.b16 %v468_v2, %v468_v2  ;;  %v161_v15 = vld [vmem:[%s13986_s0 + $0x3e8] sm:$0xff]  ;;  %v163_v16 = vld [vmem:[%s13986_s0 + $0x3f8] sm:$0xff]  ;;  %v6767_v18 = vor.u32 %v7775_v13, %v6766_v12  ;;  %v277_v19 = vpack.c.bf16 %v39_v14, %v37_v11  ;;  %v7772_v21 = vld [vmem:[%s13987_s3 + $0xe4] sm:$0xf] }
   0x6   :  { %678 = vmatpush.bf16.msra.mxu0 %v7739_v4  ;;  %8010 = vmatpush.bf16.msra.mxu2 %v7739_v4  ;;  %v7736_v17 = vld [vmem:[%s13982_s1 + $0x18] sm:$0xff]  ;;  %v339_v20 = vpack.c.bf16 %v163_v16, %v161_v15  ;;  %v6760_v22 = vld [vmem:[%s13987_s3 + $0xf0] sm:$0xf0]  ;;  %v7734_v25 = vld [vmem:[%s13982_s1 + $0x8] sm:$0xff] }
   0x7   :  { %v675_v5 = vsel %vm673_vm0, %v480_v3, 0  ;;  %v7735_v23 = vld [vmem:[%s13982_s1 + $0x10] sm:$0xff]  ;;  %v6763_v24 = vor.u32 %v7772_v21, %v6760_v22  ;;  %v6758_v26 = vld [vmem:[%s13987_s3 + $0xe0] sm:$0xf]  ;;  %v7773_v28 = vld [vmem:[%s13987_s3 + $0xec] sm:$0xf] }
   0x8   :  { %990 = vmatpush.bf16.msra.mxu1 %v675_v5  ;;  %8017 = vmatpush.bf16.msra.mxu3 %v675_v5  ;;  %v7774_v27 = vld [vmem:[%s13987_s3 + $0xec] sm:$0xf0]  ;;  %v6768_v29 = vld [vmem:[%s13987_s3 + $0xf8] sm:$0xf0]  ;;  %v7733_v30 = vld [vmem:[%s13982_s1] sm:$0xff] }
   0x9   :  { %v36_v31 = vld [vmem:[%s13986_s0] sm:$0xff]  ;;  %v38_v32 = vld [vmem:[%s13986_s0 + $0x10] sm:$0xff]  ;;  %v6759_v35 = vor.u32 %v7774_v27, %v6758_v26  ;;  %v6771_v36 = vor.u32 %v7773_v28, %v6768_v29  ;;  %v41_v37 = vld [vmem:[%s13986_s0 + $0x28] sm:$0xff] }
   0xa   :  { %679 = vmatpush.bf16.msra.mxu0 %v7738_v7  ;;  %8011 = vmatpush.bf16.msra.mxu2 %v7738_v7  ;;  %v156_v33 = vld [vmem:[%s13986_s0 + $0x3c0] sm:$0xff]  ;;  %v158_v34 = vld [vmem:[%s13986_s0 + $0x3d0] sm:$0xff]  ;;  %v276_v38 = vpack.c.bf16 %v38_v32, %v36_v31  ;;  %v43_v40 = vld [vmem:[%s13986_s0 + $0x38] sm:$0xff] }
   0xb   :  { %v336_v39 = vpack.c.bf16 %v158_v34, %v156_v33  ;;  %v165_v41 = vld [vmem:[%s13986_s0 + $0x408] sm:$0xff]  ;;  %v167_v42 = vld [vmem:[%s13986_s0 + $0x418] sm:$0xff]  ;;  %v279_v43 = vpack.c.bf16 %v43_v40, %v41_v37  ;;  %v40_v45 = vld [vmem:[%s13986_s0 + $0x20] sm:$0xff] }
   0xc   :  { %991 = vmatpush.bf16.msra.mxu1 %v7743_v6  ;;  %8018 = vmatpush.bf16.msra.mxu3 %v7743_v6  ;;  %v341_v44 = vpack.c.bf16 %v167_v42, %v165_v41  ;;  %v42_v46 = vld [vmem:[%s13986_s0 + $0x30] sm:$0xff]  ;;  %v160_v47 = vld [vmem:[%s13986_s0 + $0x3e0] sm:$0xff]  ;;  %v45_v49 = vld [vmem:[%s13986_s0 + $0x48] sm:$0xff] }
   0xd   :  { %v162_v48 = vld [vmem:[%s13986_s0 + $0x3f0] sm:$0xff]  ;;  %v278_v50 = vpack.c.bf16 %v42_v46, %v40_v45  ;;  %v47_v52 = vld [vmem:[%s13986_s0 + $0x58] sm:$0xff]  ;;  %v169_v53 = vld [vmem:[%s13986_s0 + $0x428] sm:$0xff] }
   0xe   :  { %680 = vmatpush.bf16.msra.mxu0 %v7737_v9  ;;  %8012 = vmatpush.bf16.msra.mxu2 %v7737_v9  ;;  %v338_v51 = vpack.c.bf16 %v162_v48, %v160_v47  ;;  %v171_v54 = vld [vmem:[%s13986_s0 + $0x438] sm:$0xff]  ;;  %v281_v55 = vpack.c.bf16 %v47_v52, %v45_v49  ;;  %v6750_v57 = vld [vmem:[%s13987_s3 + $0xc8] sm:$0xf]  ;;  %v6742_v59 = vld [vmem:[%s13987_s3 + $0xc0] sm:$0xf] }
   0xf   :  { %v343_v56 = vpack.c.bf16 %v171_v54, %v169_v53  ;;  %v7771_v58 = vld [vmem:[%s13987_s3 + $0xd4] sm:$0xf0]  ;;  %v7770_v61 = vld [vmem:[%s13987_s3 + $0xcc] sm:$0xf0]  ;;  %v44_v63 = vld [vmem:[%s13986_s0 + $0x40] sm:$0xff] }
  0x10   :  { %992 = vmatpush.bf16.msra.mxu1 %v7742_v8  ;;  %8019 = vmatpush.bf16.msra.mxu3 %v7742_v8  ;;  %v6751_v60 = vor.u32 %v7771_v58, %v6750_v57  ;;  %v6743_v62 = vor.u32 %v7770_v61, %v6742_v59  ;;  %v46_v0 = vld [vmem:[%s13986_s0 + $0x50] sm:$0xff]  ;;  %v164_v1 = vld [vmem:[%s13986_s0 + $0x400] sm:$0xff]  ;;  %v49_v3 = vld [vmem:[%s13986_s0 + $0x68] sm:$0xff] }
  0x11   :  { %v166_v2 = vld [vmem:[%s13986_s0 + $0x410] sm:$0xff]  ;;  %v280_v4 = vpack.c.bf16 %v46_v0, %v44_v63  ;;  %v51_v6 = vld [vmem:[%s13986_s0 + $0x78] sm:$0xff]  ;;  %v173_v7 = vld [vmem:[%s13986_s0 + $0x448] sm:$0xff] }
  0x12   :  { %681 = vmatpush.bf16.msra.mxu0 %v7736_v17  ;;  %8013 = vmatpush.bf16.msra.mxu2 %v7736_v17  ;;  %v340_v5 = vpack.c.bf16 %v166_v2, %v164_v1  ;;  %v175_v8 = vld [vmem:[%s13986_s0 + $0x458] sm:$0xff]  ;;  %v283_v9 = vpack.c.bf16 %v51_v6, %v49_v3  ;;  %v7769_v11 = vld [vmem:[%s13987_s3 + $0xcc] sm:$0xf]  ;;  %v7768_v14 = vld [vmem:[%s13987_s3 + $0xc4] sm:$0xf] }
  0x13   :  { %v6752_v12 = vld [vmem:[%s13987_s3 + $0xd8] sm:$0xf0]  ;;  %v6744_v15 = vld [vmem:[%s13987_s3 + $0xd0] sm:$0xf0]  ;;  %v48_v17 = vld [vmem:[%s13986_s0 + $0x60] sm:$0xff] }
  0x14   :  { %993 = vmatpush.bf16.msra.mxu1 %v7741_v10  ;;  %8020 = vmatpush.bf16.msra.mxu3 %v7741_v10  ;;  %v345_v10 = vpack.c.bf16 %v175_v8, %v173_v7  ;;  %v6755_v13 = vor.u32 %v7769_v11, %v6752_v12  ;;  %v6747_v16 = vor.u32 %v7768_v14, %v6744_v15  ;;  %v53_v21 = vld [vmem:[%s13986_s0 + $0x88] sm:$0xff]  ;;  %v179_v26 = vld [vmem:[%s13986_s0 + $0x478] sm:$0xff]  ;;  %v52_v29 = vld [vmem:[%s13986_s0 + $0x80] sm:$0xff] }
  0x15   :  { %v172_v31 = vld [vmem:[%s13986_s0 + $0x440] sm:$0xff]  ;;  %v174_v32 = vld [vmem:[%s13986_s0 + $0x450] sm:$0xff]  ;;  %v57_v33 = vld [vmem:[%s13986_s0 + $0xa8] sm:$0xff] }
  0x16   :  { %682 = vmatpush.bf16.msra.mxu0 %v7735_v23  ;;  %8014 = vmatpush.bf16.msra.mxu2 %v7735_v23  ;;  %v181_v37 = vld [vmem:[%s13986_s0 + $0x488] sm:$0xff]  ;;  %v56_v41 = vld [vmem:[%s13986_s0 + $0xa0] sm:$0xff]  ;;  %v58_v42 = vld [vmem:[%s13986_s0 + $0xb0] sm:$0xff] }
  0x17   :  { %6584 = vmatmul.msk.bf16.vlgmr.msra.gmra.mxu1 %vm492_vm1, %v277_v19  ;;  %6615 = vmatmul.msk.bf16.vlgmr.msra.gmra.mxu3 %vm492_vm1, %v339_v20  ;;  %v168_v19 = vld [vmem:[%s13986_s0 + $0x420] sm:$0xff]  ;;  %v170_v20 = vld [vmem:[%s13986_s0 + $0x430] sm:$0xff]  ;;  %v61_v45 = vld [vmem:[%s13986_s0 + $0xc8] sm:$0xff]  ;;  %v286_v46 = vpack.c.bf16 %v58_v42, %v56_v41 }
  0x18   :  { %2535 = vmatpush.bf16.msrb.mxu1 %v6767_v18  ;;  %2226 = vmatpush.bf16.msrb.mxu3 %v6763_v24  ;;  %v50_v18 = vld [vmem:[%s13986_s0 + $0x70] sm:$0xff]  ;;  %v342_v23 = vpack.c.bf16 %v170_v20, %v168_v19  ;;  %v55_v24 = vld [vmem:[%s13986_s0 + $0x98] sm:$0xff]  ;;  %v185_v49 = vld [vmem:[%s13986_s0 + $0x4a8] sm:$0xff] }
  0x19   :  { %v282_v22 = vpack.c.bf16 %v50_v18, %v48_v17  ;;  %v285_v27 = vpack.c.bf16 %v55_v24, %v53_v21  ;;  %v63_v48 = vld [vmem:[%s13986_s0 + $0xd8] sm:$0xff]  ;;  %v6734_v53 = vld [vmem:[%s13987_s3 + $0xa8] sm:$0xf]  ;;  %v6726_v57 = vld [vmem:[%s13987_s3 + $0xa0] sm:$0xf] }
  0x1a   :  { %683 = vmatpush.bf16.msra.mxu0 %v7734_v25  ;;  %8015 = vmatpush.bf16.msra.mxu2 %v7734_v25  ;;  %v177_v25 = vld [vmem:[%s13986_s0 + $0x468] sm:$0xff]  ;;  %v7767_v54 = vld [vmem:[%s13987_s3 + $0xb4] sm:$0xf0]  ;;  %v7766_v58 = vld [vmem:[%s13987_s3 + $0xac] sm:$0xf0] }
  0x1b   :  { %v347_v28 = vpack.c.bf16 %v179_v26, %v177_v25  ;;  %v62_v59 = vld [vmem:[%s13986_s0 + $0xd0] sm:$0xff]  ;;  %v65_v63 = vld [vmem:[%s13986_s0 + $0xe8] sm:$0xff]  ;;  %v67_v2 = vld [vmem:[%s13986_s0 + $0xf8] sm:$0xff] }
  0x1c   :  { %2536 = vmatpush.bf16.msrb.mxu1 %v6751_v60  ;;  %2227 = vmatpush.bf16.msrb.mxu3 %v6747_v16  ;;  %v180_v60 = vld [vmem:[%s13986_s0 + $0x480] sm:$0xff]  ;;  %v182_v61 = vld [vmem:[%s13986_s0 + $0x490] sm:$0xff]  ;;  %v189_v3 = vld [vmem:[%s13986_s0 + $0x4c8] sm:$0xff] }
  0x1d   :  { %v348_v1 = vpack.c.bf16 %v182_v61, %v180_v60  ;;  %v7765_v7 = vld [vmem:[%s13987_s3 + $0xac] sm:$0xf]  ;;  %v6736_v8 = vld [vmem:[%s13987_s3 + $0xb8] sm:$0xf0]  ;;  %v6728_v11 = vld [vmem:[%s13987_s3 + $0xb0] sm:$0xf0] }
  0x1e   :  { %684 = vmatpush.bf16.msra.mxu0 %v7733_v30  ;;  %8016 = vmatpush.bf16.msra.mxu2 %v7733_v30  ;;  %v54_v30 = vld [vmem:[%s13986_s0 + $0x90] sm:$0xff]  ;;  %v184_v15 = vld [vmem:[%s13986_s0 + $0x4a0] sm:$0xff]  ;;  %v69_v17 = vld [vmem:[%s13986_s0 + $0x108] sm:$0xff] }
  0x1f   :  { %v284_v34 = vpack.c.bf16 %v54_v30, %v52_v29  ;;  %v66_v14 = vld [vmem:[%s13986_s0 + $0xf0] sm:$0xff]  ;;  %v71_v20 = vld [vmem:[%s13986_s0 + $0x118] sm:$0xff]  ;;  %v193_v21 = vld [vmem:[%s13986_s0 + $0x4e8] sm:$0xff] }
  0x20   :  { %v186_v16 = vld [vmem:[%s13986_s0 + $0x4b0] sm:$0xff]  ;;  %v188_v30 = vld [vmem:[%s13986_s0 + $0x4c0] sm:$0xff] }
  0x21   :  { %685 = vmatmul.bf16.vlgmr.msra.gmra.mxu0 %v276_v38  ;;  %835 = vmatmul.bf16.vlgmr.msra.gmra.mxu2 %v336_v39  ;;  %v183_v38 = vld [vmem:[%s13986_s0 + $0x498] sm:$0xff]  ;;  %v350_v19 = vpack.c.bf16 %v186_v16, %v184_v15  ;;  %v70_v29 = vld [vmem:[%s13986_s0 + $0x110] sm:$0xff] }
  0x22   :  { %1917 = vmatpush.bf16.msrb.mxu2 %v6759_v35  ;;  %2844 = vmatpush.bf16.msrb.mxu0 %v6771_v36  ;;  %v344_v35 = vpack.c.bf16 %v174_v32, %v172_v31  ;;  %v59_v36 = vld [vmem:[%s13986_s0 + $0xb8] sm:$0xff]  ;;  %v349_v40 = vpack.c.bf16 %v183_v38, %v181_v37  ;;  %v190_v31 = vld [vmem:[%s13986_s0 + $0x4d0] sm:$0xff]  ;;  %v8671_v32 = vld [vmem:[%s13988_s2] ss:$0 sm:$0xff] }
  0x23   :  { %v287_v39 = vpack.c.bf16 %v59_v36, %v57_v33  ;;  %v73_v33 = vld [vmem:[%s13986_s0 + $0x128] sm:$0xff]  ;;  %v75_v36 = vld [vmem:[%s13986_s0 + $0x138] sm:$0xff] }
  0x24   :  { %v197_v37 = vld [vmem:[%s13986_s0 + $0x508] sm:$0xff]  ;;  %v199_v38 = vld [vmem:[%s13986_s0 + $0x518] sm:$0xff]  ;;  %v295_v42 = vpack.c.bf16 %v75_v36, %v73_v33  ;;  %v7762_v36 = vld [vmem:[%s13987_s3 + $0x8c] sm:$0xf0] }
  0x26   :  { %1918 = vmatpush.bf16.msrb.mxu2 %v6743_v62  ;;  %2845 = vmatpush.bf16.msrb.mxu0 %v6755_v13  ;;  %v6727_v62 = vor.u32 %v7766_v58, %v6726_v57  ;;  %v64_v13 = vld [vmem:[%s13986_s0 + $0xe0] sm:$0xff] }
  0x27   :  { %6585 = vmatmul.msk.bf16.gmra.mxu1 %vm492_vm1, %v279_v43  ;;  %6616 = vmatmul.msk.bf16.gmra.mxu3 %vm492_vm1, %v341_v44  ;;  %v176_v43 = vld [vmem:[%s13986_s0 + $0x460] sm:$0xff]  ;;  %v178_v44 = vld [vmem:[%s13986_s0 + $0x470] sm:$0xff]  ;;  %v290_v18 = vpack.c.bf16 %v66_v14, %v64_v13  ;;  %v6718_v13 = vld [vmem:[%s13987_s3 + $0x88] sm:$0xf] }
  0x28   :  { %v346_v47 = vpack.c.bf16 %v178_v44, %v176_v43  ;;  %v357_v43 = vpack.c.bf16 %v199_v38, %v197_v37  ;;  %v7763_v14 = vld [vmem:[%s13987_s3 + $0x94] sm:$0xf0] }
  0x29   :  { %v6719_v16 = vor.u32 %v7763_v14, %v6718_v13  ;;  %v82_v13 = vld [vmem:[%s13986_s0 + $0x170] sm:$0xff] }
  0x2a   :  { %1919 = vmatpush.bf16.msrb.mxu2 %v6727_v62  ;;  %v202_v14 = vld [vmem:[%s13986_s0 + $0x530] sm:$0xff] }
  0x31   :  { %690 = vmatmul.bf16.gmra.mxu0 %v278_v50  ;;  %840 = vmatmul.bf16.gmra.mxu2 %v338_v51  ;;  %v187_v50 = vld [vmem:[%s13986_s0 + $0x4b8] sm:$0xff]  ;;  %v289_v51 = vpack.c.bf16 %v63_v48, %v61_v45 }
  0x32   :  { %v351_v52 = vpack.c.bf16 %v187_v50, %v185_v49 }
  0x37   :  { %6586 = vmatmul.msk.bf16.gmra.mxu1 %vm492_vm1, %v281_v55  ;;  %6617 = vmatmul.msk.bf16.gmra.mxu3 %vm492_vm1, %v343_v56  ;;  %v6735_v55 = vor.u32 %v7767_v54, %v6734_v53  ;;  %v60_v56 = vld [vmem:[%s13986_s0 + $0xc0] sm:$0xff]  ;;  %v74_v54 = vld [vmem:[%s13986_s0 + $0x130] sm:$0xff] }
  0x38   :  { %v288_v0 = vpack.c.bf16 %v62_v59, %v60_v56  ;;  %v72_v53 = vld [vmem:[%s13986_s0 + $0x120] sm:$0xff]  ;;  %v194_v56 = vld [vmem:[%s13986_s0 + $0x4f0] sm:$0xff]  ;;  %v77_v59 = vld [vmem:[%s13986_s0 + $0x148] sm:$0xff] }
  0x39   :  { %2537 = vmatpush.bf16.msrb.mxu1 %v6735_v55  ;;  %v192_v55 = vld [vmem:[%s13986_s0 + $0x4e0] sm:$0xff]  ;;  %v294_v62 = vpack.c.bf16 %v74_v54, %v72_v53 }
  0x3d   :  { %2538 = vmatpush.bf16.msrb.mxu1 %v6719_v16 }
  0x41   :  { %695 = vmatmul.bf16.gmra.mxu0 %v280_v4  ;;  %845 = vmatmul.bf16.gmra.mxu2 %v340_v5  ;;  %v191_v4 = vld [vmem:[%s13986_s0 + $0x4d8] sm:$0xff]  ;;  %v291_v5 = vpack.c.bf16 %v67_v2, %v65_v63  ;;  %v354_v63 = vpack.c.bf16 %v194_v56, %v192_v55 }
  0x42   :  { %v353_v6 = vpack.c.bf16 %v191_v4, %v189_v3  ;;  %v203_v2 = vld [vmem:[%s13986_s0 + $0x538] sm:$0xff] }
  0x47   :  { %6587 = vmatmul.msk.bf16.gmra.mxu1 %vm492_vm1, %v283_v9  ;;  %6618 = vmatmul.msk.bf16.gmra.mxu3 %vm492_vm1, %v345_v10  ;;  %v7764_v9 = vld [vmem:[%s13987_s3 + $0xa4] sm:$0xf]  ;;  %v6739_v10 = vor.u32 %v7765_v7, %v6736_v8 }
  0x48   :  { %v6731_v12 = vor.u32 %v7764_v9, %v6728_v11 }
  0x49   :  { %2846 = vmatpush.bf16.msrb.mxu0 %v6739_v10 }
  0x4a   :  { %2228 = vmatpush.bf16.msrb.mxu3 %v6731_v12 }
  0x51   :  { %700 = vmatmul.bf16.gmra.mxu0 %v282_v22  ;;  %850 = vmatmul.bf16.gmra.mxu2 %v342_v23  ;;  %v195_v22 = vld [vmem:[%s13986_s0 + $0x4f8] sm:$0xff]  ;;  %v293_v23 = vpack.c.bf16 %v71_v20, %v69_v17  ;;  %v76_v20 = vld [vmem:[%s13986_s0 + $0x140] sm:$0xff] }
  0x52   :  { %v355_v24 = vpack.c.bf16 %v195_v22, %v193_v21 }
  0x57   :  { %6588 = vmatmul.msk.bf16.gmra.mxu1 %vm492_vm1, %v285_v27  ;;  %6619 = vmatmul.msk.bf16.gmra.mxu3 %vm492_vm1, %v347_v28  ;;  %v68_v28 = vld [vmem:[%s13986_s0 + $0x100] sm:$0xff] }
  0x61   :  { %705 = vmatmul.bf16.gmra.mxu0 %v284_v34  ;;  %855 = vmatmul.bf16.gmra.mxu2 %v344_v35  ;;  %v292_v34 = vpack.c.bf16 %v70_v29, %v68_v28  ;;  %v352_v35 = vpack.c.bf16 %v190_v31, %v188_v30  ;;  %v81_v28 = vld [vmem:[%s13986_s0 + $0x168] sm:$0xff]  ;;  %v6710_v29 = vld [vmem:[%s13987_s3 + $0x80] sm:$0xf] }
  0x67   :  { %6589 = vmatmul.msk.bf16.gmra.mxu1 %vm492_vm1, %v287_v39  ;;  %6620 = vmatmul.msk.bf16.gmra.mxu3 %vm492_vm1, %v349_v40 }
  0x71   :  { %710 = vmatmul.bf16.gmra.mxu0 %v286_v46  ;;  %860 = vmatmul.bf16.gmra.mxu2 %v346_v47 }
  0x77   :  { %6590 = vmatmul.msk.bf16.gmra.mxu1 %vm492_vm1, %v289_v51  ;;  %6621 = vmatmul.msk.bf16.gmra.mxu3 %vm492_vm1, %v351_v52 }
  0x81   :  { %715 = vmatmul.bf16.gmra.mxu0 %v288_v0  ;;  %865 = vmatmul.bf16.gmra.mxu2 %v348_v1  ;;  %v79_v0 = vld [vmem:[%s13986_s0 + $0x158] sm:$0xff]  ;;  %v201_v1 = vld [vmem:[%s13986_s0 + $0x528] sm:$0xff] }
  0x82   :  { %v297_v7 = vpack.c.bf16 %v79_v0, %v77_v59  ;;  %v359_v8 = vpack.c.bf16 %v203_v2, %v201_v1  ;;  %v7760_v0 = vld [vmem:[%s13987_s3 + $0x84] sm:$0xf]  ;;  %v6712_v1 = vld [vmem:[%s13987_s3 + $0x90] sm:$0xf0] }
  0x87   :  { %6591 = vmatmul.msk.bf16.gmra.mxu1 %vm492_vm1, %v291_v5  ;;  %6622 = vmatmul.msk.bf16.gmra.mxu3 %vm492_vm1, %v353_v6 }
  0x91   :  { %720 = vmatmul.bf16.gmra.mxu0 %v290_v18  ;;  %870 = vmatmul.bf16.gmra.mxu2 %v350_v19 }
  0x94   :  { %v995_v25 = vpop.f32.mrf.mxu1 }
  0x97   :  { %6592 = vmatmul.msk.bf16.gmra.mxu1 %vm492_vm1, %v293_v23  ;;  %6623 = vmatmul.msk.bf16.gmra.mxu3 %vm492_vm1, %v355_v24  ;;  %v78_v24 = vld [vmem:[%s13986_s0 + $0x150] sm:$0xff] }
  0x98   :  { %v296_v31 = vpack.c.bf16 %v78_v24, %v76_v20  ;;  %v87_v24 = vld [vmem:[%s13986_s0 + $0x198] sm:$0xff] }
  0x9a   :  { %v8654_v26 = vpop.f32.mrf.mxu3 }
  0x9c   :  { %v997_v27 = vpop.f32.mrf.mxu1 }
  0x9e   :  { %v686_v39 = vpop.f32.mrf.mxu0 }
  0x9f   :  { %v687_v40 = vadd.f32 %v8671_v32, %v686_v39 }
  0xa1   :  { %v996_v44 = vadd.f32 %v995_v25, %v687_v40  ;;  %725 = vmatmul.bf16.gmra.mxu0 %v292_v34  ;;  %875 = vmatmul.bf16.gmra.mxu2 %v352_v35  ;;  %v196_v25 = vld [vmem:[%s13986_s0 + $0x500] sm:$0xff]  ;;  %v83_v34 = vld [vmem:[%s13986_s0 + $0x178] sm:$0xff]  ;;  %v205_v35 = vld [vmem:[%s13986_s0 + $0x548] sm:$0xff] }
  0xa2   :  { %v8686_v41 = vpop.f32.mrf.mxu3  ;;  %v207_v40 = vld [vmem:[%s13986_s0 + $0x558] sm:$0xff]  ;;  %v299_v54 = vpack.c.bf16 %v83_v34, %v81_v28 }
  0xa3   :  { %v1415_v50 = vmul.f32 0.01, %v996_v44  ;;  %vm1295_vm2 = vcmp.gt.f32.partialorder %v996_v44, 0.0  ;;  %v361_v55 = vpack.c.bf16 %v207_v40, %v205_v35 }
  0xa4   :  { %v1000_v45 = vpop.f32.mrf.mxu1  ;;  %v8688_v46 = vpop.f32.mrf.mxu2 }
  0xa5   :  { %v1535_v60 = vsel %vm1295_vm2, %v996_v44, %v1415_v50  ;;  %v6720_v44 = vld [vmem:[%s13987_s3 + $0x98] sm:$0xf0] }
  0xa6   :  { %v688_v47 = vpop.f32.mrf.mxu0 }
  0xa7   :  { %6593 = vmatmul.msk.bf16.gmra.mxu1 %vm492_vm1, %v295_v42  ;;  %6624 = vmatmul.msk.bf16.gmra.mxu3 %vm492_vm1, %v357_v43  ;;  %v689_v48 = vadd.f32 %v8671_v32, %v688_v47  ;;  %v6711_v42 = vor.u32 %v7762_v36, %v6710_v29  ;;  %v7761_v43 = vld [vmem:[%s13987_s3 + $0x8c] sm:$0xf] }
  0xa8   :  { %v6723_v47 = vor.u32 %v7761_v43, %v6720_v44 }
  0xa9   :  { %v998_v51 = vadd.f32 %v997_v27, %v689_v48  ;;  %1920 = vmatpush.bf16.msrb.mxu2 %v6711_v42 }
  0xaa   :  { %v8693_v49 = vpop.f32.mrf.mxu3  ;;  %2847 = vmatpush.bf16.msrb.mxu0 %v6723_v47 }
  0xab   :  { %vm1296_vm3 = vcmp.gt.f32.partialorder %v998_v51, 0.0  ;;  %v1416_v57 = vmul.f32 0.01, %v998_v51 }
  0xac   :  { %v1002_v52 = vpop.f32.mrf.mxu1  ;;  %v8707_v58 = vpop.f32.mrf.mxu2 }
  0xad   :  { %v1536_v61 = vsel %vm1296_vm3, %v998_v51, %v1416_v57 }
  0xae   :  { %v691_v3 = vpop.f32.mrf.mxu0  ;;  %v8721_v4 = vpack.c.bf16 %v1536_v61, %v1535_v60 }
  0xaf   :  { %v692_v5 = vadd.f32 %v8671_v32, %v691_v3  ;;  %v6715_v3 = vor.u32 %v7760_v0, %v6712_v1 }
  0xb1   :  { %v1001_v9 = vadd.f32 %v1000_v45, %v692_v5  ;;  %730 = vmatmul.bf16.gmra.mxu0 %v294_v62  ;;  %880 = vmatmul.bf16.gmra.mxu2 %v354_v63 }
  0xb2   :  { %v8724_v6 = vpop.f32.mrf.mxu3  ;;  %2229 = vmatpush.bf16.msrb.mxu3 %v6715_v3  ;;  %v91_v3 = vld [vmem:[%s13986_s0 + $0x1b8] sm:$0xff] }
  0xb3   :  { %v1417_v21 = vmul.f32 0.01, %v1001_v9  ;;  %vm1297_vm4 = vcmp.gt.f32.partialorder %v1001_v9, 0.0 }
  0xb4   :  { %v1005_v10 = vpop.f32.mrf.mxu1  ;;  %v841_v11 = vpop.f32.mrf.mxu2 }
  0xb5   :  { %v842_v12 = vadd.f32 %v8671_v32, %v841_v11  ;;  %v1537_v37 = vsel %vm1297_vm4, %v1001_v9, %v1417_v21 }
  0xb6   :  { %v693_v15 = vpop.f32.mrf.mxu0 }
  0xb7   :  { %6594 = vmatmul.msk.bf16.gmra.mxu1 %vm492_vm1, %v297_v7  ;;  %6625 = vmatmul.msk.bf16.gmra.mxu3 %vm492_vm1, %v359_v8  ;;  %v1151_v17 = vadd.f32 %v8654_v26, %v842_v12  ;;  %v694_v18 = vadd.f32 %v8671_v32, %v693_v15  ;;  %v198_v26 = vld [vmem:[%s13986_s0 + $0x510] sm:$0xff]  ;;  %v80_v12 = vld [vmem:[%s13986_s0 + $0x160] sm:$0xff] }
  0xb8   :  { %v356_v33 = vpack.c.bf16 %v198_v26, %v196_v25  ;;  %v209_v25 = vld [vmem:[%s13986_s0 + $0x568] sm:$0xff]  ;;  %v211_v26 = vld [vmem:[%s13986_s0 + $0x578] sm:$0xff] }
  0xb9   :  { %v1003_v22 = vadd.f32 %v1002_v52, %v694_v18  ;;  %v1477_v50 = vmul.f32 0.01, %v1151_v17  ;;  %vm1357_vm6 = vcmp.gt.f32.partialorder %v1151_v17, 0.0  ;;  %v85_v18 = vld [vmem:[%s13986_s0 + $0x188] sm:$0xff]  ;;  %v363_v35 = vpack.c.bf16 %v211_v26, %v209_v25 }
  0xba   :  { %v8737_v19 = vpop.f32.mrf.mxu3  ;;  %v301_v34 = vpack.c.bf16 %v87_v24, %v85_v18 }
  0xbb   :  { %vm1298_vm5 = vcmp.gt.f32.partialorder %v1003_v22, 0.0  ;;  %v1418_v27 = vmul.f32 0.01, %v1003_v22  ;;  %v1597_v60 = vsel %vm1357_vm6, %v1151_v17, %v1477_v50  ;;  %v298_v17 = vpack.c.bf16 %v82_v13, %v80_v12 }
  0xbc   :  { %v1007_v23 = vpop.f32.mrf.mxu1  ;;  %v843_v30 = vpop.f32.mrf.mxu2 }
  0xbd   :  { %v1538_v38 = vsel %vm1298_vm5, %v1003_v22, %v1418_v27  ;;  %v844_v39 = vadd.f32 %v8671_v32, %v843_v30 }
  0xbe   :  { %v696_v45 = vpop.f32.mrf.mxu0  ;;  %v8776_v48 = vpack.c.bf16 %v1538_v38, %v1537_v37 }
  0xbf   :  { %v1153_v51 = vadd.f32 %v8686_v41, %v844_v39  ;;  %v697_v52 = vadd.f32 %v8671_v32, %v696_v45 }
  0xc1   :  { %vm1358_vm7 = vcmp.gt.f32.partialorder %v1153_v51, 0.0  ;;  %v1478_v56 = vmul.f32 0.01, %v1153_v51  ;;  %v1006_v57 = vadd.f32 %v1005_v10, %v697_v52  ;;  %735 = vmatmul.bf16.gmra.mxu0 %v296_v31  ;;  %885 = vmatmul.bf16.gmra.mxu2 %v356_v33 }
  0xc2   :  { %v8780_v53 = vpop.f32.mrf.mxu3 }
  0xc3   :  { %v1598_v61 = vsel %vm1358_vm7, %v1153_v51, %v1478_v56  ;;  %v1419_v9 = vmul.f32 0.01, %v1006_v57  ;;  %vm1299_vm8 = vcmp.gt.f32.partialorder %v1006_v57, 0.0  ;;  %v86_v56 = vld [vmem:[%s13986_s0 + $0x190] sm:$0xff] }
  0xc4   :  { %v1010_v59 = vpop.f32.mrf.mxu1  ;;  %v846_v62 = vpop.f32.mrf.mxu2  ;;  %v8784_v41 = vpack.c.bf16 %v1598_v61, %v1597_v60 }
  0xc5   :  { %v847_v63 = vadd.f32 %v8671_v32, %v846_v62  ;;  %v1539_v20 = vsel %vm1299_vm8, %v1006_v57, %v1419_v9  ;;  %v206_v57 = vld [vmem:[%s13986_s0 + $0x550] sm:$0xff]  ;;  %v89_v62 = vld [vmem:[%s13986_s0 + $0x1a8] sm:$0xff] }
  0xc6   :  { %v698_v2 = vpop.f32.mrf.mxu0 }
  0xc7   :  { %6595 = vmatmul.msk.bf16.gmra.mxu1 %vm492_vm1, %v299_v54  ;;  %6626 = vmatmul.msk.bf16.gmra.mxu3 %vm492_vm1, %v361_v55  ;;  %v1156_v5 = vadd.f32 %v8693_v49, %v847_v63  ;;  %v699_v7 = vadd.f32 %v8671_v32, %v698_v2  ;;  %v200_v49 = vld [vmem:[%s13986_s0 + $0x520] sm:$0xff] }
  0xc8   :  { %v84_v55 = vld [vmem:[%s13986_s0 + $0x180] sm:$0xff] }
  0xc9   :  { %v1008_v10 = vadd.f32 %v1007_v23, %v699_v7  ;;  %v358_v23 = vpack.c.bf16 %v202_v14, %v200_v49  ;;  %v1479_v29 = vmul.f32 0.01, %v1156_v5  ;;  %vm1359_vm10 = vcmp.gt.f32.partialorder %v1156_v5, 0.0  ;;  %v215_v7 = vld [vmem:[%s13986_s0 + $0x598] sm:$0xff] }
  0xca   :  { %v8795_v8 = vpop.f32.mrf.mxu3  ;;  %v300_v61 = vpack.c.bf16 %v86_v56, %v84_v55  ;;  %v303_v14 = vpack.c.bf16 %v91_v3, %v89_v62 }
  0xcb   :  { %vm1300_vm9 = vcmp.gt.f32.partialorder %v1008_v10, 0.0  ;;  %v1420_v15 = vmul.f32 0.01, %v1008_v10  ;;  %v1599_v39 = vsel %vm1359_vm10, %v1156_v5, %v1479_v29  ;;  %v213_v5 = vld [vmem:[%s13986_s0 + $0x588] sm:$0xff] }
  0xcc   :  { %v1012_v11 = vpop.f32.mrf.mxu1  ;;  %v848_v16 = vpop.f32.mrf.mxu2 }
  0xcd   :  { %v1540_v21 = vsel %vm1300_vm9, %v1008_v10, %v1420_v15  ;;  %v849_v22 = vadd.f32 %v8671_v32, %v848_v16  ;;  %v365_v15 = vpack.c.bf16 %v215_v7, %v213_v5  ;;  %v6702_v7 = vld [vmem:[%s13987_s3 + $0x68] sm:$0xf] }
  0xce   :  { %v701_v27 = vpop.f32.mrf.mxu0  ;;  %v8822_v28 = vpack.c.bf16 %v1540_v21, %v1539_v20 }
  0xcf   :  { %v1158_v30 = vadd.f32 %v8724_v6, %v849_v22  ;;  %v702_v31 = vadd.f32 %v8671_v32, %v701_v27 }
  0xd1   :  { %vm1360_vm11 = vcmp.gt.f32.partialorder %v1158_v30, 0.0  ;;  %v1480_v36 = vmul.f32 0.01, %v1158_v30  ;;  %v1011_v37 = vadd.f32 %v1010_v59, %v702_v31  ;;  %740 = vmatmul.bf16.gmra.mxu0 %v298_v17  ;;  %890 = vmatmul.bf16.gmra.mxu2 %v358_v23 }
  0xd2   :  { %v8826_v33 = vpop.f32.mrf.mxu3 }
  0xd3   :  { %v1600_v40 = vsel %vm1360_vm11, %v1158_v30, %v1480_v36  ;;  %v1421_v51 = vmul.f32 0.01, %v1011_v37  ;;  %vm1301_vm12 = vcmp.gt.f32.partialorder %v1011_v37, 0.0  ;;  %v210_v36 = vld [vmem:[%s13986_s0 + $0x570] sm:$0xff] }
  0xd4   :  { %v1015_v38 = vpop.f32.mrf.mxu1  ;;  %v851_v42 = vpop.f32.mrf.mxu2  ;;  %v8830_v6 = vpack.c.bf16 %v1600_v40, %v1599_v39  ;;  %v93_v40 = vld [vmem:[%s13986_s0 + $0x1c8] sm:$0xff] }
  0xd5   :  { %v852_v43 = vadd.f32 %v8671_v32, %v851_v42  ;;  %v1541_v63 = vsel %vm1301_vm12, %v1011_v37, %v1421_v51  ;;  %v217_v51 = vld [vmem:[%s13986_s0 + $0x5a8] sm:$0xff] }
  0xd6   :  { %v703_v44 = vpop.f32.mrf.mxu0 }
  0xd7   :  { %6596 = vmatmul.msk.bf16.gmra.mxu1 %vm492_vm1, %v301_v34  ;;  %6627 = vmatmul.msk.bf16.gmra.mxu3 %vm492_vm1, %v363_v35  ;;  %v1161_v45 = vadd.f32 %v8737_v19, %v852_v43  ;;  %v704_v47 = vadd.f32 %v8671_v32, %v703_v44  ;;  %v204_v19 = vld [vmem:[%s13986_s0 + $0x540] sm:$0xff]  ;;  %v90_v35 = vld [vmem:[%s13986_s0 + $0x1b0] sm:$0xff] }
  0xd8   :  { %v360_v2 = vpack.c.bf16 %v206_v57, %v204_v19  ;;  %v88_v34 = vld [vmem:[%s13986_s0 + $0x1a0] sm:$0xff] }
  0xd9   :  { %v1013_v52 = vadd.f32 %v1012_v11, %v704_v47  ;;  %v1481_v11 = vmul.f32 0.01, %v1161_v45  ;;  %vm1361_vm14 = vcmp.gt.f32.partialorder %v1161_v45, 0.0  ;;  %v302_v39 = vpack.c.bf16 %v90_v35, %v88_v34  ;;  %v95_v47 = vld [vmem:[%s13986_s0 + $0x1d8] sm:$0xff]  ;;  %v221_v35 = vld [vmem:[%s13986_s0 + $0x5c8] sm:$0xff] }
  0xda   :  { %v8835_v50 = vpop.f32.mrf.mxu3  ;;  %v99_v34 = vld [vmem:[%s13986_s0 + $0x1f8] sm:$0xff] }
  0xdb   :  { %vm1302_vm13 = vcmp.gt.f32.partialorder %v1013_v52, 0.0  ;;  %v1422_v59 = vmul.f32 0.01, %v1013_v52  ;;  %v1601_v20 = vsel %vm1361_vm14, %v1161_v45, %v1481_v11  ;;  %v6694_v11 = vld [vmem:[%s13987_s3 + $0x60] sm:$0xf] }
  0xdc   :  { %v1017_v54 = vpop.f32.mrf.mxu1  ;;  %v853_v60 = vpop.f32.mrf.mxu2 }
  0xdd   :  { %v1542_v0 = vsel %vm1302_vm13, %v1013_v52, %v1422_v59  ;;  %v854_v1 = vadd.f32 %v8671_v32, %v853_v60  ;;  %v219_v52 = vld [vmem:[%s13986_s0 + $0x5b8] sm:$0xff]  ;;  %v305_v60 = vpack.c.bf16 %v95_v47, %v93_v40  ;;  %v7757_v40 = vld [vmem:[%s13987_s3 + $0x6c] sm:$0xf]  ;;  %v6696_v47 = vld [vmem:[%s13987_s3 + $0x70] sm:$0xf0] }
  0xde   :  { %v706_v9 = vpop.f32.mrf.mxu0  ;;  %v8862_v10 = vpack.c.bf16 %v1542_v0, %v1541_v63 }
  0xdf   :  { %v1163_v12 = vadd.f32 %v8780_v53, %v854_v1  ;;  %v707_v13 = vadd.f32 %v8671_v32, %v706_v9  ;;  %v7759_v9 = vld [vmem:[%s13987_s3 + $0x74] sm:$0xf0] }
  0xe1   :  { %vm1362_vm15 = vcmp.gt.f32.partialorder %v1163_v12, 0.0  ;;  %v1482_v16 = vmul.f32 0.01, %v1163_v12  ;;  %v1016_v17 = vadd.f32 %v1015_v38, %v707_v13  ;;  %745 = vmatmul.bf16.gmra.mxu0 %v300_v61  ;;  %895 = vmatmul.bf16.gmra.mxu2 %v360_v2  ;;  %v367_v61 = vpack.c.bf16 %v219_v52, %v217_v51 }
  0xe2   :  { %v8866_v49 = vpop.f32.mrf.mxu3  ;;  %v6703_v13 = vor.u32 %v7759_v9, %v6702_v7 }
  0xe3   :  { %v1602_v21 = vsel %vm1362_vm15, %v1163_v12, %v1482_v16  ;;  %v1423_v29 = vmul.f32 0.01, %v1016_v17  ;;  %vm1303_vm0 = vcmp.gt.f32.partialorder %v1016_v17, 0.0 }
  0xe4   :  { %v1020_v18 = vpop.f32.mrf.mxu1  ;;  %v856_v22 = vpop.f32.mrf.mxu2  ;;  %v8870_v53 = vpack.c.bf16 %v1602_v21, %v1601_v20  ;;  %2539 = vmatpush.bf16.msrb.mxu1 %v6703_v13 }
  0xe5   :  { %v857_v23 = vadd.f32 %v8671_v32, %v856_v22  ;;  %v1543_v42 = vsel %vm1303_vm0, %v1016_v17, %v1423_v29  ;;  %v97_v29 = vld [vmem:[%s13986_s0 + $0x1e8] sm:$0xff] }
  0xe6   :  { %v708_v24 = vpop.f32.mrf.mxu0 }
  0xe7   :  { %6597 = vmatmul.msk.bf16.gmra.mxu1 %vm492_vm1, %v303_v14  ;;  %6628 = vmatmul.msk.bf16.gmra.mxu3 %vm492_vm1, %v365_v15  ;;  %v1166_v25 = vadd.f32 %v8795_v8, %v857_v23  ;;  %v709_v26 = vadd.f32 %v8671_v32, %v708_v24  ;;  %v208_v8 = vld [vmem:[%s13986_s0 + $0x560] sm:$0xff]  ;;  %v7758_v14 = vld [vmem:[%s13987_s3 + $0x6c] sm:$0xf0] }
  0xe8   :  { %v362_v45 = vpack.c.bf16 %v210_v36, %v208_v8  ;;  %v92_v23 = vld [vmem:[%s13986_s0 + $0x1c0] sm:$0xff]  ;;  %v94_v24 = vld [vmem:[%s13986_s0 + $0x1d0] sm:$0xff]  ;;  %v223_v8 = vld [vmem:[%s13986_s0 + $0x5d8] sm:$0xff] }
  0xe9   :  { %v1018_v30 = vadd.f32 %v1017_v54, %v709_v26  ;;  %v1483_v56 = vmul.f32 0.01, %v1166_v25  ;;  %vm1363_vm3 = vcmp.gt.f32.partialorder %v1166_v25, 0.0 }
  0xea   :  { %v8875_v27 = vpop.f32.mrf.mxu3 }
  0xeb   :  { %vm1304_vm2 = vcmp.gt.f32.partialorder %v1018_v30, 0.0  ;;  %v1424_v37 = vmul.f32 0.01, %v1018_v30  ;;  %v1603_v1 = vsel %vm1363_vm3, %v1166_v25, %v1483_v56  ;;  %v214_v25 = vld [vmem:[%s13986_s0 + $0x590] sm:$0xff] }
  0xec   :  { %v1022_v31 = vpop.f32.mrf.mxu1  ;;  %v858_v38 = vpop.f32.mrf.mxu2 }
  0xed   :  { %v1544_v43 = vsel %vm1304_vm2, %v1018_v30, %v1424_v37  ;;  %v859_v44 = vadd.f32 %v8671_v32, %v858_v38 }
  0xee   :  { %v711_v54 = vpop.f32.mrf.mxu0  ;;  %v8902_v55 = vpack.c.bf16 %v1544_v43, %v1543_v42  ;;  %v6704_v42 = vld [vmem:[%s13987_s3 + $0x78] sm:$0xf0]  ;;  %v7756_v43 = vld [vmem:[%s13987_s3 + $0x64] sm:$0xf] }
  0xef   :  { %v1168_v19 = vadd.f32 %v8826_v33, %v859_v44  ;;  %v712_v57 = vadd.f32 %v8671_v32, %v711_v54 }
  0xf1   :  { %vm1364_vm4 = vcmp.gt.f32.partialorder %v1168_v19, 0.0  ;;  %v1484_v62 = vmul.f32 0.01, %v1168_v19  ;;  %v1021_v63 = vadd.f32 %v1020_v18, %v712_v57  ;;  %750 = vmatmul.bf16.gmra.mxu0 %v302_v39  ;;  %900 = vmatmul.bf16.gmra.mxu2 %v362_v45  ;;  %v6695_v18 = vor.u32 %v7758_v14, %v6694_v11 }
  0xf2   :  { %v8906_v59 = vpop.f32.mrf.mxu3  ;;  %v6707_v45 = vor.u32 %v7757_v40, %v6704_v42  ;;  %v6699_v57 = vor.u32 %v7756_v43, %v6696_v47 }
  0xf3   :  { %v1604_v2 = vsel %vm1364_vm4, %v1168_v19, %v1484_v62  ;;  %v1425_v20 = vmul.f32 0.01, %v1021_v63  ;;  %1921 = vmatpush.bf16.msrb.mxu2 %v6695_v18  ;;  %vm1305_vm5 = vcmp.gt.f32.partialorder %v1021_v63, 0.0  ;;  %v98_v18 = vld [vmem:[%s13986_s0 + $0x1f0] sm:$0xff] }
  0xf4   :  { %v1025_v0 = vpop.f32.mrf.mxu1  ;;  %v861_v3 = vpop.f32.mrf.mxu2  ;;  %v8910_v33 = vpack.c.bf16 %v1604_v2, %v1603_v1  ;;  %2848 = vmatpush.bf16.msrb.mxu0 %v6707_v45  ;;  %2230 = vmatpush.bf16.msrb.mxu3 %v6699_v57 }
  0xf5   :  { %v862_v5 = vadd.f32 %v8671_v32, %v861_v3  ;;  %v1545_v36 = vsel %vm1305_vm5, %v1021_v63, %v1425_v20  ;;  %v218_v20 = vld [vmem:[%s13986_s0 + $0x5b0] sm:$0xff] }
  0xf6   :  { %v713_v12 = vpop.f32.mrf.mxu0 }
  0xf7   :  { %6598 = vmatmul.msk.bf16.gmra.mxu1 %vm492_vm1, %v305_v60  ;;  %6629 = vmatmul.msk.bf16.gmra.mxu3 %vm492_vm1, %v367_v61  ;;  %v1171_v15 = vadd.f32 %v8835_v50, %v862_v5  ;;  %v714_v16 = vadd.f32 %v8671_v32, %v713_v12  ;;  %v212_v50 = vld [vmem:[%s13986_s0 + $0x580] sm:$0xff]  ;;  %v307_v60 = vpack.c.bf16 %v99_v34, %v97_v29  ;;  %v227_v34 = vld [vmem:[%s13986_s0 + $0x5f8] sm:$0xff] }
  0xf8   :  { %v364_v39 = vpack.c.bf16 %v214_v25, %v212_v50  ;;  %v369_v61 = vpack.c.bf16 %v223_v8, %v221_v35 }
  0xf9   :  { %v1023_v21 = vadd.f32 %v1022_v31, %v714_v16  ;;  %v304_v31 = vpack.c.bf16 %v94_v24, %v92_v23  ;;  %v1485_v52 = vmul.f32 0.01, %v1171_v15  ;;  %vm1365_vm7 = vcmp.gt.f32.partialorder %v1171_v15, 0.0  ;;  %v96_v16 = vld [vmem:[%s13986_s0 + $0x1e0] sm:$0xff]  ;;  %v101_v24 = vld [vmem:[%s13986_s0 + $0x208] sm:$0xff] }
  0xfa   :  { %v8927_v17 = vpop.f32.mrf.mxu3  ;;  %v306_v23 = vpack.c.bf16 %v98_v18, %v96_v16 }
  0xfb   :  { %vm1306_vm6 = vcmp.gt.f32.partialorder %v1023_v21, 0.0  ;;  %v1426_v26 = vmul.f32 0.01, %v1023_v21  ;;  %v1605_v2 = vsel %vm1365_vm7, %v1171_v15, %v1485_v52 }
  0xfc   :  { %v1027_v22 = vpop.f32.mrf.mxu1  ;;  %v863_v30 = vpop.f32.mrf.mxu2 }
  0xfd   :  { %v1546_v37 = vsel %vm1306_vm6, %v1023_v21, %v1426_v26  ;;  %v864_v38 = vadd.f32 %v8671_v32, %v863_v30  ;;  %v103_v30 = vld [vmem:[%s13986_s0 + $0x218] sm:$0xff] }
  0xfe   :  { %v716_v44 = vpop.f32.mrf.mxu0  ;;  %v8966_v51 = vpack.c.bf16 %v1546_v37, %v1545_v36  ;;  %v309_v40 = vpack.c.bf16 %v103_v30, %v101_v24 }
  0xff   :  { %v1173_v54 = vadd.f32 %v8866_v49, %v864_v38  ;;  %v717_v56 = vadd.f32 %v8671_v32, %v716_v44 }
 0x101   :  { %vm1366_vm8 = vcmp.gt.f32.partialorder %v1173_v54, 0.0  ;;  %v1486_v62 = vmul.f32 0.01, %v1173_v54  ;;  %v1026_v63 = vadd.f32 %v1025_v0, %v717_v56  ;;  %755 = vmatmul.bf16.gmra.mxu0 %v304_v31  ;;  %905 = vmatmul.bf16.gmra.mxu2 %v364_v39  ;;  %v225_v31 = vld [vmem:[%s13986_s0 + $0x5e8] sm:$0xff] }
 0x102   :  { %v8970_v19 = vpop.f32.mrf.mxu3  ;;  %v371_v42 = vpack.c.bf16 %v227_v34, %v225_v31 }
 0x103   :  { %v1606_v3 = vsel %vm1366_vm8, %v1173_v54, %v1486_v62  ;;  %v1427_v13 = vmul.f32 0.01, %v1026_v63  ;;  %vm1307_vm9 = vcmp.gt.f32.partialorder %v1026_v63, 0.0 }
 0x104   :  { %v1030_v1 = vpop.f32.mrf.mxu1  ;;  %v866_v5 = vpop.f32.mrf.mxu2  ;;  %v8974_v49 = vpack.c.bf16 %v1606_v3, %v1605_v2  ;;  %v100_v3 = vld [vmem:[%s13986_s0 + $0x200] sm:$0xff] }
 0x105   :  { %v867_v7 = vadd.f32 %v8671_v32, %v866_v5  ;;  %v1547_v50 = vsel %vm1307_vm9, %v1026_v63, %v1427_v13  ;;  %v102_v5 = vld [vmem:[%s13986_s0 + $0x210] sm:$0xff]  ;;  %v105_v13 = vld [vmem:[%s13986_s0 + $0x228] sm:$0xff] }
 0x106   :  { %v718_v9 = vpop.f32.mrf.mxu0 }
 0x107   :  { %6599 = vmatmul.msk.bf16.gmra.mxu1 %vm492_vm1, %v307_v60  ;;  %6630 = vmatmul.msk.bf16.gmra.mxu3 %vm492_vm1, %v369_v61  ;;  %v1176_v11 = vadd.f32 %v8875_v27, %v867_v7  ;;  %v719_v0 = vadd.f32 %v8671_v32, %v718_v9  ;;  %v216_v27 = vld [vmem:[%s13986_s0 + $0x5a0] sm:$0xff]  ;;  %v222_v7 = vld [vmem:[%s13986_s0 + $0x5d0] sm:$0xff] }
 0x108   :  { %v366_v29 = vpack.c.bf16 %v218_v20, %v216_v27  ;;  %v107_v27 = vld [vmem:[%s13986_s0 + $0x238] sm:$0xff]  ;;  %v229_v20 = vld [vmem:[%s13986_s0 + $0x608] sm:$0xff] }
 0x109   :  { %v1028_v14 = vadd.f32 %v1027_v22, %v719_v0  ;;  %v1487_v36 = vmul.f32 0.01, %v1176_v11  ;;  %vm1367_vm11 = vcmp.gt.f32.partialorder %v1176_v11, 0.0  ;;  %v308_v0 = vpack.c.bf16 %v102_v5, %v100_v3 }
 0x10a   :  { %v8979_v12 = vpop.f32.mrf.mxu3 }
 0x10b   :  { %vm1308_vm10 = vcmp.gt.f32.partialorder %v1028_v14, 0.0  ;;  %v1428_v21 = vmul.f32 0.01, %v1028_v14  ;;  %v1607_v47 = vsel %vm1367_vm11, %v1176_v11, %v1487_v36 }
 0x10c   :  { %v1032_v15 = vpop.f32.mrf.mxu1  ;;  %v868_v22 = vpop.f32.mrf.mxu2 }
 0x10d   :  { %v1548_v25 = vsel %vm1308_vm10, %v1028_v14, %v1428_v21  ;;  %v869_v26 = vadd.f32 %v8671_v32, %v868_v22  ;;  %v231_v21 = vld [vmem:[%s13986_s0 + $0x618] sm:$0xff] }
 0x10e   :  { %v721_v35 = vpop.f32.mrf.mxu0  ;;  %v9006_v8 = vpack.c.bf16 %v1548_v25, %v1547_v50  ;;  %v373_v30 = vpack.c.bf16 %v231_v21, %v229_v20 }
 0x10f   :  { %v1178_v37 = vadd.f32 %v8906_v59, %v869_v26  ;;  %v722_v38 = vadd.f32 %v8671_v32, %v721_v35 }
 0x111   :  { %vm1368_vm12 = vcmp.gt.f32.partialorder %v1178_v37, 0.0  ;;  %v1488_v43 = vmul.f32 0.01, %v1178_v37  ;;  %v1031_v44 = vadd.f32 %v1030_v1, %v722_v38  ;;  %760 = vmatmul.bf16.gmra.mxu0 %v306_v23  ;;  %910 = vmatmul.bf16.gmra.mxu2 %v366_v29  ;;  %v311_v29 = vpack.c.bf16 %v107_v27, %v105_v13 }
 0x112   :  { %v9010_v39 = vpop.f32.mrf.mxu3 }
 0x113   :  { %v1608_v52 = vsel %vm1368_vm12, %v1178_v37, %v1488_v43  ;;  %v1429_v63 = vmul.f32 0.01, %v1031_v44  ;;  %vm1309_vm13 = vcmp.gt.f32.partialorder %v1031_v44, 0.0 }
 0x114   :  { %v1035_v45 = vpop.f32.mrf.mxu1  ;;  %v871_v54 = vpop.f32.mrf.mxu2  ;;  %v9014_v59 = vpack.c.bf16 %v1608_v52, %v1607_v47 }
 0x115   :  { %v872_v56 = vadd.f32 %v8671_v32, %v871_v54  ;;  %v1549_v14 = vsel %vm1309_vm13, %v1031_v44, %v1429_v63 }
 0x116   :  { %v723_v57 = vpop.f32.mrf.mxu0 }
 0x117   :  { %6600 = vmatmul.msk.bf16.gmra.mxu1 %vm492_vm1, %v309_v40  ;;  %6631 = vmatmul.msk.bf16.gmra.mxu3 %vm492_vm1, %v371_v42  ;;  %v1181_v60 = vadd.f32 %v8927_v17, %v872_v56  ;;  %v724_v61 = vadd.f32 %v8671_v32, %v723_v57  ;;  %v220_v17 = vld [vmem:[%s13986_s0 + $0x5c0] sm:$0xff]  ;;  %v106_v57 = vld [vmem:[%s13986_s0 + $0x230] sm:$0xff] }
 0x118   :  { %v368_v18 = vpack.c.bf16 %v222_v7, %v220_v17  ;;  %v104_v56 = vld [vmem:[%s13986_s0 + $0x220] sm:$0xff] }
 0x119   :  { %v1033_v1 = vadd.f32 %v1032_v15, %v724_v61  ;;  %v1489_v24 = vmul.f32 0.01, %v1181_v60  ;;  %vm1369_vm15 = vcmp.gt.f32.partialorder %v1181_v60, 0.0 }
 0x11a   :  { %v9019_v62 = vpop.f32.mrf.mxu3 }
 0x11b   :  { %vm1310_vm14 = vcmp.gt.f32.partialorder %v1033_v1, 0.0  ;;  %v1430_v9 = vmul.f32 0.01, %v1033_v1  ;;  %v1609_v36 = vsel %vm1369_vm15, %v1181_v60, %v1489_v24  ;;  %v226_v60 = vld [vmem:[%s13986_s0 + $0x5f0] sm:$0xff] }
 0x11c   :  { %v1037_v2 = vpop.f32.mrf.mxu1  ;;  %v873_v11 = vpop.f32.mrf.mxu2 }
 0x11d   :  { %v1550_v15 = vsel %vm1310_vm14, %v1033_v1, %v1430_v9  ;;  %v874_v16 = vadd.f32 %v8671_v32, %v873_v11  ;;  %v310_v1 = vpack.c.bf16 %v106_v57, %v104_v56  ;;  %v111_v9 = vld [vmem:[%s13986_s0 + $0x258] sm:$0xff]  ;;  %v233_v11 = vld [vmem:[%s13986_s0 + $0x628] sm:$0xff] }
 0x11e   :  { %v726_v22 = vpop.f32.mrf.mxu0  ;;  %v9046_v23 = vpack.c.bf16 %v1550_v15, %v1549_v14  ;;  %v6688_v56 = vld [vmem:[%s13987_s3 + $0x58] sm:$0xf0] }
 0x11f   :  { %v1183_v50 = vadd.f32 %v8970_v19, %v874_v16  ;;  %v727_v25 = vadd.f32 %v8671_v32, %v726_v22 }
 0x121   :  { %vm1370_vm0 = vcmp.gt.f32.partialorder %v1183_v50, 0.0  ;;  %v1490_v31 = vmul.f32 0.01, %v1183_v50  ;;  %v1036_v34 = vadd.f32 %v1035_v45, %v727_v25  ;;  %765 = vmatmul.bf16.gmra.mxu0 %v308_v0  ;;  %915 = vmatmul.bf16.gmra.mxu2 %v368_v18  ;;  %v235_v0 = vld [vmem:[%s13986_s0 + $0x638] sm:$0xff] }
 0x122   :  { %v9050_v26 = vpop.f32.mrf.mxu3  ;;  %v375_v21 = vpack.c.bf16 %v235_v0, %v233_v11  ;;  %v113_v11 = vld [vmem:[%s13986_s0 + $0x268] sm:$0xff] }
 0x123   :  { %v1610_v37 = vsel %vm1370_vm0, %v1183_v50, %v1490_v31  ;;  %v1431_v47 = vmul.f32 0.01, %v1036_v34  ;;  %vm1311_vm2 = vcmp.gt.f32.partialorder %v1036_v34, 0.0  ;;  %v7754_v31 = vld [vmem:[%s13987_s3 + $0x4c] sm:$0xf0] }
 0x124   :  { %v1040_v35 = vpop.f32.mrf.mxu1  ;;  %v876_v38 = vpop.f32.mrf.mxu2  ;;  %v9054_v19 = vpack.c.bf16 %v1610_v37, %v1609_v36 }
 0x125   :  { %v877_v40 = vadd.f32 %v8671_v32, %v876_v38  ;;  %v1551_v3 = vsel %vm1311_vm2, %v1036_v34, %v1431_v47  ;;  %v6686_v34 = vld [vmem:[%s13987_s3 + $0x48] sm:$0xf] }
 0x126   :  { %v728_v42 = vpop.f32.mrf.mxu0 }
 0x127   :  { %6601 = vmatmul.msk.bf16.gmra.mxu1 %vm492_vm1, %v311_v29  ;;  %6632 = vmatmul.msk.bf16.gmra.mxu3 %vm492_vm1, %v373_v30  ;;  %v1186_v43 = vadd.f32 %v8979_v12, %v877_v40  ;;  %v729_v44 = vadd.f32 %v8671_v32, %v728_v42  ;;  %v224_v12 = vld [vmem:[%s13986_s0 + $0x5e0] sm:$0xff] }
 0x128   :  { %v370_v7 = vpack.c.bf16 %v226_v60, %v224_v12  ;;  %v6678_v30 = vld [vmem:[%s13987_s3 + $0x40] sm:$0xf]  ;;  %v7752_v42 = vld [vmem:[%s13987_s3 + $0x44] sm:$0xf] }
 0x129   :  { %v1038_v52 = vadd.f32 %v1037_v2, %v729_v44  ;;  %v109_v2 = vld [vmem:[%s13986_s0 + $0x248] sm:$0xff]  ;;  %v1491_v15 = vmul.f32 0.01, %v1186_v43  ;;  %vm1371_vm4 = vcmp.gt.f32.partialorder %v1186_v43, 0.0  ;;  %v6679_v38 = vor.u32 %v7754_v31, %v6678_v30 }
 0x12a   :  { %v9059_v45 = vpop.f32.mrf.mxu3  ;;  %v313_v20 = vpack.c.bf16 %v111_v9, %v109_v2  ;;  %v7753_v44 = vld [vmem:[%s13987_s3 + $0x4c] sm:$0xf] }
 0x12b   :  { %vm1312_vm3 = vcmp.gt.f32.partialorder %v1038_v52, 0.0  ;;  %v1432_v61 = vmul.f32 0.01, %v1038_v52  ;;  %v1611_v25 = vsel %vm1371_vm4, %v1186_v43, %v1491_v15  ;;  %v6680_v43 = vld [vmem:[%s13987_s3 + $0x50] sm:$0xf0]  ;;  %1922 = vmatpush.bf16.msrb.mxu2 %v6679_v38 }
 0x12c   :  { %v1042_v54 = vpop.f32.mrf.mxu1  ;;  %v878_v63 = vpop.f32.mrf.mxu2 }
 0x12d   :  { %v1552_v5 = vsel %vm1312_vm3, %v1038_v52, %v1432_v61  ;;  %v879_v17 = vadd.f32 %v8671_v32, %v878_v63  ;;  %v6683_v52 = vor.u32 %v7752_v42, %v6680_v43  ;;  %v6691_v61 = vor.u32 %v7753_v44, %v6688_v56 }
 0x12e   :  { %v731_v13 = vpop.f32.mrf.mxu0  ;;  %v9086_v14 = vpack.c.bf16 %v1552_v5, %v1551_v3  ;;  %v108_v3 = vld [vmem:[%s13986_s0 + $0x240] sm:$0xff]  ;;  %v110_v5 = vld [vmem:[%s13986_s0 + $0x250] sm:$0xff] }
 0x12f   :  { %v1188_v16 = vadd.f32 %v9010_v39, %v879_v17  ;;  %v732_v18 = vadd.f32 %v8671_v32, %v731_v13  ;;  %2231 = vmatpush.bf16.msrb.mxu3 %v6683_v52  ;;  %2849 = vmatpush.bf16.msrb.mxu0 %v6691_v61  ;;  %v230_v17 = vld [vmem:[%s13986_s0 + $0x610] sm:$0xff]  ;;  %v312_v9 = vpack.c.bf16 %v110_v5, %v108_v3 }
 0x130   :  { %v234_v3 = vld [vmem:[%s13986_s0 + $0x630] sm:$0xff] }
 0x131   :  { %vm1372_vm5 = vcmp.gt.f32.partialorder %v1188_v16, 0.0  ;;  %v1492_v22 = vmul.f32 0.01, %v1188_v16  ;;  %v1041_v24 = vadd.f32 %v1040_v35, %v732_v18  ;;  %770 = vmatmul.bf16.gmra.mxu0 %v310_v1  ;;  %920 = vmatmul.bf16.gmra.mxu2 %v370_v7  ;;  %v7755_v35 = vld [vmem:[%s13987_s3 + $0x54] sm:$0xf0] }
 0x132   :  { %v9090_v27 = vpop.f32.mrf.mxu3  ;;  %v6687_v40 = vor.u32 %v7755_v35, %v6686_v34  ;;  %v115_v18 = vld [vmem:[%s13986_s0 + $0x278] sm:$0xff] }
 0x133   :  { %v1612_v29 = vsel %vm1372_vm5, %v1188_v16, %v1492_v22  ;;  %v1433_v63 = vmul.f32 0.01, %v1041_v24  ;;  %vm1313_vm6 = vcmp.gt.f32.partialorder %v1041_v24, 0.0  ;;  %v315_v31 = vpack.c.bf16 %v115_v18, %v113_v11 }
 0x134   :  { %v1045_v50 = vpop.f32.mrf.mxu1  ;;  %v881_v39 = vpop.f32.mrf.mxu2  ;;  %v9106_v36 = vpack.c.bf16 %v1612_v29, %v1611_v25  ;;  %2540 = vmatpush.bf16.msrb.mxu1 %v6687_v40 }
 0x135   :  { %v882_v37 = vadd.f32 %v8671_v32, %v881_v39  ;;  %v1553_v0 = vsel %vm1313_vm6, %v1041_v24, %v1433_v63  ;;  %v112_v63 = vld [vmem:[%s13986_s0 + $0x260] sm:$0xff] }
 0x136   :  { %v733_v47 = vpop.f32.mrf.mxu0 }
 0x137   :  { %6602 = vmatmul.msk.bf16.gmra.mxu1 %vm492_vm1, %v313_v20  ;;  %6633 = vmatmul.msk.bf16.gmra.mxu3 %vm492_vm1, %v375_v21  ;;  %v1191_v57 = vadd.f32 %v9019_v62, %v882_v37  ;;  %v734_v12 = vadd.f32 %v8671_v32, %v733_v47  ;;  %v228_v62 = vld [vmem:[%s13986_s0 + $0x600] sm:$0xff]  ;;  %v237_v20 = vld [vmem:[%s13986_s0 + $0x648] sm:$0xff]  ;;  %v239_v21 = vld [vmem:[%s13986_s0 + $0x658] sm:$0xff] }
 0x138   :  { %v372_v16 = vpack.c.bf16 %v230_v17, %v228_v62  ;;  %v377_v34 = vpack.c.bf16 %v239_v21, %v237_v20  ;;  %v117_v17 = vld [vmem:[%s13986_s0 + $0x288] sm:$0xff] }
 0x139   :  { %v1043_v1 = vadd.f32 %v1042_v54, %v734_v12  ;;  %v1493_v24 = vmul.f32 0.01, %v1191_v57  ;;  %vm1373_vm8 = vcmp.gt.f32.partialorder %v1191_v57, 0.0 }
 0x13a   :  { %v9123_v60 = vpop.f32.mrf.mxu3 }
 0x13b   :  { %vm1314_vm7 = vcmp.gt.f32.partialorder %v1043_v1, 0.0  ;;  %v1434_v54 = vmul.f32 0.01, %v1043_v1  ;;  %v1613_v40 = vsel %vm1373_vm8, %v1191_v57, %v1493_v24 }
 0x13c   :  { %v1047_v2 = vpop.f32.mrf.mxu1  ;;  %v883_v7 = vpop.f32.mrf.mxu2 }
 0x13d   :  { %v1554_v13 = vsel %vm1314_vm7, %v1043_v1, %v1434_v54  ;;  %v884_v15 = vadd.f32 %v8671_v32, %v883_v7  ;;  %v114_v1 = vld [vmem:[%s13986_s0 + $0x270] sm:$0xff] }
 0x13e   :  { %v736_v22 = vpop.f32.mrf.mxu0  ;;  %v9150_v25 = vpack.c.bf16 %v1554_v13, %v1553_v0  ;;  %v314_v62 = vpack.c.bf16 %v114_v1, %v112_v63  ;;  %v119_v0 = vld [vmem:[%s13986_s0 + $0x298] sm:$0xff]  ;;  %v241_v13 = vld [vmem:[%s13986_s0 + $0x668] sm:$0xff]  ;;  %v116_v63 = vld [vmem:[%s13986_s0 + $0x280] sm:$0xff] }
 0x13f   :  { %v1193_v29 = vadd.f32 %v9050_v26, %v884_v15  ;;  %v737_v30 = vadd.f32 %v8671_v32, %v736_v22  ;;  %v9163_v32 = vld [vmem:[%s13988_s2] ss:$0 sm:$0xff]  ;;  %v243_v15 = vld [vmem:[%s13986_s0 + $0x678] sm:$0xff]  ;;  %v118_v1 = vld [vmem:[%s13986_s0 + $0x290] sm:$0xff] }
 0x141   :  { %vm1374_vm9 = vcmp.gt.f32.partialorder %v1193_v29, 0.0  ;;  %v1494_v35 = vmul.f32 0.01, %v1193_v29  ;;  %v1046_v37 = vadd.f32 %v1045_v50, %v737_v30  ;;  %775 = vmatmul.bf16.gmra.mxu0 %v312_v9  ;;  %925 = vmatmul.bf16.gmra.mxu2 %v372_v16  ;;  %v379_v30 = vpack.c.bf16 %v243_v15, %v241_v13 }
 0x142   :  { %v9154_v39 = vpop.f32.mrf.mxu3 }
 0x143   :  { %v1614_v42 = vsel %vm1374_vm9, %v1193_v29, %v1494_v35  ;;  %v1435_v57 = vmul.f32 0.01, %v1046_v37  ;;  %vm1315_vm10 = vcmp.gt.f32.partialorder %v1046_v37, 0.0  ;;  %v317_v29 = vpack.c.bf16 %v119_v0, %v117_v17  ;;  %v247_v0 = vld [vmem:[%s13986_s0 + $0x698] sm:$0xff] }
 0x144   :  { %v1050_v38 = vpop.f32.mrf.mxu1  ;;  %v886_v43 = vpop.f32.mrf.mxu2  ;;  %v9158_v26 = vpack.c.bf16 %v1614_v42, %v1613_v40 }
 0x145   :  { %v887_v44 = vadd.f32 %v9163_v32, %v886_v43  ;;  %v1555_v54 = vsel %vm1315_vm10, %v1046_v37, %v1435_v57 }
 0x146   :  { %v738_v50 = vpop.f32.mrf.mxu0 }
 0x147   :  { %6603 = vmatmul.msk.bf16.gmra.mxu1 %vm492_vm1, %v315_v31  ;;  %6634 = vmatmul.msk.bf16.gmra.mxu3 %vm492_vm1, %v377_v34  ;;  %v1196_v47 = vadd.f32 %v9059_v45, %v887_v44  ;;  %v739_v52 = vadd.f32 %v9163_v32, %v738_v50  ;;  %v232_v45 = vld [vmem:[%s13986_s0 + $0x620] sm:$0xff] }
 0x148   :  { %v374_v11 = vpack.c.bf16 %v234_v3, %v232_v45  ;;  %v238_v45 = vld [vmem:[%s13986_s0 + $0x650] sm:$0xff] }
 0x149   :  { %v1048_v12 = vadd.f32 %v1047_v2, %v739_v52  ;;  %v1495_v20 = vmul.f32 0.01, %v1196_v47  ;;  %vm1375_vm12 = vcmp.gt.f32.partialorder %v1196_v47, 0.0 }
 0x14a   :  { %v9168_v56 = vpop.f32.mrf.mxu3 }
 0x14b   :  { %vm1316_vm11 = vcmp.gt.f32.partialorder %v1048_v12, 0.0  ;;  %v1436_v2 = vmul.f32 0.01, %v1048_v12  ;;  %v1615_v37 = vsel %vm1375_vm12, %v1196_v47, %v1495_v20 }
 0x14c   :  { %v1052_v61 = vpop.f32.mrf.mxu1  ;;  %v888_v5 = vpop.f32.mrf.mxu2 }
 0x14d   :  { %v1556_v7 = vsel %vm1316_vm11, %v1048_v12, %v1436_v2  ;;  %v889_v9 = vadd.f32 %v9163_v32, %v888_v5  ;;  %v316_v2 = vpack.c.bf16 %v118_v1, %v116_v63  ;;  %v121_v5 = vld [vmem:[%s13986_s0 + $0x2a8] sm:$0xff] }
 0x14e   :  { %v741_v16 = vpop.f32.mrf.mxu0  ;;  %v9195_v18 = vpack.c.bf16 %v1556_v7, %v1555_v54 }
 0x14f   :  { %v1198_v21 = vadd.f32 %v9090_v27, %v889_v9  ;;  %v742_v22 = vadd.f32 %v9163_v32, %v741_v16  ;;  %v123_v9 = vld [vmem:[%s13986_s0 + $0x2b8] sm:$0xff] }
 0x151   :  { %vm1376_vm13 = vcmp.gt.f32.partialorder %v1198_v21, 0.0  ;;  %v1496_v31 = vmul.f32 0.01, %v1198_v21  ;;  %v1051_v34 = vadd.f32 %v1050_v38, %v742_v22  ;;  %780 = vmatmul.bf16.gmra.mxu0 %v314_v62  ;;  %930 = vmatmul.bf16.gmra.mxu2 %v374_v11  ;;  %v245_v11 = vld [vmem:[%s13986_s0 + $0x688] sm:$0xff] }
 0x152   :  { %v9199_v24 = vpop.f32.mrf.mxu3 }
 0x153   :  { %v1616_v40 = vsel %vm1376_vm13, %v1198_v21, %v1496_v31  ;;  %v1437_v57 = vmul.f32 0.01, %v1051_v34  ;;  %vm1317_vm14 = vcmp.gt.f32.partialorder %v1051_v34, 0.0 }
 0x154   :  { %v1055_v35 = vpop.f32.mrf.mxu1  ;;  %v891_v42 = vpop.f32.mrf.mxu2  ;;  %v9203_v27 = vpack.c.bf16 %v1616_v40, %v1615_v37 }
 0x155   :  { %v892_v43 = vadd.f32 %v9163_v32, %v891_v42  ;;  %v1557_v62 = vsel %vm1317_vm14, %v1051_v34, %v1437_v57 }
 0x156   :  { %v743_v44 = vpop.f32.mrf.mxu0 }
 0x157   :  { %6604 = vmatmul.msk.bf16.gmra.mxu1 %vm492_vm1, %v317_v29  ;;  %6635 = vmatmul.msk.bf16.gmra.mxu3 %vm492_vm1, %v379_v30  ;;  %v1201_v50 = vadd.f32 %v9123_v60, %v892_v43  ;;  %v744_v52 = vadd.f32 %v9163_v32, %v743_v44  ;;  %v236_v60 = vld [vmem:[%s13986_s0 + $0x640] sm:$0xff]  ;;  %v319_v29 = vpack.c.bf16 %v123_v9, %v121_v5 }
 0x158   :  { %v376_v7 = vpack.c.bf16 %v238_v45, %v236_v60  ;;  %v381_v30 = vpack.c.bf16 %v247_v0, %v245_v11  ;;  %v120_v60 = vld [vmem:[%s13986_s0 + $0x2a0] sm:$0xff]  ;;  %v122_v45 = vld [vmem:[%s13986_s0 + $0x2b0] sm:$0xff] }
 0x159   :  { %v1053_v12 = vadd.f32 %v1052_v61, %v744_v52  ;;  %v1497_v16 = vmul.f32 0.01, %v1201_v50  ;;  %vm1377_vm0 = vcmp.gt.f32.partialorder %v1201_v50, 0.0  ;;  %v318_v5 = vpack.c.bf16 %v122_v45, %v120_v60 }
 0x15a   :  { %v9208_v38 = vpop.f32.mrf.mxu3 }
 0x15b   :  { %vm1318_vm15 = vcmp.gt.f32.partialorder %v1053_v12, 0.0  ;;  %v1438_v61 = vmul.f32 0.01, %v1053_v12  ;;  %v1617_v40 = vsel %vm1377_vm0, %v1201_v50, %v1497_v16  ;;  %v7750_v16 = vld [vmem:[%s13987_s3 + $0x2c] sm:$0xf0] }
 0x15c   :  { %v1057_v47 = vpop.f32.mrf.mxu1  ;;  %v893_v3 = vpop.f32.mrf.mxu2 }
 0x15d   :  { %v1558_v17 = vsel %vm1318_vm15, %v1053_v12, %v1438_v61  ;;  %v894_v54 = vadd.f32 %v9163_v32, %v893_v3  ;;  %v242_v61 = vld [vmem:[%s13986_s0 + $0x670] sm:$0xff]  ;;  %v125_v3 = vld [vmem:[%s13986_s0 + $0x2c8] sm:$0xff] }
 0x15e   :  { %v746_v13 = vpop.f32.mrf.mxu0  ;;  %v9235_v15 = vpack.c.bf16 %v1558_v17, %v1557_v62  ;;  %v127_v62 = vld [vmem:[%s13986_s0 + $0x2d8] sm:$0xff]  ;;  %v249_v17 = vld [vmem:[%s13986_s0 + $0x6a8] sm:$0xff] }
 0x15f   :  { %v1203_v20 = vadd.f32 %v9154_v39, %v894_v54  ;;  %v747_v21 = vadd.f32 %v9163_v32, %v746_v13  ;;  %v251_v54 = vld [vmem:[%s13986_s0 + $0x6b8] sm:$0xff]  ;;  %v6662_v13 = vld [vmem:[%s13987_s3 + $0x20] sm:$0xf] }
 0x161   :  { %vm1378_vm2 = vcmp.gt.f32.partialorder %v1203_v20, 0.0  ;;  %v1498_v31 = vmul.f32 0.01, %v1203_v20  ;;  %v1056_v34 = vadd.f32 %v1055_v35, %v747_v21  ;;  %785 = vmatmul.bf16.gmra.mxu0 %v316_v2  ;;  %935 = vmatmul.bf16.gmra.mxu2 %v376_v7 }
 0x162   :  { %v9239_v22 = vpop.f32.mrf.mxu3 }
 0x163   :  { %v1618_v42 = vsel %vm1378_vm2, %v1203_v20, %v1498_v31  ;;  %v1439_v63 = vmul.f32 0.01, %v1056_v34  ;;  %vm1319_vm3 = vcmp.gt.f32.partialorder %v1056_v34, 0.0  ;;  %v6670_v20 = vld [vmem:[%s13987_s3 + $0x28] sm:$0xf] }
 0x164   :  { %v1060_v37 = vpop.f32.mrf.mxu1  ;;  %v896_v43 = vpop.f32.mrf.mxu2  ;;  %v9243_v39 = vpack.c.bf16 %v1618_v42, %v1617_v40 }
 0x165   :  { %v897_v44 = vadd.f32 %v9163_v32, %v896_v43  ;;  %v1559_v7 = vsel %vm1319_vm3, %v1056_v34, %v1439_v63 }
 0x166   :  { %v748_v52 = vpop.f32.mrf.mxu0 }
 0x167   :  { %6605 = vmatmul.msk.bf16.gmra.mxu1 %vm492_vm1, %v319_v29  ;;  %6636 = vmatmul.msk.bf16.gmra.mxu3 %vm492_vm1, %v381_v30  ;;  %v1206_v57 = vadd.f32 %v9168_v56, %v897_v44  ;;  %v749_v12 = vadd.f32 %v9163_v32, %v748_v52  ;;  %v240_v56 = vld [vmem:[%s13986_s0 + $0x660] sm:$0xff]  ;;  %v6663_v29 = vor.u32 %v7750_v16, %v6662_v13  ;;  %v7751_v30 = vld [vmem:[%s13987_s3 + $0x34] sm:$0xf0] }
 0x168   :  { %v378_v0 = vpack.c.bf16 %v242_v61, %v240_v56  ;;  %v6671_v44 = vor.u32 %v7751_v30, %v6670_v20  ;;  %v321_v52 = vpack.c.bf16 %v127_v62, %v125_v3  ;;  %v124_v16 = vld [vmem:[%s13986_s0 + $0x2c0] sm:$0xff]  ;;  %v126_v20 = vld [vmem:[%s13986_s0 + $0x2d0] sm:$0xff] }
 0x169   :  { %v1058_v1 = vadd.f32 %v1057_v47, %v749_v12  ;;  %v1499_v34 = vmul.f32 0.01, %v1206_v57  ;;  %vm1379_vm5 = vcmp.gt.f32.partialorder %v1206_v57, 0.0  ;;  %v383_v12 = vpack.c.bf16 %v251_v54, %v249_v17  ;;  %1923 = vmatpush.bf16.msrb.mxu2 %v6663_v29 }
 0x16a   :  { %v9248_v35 = vpop.f32.mrf.mxu3  ;;  %2541 = vmatpush.bf16.msrb.mxu1 %v6671_v44  ;;  %v320_v30 = vpack.c.bf16 %v126_v20, %v124_v16 }
 0x16b   :  { %vm1320_vm4 = vcmp.gt.f32.partialorder %v1058_v1, 0.0  ;;  %v1440_v47 = vmul.f32 0.01, %v1058_v1  ;;  %v1619_v45 = vsel %vm1379_vm5, %v1206_v57, %v1499_v34  ;;  %v7749_v57 = vld [vmem:[%s13987_s3 + $0x2c] sm:$0xf] }
 0x16c   :  { %v1062_v50 = vpop.f32.mrf.mxu1  ;;  %v898_v2 = vpop.f32.mrf.mxu2  ;;  %v129_v34 = vld [vmem:[%s13986_s0 + $0x2e8] sm:$0xff] }
 0x16d   :  { %v1560_v9 = vsel %vm1320_vm4, %v1058_v1, %v1440_v47  ;;  %v899_v11 = vadd.f32 %v9163_v32, %v898_v2  ;;  %v6664_v47 = vld [vmem:[%s13987_s3 + $0x30] sm:$0xf0] }
 0x16e   :  { %v751_v21 = vpop.f32.mrf.mxu0  ;;  %v9287_v31 = vpack.c.bf16 %v1560_v9, %v1559_v7 }
 0x16f   :  { %v1208_v40 = vadd.f32 %v9199_v24, %v899_v11  ;;  %v752_v42 = vadd.f32 %v9163_v32, %v751_v21  ;;  %v7748_v24 = vld [vmem:[%s13987_s3 + $0x24] sm:$0xf]  ;;  %v246_v21 = vld [vmem:[%s13986_s0 + $0x690] sm:$0xff] }
 0x170   :  { %v6667_v2 = vor.u32 %v7748_v24, %v6664_v47 }
 0x171   :  { %vm1380_vm6 = vcmp.gt.f32.partialorder %v1208_v40, 0.0  ;;  %v1500_v63 = vmul.f32 0.01, %v1208_v40  ;;  %v1061_v1 = vadd.f32 %v1060_v37, %v752_v42  ;;  %790 = vmatmul.bf16.gmra.mxu0 %v318_v5  ;;  %940 = vmatmul.bf16.gmra.mxu2 %v378_v0  ;;  %v6672_v5 = vld [vmem:[%s13987_s3 + $0x38] sm:$0xf0] }
 0x172   :  { %v9291_v43 = vpop.f32.mrf.mxu3  ;;  %v6675_v17 = vor.u32 %v7749_v57, %v6672_v5  ;;  %2232 = vmatpush.bf16.msrb.mxu3 %v6667_v2 }
 0x173   :  { %v1620_v56 = vsel %vm1380_vm6, %v1208_v40, %v1500_v63  ;;  %v1441_v11 = vmul.f32 0.01, %v1061_v1  ;;  %vm1321_vm7 = vcmp.gt.f32.partialorder %v1061_v1, 0.0  ;;  %v253_v63 = vld [vmem:[%s13986_s0 + $0x6c8] sm:$0xff] }
 0x174   :  { %v1065_v60 = vpop.f32.mrf.mxu1  ;;  %v901_v61 = vpop.f32.mrf.mxu2  ;;  %v9301_v37 = vpack.c.bf16 %v1620_v56, %v1619_v45  ;;  %2850 = vmatpush.bf16.msrb.mxu0 %v6675_v17  ;;  %v255_v45 = vld [vmem:[%s13986_s0 + $0x6d8] sm:$0xff] }
 0x175   :  { %v902_v3 = vadd.f32 %v9163_v32, %v901_v61  ;;  %v1561_v40 = vsel %vm1321_vm7, %v1061_v1, %v1441_v11  ;;  %v385_v57 = vpack.c.bf16 %v255_v45, %v253_v63 }
 0x176   :  { %14206 = vst [vmem:[#allocation3_spill] sm:$0xff] %v9301_v37  ;;  %v753_v62 = vpop.f32.mrf.mxu0 }
 0x177   :  { %6606 = vmatmul.msk.bf16.gmra.mxu1 %vm492_vm1, %v321_v52  ;;  %6637 = vmatmul.msk.bf16.gmra.mxu3 %vm492_vm1, %v383_v12  ;;  %v1211_v54 = vadd.f32 %v9208_v38, %v902_v3  ;;  %v754_v7 = vadd.f32 %v9163_v32, %v753_v62  ;;  %v244_v38 = vld [vmem:[%s13986_s0 + $0x680] sm:$0xff]  ;;  %v131_v12 = vld [vmem:[%s13986_s0 + $0x2f8] sm:$0xff] }
 0x178   :  { %v380_v52 = vpack.c.bf16 %v246_v21, %v244_v38  ;;  %v323_v2 = vpack.c.bf16 %v131_v12, %v129_v34  ;;  %v130_v34 = vld [vmem:[%s13986_s0 + $0x2f0] sm:$0xff] }
 0x179   :  { %v1063_v0 = vadd.f32 %v1062_v50, %v754_v7  ;;  %v1501_v1 = vmul.f32 0.01, %v1211_v54  ;;  %vm1381_vm9 = vcmp.gt.f32.partialorder %v1211_v54, 0.0 }
 0x17a   :  { %v9312_v9 = vpop.f32.mrf.mxu3 }
 0x17b   :  { %vm1322_vm8 = vcmp.gt.f32.partialorder %v1063_v0, 0.0  ;;  %v1442_v50 = vmul.f32 0.01, %v1063_v0  ;;  %v1621_v7 = vsel %vm1381_vm9, %v1211_v54, %v1501_v1  ;;  %v135_v1 = vld [vmem:[%s13986_s0 + $0x318] sm:$0xff] }
 0x17c   :  { %v1067_v13 = vpop.f32.mrf.mxu1  ;;  %v903_v29 = vpop.f32.mrf.mxu2 }
 0x17d   :  { %v1562_v42 = vsel %vm1322_vm8, %v1063_v0, %v1442_v50  ;;  %v904_v44 = vadd.f32 %v9163_v32, %v903_v29 }
 0x17e   :  { %v756_v56 = vpop.f32.mrf.mxu0  ;;  %v9339_v24 = vpack.c.bf16 %v1562_v42, %v1561_v40  ;;  %v250_v40 = vld [vmem:[%s13986_s0 + $0x6b0] sm:$0xff] }
 0x17f   :  { %v1213_v61 = vadd.f32 %v9239_v22, %v904_v44  ;;  %v757_v47 = vadd.f32 %v9163_v32, %v756_v56 }
 0x181   :  { %vm1382_vm10 = vcmp.gt.f32.partialorder %v1213_v61, 0.0  ;;  %v1502_v5 = vmul.f32 0.01, %v1213_v61  ;;  %v1066_v62 = vadd.f32 %v1065_v60, %v757_v47  ;;  %795 = vmatmul.bf16.gmra.mxu0 %v320_v30  ;;  %945 = vmatmul.bf16.gmra.mxu2 %v380_v52  ;;  %v128_v30 = vld [vmem:[%s13986_s0 + $0x2e0] sm:$0xff]  ;;  %v133_v52 = vld [vmem:[%s13986_s0 + $0x308] sm:$0xff]  ;;  %v259_v47 = vld [vmem:[%s13986_s0 + $0x6f8] sm:$0xff] }
 0x182   :  { %v9343_v3 = vpop.f32.mrf.mxu3  ;;  %v322_v44 = vpack.c.bf16 %v130_v34, %v128_v30 }
 0x183   :  { %v1622_v11 = vsel %vm1382_vm10, %v1213_v61, %v1502_v5  ;;  %v1443_v50 = vmul.f32 0.01, %v1066_v62  ;;  %vm1323_vm11 = vcmp.gt.f32.partialorder %v1066_v62, 0.0  ;;  %v257_v61 = vld [vmem:[%s13986_s0 + $0x6e8] sm:$0xff] }
 0x184   :  { %v1070_v17 = vpop.f32.mrf.mxu1  ;;  %v906_v0 = vpop.f32.mrf.mxu2  ;;  %v9347_v22 = vpack.c.bf16 %v1622_v11, %v1621_v7 }
 0x185   :  { %v907_v16 = vadd.f32 %v9163_v32, %v906_v0  ;;  %v1563_v12 = vsel %vm1323_vm11, %v1066_v62, %v1443_v50  ;;  %v325_v0 = vpack.c.bf16 %v135_v1, %v133_v52 }
 0x186   :  { %14207 = vst [vmem:[#allocation4_spill] sm:$0xff] %v9347_v22  ;;  %v758_v20 = vpop.f32.mrf.mxu0 }
 0x187   :  { %6607 = vmatmul.msk.bf16.gmra.mxu1 %vm492_vm1, %v323_v2  ;;  %6638 = vmatmul.msk.bf16.gmra.mxu3 %vm492_vm1, %v385_v57  ;;  %v1216_v38 = vadd.f32 %v9248_v35, %v907_v16  ;;  %v759_v21 = vadd.f32 %v9163_v32, %v758_v20  ;;  %v248_v35 = vld [vmem:[%s13986_s0 + $0x6a0] sm:$0xff]  ;;  %v387_v16 = vpack.c.bf16 %v259_v47, %v257_v61  ;;  %v137_v61 = vld [vmem:[%s13986_s0 + $0x328] sm:$0xff] }
 0x188   :  { %v382_v56 = vpack.c.bf16 %v250_v40, %v248_v35 }
 0x189   :  { %v1068_v29 = vadd.f32 %v1067_v13, %v759_v21  ;;  %v1503_v5 = vmul.f32 0.01, %v1216_v38  ;;  %vm1383_vm13 = vcmp.gt.f32.partialorder %v1216_v38, 0.0 }
 0x18a   :  { %v9352_v60 = vpop.f32.mrf.mxu3 }
 0x18b   :  { %vm1324_vm12 = vcmp.gt.f32.partialorder %v1068_v29, 0.0  ;;  %v1444_v13 = vmul.f32 0.01, %v1068_v29 }
 0x18c   :  { %v1072_v54 = vpop.f32.mrf.mxu1  ;;  %v908_v42 = vpop.f32.mrf.mxu2 }
 0x18d   :  { %v1564_v63 = vsel %vm1324_vm12, %v1068_v29, %v1444_v13  ;;  %v909_v45 = vadd.f32 %v9163_v32, %v908_v42  ;;  %v1623_v29 = vsel %vm1383_vm13, %v1216_v38, %v1503_v5 }
 0x18e   :  { %v761_v2 = vpop.f32.mrf.mxu0  ;;  %v9379_v57 = vpack.c.bf16 %v1564_v63, %v1563_v12  ;;  %v132_v12 = vld [vmem:[%s13986_s0 + $0x300] sm:$0xff]  ;;  %v134_v63 = vld [vmem:[%s13986_s0 + $0x310] sm:$0xff] }
 0x18f   :  { %v1218_v62 = vadd.f32 %v9291_v43, %v909_v45  ;;  %v762_v7 = vadd.f32 %v9163_v32, %v761_v2  ;;  %v254_v45 = vld [vmem:[%s13986_s0 + $0x6d0] sm:$0xff]  ;;  %v324_v1 = vpack.c.bf16 %v134_v63, %v132_v12 }
 0x191   :  { %vm1384_vm14 = vcmp.gt.f32.partialorder %v1218_v62, 0.0  ;;  %v1504_v20 = vmul.f32 0.01, %v1218_v62  ;;  %v1071_v21 = vadd.f32 %v1070_v17, %v762_v7  ;;  %800 = vmatmul.bf16.gmra.mxu0 %v322_v44  ;;  %950 = vmatmul.bf16.gmra.mxu2 %v382_v56  ;;  %v139_v7 = vld [vmem:[%s13986_s0 + $0x338] sm:$0xff] }
 0x192   :  { %v9383_v11 = vpop.f32.mrf.mxu3 }
 0x193   :  { %v1624_v30 = vsel %vm1384_vm14, %v1218_v62, %v1504_v20  ;;  %v1445_v44 = vmul.f32 0.01, %v1071_v21  ;;  %vm1325_vm15 = vcmp.gt.f32.partialorder %v1071_v21, 0.0 }
 0x194   :  { %v1075_v50 = vpop.f32.mrf.mxu1  ;;  %v911_v34 = vpop.f32.mrf.mxu2  ;;  %v9387_v43 = vpack.c.bf16 %v1624_v30, %v1623_v29 }
 0x195   :  { %v912_v35 = vadd.f32 %v9163_v32, %v911_v34  ;;  %v1565_v47 = vsel %vm1325_vm15, %v1071_v21, %v1445_v44 }
 0x196   :  { %14208 = vst [vmem:[#allocation5_spill] sm:$0xff] %v9387_v43  ;;  %v763_v40 = vpop.f32.mrf.mxu0 }
 0x197   :  { %6608 = vmatmul.msk.bf16.gmra.mxu1 %vm492_vm1, %v325_v0  ;;  %6639 = vmatmul.msk.bf16.gmra.mxu3 %vm492_vm1, %v387_v16  ;;  %v1221_v13 = vadd.f32 %v9312_v9, %v912_v35  ;;  %v764_v42 = vadd.f32 %v9163_v32, %v763_v40  ;;  %v252_v9 = vld [vmem:[%s13986_s0 + $0x6c0] sm:$0xff]  ;;  %v261_v0 = vld [vmem:[%s13986_s0 + $0x708] sm:$0xff]  ;;  %v263_v16 = vld [vmem:[%s13986_s0 + $0x718] sm:$0xff]  ;;  %v327_v40 = vpack.c.bf16 %v139_v7, %v137_v61 }
 0x198   :  { %v384_v62 = vpack.c.bf16 %v254_v45, %v252_v9  ;;  %v256_v7 = vld [vmem:[%s13986_s0 + $0x6e0] sm:$0xff] }
 0x199   :  { %v1073_v52 = vadd.f32 %v1072_v54, %v764_v42  ;;  %v1505_v21 = vmul.f32 0.01, %v1221_v13  ;;  %vm1385_vm2 = vcmp.gt.f32.partialorder %v1221_v13, 0.0  ;;  %v389_v42 = vpack.c.bf16 %v263_v16, %v261_v0  ;;  %v143_v16 = vld [vmem:[%s13986_s0 + $0x358] sm:$0xff] }
 0x19a   :  { %v9392_v17 = vpop.f32.mrf.mxu3 }
 0x19b   :  { %vm1326_vm0 = vcmp.gt.f32.partialorder %v1073_v52, 0.0  ;;  %v1446_v54 = vmul.f32 0.01, %v1073_v52  ;;  %v1625_v63 = vsel %vm1385_vm2, %v1221_v13, %v1505_v21  ;;  %v136_v13 = vld [vmem:[%s13986_s0 + $0x320] sm:$0xff] }
 0x19c   :  { %v1077_v38 = vpop.f32.mrf.mxu1  ;;  %v913_v56 = vpop.f32.mrf.mxu2 }
 0x19d   :  { %v1566_v2 = vsel %vm1326_vm0, %v1073_v52, %v1446_v54  ;;  %v914_v5 = vadd.f32 %v9163_v32, %v913_v56 }
 0x19e   :  { %v766_v20 = vpop.f32.mrf.mxu0  ;;  %v9419_v29 = vpack.c.bf16 %v1566_v2, %v1565_v47 }
 0x19f   :  { %v1223_v30 = vadd.f32 %v9343_v3, %v914_v5  ;;  %v767_v34 = vadd.f32 %v9163_v32, %v766_v20  ;;  %v6646_v20 = vld [vmem:[%s13987_s3] sm:$0xf] }
 0x1a1   :  { %vm1386_vm3 = vcmp.gt.f32.partialorder %v1223_v30, 0.0  ;;  %v1506_v44 = vmul.f32 0.01, %v1223_v30  ;;  %v1076_v52 = vadd.f32 %v1075_v50, %v767_v34  ;;  %805 = vmatmul.bf16.gmra.mxu0 %v324_v1  ;;  %955 = vmatmul.bf16.gmra.mxu2 %v384_v62  ;;  %v138_v62 = vld [vmem:[%s13986_s0 + $0x330] sm:$0xff] }
 0x1a2   :  { %v9423_v35 = vpop.f32.mrf.mxu3  ;;  %v326_v34 = vpack.c.bf16 %v138_v62, %v136_v13  ;;  %v6648_v13 = vld [vmem:[%s13987_s3 + $0x10] sm:$0xf0]  ;;  %v6654_v62 = vld [vmem:[%s13987_s3 + $0x8] sm:$0xf] }
 0x1a3   :  { %v1626_v9 = vsel %vm1386_vm3, %v1223_v30, %v1506_v44  ;;  %v1447_v1 = vmul.f32 0.01, %v1076_v52  ;;  %vm1327_vm4 = vcmp.gt.f32.partialorder %v1076_v52, 0.0  ;;  %v267_v44 = vld [vmem:[%s13986_s0 + $0x738] sm:$0xff] }
 0x1a4   :  { %v1080_v12 = vpop.f32.mrf.mxu1  ;;  %v916_v45 = vpop.f32.mrf.mxu2  ;;  %v9427_v3 = vpack.c.bf16 %v1626_v9, %v1625_v63  ;;  %v7746_v63 = vld [vmem:[%s13987_s3 + $0xc] sm:$0xf0] }
 0x1a5   :  { %v917_v54 = vadd.f32 %v9163_v32, %v916_v45  ;;  %v1567_v9 = vsel %vm1327_vm4, %v1076_v52, %v1447_v1  ;;  %v7747_v52 = vld [vmem:[%s13987_s3 + $0x14] sm:$0xf0]  ;;  %v7745_v1 = vld [vmem:[%s13987_s3 + $0xc] sm:$0xf] }
 0x1a6   :  { %14209 = vst [vmem:[#allocation6_spill] sm:$0xff] %v9427_v3  ;;  %v768_v56 = vpop.f32.mrf.mxu0 }
 0x1a7   :  { %6609 = vmatmul.msk.bf16.gmra.mxu1 %vm492_vm1, %v327_v40  ;;  %6640 = vmatmul.msk.bf16.gmra.mxu3 %vm492_vm1, %v389_v42  ;;  %v1226_v61 = vadd.f32 %v9352_v60, %v917_v54  ;;  %v769_v47 = vadd.f32 %v9163_v32, %v768_v56  ;;  %v258_v60 = vld [vmem:[%s13986_s0 + $0x6f0] sm:$0xff]  ;;  %v265_v42 = vld [vmem:[%s13986_s0 + $0x728] sm:$0xff]  ;;  %v6647_v56 = vor.u32 %v7746_v63, %v6646_v20 }
 0x1a8   :  { %v386_v40 = vpack.c.bf16 %v258_v60, %v256_v7  ;;  %v391_v43 = vpack.c.bf16 %v267_v44, %v265_v42 }
 0x1a9   :  { %v1078_v2 = vadd.f32 %v1077_v38, %v769_v47  ;;  %v141_v38 = vld [vmem:[%s13986_s0 + $0x348] sm:$0xff]  ;;  %v1507_v21 = vmul.f32 0.01, %v1226_v61  ;;  %v7744_v47 = vld [vmem:[%s13987_s3 + $0x4] sm:$0xf]  ;;  %1924 = vmatpush.bf16.msrb.mxu2 %v6647_v56  ;;  %vm1387_vm6 = vcmp.gt.f32.partialorder %v1226_v61, 0.0 }
 0x1aa   :  { %v9432_v50 = vpop.f32.mrf.mxu3  ;;  %v6651_v60 = vor.u32 %v7744_v47, %v6648_v13  ;;  %v6655_v47 = vor.u32 %v7747_v52, %v6654_v62  ;;  %v329_v3 = vpack.c.bf16 %v143_v16, %v141_v38 }
 0x1ab   :  { %vm1328_vm5 = vcmp.gt.f32.partialorder %v1078_v2, 0.0  ;;  %v1448_v0 = vmul.f32 0.01, %v1078_v2 }
 0x1ac   :  { %v1082_v5 = vpop.f32.mrf.mxu1  ;;  %v918_v30 = vpop.f32.mrf.mxu2  ;;  %2233 = vmatpush.bf16.msrb.mxu3 %v6651_v60  ;;  %2542 = vmatpush.bf16.msrb.mxu1 %v6655_v47  ;;  %v271_v47 = vld [vmem:[%s13986_s0 + $0x758] sm:$0xff] }
 0x1ad   :  { %v1568_v45 = vsel %vm1328_vm5, %v1078_v2, %v1448_v0  ;;  %v919_v54 = vadd.f32 %v9163_v32, %v918_v30  ;;  %v6656_v2 = vld [vmem:[%s13987_s3 + $0x18] sm:$0xf0] }
 0x1ae   :  { %v771_v7 = vpop.f32.mrf.mxu0  ;;  %v9483_v0 = vpack.c.bf16 %v1568_v45, %v1567_v9  ;;  %v6659_v13 = vor.u32 %v7745_v1, %v6656_v2 }
 0x1af   :  { %v1228_v20 = vadd.f32 %v9383_v11, %v919_v54  ;;  %v772_v30 = vadd.f32 %v9163_v32, %v771_v7  ;;  %v1627_v11 = vsel %vm1387_vm6, %v1226_v61, %v1507_v21  ;;  %v145_v7 = vld [vmem:[%s13986_s0 + $0x368] sm:$0xff] }
 0x1b0   :  { %2851 = vmatpush.bf16.msrb.mxu0 %v6659_v13 }
 0x1b1   :  { %vm1388_vm7 = vcmp.gt.f32.partialorder %v1228_v20, 0.0  ;;  %v1508_v22 = vmul.f32 0.01, %v1228_v20  ;;  %v1081_v37 = vadd.f32 %v1080_v12, %v772_v30  ;;  %810 = vmatmul.bf16.gmra.mxu0 %v326_v34  ;;  %960 = vmatmul.bf16.gmra.mxu2 %v386_v40  ;;  %v269_v30 = vld [vmem:[%s13986_s0 + $0x748] sm:$0xff] }
 0x1b2   :  { %v9487_v63 = vpop.f32.mrf.mxu3 }
 0x1b3   :  { %v1628_v45 = vsel %vm1388_vm7, %v1228_v20, %v1508_v22  ;;  %v1449_v40 = vmul.f32 0.01, %v1081_v37  ;;  %v140_v22 = vld [vmem:[%s13986_s0 + $0x340] sm:$0xff]  ;;  %vm1329_vm8 = vcmp.gt.f32.partialorder %v1081_v37, 0.0  ;;  %v147_v20 = vld [vmem:[%s13986_s0 + $0x378] sm:$0xff] }
 0x1b4   :  { %v1085_v9 = vpop.f32.mrf.mxu1  ;;  %v921_v54 = vpop.f32.mrf.mxu2  ;;  %v9491_v56 = vpack.c.bf16 %v1628_v45, %v1627_v11 }
 0x1b5   :  { %v922_v38 = vadd.f32 %v9163_v32, %v921_v54  ;;  %v1569_v60 = vsel %vm1329_vm8, %v1081_v37, %v1449_v40 }
 0x1b6   :  { %v773_v16 = vpop.f32.mrf.mxu0 }
 0x1b7   :  { %6610 = vmatmul.msk.bf16.gmra.mxu1 %vm492_vm1, %v329_v3  ;;  %6641 = vmatmul.msk.bf16.gmra.mxu3 %vm492_vm1, %v391_v43  ;;  %v1231_v42 = vadd.f32 %v9392_v17, %v922_v38  ;;  %v774_v12 = vadd.f32 %v9163_v32, %v773_v16  ;;  %v142_v43 = vld [vmem:[%s13986_s0 + $0x350] sm:$0xff]  ;;  %v260_v17 = vld [vmem:[%s13986_s0 + $0x700] sm:$0xff]  ;;  %v331_v16 = vpack.c.bf16 %v147_v20, %v145_v7 }
 0x1b8   :  { %v262_v3 = vld [vmem:[%s13986_s0 + $0x710] sm:$0xff]  ;;  %v328_v62 = vpack.c.bf16 %v142_v43, %v140_v22 }
 0x1b9   :  { %v1083_v44 = vadd.f32 %v1082_v5, %v774_v12  ;;  %v388_v2 = vpack.c.bf16 %v262_v3, %v260_v17  ;;  %v1509_v37 = vmul.f32 0.01, %v1231_v42  ;;  %vm1389_vm10 = vcmp.gt.f32.partialorder %v1231_v42, 0.0  ;;  %v266_v20 = vld [vmem:[%s13986_s0 + $0x730] sm:$0xff] }
 0x1ba   :  { %v9496_v34 = vpop.f32.mrf.mxu3  ;;  %v393_v12 = vpack.c.bf16 %v271_v47, %v269_v30 }
 0x1bb   :  { %vm1330_vm9 = vcmp.gt.f32.partialorder %v1083_v44, 0.0  ;;  %v1450_v5 = vmul.f32 0.01, %v1083_v44  ;;  %v1629_v43 = vsel %vm1389_vm10, %v1231_v42, %v1509_v37 }
 0x1bc   :  { %v1087_v61 = vpop.f32.mrf.mxu1  ;;  %v923_v21 = vpop.f32.mrf.mxu2 }
 0x1bd   :  { %v1570_v52 = vsel %vm1330_vm9, %v1083_v44, %v1450_v5  ;;  %v924_v1 = vadd.f32 %v9163_v32, %v923_v21 }
 0x1be   :  { %v776_v13 = vpop.f32.mrf.mxu0  ;;  %v9523_v11 = vpack.c.bf16 %v1570_v52, %v1569_v60 }
 0x1bf   :  { %v1233_v45 = vadd.f32 %v9423_v35, %v924_v1  ;;  %v777_v54 = vadd.f32 %v9163_v32, %v776_v13  ;;  %v144_v1 = vld [vmem:[%s13986_s0 + $0x360] sm:$0xff]  ;;  %v149_v13 = vld [vmem:[%s13986_s0 + $0x388] sm:$0xff] }
 0x1c1   :  { %vm1390_vm11 = vcmp.gt.f32.partialorder %v1233_v45, 0.0  ;;  %v1510_v40 = vmul.f32 0.01, %v1233_v45  ;;  %v1086_v44 = vadd.f32 %v1085_v9, %v777_v54  ;;  %815 = vmatmul.bf16.gmra.mxu0 %v328_v62  ;;  %965 = vmatmul.bf16.gmra.mxu2 %v388_v2  ;;  %v146_v2 = vld [vmem:[%s13986_s0 + $0x370] sm:$0xff] }
 0x1c2   :  { %v9527_v38 = vpop.f32.mrf.mxu3  ;;  %v330_v47 = vpack.c.bf16 %v146_v2, %v144_v1 }
 0x1c3   :  { %v1630_v17 = vsel %vm1390_vm11, %v1233_v45, %v1510_v40  ;;  %v1451_v62 = vmul.f32 0.01, %v1086_v44  ;;  %vm1331_vm12 = vcmp.gt.f32.partialorder %v1086_v44, 0.0  ;;  %v273_v40 = vld [vmem:[%s13986_s0 + $0x768] sm:$0xff] }
 0x1c4   :  { %v1090_v22 = vpop.f32.mrf.mxu1  ;;  %v926_v3 = vpop.f32.mrf.mxu2  ;;  %v9531_v35 = vpack.c.bf16 %v1630_v17, %v1629_v43  ;;  %v275_v43 = vld [vmem:[%s13986_s0 + $0x778] sm:$0xff] }
 0x1c5   :  { %v927_v5 = vadd.f32 %v9163_v32, %v926_v3  ;;  %v1571_v37 = vsel %vm1331_vm12, %v1086_v44, %v1451_v62 }
 0x1c6   :  { %v778_v21 = vpop.f32.mrf.mxu0 }
 0x1c7   :  { %6611 = vmatmul.msk.bf16.gmra.mxu1 %vm492_vm1, %v331_v16  ;;  %6642 = vmatmul.msk.bf16.gmra.mxu3 %vm492_vm1, %v393_v12  ;;  %v1236_v7 = vadd.f32 %v9432_v50, %v927_v5  ;;  %v779_v60 = vadd.f32 %v9163_v32, %v778_v21  ;;  %v264_v50 = vld [vmem:[%s13986_s0 + $0x720] sm:$0xff]  ;;  %v151_v12 = vld [vmem:[%s13986_s0 + $0x398] sm:$0xff] }
 0x1c8   :  { %v390_v16 = vpack.c.bf16 %v266_v20, %v264_v50  ;;  %v333_v62 = vpack.c.bf16 %v151_v12, %v149_v13  ;;  %v148_v12 = vld [vmem:[%s13986_s0 + $0x380] sm:$0xff] }
 0x1c9   :  { %v1088_v52 = vadd.f32 %v1087_v61, %v779_v60  ;;  %v1511_v44 = vmul.f32 0.01, %v1236_v7  ;;  %vm1391_vm14 = vcmp.gt.f32.partialorder %v1236_v7, 0.0 }
 0x1ca   :  { %v9536_v9 = vpop.f32.mrf.mxu3 }
 0x1cb   :  { %vm1332_vm13 = vcmp.gt.f32.partialorder %v1088_v52, 0.0  ;;  %v1452_v61 = vmul.f32 0.01, %v1088_v52  ;;  %v1631_v20 = vsel %vm1391_vm14, %v1236_v7, %v1511_v44 }
 0x1cc   :  { %v1092_v42 = vpop.f32.mrf.mxu1  ;;  %v928_v30 = vpop.f32.mrf.mxu2 }
 0x1cd   :  { %v1572_v45 = vsel %vm1332_vm13, %v1088_v52, %v1452_v61  ;;  %v929_v54 = vadd.f32 %v9163_v32, %v928_v30  ;;  %v395_v52 = vpack.c.bf16 %v275_v43, %v273_v40  ;;  %v150_v40 = vld [vmem:[%s13986_s0 + $0x390] sm:$0xff] }
 0x1ce   :  { %v781_v17 = vpop.f32.mrf.mxu0  ;;  %v9563_v3 = vpack.c.bf16 %v1572_v45, %v1571_v37  ;;  %v270_v43 = vld [vmem:[%s13986_s0 + $0x750] sm:$0xff]  ;;  %v332_v44 = vpack.c.bf16 %v150_v40, %v148_v12 }
 0x1cf   :  { %v1238_v5 = vadd.f32 %v9487_v63, %v929_v54  ;;  %v782_v21 = vadd.f32 %v9163_v32, %v781_v17 }
 0x1d1   :  { %vm1392_vm15 = vcmp.gt.f32.partialorder %v1238_v5, 0.0  ;;  %v1512_v1 = vmul.f32 0.01, %v1238_v5  ;;  %v1091_v2 = vadd.f32 %v1090_v22, %v782_v21  ;;  %820 = vmatmul.bf16.gmra.mxu0 %v330_v47  ;;  %970 = vmatmul.bf16.gmra.mxu2 %v390_v16 }
 0x1d2   :  { %v9567_v60 = vpop.f32.mrf.mxu3 }
 0x1d3   :  { %v1632_v61 = vsel %vm1392_vm15, %v1238_v5, %v1512_v1  ;;  %v1453_v47 = vmul.f32 0.01, %v1091_v2  ;;  %vm1333_vm0 = vcmp.gt.f32.partialorder %v1091_v2, 0.0  ;;  %v153_v1 = vld [vmem:[%s13986_s0 + $0x3a8] sm:$0xff] }
 0x1d4   :  { %v1095_v50 = vpop.f32.mrf.mxu1  ;;  %v931_v30 = vpop.f32.mrf.mxu2  ;;  %v9571_v63 = vpack.c.bf16 %v1632_v61, %v1631_v20  ;;  %v155_v20 = vld [vmem:[%s13986_s0 + $0x3b8] sm:$0xff] }
 0x1d5   :  { %v932_v37 = vadd.f32 %v9163_v32, %v931_v30  ;;  %v1573_v5 = vsel %vm1333_vm0, %v1091_v2, %v1453_v47  ;;  %v335_v47 = vpack.c.bf16 %v155_v20, %v153_v1  ;;  %v152_v1 = vld [vmem:[%s13986_s0 + $0x3a0] sm:$0xff]  ;;  %v154_v20 = vld [vmem:[%s13986_s0 + $0x3b0] sm:$0xff] }
 0x1d6   :  { %v783_v45 = vpop.f32.mrf.mxu0 }
 0x1d7   :  { %6612 = vmatmul.msk.bf16.gmra.mxu1 %vm492_vm1, %v333_v62  ;;  %6643 = vmatmul.msk.bf16.gmra.mxu3 %vm492_vm1, %v395_v52  ;;  %v1241_v13 = vadd.f32 %v9496_v34, %v932_v37  ;;  %v784_v54 = vadd.f32 %v9163_v32, %v783_v45  ;;  %v268_v34 = vld [vmem:[%s13986_s0 + $0x740] sm:$0xff] }
 0x1d8   :  { %v392_v52 = vpack.c.bf16 %v270_v43, %v268_v34 }
 0x1d9   :  { %v1093_v16 = vadd.f32 %v1092_v42, %v784_v54  ;;  %v1513_v37 = vmul.f32 0.01, %v1241_v13  ;;  %vm1393_vm3 = vcmp.gt.f32.partialorder %v1241_v13, 0.0 }
 0x1da   :  { %v9576_v22 = vpop.f32.mrf.mxu3 }
 0x1db   :  { %vm1334_vm2 = vcmp.gt.f32.partialorder %v1093_v16, 0.0  ;;  %v1454_v42 = vmul.f32 0.01, %v1093_v16  ;;  %v1633_v34 = vsel %vm1393_vm3, %v1241_v13, %v1513_v37 }
 0x1dc   :  { %v1097_v7 = vpop.f32.mrf.mxu1  ;;  %v933_v17 = vpop.f32.mrf.mxu2 }
 0x1dd   :  { %v1574_v21 = vsel %vm1334_vm2, %v1093_v16, %v1454_v42  ;;  %v934_v62 = vadd.f32 %v9163_v32, %v933_v17 }
 0x1de   :  { %v786_v61 = vpop.f32.mrf.mxu0  ;;  %v9597_v30 = vpack.c.bf16 %v1574_v21, %v1573_v5 }
 0x1df   :  { %v1243_v45 = vadd.f32 %v9527_v38, %v934_v62  ;;  %v787_v2 = vadd.f32 %v9163_v32, %v786_v61  ;;  %v274_v61 = vld [vmem:[%s13986_s0 + $0x770] sm:$0xff] }
 0x1e1   :  { %vm1394_vm4 = vcmp.gt.f32.partialorder %v1243_v45, 0.0  ;;  %v1514_v16 = vmul.f32 0.01, %v1243_v45  ;;  %v1096_v12 = vadd.f32 %v1095_v50, %v787_v2  ;;  %825 = vmatmul.bf16.gmra.mxu0 %v332_v44  ;;  %975 = vmatmul.bf16.gmra.mxu2 %v392_v52 }
 0x1e2   :  { %v9601_v54 = vpop.f32.mrf.mxu3 }
 0x1e3   :  { %v1634_v43 = vsel %vm1394_vm4, %v1243_v45, %v1514_v16  ;;  %v1455_v44 = vmul.f32 0.01, %v1096_v12  ;;  %vm1335_vm5 = vcmp.gt.f32.partialorder %v1096_v12, 0.0  ;;  %v334_v45 = vpack.c.bf16 %v154_v20, %v152_v1 }
 0x1e4   :  { %v1100_v40 = vpop.f32.mrf.mxu1  ;;  %v936_v42 = vpop.f32.mrf.mxu2  ;;  %v9605_v38 = vpack.c.bf16 %v1634_v43, %v1633_v34  ;;  %v157_v43 = vld [vmem:[%s13986_s0 + $0x3c8] sm:$0xff] }
 0x1e5   :  { %v937_v17 = vadd.f32 %v9163_v32, %v936_v42  ;;  %v1575_v2 = vsel %vm1335_vm5, %v1096_v12, %v1455_v44  ;;  %v159_v42 = vld [vmem:[%s13986_s0 + $0x3d8] sm:$0xff]  ;;  %v9637_v12 = vld [vmem:[%s13988_s2] ss:$0 sm:$0xff] }
 0x1e6   :  { %14210 = vst [vmem:[#allocation7_spill] sm:$0xff] %v9605_v38  ;;  %v788_v5 = vpop.f32.mrf.mxu0 }
 0x1e7   :  { %6613 = vmatmul.msk.bf16.gmra.mxu1 %vm492_vm1, %v335_v47  ;;  %2234 = vmatmul.bf16.vlgmr.msrb.gmra.mxu3 %v8721_v4  ;;  %v1246_v21 = vadd.f32 %v9536_v9, %v937_v17  ;;  %v789_v62 = vadd.f32 %v9163_v32, %v788_v5  ;;  %v272_v9 = vld [vmem:[%s13986_s0 + $0x760] sm:$0xff] }
 0x1e8   :  { %v394_v34 = vpack.c.bf16 %v274_v61, %v272_v9 }
 0x1e9   :  { %v1098_v52 = vadd.f32 %v1097_v7, %v789_v62  ;;  %v1515_v62 = vmul.f32 0.01, %v1246_v21  ;;  %vm1395_vm7 = vcmp.gt.f32.partialorder %v1246_v21, 0.0 }
 0x1ea   :  { %v9610_v50 = vpop.f32.mrf.mxu3 }
 0x1eb   :  { %vm1336_vm6 = vcmp.gt.f32.partialorder %v1098_v52, 0.0  ;;  %v1456_v7 = vmul.f32 0.01, %v1098_v52  ;;  %v1635_v61 = vsel %vm1395_vm7, %v1246_v21, %v1515_v62 }
 0x1ec   :  { %v1102_v13 = vpop.f32.mrf.mxu1  ;;  %v938_v37 = vpop.f32.mrf.mxu2 }
 0x1ed   :  { %v1576_v47 = vsel %vm1336_vm6, %v1098_v52, %v1456_v7  ;;  %v939_v16 = vadd.f32 %v9163_v32, %v938_v37  ;;  %v337_v52 = vpack.c.bf16 %v159_v42, %v157_v43 }
 0x1ee   :  { %v791_v17 = vpop.f32.mrf.mxu0  ;;  %v9631_v5 = vpack.c.bf16 %v1576_v47, %v1575_v2 }
 0x1ef   :  { %v1248_v38 = vadd.f32 %v9567_v60, %v939_v16  ;;  %v792_v32 = vadd.f32 %v9637_v12, %v791_v17 }
 0x1f1   :  { %vm1396_vm8 = vcmp.gt.f32.partialorder %v1248_v38, 0.0  ;;  %v1516_v1 = vmul.f32 0.01, %v1248_v38  ;;  %v1101_v20 = vadd.f32 %v1100_v40, %v792_v32  ;;  %830 = vmatmul.bf16.gmra.mxu0 %v334_v45  ;;  %980 = vmatmul.bf16.gmra.mxu2 %v394_v34 }
 0x1f2   :  { %v9640_v44 = vpop.f32.mrf.mxu3 }
 0x1f3   :  { %v1636_v7 = vsel %vm1396_vm8, %v1248_v38, %v1516_v1  ;;  %v1457_v45 = vmul.f32 0.01, %v1101_v20  ;;  %vm1337_vm9 = vcmp.gt.f32.partialorder %v1101_v20, 0.0 }
 0x1f4   :  { %v1105_v9 = vpop.f32.mrf.mxu1  ;;  %v941_v60 = vpop.f32.mrf.mxu2  ;;  %v9644_v37 = vpack.c.bf16 %v1636_v7, %v1635_v61 }
 0x1f5   :  { %v942_v2 = vadd.f32 %v9637_v12, %v941_v60  ;;  %v1577_v17 = vsel %vm1337_vm9, %v1101_v20, %v1457_v45 }
 0x1f6   :  { %v793_v47 = vpop.f32.mrf.mxu0 }
 0x1f7   :  { %6614 = vmatmul.msk.bf16.gmra.mxu1 %vm492_vm1, %v337_v52  ;;  %2239 = vmatmul.bf16.gmra.mxu3 %v8776_v48  ;;  %v1251_v16 = vadd.f32 %v9576_v22, %v942_v2  ;;  %v794_v43 = vadd.f32 %v9637_v12, %v793_v47 }
 0x1f9   :  { %v1103_v34 = vadd.f32 %v1102_v13, %v794_v43  ;;  %v1517_v61 = vmul.f32 0.01, %v1251_v16  ;;  %vm1397_vm1 = vcmp.gt.f32.partialorder %v1251_v16, 0.0 }
 0x1fa   :  { %v9649_v40 = vpop.f32.mrf.mxu3 }
 0x1fb   :  { %vm1338_vm10 = vcmp.gt.f32.partialorder %v1103_v34, 0.0  ;;  %v1458_v38 = vmul.f32 0.01, %v1103_v34  ;;  %v1637_v20 = vsel %vm1397_vm1, %v1251_v16, %v1517_v61 }
 0x1fc   :  { %v1107_v21 = vpop.f32.mrf.mxu1  ;;  %v943_v42 = vpop.f32.mrf.mxu2 }
 0x1fd   :  { %v1578_v62 = vsel %vm1338_vm10, %v1103_v34, %v1458_v38  ;;  %v944_v32 = vadd.f32 %v9637_v12, %v943_v42 }
 0x1fe   :  { %v796_v52 = vpop.f32.mrf.mxu0  ;;  %v9652_v1 = vpack.c.bf16 %v1578_v62, %v1577_v17 }
 0x1ff   :  { %v1253_v22 = vadd.f32 %v9601_v54, %v944_v32  ;;  %v797_v7 = vadd.f32 %v9637_v12, %v796_v52 }
 0x201   :  { %vm1398_vm11 = vcmp.gt.f32.partialorder %v1253_v22, 0.0  ;;  %v1518_v13 = vmul.f32 0.01, %v1253_v22  ;;  %v1106_v2 = vadd.f32 %v1105_v9, %v797_v7  ;;  %1925 = vmatmul.bf16.vlgmr.msrb.gmra.mxu2 %v8721_v4  ;;  %2852 = vmatmul.bf16.vlgmr.msrb.gmra.mxu0 %v8721_v4 }
 0x202   :  { %v9656_v60 = vpop.f32.mrf.mxu3 }
 0x203   :  { %v1638_v43 = vsel %vm1398_vm11, %v1253_v22, %v1518_v13  ;;  %v1459_v62 = vmul.f32 0.01, %v1106_v2  ;;  %vm1339_vm12 = vcmp.gt.f32.partialorder %v1106_v2, 0.0 }
 0x204   :  { %v1110_v47 = vpop.f32.mrf.mxu1  ;;  %v946_v45 = vpop.f32.mrf.mxu2  ;;  %v9662_v54 = vpack.c.bf16 %v1638_v43, %v1637_v20 }
 0x205   :  { %v947_v34 = vadd.f32 %v9637_v12, %v946_v45  ;;  %v1579_v22 = vsel %vm1339_vm12, %v1106_v2, %v1459_v62 }
 0x206   :  { %14211 = vst [vmem:[#allocation8_spill] sm:$0xff] %v9662_v54  ;;  %v798_v38 = vpop.f32.mrf.mxu0 }
 0x207   :  { %2244 = vmatmul.bf16.gmra.mxu3 %v8822_v28  ;;  %2543 = vmatmul.bf16.vlgmr.msrb.gmra.mxu1 %v8721_v4  ;;  %v1256_v42 = vadd.f32 %v9610_v50, %v947_v34  ;;  %v799_v9 = vadd.f32 %v9637_v12, %v798_v38 }
 0x209   :  { %v1108_v32 = vadd.f32 %v1107_v21, %v799_v9  ;;  %v1519_v43 = vmul.f32 0.01, %v1256_v42  ;;  %vm1399_vm14 = vcmp.gt.f32.partialorder %v1256_v42, 0.0 }
 0x20a   :  { %v9667_v17 = vpop.f32.mrf.mxu3 }
 0x20b   :  { %vm1340_vm13 = vcmp.gt.f32.partialorder %v1108_v32, 0.0  ;;  %v1460_v52 = vmul.f32 0.01, %v1108_v32  ;;  %v1639_v2 = vsel %vm1399_vm14, %v1256_v42, %v1519_v43 }
 0x20c   :  { %v1112_v16 = vpop.f32.mrf.mxu1  ;;  %v948_v61 = vpop.f32.mrf.mxu2 }
 0x20d   :  { %v1580_v4 = vsel %vm1340_vm13, %v1108_v32, %v1460_v52  ;;  %v949_v7 = vadd.f32 %v9637_v12, %v948_v61 }
 0x20e   :  { %v801_v13 = vpop.f32.mrf.mxu0  ;;  %v9670_v20 = vpack.c.bf16 %v1580_v4, %v1579_v22 }
 0x20f   :  { %v1258_v50 = vadd.f32 %v9640_v44, %v949_v7  ;;  %v802_v45 = vadd.f32 %v9637_v12, %v801_v13 }
 0x211   :  { %vm1400_vm15 = vcmp.gt.f32.partialorder %v1258_v50, 0.0  ;;  %v1520_v21 = vmul.f32 0.01, %v1258_v50  ;;  %v1111_v38 = vadd.f32 %v1110_v47, %v802_v45  ;;  %1930 = vmatmul.bf16.gmra.mxu2 %v8776_v48  ;;  %2857 = vmatmul.bf16.gmra.mxu0 %v8776_v48 }
 0x212   :  { %v9674_v34 = vpop.f32.mrf.mxu3 }
 0x213   :  { %v1640_v62 = vsel %vm1400_vm15, %v1258_v50, %v1520_v21  ;;  %v1461_v7 = vmul.f32 0.01, %v1111_v38  ;;  %vm1341_vm0 = vcmp.gt.f32.partialorder %v1111_v38, 0.0 }
 0x214   :  { %v1115_v9 = vpop.f32.mrf.mxu1  ;;  %v951_v32 = vpop.f32.mrf.mxu2  ;;  %v9680_v44 = vpack.c.bf16 %v1640_v62, %v1639_v2 }
 0x215   :  { %v952_v52 = vadd.f32 %v9637_v12, %v951_v32  ;;  %v1581_v45 = vsel %vm1341_vm0, %v1111_v38, %v1461_v7 }
 0x216   :  { %14212 = vst [vmem:[#allocation9_spill] sm:$0xff] %v9680_v44  ;;  %v803_v61 = vpop.f32.mrf.mxu0 }
 0x217   :  { %2249 = vmatmul.bf16.gmra.mxu3 %v8862_v10  ;;  %2548 = vmatmul.bf16.gmra.mxu1 %v8776_v48  ;;  %v1261_v22 = vadd.f32 %v9649_v40, %v952_v52  ;;  %v804_v47 = vadd.f32 %v9637_v12, %v803_v61 }
 0x219   :  { %v1113_v13 = vadd.f32 %v1112_v16, %v804_v47  ;;  %v1521_v32 = vmul.f32 0.01, %v1261_v22  ;;  %vm1401_vm3 = vcmp.gt.f32.partialorder %v1261_v22, 0.0 }
 0x21a   :  { %v9685_v4 = vpop.f32.mrf.mxu3 }
 0x21b   :  { %vm1342_vm2 = vcmp.gt.f32.partialorder %v1113_v13, 0.0  ;;  %v1462_v43 = vmul.f32 0.01, %v1113_v13  ;;  %v1641_v38 = vsel %vm1401_vm3, %v1261_v22, %v1521_v32 }
 0x21c   :  { %v1117_v42 = vpop.f32.mrf.mxu1  ;;  %v953_v50 = vpop.f32.mrf.mxu2 }
 0x21d   :  { %v1582_v48 = vsel %vm1342_vm2, %v1113_v13, %v1462_v43  ;;  %v954_v21 = vadd.f32 %v9637_v12, %v953_v50 }
 0x21e   :  { %v806_v2 = vpop.f32.mrf.mxu0  ;;  %v9688_v62 = vpack.c.bf16 %v1582_v48, %v1581_v45 }
 0x21f   :  { %v1263_v40 = vadd.f32 %v9656_v60, %v954_v21  ;;  %v807_v52 = vadd.f32 %v9637_v12, %v806_v2 }
 0x221   :  { %vm1402_vm4 = vcmp.gt.f32.partialorder %v1263_v40, 0.0  ;;  %v1522_v16 = vmul.f32 0.01, %v1263_v40  ;;  %v1116_v47 = vadd.f32 %v1115_v9, %v807_v52  ;;  %1935 = vmatmul.bf16.gmra.mxu2 %v8822_v28  ;;  %2862 = vmatmul.bf16.gmra.mxu0 %v8822_v28 }
 0x222   :  { %v9692_v61 = vpop.f32.mrf.mxu3 }
 0x223   :  { %v1642_v7 = vsel %vm1402_vm4, %v1263_v40, %v1522_v16  ;;  %v1463_v21 = vmul.f32 0.01, %v1116_v47  ;;  %vm1343_vm5 = vcmp.gt.f32.partialorder %v1116_v47, 0.0 }
 0x224   :  { %v1120_v44 = vpop.f32.mrf.mxu1  ;;  %v956_v13 = vpop.f32.mrf.mxu2  ;;  %v9698_v60 = vpack.c.bf16 %v1642_v7, %v1641_v38 }
 0x225   :  { %v957_v43 = vadd.f32 %v9637_v12, %v956_v13  ;;  %v1583_v52 = vsel %vm1343_vm5, %v1116_v47, %v1463_v21 }
 0x226   :  { %14213 = vst [vmem:[#allocation10_spill] sm:$0xff] %v9698_v60  ;;  %v808_v50 = vpop.f32.mrf.mxu0 }
 0x227   :  { %2254 = vmatmul.bf16.gmra.mxu3 %v8902_v55  ;;  %2553 = vmatmul.bf16.gmra.mxu1 %v8822_v28  ;;  %v1266_v45 = vadd.f32 %v9667_v17, %v957_v43  ;;  %v809_v9 = vadd.f32 %v9637_v12, %v808_v50 }
 0x229   :  { %v1118_v2 = vadd.f32 %v1117_v42, %v809_v9  ;;  %v1523_v13 = vmul.f32 0.01, %v1266_v45  ;;  %vm1403_vm7 = vcmp.gt.f32.partialorder %v1266_v45, 0.0 }
 0x22a   :  { %v9703_v48 = vpop.f32.mrf.mxu3 }
 0x22b   :  { %vm1344_vm6 = vcmp.gt.f32.partialorder %v1118_v2, 0.0  ;;  %v1464_v32 = vmul.f32 0.01, %v1118_v2  ;;  %v1643_v47 = vsel %vm1403_vm7, %v1266_v45, %v1523_v13 }
 0x22c   :  { %v1122_v22 = vpop.f32.mrf.mxu1  ;;  %v958_v40 = vpop.f32.mrf.mxu2 }
 0x22d   :  { %v1584_v28 = vsel %vm1344_vm6, %v1118_v2, %v1464_v32  ;;  %v959_v16 = vadd.f32 %v9637_v12, %v958_v40 }
 0x22e   :  { %v811_v38 = vpop.f32.mrf.mxu0  ;;  %v9706_v7 = vpack.c.bf16 %v1584_v28, %v1583_v52 }
 0x22f   :  { %v1268_v17 = vadd.f32 %v9674_v34, %v959_v16  ;;  %v812_v43 = vadd.f32 %v9637_v12, %v811_v38 }
 0x231   :  { %vm1404_vm8 = vcmp.gt.f32.partialorder %v1268_v17, 0.0  ;;  %v1524_v42 = vmul.f32 0.01, %v1268_v17  ;;  %v1121_v9 = vadd.f32 %v1120_v44, %v812_v43  ;;  %1940 = vmatmul.bf16.gmra.mxu2 %v8862_v10  ;;  %2867 = vmatmul.bf16.gmra.mxu0 %v8862_v10 }
 0x232   :  { %v9710_v50 = vpop.f32.mrf.mxu3 }
 0x233   :  { %v1644_v21 = vsel %vm1404_vm8, %v1268_v17, %v1524_v42  ;;  %v1465_v16 = vmul.f32 0.01, %v1121_v9  ;;  %vm1345_vm9 = vcmp.gt.f32.partialorder %v1121_v9, 0.0 }
 0x234   :  { %v1125_v60 = vpop.f32.mrf.mxu1  ;;  %v961_v2 = vpop.f32.mrf.mxu2  ;;  %v9716_v34 = vpack.c.bf16 %v1644_v21, %v1643_v47 }
 0x235   :  { %v962_v32 = vadd.f32 %v9637_v12, %v961_v2  ;;  %v1585_v43 = vsel %vm1345_vm9, %v1121_v9, %v1465_v16 }
 0x236   :  { %14214 = vst [vmem:[#allocation11_spill] sm:$0xff] %v9716_v34  ;;  %v813_v40 = vpop.f32.mrf.mxu0 }
 0x237   :  { %2259 = vmatmul.bf16.gmra.mxu3 %v8966_v51  ;;  %2558 = vmatmul.bf16.gmra.mxu1 %v8862_v10  ;;  %v1271_v52 = vadd.f32 %v9685_v4, %v962_v32  ;;  %v814_v44 = vadd.f32 %v9637_v12, %v813_v40 }
 0x239   :  { %v1123_v38 = vadd.f32 %v1122_v22, %v814_v44  ;;  %v1525_v2 = vmul.f32 0.01, %v1271_v52  ;;  %vm1405_vm1 = vcmp.gt.f32.partialorder %v1271_v52, 0.0 }
 0x23a   :  { %v9721_v28 = vpop.f32.mrf.mxu3 }
 0x23b   :  { %vm1346_vm10 = vcmp.gt.f32.partialorder %v1123_v38, 0.0  ;;  %v1466_v13 = vmul.f32 0.01, %v1123_v38  ;;  %v1645_v9 = vsel %vm1405_vm1, %v1271_v52, %v1525_v2 }
 0x23c   :  { %v1127_v45 = vpop.f32.mrf.mxu1  ;;  %v963_v17 = vpop.f32.mrf.mxu2 }
 0x23d   :  { %v1586_v10 = vsel %vm1346_vm10, %v1123_v38, %v1466_v13  ;;  %v964_v42 = vadd.f32 %v9637_v12, %v963_v17 }
 0x23e   :  { %v816_v47 = vpop.f32.mrf.mxu0  ;;  %v9724_v21 = vpack.c.bf16 %v1586_v10, %v1585_v43 }
 0x23f   :  { %v1273_v4 = vadd.f32 %v9692_v61, %v964_v42  ;;  %v817_v32 = vadd.f32 %v9637_v12, %v816_v47 }
 0x241   :  { %vm1406_vm11 = vcmp.gt.f32.partialorder %v1273_v4, 0.0  ;;  %v1526_v22 = vmul.f32 0.01, %v1273_v4  ;;  %v1126_v44 = vadd.f32 %v1125_v60, %v817_v32  ;;  %1945 = vmatmul.bf16.gmra.mxu2 %v8902_v55  ;;  %2872 = vmatmul.bf16.gmra.mxu0 %v8902_v55 }
 0x242   :  { %v9728_v40 = vpop.f32.mrf.mxu3 }
 0x243   :  { %v1646_v16 = vsel %vm1406_vm11, %v1273_v4, %v1526_v22  ;;  %v1467_v42 = vmul.f32 0.01, %v1126_v44  ;;  %vm1347_vm12 = vcmp.gt.f32.partialorder %v1126_v44, 0.0 }
 0x244   :  { %v1130_v34 = vpop.f32.mrf.mxu1  ;;  %v966_v38 = vpop.f32.mrf.mxu2  ;;  %v9734_v61 = vpack.c.bf16 %v1646_v16, %v1645_v9 }
 0x245   :  { %v967_v13 = vadd.f32 %v9637_v12, %v966_v38  ;;  %v1587_v32 = vsel %vm1347_vm12, %v1126_v44, %v1467_v42 }
 0x246   :  { %14215 = vst [vmem:[#allocation12_spill] sm:$0xff] %v9734_v61  ;;  %v818_v17 = vpop.f32.mrf.mxu0 }
 0x247   :  { %2264 = vmatmul.bf16.gmra.mxu3 %v9006_v8  ;;  %2563 = vmatmul.bf16.gmra.mxu1 %v8902_v55  ;;  %v1276_v43 = vadd.f32 %v9703_v48, %v967_v13  ;;  %v819_v60 = vadd.f32 %v9637_v12, %v818_v17 }
 0x249   :  { %v1128_v47 = vadd.f32 %v1127_v45, %v819_v60  ;;  %v1527_v38 = vmul.f32 0.01, %v1276_v43  ;;  %vm1407_vm14 = vcmp.gt.f32.partialorder %v1276_v43, 0.0 }
 0x24a   :  { %v9739_v10 = vpop.f32.mrf.mxu3 }
 0x24b   :  { %vm1348_vm13 = vcmp.gt.f32.partialorder %v1128_v47, 0.0  ;;  %v1468_v2 = vmul.f32 0.01, %v1128_v47  ;;  %v1647_v44 = vsel %vm1407_vm14, %v1276_v43, %v1527_v38 }
 0x24c   :  { %v1132_v52 = vpop.f32.mrf.mxu1  ;;  %v968_v4 = vpop.f32.mrf.mxu2 }
 0x24d   :  { %v1588_v55 = vsel %vm1348_vm13, %v1128_v47, %v1468_v2  ;;  %v969_v22 = vadd.f32 %v9637_v12, %v968_v4 }
 0x24e   :  { %v821_v9 = vpop.f32.mrf.mxu0  ;;  %v9742_v16 = vpack.c.bf16 %v1588_v55, %v1587_v32 }
 0x24f   :  { %v1278_v48 = vadd.f32 %v9710_v50, %v969_v22  ;;  %v822_v13 = vadd.f32 %v9637_v12, %v821_v9 }
 0x251   :  { %vm1408_vm15 = vcmp.gt.f32.partialorder %v1278_v48, 0.0  ;;  %v1528_v45 = vmul.f32 0.01, %v1278_v48  ;;  %v1131_v60 = vadd.f32 %v1130_v34, %v822_v13  ;;  %1950 = vmatmul.bf16.gmra.mxu2 %v8966_v51  ;;  %2877 = vmatmul.bf16.gmra.mxu0 %v8966_v51 }
 0x252   :  { %v9746_v17 = vpop.f32.mrf.mxu3 }
 0x253   :  { %v1648_v42 = vsel %vm1408_vm15, %v1278_v48, %v1528_v45  ;;  %v1469_v22 = vmul.f32 0.01, %v1131_v60  ;;  %vm1349_vm0 = vcmp.gt.f32.partialorder %v1131_v60, 0.0 }
 0x254   :  { %v1135_v61 = vpop.f32.mrf.mxu1  ;;  %v971_v47 = vpop.f32.mrf.mxu2  ;;  %v9752_v50 = vpack.c.bf16 %v1648_v42, %v1647_v44 }
 0x255   :  { %v972_v2 = vadd.f32 %v9637_v12, %v971_v47  ;;  %v1589_v13 = vsel %vm1349_vm0, %v1131_v60, %v1469_v22  ;;  %v9771_v60 = vld [vmem:[%s13989_s5] sm:$0xf] }
 0x256   :  { %14216 = vst [vmem:[#allocation13_spill] sm:$0xff] %v9752_v50  ;;  %v823_v4 = vpop.f32.mrf.mxu0 }
 0x257   :  { %2269 = vmatmul.bf16.gmra.mxu3 %v9046_v23  ;;  %2568 = vmatmul.bf16.gmra.mxu1 %v8966_v51  ;;  %v1281_v32 = vadd.f32 %v9721_v28, %v972_v2  ;;  %v824_v34 = vadd.f32 %v9637_v12, %v823_v4 }
 0x259   :  { %v1133_v9 = vadd.f32 %v1132_v52, %v824_v34  ;;  %v1529_v47 = vmul.f32 0.01, %v1281_v32  ;;  %vm1409_vm3 = vcmp.gt.f32.partialorder %v1281_v32, 0.0 }
 0x25a   :  { %v9757_v55 = vpop.f32.mrf.mxu3 }
 0x25b   :  { %vm1350_vm2 = vcmp.gt.f32.partialorder %v1133_v9, 0.0  ;;  %v1470_v38 = vmul.f32 0.01, %v1133_v9  ;;  %v1649_v22 = vsel %vm1409_vm3, %v1281_v32, %v1529_v47 }
 0x25c   :  { %v1137_v43 = vpop.f32.mrf.mxu1  ;;  %v973_v48 = vpop.f32.mrf.mxu2 }
 0x25d   :  { %v1590_v51 = vsel %vm1350_vm2, %v1133_v9, %v1470_v38  ;;  %v974_v45 = vadd.f32 %v9637_v12, %v973_v48  ;;  %v9776_v38 = vperm.slane %v9771_v60, 1 }
 0x25e   :  { %v826_v44 = vpop.f32.mrf.mxu0  ;;  %v9760_v42 = vpack.c.bf16 %v1590_v51, %v1589_v13 }
 0x25f   :  { %v1283_v28 = vadd.f32 %v9728_v40, %v974_v45  ;;  %v827_v2 = vadd.f32 %v9637_v12, %v826_v44 }
 0x261   :  { %vm1410_vm4 = vcmp.gt.f32.partialorder %v1283_v28, 0.0  ;;  %v1530_v52 = vmul.f32 0.01, %v1283_v28  ;;  %v1136_v34 = vadd.f32 %v1135_v61, %v827_v2  ;;  %1955 = vmatmul.bf16.gmra.mxu2 %v9006_v8  ;;  %2882 = vmatmul.bf16.gmra.mxu0 %v9006_v8 }
 0x262   :  { %v9764_v4 = vpop.f32.mrf.mxu3 }
 0x263   :  { %v1650_v40 = vsel %vm1410_vm4, %v1283_v28, %v1530_v52  ;;  %v1471_v47 = vmul.f32 0.01, %v1136_v34  ;;  %vm1351_vm5 = vcmp.gt.f32.partialorder %v1136_v34, 0.0 }
 0x264   :  { %v1140_v50 = vpop.f32.mrf.mxu1  ;;  %v976_v9 = vpop.f32.mrf.mxu2  ;;  %v9778_v61 = vpack.c.bf16 %v1650_v40, %v1649_v22 }
 0x265   :  { %v977_v48 = vadd.f32 %v9637_v12, %v976_v9  ;;  %v1591_v22 = vsel %vm1351_vm5, %v1136_v34, %v1471_v47 }
 0x266   :  { %14217 = vst [vmem:[#allocation14_spill] sm:$0xff] %v9778_v61  ;;  %v828_v13 = vpop.f32.mrf.mxu0 }
 0x267   :  { %2274 = vmatmul.bf16.gmra.mxu3 %v9086_v14  ;;  %2573 = vmatmul.bf16.gmra.mxu1 %v9006_v8  ;;  %v1286_v51 = vadd.f32 %v9739_v10, %v977_v48  ;;  %v829_v45 = vadd.f32 %v9637_v12, %v828_v13 }
 0x269   :  { %v1138_v28 = vadd.f32 %v1137_v43, %v829_v45  ;;  %v1531_v10 = vmul.f32 0.01, %v1286_v51  ;;  %v837_v43 = vadd.f32 %v9637_v12, %v8688_v46  ;;  %vm1411_vm7 = vcmp.gt.f32.partialorder %v1286_v51, 0.0 }
 0x26a   :  { %v2235_v44 = vpop.f32.mrf.mxu3 }
 0x26b   :  { %v2236_v32 = vadd.f32 %v2235_v44, %v9776_v38  ;;  %vm1352_vm6 = vcmp.gt.f32.partialorder %v1138_v28, 0.0  ;;  %v1472_v8 = vmul.f32 0.01, %v1138_v28 }
 0x26c   :  { %v1142_v2 = vpop.f32.mrf.mxu1  ;;  %v978_v52 = vpop.f32.mrf.mxu2 }
 0x26d   :  { %3154 = vst [vmem:[#allocation2 + $0x8] sm:$0xff] %v2236_v32  ;;  %v1592_v40 = vsel %vm1352_vm6, %v1138_v28, %v1472_v8  ;;  %v979_v9 = vadd.f32 %v9637_v12, %v978_v52 }
 0x26e   :  { %v831_v61 = vpop.f32.mrf.mxu0  ;;  %v9785_v54 = vpack.c.bf16 %v1592_v40, %v1591_v22 }
 0x26f   :  { %v1288_v48 = vadd.f32 %v9746_v17, %v979_v9  ;;  %v832_v13 = vadd.f32 %v9637_v12, %v831_v61  ;;  %v1651_v17 = vsel %vm1411_vm7, %v1286_v51, %v1531_v10 }
 0x271   :  { %vm1412_vm8 = vcmp.gt.f32.partialorder %v1288_v48, 0.0  ;;  %v1532_v34 = vmul.f32 0.01, %v1288_v48  ;;  %v1141_v32 = vadd.f32 %v1140_v50, %v832_v13  ;;  %1960 = vmatmul.bf16.gmra.mxu2 %v9046_v23  ;;  %2887 = vmatmul.bf16.gmra.mxu0 %v9046_v23  ;;  %v839_v13 = vadd.f32 %v9637_v12, %v8707_v58 }
 0x272   :  { %v2237_v44 = vpop.f32.mrf.mxu3 }
 0x273   :  { %v2238_v45 = vadd.f32 %v2237_v44, %v9776_v38  ;;  %v1652_v8 = vsel %vm1412_vm8, %v1288_v48, %v1532_v34  ;;  %v1473_v10 = vmul.f32 0.01, %v1141_v32  ;;  %vm1353_vm9 = vcmp.gt.f32.partialorder %v1141_v32, 0.0 }
 0x274   :  { %v1145_v47 = vpop.f32.mrf.mxu1  ;;  %v981_v61 = vpop.f32.mrf.mxu2  ;;  %v9796_v46 = vpack.c.bf16 %v1652_v8, %v1651_v17 }
 0x275   :  { %3158 = vst [vmem:[#allocation2 + $0x28] sm:$0xff] %v2238_v45  ;;  %v1146_v28 = vadd.f32 %v1145_v47, %v837_v43  ;;  %v982_v52 = vadd.f32 %v9637_v12, %v981_v61  ;;  %v1593_v17 = vsel %vm1353_vm9, %v1141_v32, %v1473_v10  ;;  %v9821_v10 = vperm.slane %v9771_v60, 0 }
 0x276   :  { %14218 = vst [vmem:[#allocation15_spill] sm:$0xff] %v9796_v46  ;;  %v833_v22 = vpop.f32.mrf.mxu0 }
 0x277   :  { %2279 = vmatmul.bf16.gmra.mxu3 %v9150_v25  ;;  %2578 = vmatmul.bf16.gmra.mxu1 %v9046_v23  ;;  %v1291_v50 = vadd.f32 %v9757_v55, %v982_v52  ;;  %v834_v40 = vadd.f32 %v9637_v12, %v833_v22  ;;  %v1475_v23 = vmul.f32 0.01, %v1146_v28  ;;  %vm1355_vm10 = vcmp.gt.f32.partialorder %v1146_v28, 0.0 }
 0x278   :  { %v9805_v55 = vperm.slane %v9771_v60, 3  ;;  %v9809_v22 = vperm.slane %v9771_v60, 2 }
 0x279   :  { %v1143_v48 = vadd.f32 %v1142_v2, %v834_v40  ;;  %v1595_v61 = vsel %vm1355_vm10, %v1146_v28, %v1475_v23  ;;  %vm1413_vm12 = vcmp.gt.f32.partialorder %v1291_v50, 0.0 }
 0x27a   :  { %v2240_v9 = vpop.f32.mrf.mxu3 }
 0x27b   :  { %v2241_v51 = vadd.f32 %v2240_v9, %v9776_v38  ;;  %vm1354_vm1 = vcmp.gt.f32.partialorder %v1143_v48, 0.0  ;;  %v1474_v45 = vmul.f32 0.01, %v1143_v48  ;;  %v1533_v9 = vmul.f32 0.01, %v1291_v50 }
 0x27c   :  { %v1147_v44 = vpop.f32.mrf.mxu1  ;;  %v983_v47 = vpop.f32.mrf.mxu2 }
 0x27d   :  { %3162 = vst [vmem:[#allocation2 + $0x48] sm:$0xff] %v2241_v51  ;;  %v1148_v43 = vadd.f32 %v1147_v44, %v839_v13  ;;  %v1594_v58 = vsel %vm1354_vm1, %v1143_v48, %v1474_v45  ;;  %v984_v8 = vadd.f32 %v9637_v12, %v983_v47  ;;  %v1653_v48 = vsel %vm1413_vm12, %v1291_v50, %v1533_v9 }
 0x27e   :  { %v2853_v52 = vpop.f32.mrf.mxu0  ;;  %v9811_v40 = vpack.c.bf16 %v1594_v58, %v1593_v17 }
 0x27f   :  { %vm1356_vm11 = vcmp.gt.f32.partialorder %v1148_v43, 0.0  ;;  %v1476_v34 = vmul.f32 0.01, %v1148_v43  ;;  %v1293_v51 = vadd.f32 %v9764_v4, %v984_v8  ;;  %v2854_v44 = vadd.f32 %v2853_v52, %v9805_v55 }
 0x281   :  { %v1596_v2 = vsel %vm1356_vm11, %v1148_v43, %v1476_v34  ;;  %vm1414_vm13 = vcmp.gt.f32.partialorder %v1293_v51, 0.0  ;;  %v1534_v12 = vmul.f32 0.01, %v1293_v51  ;;  %3156 = vst [vmem:[#allocation2 + $0x18] sm:$0xff] %v2854_v44  ;;  %1965 = vmatmul.bf16.gmra.mxu2 %v9086_v14  ;;  %2892 = vmatmul.bf16.gmra.mxu0 %v9086_v14 }
 0x282   :  { %v9813_v13 = vpack.c.bf16 %v1596_v2, %v1595_v61  ;;  %v2242_v46 = vpop.f32.mrf.mxu3 }
 0x283   :  { %v2243_v32 = vadd.f32 %v2242_v46, %v9776_v38  ;;  %v1654_v23 = vsel %vm1414_vm13, %v1293_v51, %v1534_v12 }
 0x284   :  { %v2544_v28 = vpop.f32.mrf.mxu1  ;;  %v1926_v43 = vpop.f32.mrf.mxu2  ;;  %v9826_v46 = vpack.c.bf16 %v1654_v23, %v1653_v48 }
 0x285   :  { %3166 = vst [vmem:[#allocation2 + $0x68] sm:$0xff] %v2243_v32  ;;  %v2545_v4 = vadd.f32 %v2544_v28, %v9809_v22  ;;  %v1927_v45 = vadd.f32 %v1926_v43, %v9821_v10 }
 0x286   :  { %v2855_v34 = vpop.f32.mrf.mxu0 }
 0x287   :  { %3155 = vst [vmem:[#allocation2 + $0x10] sm:$0xff] %v2545_v4  ;;  %2284 = vmatmul.bf16.gmra.mxu3 %v9195_v18  ;;  %2583 = vmatmul.bf16.gmra.mxu1 %v9086_v14  ;;  %v2856_v60 = vadd.f32 %v2855_v34, %v9805_v55 }
 0x288   :  { %3153 = vst [vmem:[#allocation2] sm:$0xff] %v1927_v45 }
 0x289   :  { %3160 = vst [vmem:[#allocation2 + $0x38] sm:$0xff] %v2856_v60 }
 0x28a   :  { %v2245_v47 = vpop.f32.mrf.mxu3 }
 0x28b   :  { %v2246_v17 = vadd.f32 %v2245_v47, %v9776_v38 }
 0x28c   :  { %v2546_v50 = vpop.f32.mrf.mxu1  ;;  %v1928_v8 = vpop.f32.mrf.mxu2 }
 0x28d   :  { %3170 = vst [vmem:[#allocation2 + $0x88] sm:$0xff] %v2246_v17  ;;  %v2547_v58 = vadd.f32 %v2546_v50, %v9809_v22  ;;  %v1929_v14 = vadd.f32 %v1928_v8, %v9821_v10 }
 0x28e   :  { %v2858_v61 = vpop.f32.mrf.mxu0 }
 0x28f   :  { %3159 = vst [vmem:[#allocation2 + $0x30] sm:$0xff] %v2547_v58  ;;  %v2859_v2 = vadd.f32 %v2858_v61, %v9805_v55 }
 0x290   :  { %3157 = vst [vmem:[#allocation2 + $0x20] sm:$0xff] %v1929_v14 }
 0x291   :  { %3164 = vst [vmem:[#allocation2 + $0x58] sm:$0xff] %v2859_v2  ;;  %1970 = vmatmul.bf16.gmra.mxu2 %v9150_v25  ;;  %2897 = vmatmul.bf16.gmra.mxu0 %v9150_v25 }
 0x292   :  { %v2247_v52 = vpop.f32.mrf.mxu3 }
 0x293   :  { %v2248_v9 = vadd.f32 %v2247_v52, %v9776_v38 }
 0x294   :  { %v2549_v51 = vpop.f32.mrf.mxu1  ;;  %v1931_v32 = vpop.f32.mrf.mxu2 }
 0x295   :  { %3174 = vst [vmem:[#allocation2 + $0xa8] sm:$0xff] %v2248_v9  ;;  %v2550_v44 = vadd.f32 %v2549_v51, %v9809_v22  ;;  %v1932_v12 = vadd.f32 %v1931_v32, %v9821_v10 }
 0x296   :  { %v2860_v28 = vpop.f32.mrf.mxu0 }
 0x297   :  { %3163 = vst [vmem:[#allocation2 + $0x50] sm:$0xff] %v2550_v44  ;;  %2289 = vmatmul.bf16.gmra.mxu3 %v9235_v15  ;;  %2588 = vmatmul.bf16.gmra.mxu1 %v9150_v25  ;;  %v2861_v4 = vadd.f32 %v2860_v28, %v9805_v55 }
 0x298   :  { %3161 = vst [vmem:[#allocation2 + $0x40] sm:$0xff] %v1932_v12 }
 0x299   :  { %3168 = vst [vmem:[#allocation2 + $0x78] sm:$0xff] %v2861_v4 }
 0x29a   :  { %v2250_v48 = vpop.f32.mrf.mxu3 }
 0x29b   :  { %v2251_v23 = vadd.f32 %v2250_v48, %v9776_v38 }
 0x29c   :  { %v2551_v43 = vpop.f32.mrf.mxu1  ;;  %v1933_v34 = vpop.f32.mrf.mxu2 }
 0x29d   :  { %3178 = vst [vmem:[#allocation2 + $0xc8] sm:$0xff] %v2251_v23  ;;  %v2552_v45 = vadd.f32 %v2551_v43, %v9809_v22  ;;  %v1934_v60 = vadd.f32 %v1933_v34, %v9821_v10 }
 0x29e   :  { %v2863_v47 = vpop.f32.mrf.mxu0 }
 0x29f   :  { %3167 = vst [vmem:[#allocation2 + $0x70] sm:$0xff] %v2552_v45  ;;  %v2864_v25 = vadd.f32 %v2863_v47, %v9805_v55 }
 0x2a0   :  { %3165 = vst [vmem:[#allocation2 + $0x60] sm:$0xff] %v1934_v60 }
 0x2a1   :  { %3172 = vst [vmem:[#allocation2 + $0x98] sm:$0xff] %v2864_v25  ;;  %1975 = vmatmul.bf16.gmra.mxu2 %v9195_v18  ;;  %2902 = vmatmul.bf16.gmra.mxu0 %v9195_v18 }
 0x2a2   :  { %v2252_v17 = vpop.f32.mrf.mxu3 }
 0x2a3   :  { %v2253_v50 = vadd.f32 %v2252_v17, %v9776_v38 }
 0x2a4   :  { %v2554_v58 = vpop.f32.mrf.mxu1  ;;  %v1936_v14 = vpop.f32.mrf.mxu2 }
 0x2a5   :  { %3182 = vst [vmem:[#allocation2 + $0xe8] sm:$0xff] %v2253_v50  ;;  %v2555_v8 = vadd.f32 %v2554_v58, %v9809_v22  ;;  %v1937_v61 = vadd.f32 %v1936_v14, %v9821_v10 }
 0x2a6   :  { %v2865_v2 = vpop.f32.mrf.mxu0 }
 0x2a7   :  { %3171 = vst [vmem:[#allocation2 + $0x90] sm:$0xff] %v2555_v8  ;;  %2294 = vmatmul.bf16.gmra.mxu3 %v9287_v31  ;;  %2593 = vmatmul.bf16.gmra.mxu1 %v9195_v18  ;;  %v2866_v52 = vadd.f32 %v2865_v2, %v9805_v55 }
 0x2a8   :  { %3169 = vst [vmem:[#allocation2 + $0x80] sm:$0xff] %v1937_v61 }
 0x2a9   :  { %3176 = vst [vmem:[#allocation2 + $0xb8] sm:$0xff] %v2866_v52 }
 0x2aa   :  { %v2255_v9 = vpop.f32.mrf.mxu3 }
 0x2ab   :  { %v2256_v51 = vadd.f32 %v2255_v9, %v9776_v38 }
 0x2ac   :  { %v2556_v44 = vpop.f32.mrf.mxu1  ;;  %v1938_v12 = vpop.f32.mrf.mxu2 }
 0x2ad   :  { %3186 = vst [vmem:[#allocation2 + $0x108] sm:$0xff] %v2256_v51  ;;  %v2557_v32 = vadd.f32 %v2556_v44, %v9809_v22  ;;  %v1939_v28 = vadd.f32 %v1938_v12, %v9821_v10 }
 0x2ae   :  { %v2868_v4 = vpop.f32.mrf.mxu0 }
 0x2af   :  { %3175 = vst [vmem:[#allocation2 + $0xb0] sm:$0xff] %v2557_v32  ;;  %v2869_v18 = vadd.f32 %v2868_v4, %v9805_v55 }
 0x2b0   :  { %3173 = vst [vmem:[#allocation2 + $0xa0] sm:$0xff] %v1939_v28 }
 0x2b1   :  { %3180 = vst [vmem:[#allocation2 + $0xd8] sm:$0xff] %v2869_v18  ;;  %1980 = vmatmul.bf16.gmra.mxu2 %v9235_v15  ;;  %2907 = vmatmul.bf16.gmra.mxu0 %v9235_v15 }
 0x2b2   :  { %v2257_v48 = vpop.f32.mrf.mxu3 }
 0x2b3   :  { %v2258_v23 = vadd.f32 %v2257_v48, %v9776_v38 }
 0x2b4   :  { %v2559_v43 = vpop.f32.mrf.mxu1  ;;  %v1941_v34 = vpop.f32.mrf.mxu2 }
 0x2b5   :  { %3190 = vst [vmem:[#allocation2 + $0x128] sm:$0xff] %v2258_v23  ;;  %v2560_v45 = vadd.f32 %v2559_v43, %v9809_v22  ;;  %v1942_v60 = vadd.f32 %v1941_v34, %v9821_v10 }
 0x2b6   :  { %v2870_v47 = vpop.f32.mrf.mxu0 }
 0x2b7   :  { %3179 = vst [vmem:[#allocation2 + $0xd0] sm:$0xff] %v2560_v45  ;;  %2299 = vmatmul.bf16.gmra.mxu3 %v9339_v24  ;;  %2598 = vmatmul.bf16.gmra.mxu1 %v9235_v15  ;;  %v2871_v25 = vadd.f32 %v2870_v47, %v9805_v55 }
 0x2b8   :  { %3177 = vst [vmem:[#allocation2 + $0xc0] sm:$0xff] %v1942_v60 }
 0x2b9   :  { %3184 = vst [vmem:[#allocation2 + $0xf8] sm:$0xff] %v2871_v25 }
 0x2ba   :  { %v2260_v17 = vpop.f32.mrf.mxu3 }
 0x2bb   :  { %v2261_v50 = vadd.f32 %v2260_v17, %v9776_v38 }
 0x2bc   :  { %v2561_v58 = vpop.f32.mrf.mxu1  ;;  %v1943_v14 = vpop.f32.mrf.mxu2 }
 0x2bd   :  { %3194 = vst [vmem:[#allocation2 + $0x148] sm:$0xff] %v2261_v50  ;;  %v2562_v8 = vadd.f32 %v2561_v58, %v9809_v22  ;;  %v1944_v61 = vadd.f32 %v1943_v14, %v9821_v10 }
 0x2be   :  { %v2873_v2 = vpop.f32.mrf.mxu0 }
 0x2bf   :  { %3183 = vst [vmem:[#allocation2 + $0xf0] sm:$0xff] %v2562_v8  ;;  %v2874_v15 = vadd.f32 %v2873_v2, %v9805_v55 }
 0x2c0   :  { %3181 = vst [vmem:[#allocation2 + $0xe0] sm:$0xff] %v1944_v61 }
 0x2c1   :  { %3188 = vst [vmem:[#allocation2 + $0x118] sm:$0xff] %v2874_v15  ;;  %1985 = vmatmul.bf16.gmra.mxu2 %v9287_v31  ;;  %2912 = vmatmul.bf16.gmra.mxu0 %v9287_v31 }
 0x2c2   :  { %v2262_v52 = vpop.f32.mrf.mxu3 }
 0x2c3   :  { %v2263_v9 = vadd.f32 %v2262_v52, %v9776_v38 }
 0x2c4   :  { %v2564_v51 = vpop.f32.mrf.mxu1  ;;  %v1946_v32 = vpop.f32.mrf.mxu2 }
 0x2c5   :  { %3198 = vst [vmem:[#allocation2 + $0x168] sm:$0xff] %v2263_v9  ;;  %v2565_v44 = vadd.f32 %v2564_v51, %v9809_v22  ;;  %v1947_v12 = vadd.f32 %v1946_v32, %v9821_v10 }
 0x2c6   :  { %v2875_v28 = vpop.f32.mrf.mxu0 }
 0x2c7   :  { %3187 = vst [vmem:[#allocation2 + $0x110] sm:$0xff] %v2565_v44  ;;  %2304 = vmatmul.bf16.gmra.mxu3 %v9379_v57  ;;  %2603 = vmatmul.bf16.gmra.mxu1 %v9287_v31  ;;  %v2876_v4 = vadd.f32 %v2875_v28, %v9805_v55 }
 0x2c8   :  { %3185 = vst [vmem:[#allocation2 + $0x100] sm:$0xff] %v1947_v12 }
 0x2c9   :  { %3192 = vst [vmem:[#allocation2 + $0x138] sm:$0xff] %v2876_v4 }
 0x2ca   :  { %v2265_v18 = vpop.f32.mrf.mxu3 }
 0x2cb   :  { %v2266_v48 = vadd.f32 %v2265_v18, %v9776_v38 }
 0x2cc   :  { %v2566_v23 = vpop.f32.mrf.mxu1  ;;  %v1948_v45 = vpop.f32.mrf.mxu2 }
 0x2cd   :  { %3202 = vst [vmem:[#allocation2 + $0x188] sm:$0xff] %v2266_v48  ;;  %v2567_v43 = vadd.f32 %v2566_v23, %v9809_v22  ;;  %v1949_v34 = vadd.f32 %v1948_v45, %v9821_v10 }
 0x2ce   :  { %v2878_v60 = vpop.f32.mrf.mxu0 }
 0x2cf   :  { %3191 = vst [vmem:[#allocation2 + $0x130] sm:$0xff] %v2567_v43  ;;  %v2879_v31 = vadd.f32 %v2878_v60, %v9805_v55 }
 0x2d0   :  { %3189 = vst [vmem:[#allocation2 + $0x120] sm:$0xff] %v1949_v34 }
 0x2d1   :  { %3196 = vst [vmem:[#allocation2 + $0x158] sm:$0xff] %v2879_v31  ;;  %1990 = vmatmul.bf16.gmra.mxu2 %v9339_v24  ;;  %2917 = vmatmul.bf16.gmra.mxu0 %v9339_v24 }
 0x2d2   :  { %v2267_v47 = vpop.f32.mrf.mxu3 }
 0x2d3   :  { %v2268_v25 = vadd.f32 %v2267_v47, %v9776_v38 }
 0x2d4   :  { %v2569_v17 = vpop.f32.mrf.mxu1  ;;  %v1951_v58 = vpop.f32.mrf.mxu2 }
 0x2d5   :  { %3206 = vst [vmem:[#allocation2 + $0x1a8] sm:$0xff] %v2268_v25  ;;  %v2570_v50 = vadd.f32 %v2569_v17, %v9809_v22  ;;  %v1952_v8 = vadd.f32 %v1951_v58, %v9821_v10 }
 0x2d6   :  { %v2880_v14 = vpop.f32.mrf.mxu0 }
 0x2d7   :  { %3195 = vst [vmem:[#allocation2 + $0x150] sm:$0xff] %v2570_v50  ;;  %2309 = vmatmul.bf16.gmra.mxu3 %v9419_v29  ;;  %2608 = vmatmul.bf16.gmra.mxu1 %v9339_v24  ;;  %v2881_v61 = vadd.f32 %v2880_v14, %v9805_v55 }
 0x2d8   :  { %3193 = vst [vmem:[#allocation2 + $0x140] sm:$0xff] %v1952_v8 }
 0x2d9   :  { %3200 = vst [vmem:[#allocation2 + $0x178] sm:$0xff] %v2881_v61 }
 0x2da   :  { %v2270_v2 = vpop.f32.mrf.mxu3 }
 0x2db   :  { %v2271_v15 = vadd.f32 %v2270_v2, %v9776_v38 }
 0x2dc   :  { %v2571_v52 = vpop.f32.mrf.mxu1  ;;  %v1953_v51 = vpop.f32.mrf.mxu2 }
 0x2dd   :  { %3210 = vst [vmem:[#allocation2 + $0x1c8] sm:$0xff] %v2271_v15  ;;  %v2572_v9 = vadd.f32 %v2571_v52, %v9809_v22  ;;  %v1954_v44 = vadd.f32 %v1953_v51, %v9821_v10 }
 0x2de   :  { %v2883_v32 = vpop.f32.mrf.mxu0 }
 0x2df   :  { %3199 = vst [vmem:[#allocation2 + $0x170] sm:$0xff] %v2572_v9  ;;  %v2884_v24 = vadd.f32 %v2883_v32, %v9805_v55 }
 0x2e0   :  { %3197 = vst [vmem:[#allocation2 + $0x160] sm:$0xff] %v1954_v44 }
 0x2e1   :  { %3204 = vst [vmem:[#allocation2 + $0x198] sm:$0xff] %v2884_v24  ;;  %1995 = vmatmul.bf16.gmra.mxu2 %v9379_v57  ;;  %2922 = vmatmul.bf16.gmra.mxu0 %v9379_v57 }
 0x2e2   :  { %v2272_v12 = vpop.f32.mrf.mxu3 }
 0x2e3   :  { %v2273_v28 = vadd.f32 %v2272_v12, %v9776_v38 }
 0x2e4   :  { %v2574_v4 = vpop.f32.mrf.mxu1  ;;  %v1956_v48 = vpop.f32.mrf.mxu2 }
 0x2e5   :  { %3214 = vst [vmem:[#allocation2 + $0x1e8] sm:$0xff] %v2273_v28  ;;  %v2575_v18 = vadd.f32 %v2574_v4, %v9809_v22  ;;  %v1957_v23 = vadd.f32 %v1956_v48, %v9821_v10 }
 0x2e6   :  { %v2885_v43 = vpop.f32.mrf.mxu0 }
 0x2e7   :  { %3203 = vst [vmem:[#allocation2 + $0x190] sm:$0xff] %v2575_v18  ;;  %2314 = vmatmul.bf16.gmra.mxu3 %v9483_v0  ;;  %2613 = vmatmul.bf16.gmra.mxu1 %v9379_v57  ;;  %v2886_v45 = vadd.f32 %v2885_v43, %v9805_v55 }
 0x2e8   :  { %3201 = vst [vmem:[#allocation2 + $0x180] sm:$0xff] %v1957_v23 }
 0x2e9   :  { %3208 = vst [vmem:[#allocation2 + $0x1b8] sm:$0xff] %v2886_v45 }
 0x2ea   :  { %v2275_v34 = vpop.f32.mrf.mxu3 }
 0x2eb   :  { %v2276_v60 = vadd.f32 %v2275_v34, %v9776_v38 }
 0x2ec   :  { %v2576_v31 = vpop.f32.mrf.mxu1  ;;  %v1958_v25 = vpop.f32.mrf.mxu2 }
 0x2ed   :  { %3218 = vst [vmem:[#allocation2 + $0x208] sm:$0xff] %v2276_v60  ;;  %v2577_v47 = vadd.f32 %v2576_v31, %v9809_v22  ;;  %v1959_v17 = vadd.f32 %v1958_v25, %v9821_v10 }
 0x2ee   :  { %v2888_v50 = vpop.f32.mrf.mxu0 }
 0x2ef   :  { %3207 = vst [vmem:[#allocation2 + $0x1b0] sm:$0xff] %v2577_v47  ;;  %v2889_v57 = vadd.f32 %v2888_v50, %v9805_v55 }
 0x2f0   :  { %3205 = vst [vmem:[#allocation2 + $0x1a0] sm:$0xff] %v1959_v17 }
 0x2f1   :  { %3212 = vst [vmem:[#allocation2 + $0x1d8] sm:$0xff] %v2889_v57  ;;  %2000 = vmatmul.bf16.gmra.mxu2 %v9419_v29  ;;  %2927 = vmatmul.bf16.gmra.mxu0 %v9419_v29 }
 0x2f2   :  { %v2277_v58 = vpop.f32.mrf.mxu3 }
 0x2f3   :  { %v2278_v8 = vadd.f32 %v2277_v58, %v9776_v38 }
 0x2f4   :  { %v2579_v14 = vpop.f32.mrf.mxu1  ;;  %v1961_v2 = vpop.f32.mrf.mxu2 }
 0x2f5   :  { %3222 = vst [vmem:[#allocation2 + $0x228] sm:$0xff] %v2278_v8  ;;  %v2580_v61 = vadd.f32 %v2579_v14, %v9809_v22  ;;  %v1962_v15 = vadd.f32 %v1961_v2, %v9821_v10 }
 0x2f6   :  { %v2890_v52 = vpop.f32.mrf.mxu0 }
 0x2f7   :  { %3211 = vst [vmem:[#allocation2 + $0x1d0] sm:$0xff] %v2580_v61  ;;  %2319 = vmatmul.bf16.gmra.mxu3 %v9523_v11  ;;  %2618 = vmatmul.bf16.gmra.mxu1 %v9419_v29  ;;  %v2891_v9 = vadd.f32 %v2890_v52, %v9805_v55 }
 0x2f8   :  { %3209 = vst [vmem:[#allocation2 + $0x1c0] sm:$0xff] %v1962_v15 }
 0x2f9   :  { %3216 = vst [vmem:[#allocation2 + $0x1f8] sm:$0xff] %v2891_v9 }
 0x2fa   :  { %v2280_v51 = vpop.f32.mrf.mxu3 }
 0x2fb   :  { %v2281_v44 = vadd.f32 %v2280_v51, %v9776_v38 }
 0x2fc   :  { %v2581_v32 = vpop.f32.mrf.mxu1  ;;  %v1963_v12 = vpop.f32.mrf.mxu2 }
 0x2fd   :  { %3226 = vst [vmem:[#allocation2 + $0x248] sm:$0xff] %v2281_v44  ;;  %v2582_v24 = vadd.f32 %v2581_v32, %v9809_v22  ;;  %v1964_v28 = vadd.f32 %v1963_v12, %v9821_v10 }
 0x2fe   :  { %v2893_v4 = vpop.f32.mrf.mxu0 }
 0x2ff   :  { %3215 = vst [vmem:[#allocation2 + $0x1f0] sm:$0xff] %v2582_v24  ;;  %v2894_v29 = vadd.f32 %v2893_v4, %v9805_v55 }
 0x300   :  { %3213 = vst [vmem:[#allocation2 + $0x1e0] sm:$0xff] %v1964_v28 }
 0x301   :  { %3220 = vst [vmem:[#allocation2 + $0x218] sm:$0xff] %v2894_v29  ;;  %2005 = vmatmul.bf16.gmra.mxu2 %v9483_v0  ;;  %2932 = vmatmul.bf16.gmra.mxu0 %v9483_v0 }
 0x302   :  { %v2282_v18 = vpop.f32.mrf.mxu3 }
 0x303   :  { %v2283_v48 = vadd.f32 %v2282_v18, %v9776_v38 }
 0x304   :  { %v2584_v23 = vpop.f32.mrf.mxu1  ;;  %v1966_v45 = vpop.f32.mrf.mxu2 }
 0x305   :  { %3230 = vst [vmem:[#allocation2 + $0x268] sm:$0xff] %v2283_v48  ;;  %v2585_v43 = vadd.f32 %v2584_v23, %v9809_v22  ;;  %v1967_v34 = vadd.f32 %v1966_v45, %v9821_v10 }
 0x306   :  { %v2895_v60 = vpop.f32.mrf.mxu0 }
 0x307   :  { %3219 = vst [vmem:[#allocation2 + $0x210] sm:$0xff] %v2585_v43  ;;  %2324 = vmatmul.bf16.gmra.mxu3 %v9563_v3  ;;  %2623 = vmatmul.bf16.gmra.mxu1 %v9483_v0  ;;  %v2896_v31 = vadd.f32 %v2895_v60, %v9805_v55 }
 0x308   :  { %3217 = vst [vmem:[#allocation2 + $0x200] sm:$0xff] %v1967_v34 }
 0x309   :  { %3224 = vst [vmem:[#allocation2 + $0x238] sm:$0xff] %v2896_v31 }
 0x30a   :  { %v2285_v47 = vpop.f32.mrf.mxu3 }
 0x30b   :  { %v2286_v25 = vadd.f32 %v2285_v47, %v9776_v38 }
 0x30c   :  { %v2586_v17 = vpop.f32.mrf.mxu1  ;;  %v1968_v57 = vpop.f32.mrf.mxu2 }
 0x30d   :  { %3234 = vst [vmem:[#allocation2 + $0x288] sm:$0xff] %v2286_v25  ;;  %v2587_v50 = vadd.f32 %v2586_v17, %v9809_v22  ;;  %v1969_v58 = vadd.f32 %v1968_v57, %v9821_v10 }
 0x30e   :  { %v2898_v8 = vpop.f32.mrf.mxu0 }
 0x30f   :  { %3223 = vst [vmem:[#allocation2 + $0x230] sm:$0xff] %v2587_v50  ;;  %v2899_v0 = vadd.f32 %v2898_v8, %v9805_v55 }
 0x310   :  { %3221 = vst [vmem:[#allocation2 + $0x220] sm:$0xff] %v1969_v58 }
 0x311   :  { %3228 = vst [vmem:[#allocation2 + $0x258] sm:$0xff] %v2899_v0  ;;  %2010 = vmatmul.bf16.gmra.mxu2 %v9523_v11  ;;  %2937 = vmatmul.bf16.gmra.mxu0 %v9523_v11 }
 0x312   :  { %v2287_v14 = vpop.f32.mrf.mxu3 }
 0x313   :  { %v2288_v61 = vadd.f32 %v2287_v14, %v9776_v38 }
 0x314   :  { %v2589_v2 = vpop.f32.mrf.mxu1  ;;  %v1971_v52 = vpop.f32.mrf.mxu2 }
 0x315   :  { %3238 = vst [vmem:[#allocation2 + $0x2a8] sm:$0xff] %v2288_v61  ;;  %v2590_v15 = vadd.f32 %v2589_v2, %v9809_v22  ;;  %v1972_v9 = vadd.f32 %v1971_v52, %v9821_v10 }
 0x316   :  { %v2900_v51 = vpop.f32.mrf.mxu0 }
 0x317   :  { %3227 = vst [vmem:[#allocation2 + $0x250] sm:$0xff] %v2590_v15  ;;  %2329 = vmatmul.bf16.gmra.mxu3 %v9597_v30  ;;  %2628 = vmatmul.bf16.gmra.mxu1 %v9523_v11  ;;  %v2901_v44 = vadd.f32 %v2900_v51, %v9805_v55 }
 0x318   :  { %3225 = vst [vmem:[#allocation2 + $0x240] sm:$0xff] %v1972_v9 }
 0x319   :  { %3232 = vst [vmem:[#allocation2 + $0x278] sm:$0xff] %v2901_v44 }
 0x31a   :  { %v2290_v32 = vpop.f32.mrf.mxu3 }
 0x31b   :  { %v2291_v24 = vadd.f32 %v2290_v32, %v9776_v38 }
 0x31c   :  { %v2591_v12 = vpop.f32.mrf.mxu1  ;;  %v1973_v4 = vpop.f32.mrf.mxu2 }
 0x31d   :  { %3242 = vst [vmem:[#allocation2 + $0x2c8] sm:$0xff] %v2291_v24  ;;  %v2592_v28 = vadd.f32 %v2591_v12, %v9809_v22  ;;  %v1974_v29 = vadd.f32 %v1973_v4, %v9821_v10 }
 0x31e   :  { %v2903_v18 = vpop.f32.mrf.mxu0 }
 0x31f   :  { %3231 = vst [vmem:[#allocation2 + $0x270] sm:$0xff] %v2592_v28  ;;  %v2904_v11 = vadd.f32 %v2903_v18, %v9805_v55 }
 0x320   :  { %3229 = vst [vmem:[#allocation2 + $0x260] sm:$0xff] %v1974_v29 }
 0x321   :  { %3236 = vst [vmem:[#allocation2 + $0x298] sm:$0xff] %v2904_v11  ;;  %2015 = vmatmul.bf16.gmra.mxu2 %v9563_v3  ;;  %2942 = vmatmul.bf16.gmra.mxu0 %v9563_v3 }
 0x322   :  { %v2292_v48 = vpop.f32.mrf.mxu3 }
 0x323   :  { %v2293_v23 = vadd.f32 %v2292_v48, %v9776_v38 }
 0x324   :  { %v2594_v43 = vpop.f32.mrf.mxu1  ;;  %v1976_v34 = vpop.f32.mrf.mxu2 }
 0x325   :  { %3246 = vst [vmem:[#allocation2 + $0x2e8] sm:$0xff] %v2293_v23  ;;  %v2595_v45 = vadd.f32 %v2594_v43, %v9809_v22  ;;  %v1977_v60 = vadd.f32 %v1976_v34, %v9821_v10 }
 0x326   :  { %v2905_v31 = vpop.f32.mrf.mxu0 }
 0x327   :  { %3235 = vst [vmem:[#allocation2 + $0x290] sm:$0xff] %v2595_v45  ;;  %2334 = vmatmul.bf16.gmra.mxu3 %v9631_v5  ;;  %2633 = vmatmul.bf16.gmra.mxu1 %v9563_v3  ;;  %v2906_v47 = vadd.f32 %v2905_v31, %v9805_v55 }
 0x328   :  { %3233 = vst [vmem:[#allocation2 + $0x280] sm:$0xff] %v1977_v60 }
 0x329   :  { %3240 = vst [vmem:[#allocation2 + $0x2b8] sm:$0xff] %v2906_v47 }
 0x32a   :  { %v2295_v25 = vpop.f32.mrf.mxu3 }
 0x32b   :  { %v2296_v17 = vadd.f32 %v2295_v25, %v9776_v38 }
 0x32c   :  { %v2596_v50 = vpop.f32.mrf.mxu1  ;;  %v1978_v58 = vpop.f32.mrf.mxu2 }
 0x32d   :  { %3250 = vst [vmem:[#allocation2 + $0x308] sm:$0xff] %v2296_v17  ;;  %v2597_v57 = vadd.f32 %v2596_v50, %v9809_v22  ;;  %v1979_v8 = vadd.f32 %v1978_v58, %v9821_v10 }
 0x32e   :  { %v2908_v0 = vpop.f32.mrf.mxu0 }
 0x32f   :  { %3239 = vst [vmem:[#allocation2 + $0x2b0] sm:$0xff] %v2597_v57  ;;  %v2909_v3 = vadd.f32 %v2908_v0, %v9805_v55 }
 0x330   :  { %3237 = vst [vmem:[#allocation2 + $0x2a0] sm:$0xff] %v1979_v8 }
 0x331   :  { %3244 = vst [vmem:[#allocation2 + $0x2d8] sm:$0xff] %v2909_v3  ;;  %2020 = vmatmul.bf16.gmra.mxu2 %v9597_v30  ;;  %2947 = vmatmul.bf16.gmra.mxu0 %v9597_v30 }
 0x332   :  { %v2297_v14 = vpop.f32.mrf.mxu3 }
 0x333   :  { %v2298_v61 = vadd.f32 %v2297_v14, %v9776_v38 }
 0x334   :  { %v2599_v2 = vpop.f32.mrf.mxu1  ;;  %v1981_v52 = vpop.f32.mrf.mxu2 }
 0x335   :  { %3254 = vst [vmem:[#allocation2 + $0x328] sm:$0xff] %v2298_v61  ;;  %v2600_v15 = vadd.f32 %v2599_v2, %v9809_v22  ;;  %v1982_v9 = vadd.f32 %v1981_v52, %v9821_v10 }
 0x336   :  { %v2910_v51 = vpop.f32.mrf.mxu0 }
 0x337   :  { %3243 = vst [vmem:[#allocation2 + $0x2d0] sm:$0xff] %v2600_v15  ;;  %2339 = vmatmul.bf16.gmra.mxu3 %v9652_v1  ;;  %2638 = vmatmul.bf16.gmra.mxu1 %v9597_v30  ;;  %v2911_v44 = vadd.f32 %v2910_v51, %v9805_v55 }
 0x338   :  { %3241 = vst [vmem:[#allocation2 + $0x2c0] sm:$0xff] %v1982_v9 }
 0x339   :  { %3248 = vst [vmem:[#allocation2 + $0x2f8] sm:$0xff] %v2911_v44 }
 0x33a   :  { %v2300_v32 = vpop.f32.mrf.mxu3 }
 0x33b   :  { %v2301_v24 = vadd.f32 %v2300_v32, %v9776_v38 }
 0x33c   :  { %v2601_v12 = vpop.f32.mrf.mxu1  ;;  %v1983_v4 = vpop.f32.mrf.mxu2 }
 0x33d   :  { %3258 = vst [vmem:[#allocation2 + $0x348] sm:$0xff] %v2301_v24  ;;  %v2602_v28 = vadd.f32 %v2601_v12, %v9809_v22  ;;  %v1984_v29 = vadd.f32 %v1983_v4, %v9821_v10 }
 0x33e   :  { %v2913_v18 = vpop.f32.mrf.mxu0 }
 0x33f   :  { %3247 = vst [vmem:[#allocation2 + $0x2f0] sm:$0xff] %v2602_v28  ;;  %v2914_v30 = vadd.f32 %v2913_v18, %v9805_v55 }
 0x340   :  { %3245 = vst [vmem:[#allocation2 + $0x2e0] sm:$0xff] %v1984_v29 }
 0x341   :  { %3252 = vst [vmem:[#allocation2 + $0x318] sm:$0xff] %v2914_v30  ;;  %2025 = vmatmul.bf16.gmra.mxu2 %v9631_v5  ;;  %2952 = vmatmul.bf16.gmra.mxu0 %v9631_v5 }
 0x342   :  { %v2302_v11 = vpop.f32.mrf.mxu3 }
 0x343   :  { %v2303_v48 = vadd.f32 %v2302_v11, %v9776_v38 }
 0x344   :  { %v2604_v23 = vpop.f32.mrf.mxu1  ;;  %v1986_v45 = vpop.f32.mrf.mxu2 }
 0x345   :  { %3262 = vst [vmem:[#allocation2 + $0x368] sm:$0xff] %v2303_v48  ;;  %v2605_v43 = vadd.f32 %v2604_v23, %v9809_v22  ;;  %v1987_v34 = vadd.f32 %v1986_v45, %v9821_v10 }
 0x346   :  { %v2915_v60 = vpop.f32.mrf.mxu0 }
 0x347   :  { %3251 = vst [vmem:[#allocation2 + $0x310] sm:$0xff] %v2605_v43  ;;  %2344 = vmatmul.bf16.gmra.mxu3 %v9670_v20  ;;  %2643 = vmatmul.bf16.gmra.mxu1 %v9631_v5  ;;  %v2916_v31 = vadd.f32 %v2915_v60, %v9805_v55 }
 0x348   :  { %3249 = vst [vmem:[#allocation2 + $0x300] sm:$0xff] %v1987_v34 }
 0x349   :  { %3256 = vst [vmem:[#allocation2 + $0x338] sm:$0xff] %v2916_v31 }
 0x34a   :  { %v2305_v47 = vpop.f32.mrf.mxu3 }
 0x34b   :  { %v2306_v25 = vadd.f32 %v2305_v47, %v9776_v38 }
 0x34c   :  { %v2606_v17 = vpop.f32.mrf.mxu1  ;;  %v1988_v57 = vpop.f32.mrf.mxu2 }
 0x34d   :  { %3266 = vst [vmem:[#allocation2 + $0x388] sm:$0xff] %v2306_v25  ;;  %v2607_v50 = vadd.f32 %v2606_v17, %v9809_v22  ;;  %v1989_v58 = vadd.f32 %v1988_v57, %v9821_v10 }
 0x34e   :  { %v2918_v8 = vpop.f32.mrf.mxu0 }
 0x34f   :  { %3255 = vst [vmem:[#allocation2 + $0x330] sm:$0xff] %v2607_v50  ;;  %v2919_v5 = vadd.f32 %v2918_v8, %v9805_v55 }
 0x350   :  { %3253 = vst [vmem:[#allocation2 + $0x320] sm:$0xff] %v1989_v58 }
 0x351   :  { %3260 = vst [vmem:[#allocation2 + $0x358] sm:$0xff] %v2919_v5  ;;  %2030 = vmatmul.bf16.gmra.mxu2 %v9652_v1  ;;  %2957 = vmatmul.bf16.gmra.mxu0 %v9652_v1 }
 0x352   :  { %v2307_v0 = vpop.f32.mrf.mxu3 }
 0x353   :  { %v2308_v3 = vadd.f32 %v2307_v0, %v9776_v38 }
 0x354   :  { %v2609_v14 = vpop.f32.mrf.mxu1  ;;  %v1991_v2 = vpop.f32.mrf.mxu2 }
 0x355   :  { %3270 = vst [vmem:[#allocation2 + $0x3a8] sm:$0xff] %v2308_v3  ;;  %v2610_v61 = vadd.f32 %v2609_v14, %v9809_v22  ;;  %v1992_v15 = vadd.f32 %v1991_v2, %v9821_v10 }
 0x356   :  { %v2920_v52 = vpop.f32.mrf.mxu0 }
 0x357   :  { %3259 = vst [vmem:[#allocation2 + $0x350] sm:$0xff] %v2610_v61  ;;  %2349 = vmatmul.bf16.gmra.mxu3 %v9688_v62  ;;  %2648 = vmatmul.bf16.gmra.mxu1 %v9652_v1  ;;  %v2921_v9 = vadd.f32 %v2920_v52, %v9805_v55 }
 0x358   :  { %3257 = vst [vmem:[#allocation2 + $0x340] sm:$0xff] %v1992_v15 }
 0x359   :  { %3264 = vst [vmem:[#allocation2 + $0x378] sm:$0xff] %v2921_v9 }
 0x35a   :  { %v2310_v51 = vpop.f32.mrf.mxu3 }
 0x35b   :  { %v2311_v44 = vadd.f32 %v2310_v51, %v9776_v38 }
 0x35c   :  { %v2611_v32 = vpop.f32.mrf.mxu1  ;;  %v1993_v12 = vpop.f32.mrf.mxu2 }
 0x35d   :  { %3274 = vst [vmem:[#allocation2 + $0x3c8] sm:$0xff] %v2311_v44  ;;  %v2612_v24 = vadd.f32 %v2611_v32, %v9809_v22  ;;  %v1994_v28 = vadd.f32 %v1993_v12, %v9821_v10 }
 0x35e   :  { %v2923_v4 = vpop.f32.mrf.mxu0 }
 0x35f   :  { %3263 = vst [vmem:[#allocation2 + $0x370] sm:$0xff] %v2612_v24  ;;  %v2924_v1 = vadd.f32 %v2923_v4, %v9805_v55 }
 0x360   :  { %3261 = vst [vmem:[#allocation2 + $0x360] sm:$0xff] %v1994_v28 }
 0x361   :  { %3268 = vst [vmem:[#allocation2 + $0x398] sm:$0xff] %v2924_v1  ;;  %2035 = vmatmul.bf16.gmra.mxu2 %v9670_v20  ;;  %2962 = vmatmul.bf16.gmra.mxu0 %v9670_v20 }
 0x362   :  { %v2312_v29 = vpop.f32.mrf.mxu3 }
 0x363   :  { %v2313_v18 = vadd.f32 %v2312_v29, %v9776_v38 }
 0x364   :  { %v2614_v30 = vpop.f32.mrf.mxu1  ;;  %v1996_v48 = vpop.f32.mrf.mxu2 }
 0x365   :  { %3278 = vst [vmem:[#allocation2 + $0x3e8] sm:$0xff] %v2313_v18  ;;  %v2615_v11 = vadd.f32 %v2614_v30, %v9809_v22  ;;  %v1997_v23 = vadd.f32 %v1996_v48, %v9821_v10 }
 0x366   :  { %v2925_v43 = vpop.f32.mrf.mxu0 }
 0x367   :  { %3267 = vst [vmem:[#allocation2 + $0x390] sm:$0xff] %v2615_v11  ;;  %2354 = vmatmul.bf16.gmra.mxu3 %v9706_v7  ;;  %2653 = vmatmul.bf16.gmra.mxu1 %v9670_v20  ;;  %v2926_v45 = vadd.f32 %v2925_v43, %v9805_v55 }
 0x368   :  { %3265 = vst [vmem:[#allocation2 + $0x380] sm:$0xff] %v1997_v23 }
 0x369   :  { %3272 = vst [vmem:[#allocation2 + $0x3b8] sm:$0xff] %v2926_v45 }
 0x36a   :  { %v2315_v34 = vpop.f32.mrf.mxu3 }
 0x36b   :  { %v2316_v60 = vadd.f32 %v2315_v34, %v9776_v38 }
 0x36c   :  { %v2616_v31 = vpop.f32.mrf.mxu1  ;;  %v1998_v25 = vpop.f32.mrf.mxu2 }
 0x36d   :  { %3282 = vst [vmem:[#allocation2 + $0x408] sm:$0xff] %v2316_v60  ;;  %v2617_v47 = vadd.f32 %v2616_v31, %v9809_v22  ;;  %v1999_v17 = vadd.f32 %v1998_v25, %v9821_v10 }
 0x36e   :  { %v2928_v50 = vpop.f32.mrf.mxu0 }
 0x36f   :  { %3271 = vst [vmem:[#allocation2 + $0x3b0] sm:$0xff] %v2617_v47  ;;  %v2929_v20 = vadd.f32 %v2928_v50, %v9805_v55 }
 0x370   :  { %3269 = vst [vmem:[#allocation2 + $0x3a0] sm:$0xff] %v1999_v17 }
 0x371   :  { %3276 = vst [vmem:[#allocation2 + $0x3d8] sm:$0xff] %v2929_v20  ;;  %2040 = vmatmul.bf16.gmra.mxu2 %v9688_v62  ;;  %2967 = vmatmul.bf16.gmra.mxu0 %v9688_v62 }
 0x372   :  { %v2317_v57 = vpop.f32.mrf.mxu3 }
 0x373   :  { %v2318_v58 = vadd.f32 %v2317_v57, %v9776_v38 }
 0x374   :  { %v2619_v8 = vpop.f32.mrf.mxu1  ;;  %v2001_v0 = vpop.f32.mrf.mxu2 }
 0x375   :  { %3286 = vst [vmem:[#allocation2 + $0x428] sm:$0xff] %v2318_v58  ;;  %v2620_v5 = vadd.f32 %v2619_v8, %v9809_v22  ;;  %v2002_v3 = vadd.f32 %v2001_v0, %v9821_v10 }
 0x376   :  { %v2930_v14 = vpop.f32.mrf.mxu0 }
 0x377   :  { %3275 = vst [vmem:[#allocation2 + $0x3d0] sm:$0xff] %v2620_v5  ;;  %2359 = vmatmul.bf16.gmra.mxu3 %v9724_v21  ;;  %2658 = vmatmul.bf16.gmra.mxu1 %v9688_v62  ;;  %v2931_v61 = vadd.f32 %v2930_v14, %v9805_v55 }
 0x378   :  { %3273 = vst [vmem:[#allocation2 + $0x3c0] sm:$0xff] %v2002_v3 }
 0x379   :  { %3280 = vst [vmem:[#allocation2 + $0x3f8] sm:$0xff] %v2931_v61 }
 0x37a   :  { %v2320_v2 = vpop.f32.mrf.mxu3 }
 0x37b   :  { %v2321_v15 = vadd.f32 %v2320_v2, %v9776_v38 }
 0x37c   :  { %v2621_v52 = vpop.f32.mrf.mxu1  ;;  %v2003_v51 = vpop.f32.mrf.mxu2 }
 0x37d   :  { %3290 = vst [vmem:[#allocation2 + $0x448] sm:$0xff] %v2321_v15  ;;  %v2622_v9 = vadd.f32 %v2621_v52, %v9809_v22  ;;  %v2004_v44 = vadd.f32 %v2003_v51, %v9821_v10 }
 0x37e   :  { %v2933_v32 = vpop.f32.mrf.mxu0 }
 0x37f   :  { %3279 = vst [vmem:[#allocation2 + $0x3f0] sm:$0xff] %v2622_v9  ;;  %v2934_v62 = vadd.f32 %v2933_v32, %v9805_v55 }
 0x380   :  { %3277 = vst [vmem:[#allocation2 + $0x3e0] sm:$0xff] %v2004_v44 }
 0x381   :  { %3284 = vst [vmem:[#allocation2 + $0x418] sm:$0xff] %v2934_v62  ;;  %2045 = vmatmul.bf16.gmra.mxu2 %v9706_v7  ;;  %2972 = vmatmul.bf16.gmra.mxu0 %v9706_v7 }
 0x382   :  { %v2322_v24 = vpop.f32.mrf.mxu3 }
 0x383   :  { %v2323_v12 = vadd.f32 %v2322_v24, %v9776_v38 }
 0x384   :  { %v2624_v28 = vpop.f32.mrf.mxu1  ;;  %v2006_v1 = vpop.f32.mrf.mxu2 }
 0x385   :  { %3294 = vst [vmem:[#allocation2 + $0x468] sm:$0xff] %v2323_v12  ;;  %v2625_v4 = vadd.f32 %v2624_v28, %v9809_v22  ;;  %v2007_v29 = vadd.f32 %v2006_v1, %v9821_v10 }
 0x386   :  { %v2935_v18 = vpop.f32.mrf.mxu0 }
 0x387   :  { %3283 = vst [vmem:[#allocation2 + $0x410] sm:$0xff] %v2625_v4  ;;  %2364 = vmatmul.bf16.gmra.mxu3 %v9742_v16  ;;  %2663 = vmatmul.bf16.gmra.mxu1 %v9706_v7  ;;  %v2936_v30 = vadd.f32 %v2935_v18, %v9805_v55 }
 0x388   :  { %3281 = vst [vmem:[#allocation2 + $0x400] sm:$0xff] %v2007_v29 }
 0x389   :  { %3288 = vst [vmem:[#allocation2 + $0x438] sm:$0xff] %v2936_v30 }
 0x38a   :  { %v2325_v11 = vpop.f32.mrf.mxu3 }
 0x38b   :  { %v2326_v48 = vadd.f32 %v2325_v11, %v9776_v38 }
 0x38c   :  { %v2626_v23 = vpop.f32.mrf.mxu1  ;;  %v2008_v45 = vpop.f32.mrf.mxu2 }
 0x38d   :  { %3298 = vst [vmem:[#allocation2 + $0x488] sm:$0xff] %v2326_v48  ;;  %v2627_v43 = vadd.f32 %v2626_v23, %v9809_v22  ;;  %v2009_v34 = vadd.f32 %v2008_v45, %v9821_v10 }
 0x38e   :  { %v2938_v60 = vpop.f32.mrf.mxu0 }
 0x38f   :  { %3287 = vst [vmem:[#allocation2 + $0x430] sm:$0xff] %v2627_v43  ;;  %v2939_v7 = vadd.f32 %v2938_v60, %v9805_v55 }
 0x390   :  { %3285 = vst [vmem:[#allocation2 + $0x420] sm:$0xff] %v2009_v34 }
 0x391   :  { %3292 = vst [vmem:[#allocation2 + $0x458] sm:$0xff] %v2939_v7  ;;  %2050 = vmatmul.bf16.gmra.mxu2 %v9724_v21  ;;  %2977 = vmatmul.bf16.gmra.mxu0 %v9724_v21 }
 0x392   :  { %v2327_v31 = vpop.f32.mrf.mxu3 }
 0x393   :  { %v2328_v47 = vadd.f32 %v2327_v31, %v9776_v38 }
 0x394   :  { %v2629_v25 = vpop.f32.mrf.mxu1  ;;  %v2011_v50 = vpop.f32.mrf.mxu2 }
 0x395   :  { %3302 = vst [vmem:[#allocation2 + $0x4a8] sm:$0xff] %v2328_v47  ;;  %v2630_v17 = vadd.f32 %v2629_v25, %v9809_v22  ;;  %v2012_v20 = vadd.f32 %v2011_v50, %v9821_v10 }
 0x396   :  { %v2940_v57 = vpop.f32.mrf.mxu0 }
 0x397   :  { %3291 = vst [vmem:[#allocation2 + $0x450] sm:$0xff] %v2630_v17  ;;  %2369 = vmatmul.bf16.gmra.mxu3 %v9760_v42  ;;  %2668 = vmatmul.bf16.gmra.mxu1 %v9724_v21  ;;  %v2941_v58 = vadd.f32 %v2940_v57, %v9805_v55 }
 0x398   :  { %3289 = vst [vmem:[#allocation2 + $0x440] sm:$0xff] %v2012_v20 }
 0x399   :  { %3296 = vst [vmem:[#allocation2 + $0x478] sm:$0xff] %v2941_v58 }
 0x39a   :  { %v2330_v8 = vpop.f32.mrf.mxu3 }
 0x39b   :  { %v2331_v5 = vadd.f32 %v2330_v8, %v9776_v38 }
 0x39c   :  { %v2631_v0 = vpop.f32.mrf.mxu1  ;;  %v2013_v14 = vpop.f32.mrf.mxu2 }
 0x39d   :  { %3306 = vst [vmem:[#allocation2 + $0x4c8] sm:$0xff] %v2331_v5  ;;  %v2632_v3 = vadd.f32 %v2631_v0, %v9809_v22  ;;  %v2014_v61 = vadd.f32 %v2013_v14, %v9821_v10 }
 0x39e   :  { %v2943_v2 = vpop.f32.mrf.mxu0 }
 0x39f   :  { %3295 = vst [vmem:[#allocation2 + $0x470] sm:$0xff] %v2632_v3  ;;  %v2944_v21 = vadd.f32 %v2943_v2, %v9805_v55 }
 0x3a0   :  { %3293 = vst [vmem:[#allocation2 + $0x460] sm:$0xff] %v2014_v61 }
 0x3a1   :  { %3300 = vst [vmem:[#allocation2 + $0x498] sm:$0xff] %v2944_v21  ;;  %2055 = vmatmul.bf16.gmra.mxu2 %v9742_v16  ;;  %2982 = vmatmul.bf16.gmra.mxu0 %v9742_v16 }
 0x3a2   :  { %v2332_v15 = vpop.f32.mrf.mxu3 }
 0x3a3   :  { %v2333_v52 = vadd.f32 %v2332_v15, %v9776_v38 }
 0x3a4   :  { %v2634_v9 = vpop.f32.mrf.mxu1  ;;  %v2016_v44 = vpop.f32.mrf.mxu2 }
 0x3a5   :  { %3310 = vst [vmem:[#allocation2 + $0x4e8] sm:$0xff] %v2333_v52  ;;  %v2635_v51 = vadd.f32 %v2634_v9, %v9809_v22  ;;  %v2017_v32 = vadd.f32 %v2016_v44, %v9821_v10 }
 0x3a6   :  { %v2945_v62 = vpop.f32.mrf.mxu0 }
 0x3a7   :  { %3299 = vst [vmem:[#allocation2 + $0x490] sm:$0xff] %v2635_v51  ;;  %2374 = vmatmul.bf16.gmra.mxu3 %v9785_v54  ;;  %2673 = vmatmul.bf16.gmra.mxu1 %v9742_v16  ;;  %v2946_v24 = vadd.f32 %v2945_v62, %v9805_v55 }
 0x3a8   :  { %3297 = vst [vmem:[#allocation2 + $0x480] sm:$0xff] %v2017_v32 }
 0x3a9   :  { %3304 = vst [vmem:[#allocation2 + $0x4b8] sm:$0xff] %v2946_v24 }
 0x3aa   :  { %v2335_v12 = vpop.f32.mrf.mxu3 }
 0x3ab   :  { %v2336_v28 = vadd.f32 %v2335_v12, %v9776_v38 }
 0x3ac   :  { %v2636_v4 = vpop.f32.mrf.mxu1  ;;  %v2018_v29 = vpop.f32.mrf.mxu2 }
 0x3ad   :  { %3314 = vst [vmem:[#allocation2 + $0x508] sm:$0xff] %v2336_v28  ;;  %v2637_v1 = vadd.f32 %v2636_v4, %v9809_v22  ;;  %v2019_v18 = vadd.f32 %v2018_v29, %v9821_v10 }
 0x3ae   :  { %v2948_v30 = vpop.f32.mrf.mxu0 }
 0x3af   :  { %3303 = vst [vmem:[#allocation2 + $0x4b0] sm:$0xff] %v2637_v1  ;;  %v2949_v16 = vadd.f32 %v2948_v30, %v9805_v55 }
 0x3b0   :  { %3301 = vst [vmem:[#allocation2 + $0x4a0] sm:$0xff] %v2019_v18 }
 0x3b1   :  { %3308 = vst [vmem:[#allocation2 + $0x4d8] sm:$0xff] %v2949_v16  ;;  %2060 = vmatmul.bf16.gmra.mxu2 %v9760_v42  ;;  %2987 = vmatmul.bf16.gmra.mxu0 %v9760_v42 }
 0x3b2   :  { %v2337_v11 = vpop.f32.mrf.mxu3 }
 0x3b3   :  { %v2338_v48 = vadd.f32 %v2337_v11, %v9776_v38 }
 0x3b4   :  { %v2639_v23 = vpop.f32.mrf.mxu1  ;;  %v2021_v45 = vpop.f32.mrf.mxu2 }
 0x3b5   :  { %3318 = vst [vmem:[#allocation2 + $0x528] sm:$0xff] %v2338_v48  ;;  %v2640_v43 = vadd.f32 %v2639_v23, %v9809_v22  ;;  %v2022_v34 = vadd.f32 %v2021_v45, %v9821_v10 }
 0x3b6   :  { %v2950_v60 = vpop.f32.mrf.mxu0 }
 0x3b7   :  { %3307 = vst [vmem:[#allocation2 + $0x4d0] sm:$0xff] %v2640_v43  ;;  %2379 = vmatmul.bf16.gmra.mxu3 %v9811_v40  ;;  %2678 = vmatmul.bf16.gmra.mxu1 %v9760_v42  ;;  %v2951_v7 = vadd.f32 %v2950_v60, %v9805_v55 }
 0x3b8   :  { %3305 = vst [vmem:[#allocation2 + $0x4c0] sm:$0xff] %v2022_v34 }
 0x3b9   :  { %3312 = vst [vmem:[#allocation2 + $0x4f8] sm:$0xff] %v2951_v7 }
 0x3ba   :  { %v2340_v31 = vpop.f32.mrf.mxu3 }
 0x3bb   :  { %v2341_v47 = vadd.f32 %v2340_v31, %v9776_v38 }
 0x3bc   :  { %v2641_v25 = vpop.f32.mrf.mxu1  ;;  %v2023_v50 = vpop.f32.mrf.mxu2 }
 0x3bd   :  { %3322 = vst [vmem:[#allocation2 + $0x548] sm:$0xff] %v2341_v47  ;;  %v2642_v17 = vadd.f32 %v2641_v25, %v9809_v22  ;;  %v2024_v20 = vadd.f32 %v2023_v50, %v9821_v10 }
 0x3be   :  { %v2953_v57 = vpop.f32.mrf.mxu0 }
 0x3bf   :  { %3311 = vst [vmem:[#allocation2 + $0x4f0] sm:$0xff] %v2642_v17  ;;  %v2954_v42 = vadd.f32 %v2953_v57, %v9805_v55 }
 0x3c0   :  { %3309 = vst [vmem:[#allocation2 + $0x4e0] sm:$0xff] %v2024_v20 }
 0x3c1   :  { %3316 = vst [vmem:[#allocation2 + $0x518] sm:$0xff] %v2954_v42  ;;  %2065 = vmatmul.bf16.gmra.mxu2 %v9785_v54  ;;  %2992 = vmatmul.bf16.gmra.mxu0 %v9785_v54 }
 0x3c2   :  { %v2342_v58 = vpop.f32.mrf.mxu3 }
 0x3c3   :  { %v2343_v8 = vadd.f32 %v2342_v58, %v9776_v38 }
 0x3c4   :  { %v2644_v5 = vpop.f32.mrf.mxu1  ;;  %v2026_v3 = vpop.f32.mrf.mxu2 }
 0x3c5   :  { %3326 = vst [vmem:[#allocation2 + $0x568] sm:$0xff] %v2343_v8  ;;  %v2645_v0 = vadd.f32 %v2644_v5, %v9809_v22  ;;  %v2027_v14 = vadd.f32 %v2026_v3, %v9821_v10 }
 0x3c6   :  { %v2955_v61 = vpop.f32.mrf.mxu0 }
 0x3c7   :  { %3315 = vst [vmem:[#allocation2 + $0x510] sm:$0xff] %v2645_v0  ;;  %2384 = vmatmul.bf16.gmra.mxu3 %v9813_v13  ;;  %2683 = vmatmul.bf16.gmra.mxu1 %v9785_v54  ;;  %v2956_v2 = vadd.f32 %v2955_v61, %v9805_v55 }
 0x3c8   :  { %3313 = vst [vmem:[#allocation2 + $0x500] sm:$0xff] %v2027_v14 }
 0x3c9   :  { %3320 = vst [vmem:[#allocation2 + $0x538] sm:$0xff] %v2956_v2 }
 0x3ca   :  { %v2345_v21 = vpop.f32.mrf.mxu3 }
 0x3cb   :  { %v2346_v15 = vadd.f32 %v2345_v21, %v9776_v38 }
 0x3cc   :  { %v2646_v52 = vpop.f32.mrf.mxu1  ;;  %v2028_v51 = vpop.f32.mrf.mxu2 }
 0x3cd   :  { %3330 = vst [vmem:[#allocation2 + $0x588] sm:$0xff] %v2346_v15  ;;  %v2647_v9 = vadd.f32 %v2646_v52, %v9809_v22  ;;  %v2029_v44 = vadd.f32 %v2028_v51, %v9821_v10 }
 0x3ce   :  { %v2958_v32 = vpop.f32.mrf.mxu0 }
 0x3cf   :  { %3319 = vst [vmem:[#allocation2 + $0x530] sm:$0xff] %v2647_v9  ;;  %v2959_v54 = vadd.f32 %v2958_v32, %v9805_v55 }
 0x3d0   :  { %3317 = vst [vmem:[#allocation2 + $0x520] sm:$0xff] %v2029_v44 }
 0x3d1   :  { %3324 = vst [vmem:[#allocation2 + $0x558] sm:$0xff] %v2959_v54  ;;  %2070 = vmatmul.bf16.gmra.mxu2 %v9811_v40  ;;  %2997 = vmatmul.bf16.gmra.mxu0 %v9811_v40 }
 0x3d2   :  { %v2347_v62 = vpop.f32.mrf.mxu3 }
 0x3d3   :  { %v2348_v24 = vadd.f32 %v2347_v62, %v9776_v38 }
 0x3d4   :  { %v2649_v12 = vpop.f32.mrf.mxu1  ;;  %v2031_v4 = vpop.f32.mrf.mxu2 }
 0x3d5   :  { %3334 = vst [vmem:[#allocation2 + $0x5a8] sm:$0xff] %v2348_v24  ;;  %v2650_v28 = vadd.f32 %v2649_v12, %v9809_v22  ;;  %v2032_v1 = vadd.f32 %v2031_v4, %v9821_v10 }
 0x3d6   :  { %v2960_v29 = vpop.f32.mrf.mxu0 }
 0x3d7   :  { %3323 = vst [vmem:[#allocation2 + $0x550] sm:$0xff] %v2650_v28  ;;  %2389 = vmatmul.bf16.gmra.mxu3 %v8784_v41  ;;  %2688 = vmatmul.bf16.gmra.mxu1 %v9811_v40  ;;  %v2961_v18 = vadd.f32 %v2960_v29, %v9805_v55 }
 0x3d8   :  { %3321 = vst [vmem:[#allocation2 + $0x540] sm:$0xff] %v2032_v1 }
 0x3d9   :  { %3328 = vst [vmem:[#allocation2 + $0x578] sm:$0xff] %v2961_v18 }
 0x3da   :  { %v2350_v30 = vpop.f32.mrf.mxu3 }
 0x3db   :  { %v2351_v16 = vadd.f32 %v2350_v30, %v9776_v38 }
 0x3dc   :  { %v2651_v11 = vpop.f32.mrf.mxu1  ;;  %v2033_v23 = vpop.f32.mrf.mxu2 }
 0x3dd   :  { %3338 = vst [vmem:[#allocation2 + $0x5c8] sm:$0xff] %v2351_v16  ;;  %v2652_v48 = vadd.f32 %v2651_v11, %v9809_v22  ;;  %v2034_v43 = vadd.f32 %v2033_v23, %v9821_v10 }
 0x3de   :  { %v2963_v45 = vpop.f32.mrf.mxu0 }
 0x3df   :  { %3327 = vst [vmem:[#allocation2 + $0x570] sm:$0xff] %v2652_v48  ;;  %v2964_v40 = vadd.f32 %v2963_v45, %v9805_v55 }
 0x3e0   :  { %3325 = vst [vmem:[#allocation2 + $0x560] sm:$0xff] %v2034_v43 }
 0x3e1   :  { %3332 = vst [vmem:[#allocation2 + $0x598] sm:$0xff] %v2964_v40  ;;  %2075 = vmatmul.bf16.gmra.mxu2 %v9813_v13  ;;  %3002 = vmatmul.bf16.gmra.mxu0 %v9813_v13 }
 0x3e2   :  { %v2352_v34 = vpop.f32.mrf.mxu3 }
 0x3e3   :  { %v2353_v60 = vadd.f32 %v2352_v34, %v9776_v38 }
 0x3e4   :  { %v2654_v7 = vpop.f32.mrf.mxu1  ;;  %v2036_v47 = vpop.f32.mrf.mxu2 }
 0x3e5   :  { %3342 = vst [vmem:[#allocation2 + $0x5e8] sm:$0xff] %v2353_v60  ;;  %v2655_v31 = vadd.f32 %v2654_v7, %v9809_v22  ;;  %v2037_v25 = vadd.f32 %v2036_v47, %v9821_v10 }
 0x3e6   :  { %v2965_v17 = vpop.f32.mrf.mxu0 }
 0x3e7   :  { %3331 = vst [vmem:[#allocation2 + $0x590] sm:$0xff] %v2655_v31  ;;  %2394 = vmatmul.bf16.gmra.mxu3 %v8830_v6  ;;  %2693 = vmatmul.bf16.gmra.mxu1 %v9813_v13  ;;  %v2966_v50 = vadd.f32 %v2965_v17, %v9805_v55 }
 0x3e8   :  { %3329 = vst [vmem:[#allocation2 + $0x580] sm:$0xff] %v2037_v25 }
 0x3e9   :  { %3336 = vst [vmem:[#allocation2 + $0x5b8] sm:$0xff] %v2966_v50 }
 0x3ea   :  { %v2355_v20 = vpop.f32.mrf.mxu3 }
 0x3eb   :  { %v2356_v57 = vadd.f32 %v2355_v20, %v9776_v38 }
 0x3ec   :  { %v2656_v42 = vpop.f32.mrf.mxu1  ;;  %v2038_v8 = vpop.f32.mrf.mxu2 }
 0x3ed   :  { %3346 = vst [vmem:[#allocation2 + $0x608] sm:$0xff] %v2356_v57  ;;  %v2657_v58 = vadd.f32 %v2656_v42, %v9809_v22  ;;  %v2039_v5 = vadd.f32 %v2038_v8, %v9821_v10 }
 0x3ee   :  { %v2968_v0 = vpop.f32.mrf.mxu0 }
 0x3ef   :  { %3335 = vst [vmem:[#allocation2 + $0x5b0] sm:$0xff] %v2657_v58  ;;  %v2969_v13 = vadd.f32 %v2968_v0, %v9805_v55 }
 0x3f0   :  { %3333 = vst [vmem:[#allocation2 + $0x5a0] sm:$0xff] %v2039_v5 }
 0x3f1   :  { %3340 = vst [vmem:[#allocation2 + $0x5d8] sm:$0xff] %v2969_v13  ;;  %2080 = vmatmul.bf16.gmra.mxu2 %v8784_v41  ;;  %3007 = vmatmul.bf16.gmra.mxu0 %v8784_v41 }
 0x3f2   :  { %v2357_v3 = vpop.f32.mrf.mxu3 }
 0x3f3   :  { %v2358_v14 = vadd.f32 %v2357_v3, %v9776_v38 }
 0x3f4   :  { %v2659_v61 = vpop.f32.mrf.mxu1  ;;  %v2041_v21 = vpop.f32.mrf.mxu2 }
 0x3f5   :  { %3350 = vst [vmem:[#allocation2 + $0x628] sm:$0xff] %v2358_v14  ;;  %v2660_v2 = vadd.f32 %v2659_v61, %v9809_v22  ;;  %v2042_v15 = vadd.f32 %v2041_v21, %v9821_v10 }
 0x3f6   :  { %v2970_v52 = vpop.f32.mrf.mxu0 }
 0x3f7   :  { %3339 = vst [vmem:[#allocation2 + $0x5d0] sm:$0xff] %v2660_v2  ;;  %2399 = vmatmul.bf16.gmra.mxu3 %v8870_v53  ;;  %2698 = vmatmul.bf16.gmra.mxu1 %v8784_v41  ;;  %v2971_v9 = vadd.f32 %v2970_v52, %v9805_v55 }
 0x3f8   :  { %3337 = vst [vmem:[#allocation2 + $0x5c0] sm:$0xff] %v2042_v15 }
 0x3f9   :  { %3344 = vst [vmem:[#allocation2 + $0x5f8] sm:$0xff] %v2971_v9 }
 0x3fa   :  { %v2360_v51 = vpop.f32.mrf.mxu3 }
 0x3fb   :  { %v2361_v44 = vadd.f32 %v2360_v51, %v9776_v38 }
 0x3fc   :  { %v2661_v32 = vpop.f32.mrf.mxu1  ;;  %v2043_v62 = vpop.f32.mrf.mxu2 }
 0x3fd   :  { %3354 = vst [vmem:[#allocation2 + $0x648] sm:$0xff] %v2361_v44  ;;  %v2662_v54 = vadd.f32 %v2661_v32, %v9809_v22  ;;  %v2044_v24 = vadd.f32 %v2043_v62, %v9821_v10 }
 0x3fe   :  { %v2973_v12 = vpop.f32.mrf.mxu0 }
 0x3ff   :  { %3343 = vst [vmem:[#allocation2 + $0x5f0] sm:$0xff] %v2662_v54  ;;  %v2974_v41 = vadd.f32 %v2973_v12, %v9805_v55 }
 0x400   :  { %3341 = vst [vmem:[#allocation2 + $0x5e0] sm:$0xff] %v2044_v24 }
 0x401   :  { %3348 = vst [vmem:[#allocation2 + $0x618] sm:$0xff] %v2974_v41  ;;  %2085 = vmatmul.bf16.gmra.mxu2 %v8830_v6  ;;  %3012 = vmatmul.bf16.gmra.mxu0 %v8830_v6 }
 0x402   :  { %v2362_v28 = vpop.f32.mrf.mxu3 }
 0x403   :  { %v2363_v4 = vadd.f32 %v2362_v28, %v9776_v38 }
 0x404   :  { %v2664_v1 = vpop.f32.mrf.mxu1  ;;  %v2046_v18 = vpop.f32.mrf.mxu2 }
 0x405   :  { %3358 = vst [vmem:[#allocation2 + $0x668] sm:$0xff] %v2363_v4  ;;  %v2665_v29 = vadd.f32 %v2664_v1, %v9809_v22  ;;  %v2047_v30 = vadd.f32 %v2046_v18, %v9821_v10 }
 0x406   :  { %v2975_v16 = vpop.f32.mrf.mxu0 }
 0x407   :  { %3347 = vst [vmem:[#allocation2 + $0x610] sm:$0xff] %v2665_v29  ;;  %2404 = vmatmul.bf16.gmra.mxu3 %v8910_v33  ;;  %2703 = vmatmul.bf16.gmra.mxu1 %v8830_v6  ;;  %v2976_v11 = vadd.f32 %v2975_v16, %v9805_v55 }
 0x408   :  { %3345 = vst [vmem:[#allocation2 + $0x600] sm:$0xff] %v2047_v30 }
 0x409   :  { %3352 = vst [vmem:[#allocation2 + $0x638] sm:$0xff] %v2976_v11 }
 0x40a   :  { %v2365_v48 = vpop.f32.mrf.mxu3 }
 0x40b   :  { %v2366_v23 = vadd.f32 %v2365_v48, %v9776_v38 }
 0x40c   :  { %v2666_v43 = vpop.f32.mrf.mxu1  ;;  %v2048_v40 = vpop.f32.mrf.mxu2 }
 0x40d   :  { %3362 = vst [vmem:[#allocation2 + $0x688] sm:$0xff] %v2366_v23  ;;  %v2667_v45 = vadd.f32 %v2666_v43, %v9809_v22  ;;  %v2049_v34 = vadd.f32 %v2048_v40, %v9821_v10 }
 0x40e   :  { %v2978_v60 = vpop.f32.mrf.mxu0 }
 0x40f   :  { %3351 = vst [vmem:[#allocation2 + $0x630] sm:$0xff] %v2667_v45  ;;  %v2979_v6 = vadd.f32 %v2978_v60, %v9805_v55 }
 0x410   :  { %3349 = vst [vmem:[#allocation2 + $0x620] sm:$0xff] %v2049_v34 }
 0x411   :  { %3356 = vst [vmem:[#allocation2 + $0x658] sm:$0xff] %v2979_v6  ;;  %2090 = vmatmul.bf16.gmra.mxu2 %v8870_v53  ;;  %3017 = vmatmul.bf16.gmra.mxu0 %v8870_v53 }
 0x412   :  { %v2367_v7 = vpop.f32.mrf.mxu3 }
 0x413   :  { %v2368_v31 = vadd.f32 %v2367_v7, %v9776_v38 }
 0x414   :  { %v2669_v47 = vpop.f32.mrf.mxu1  ;;  %v2051_v17 = vpop.f32.mrf.mxu2 }
 0x415   :  { %3366 = vst [vmem:[#allocation2 + $0x6a8] sm:$0xff] %v2368_v31  ;;  %v2670_v25 = vadd.f32 %v2669_v47, %v9809_v22  ;;  %v2052_v50 = vadd.f32 %v2051_v17, %v9821_v10 }
 0x416   :  { %v2980_v20 = vpop.f32.mrf.mxu0 }
 0x417   :  { %3355 = vst [vmem:[#allocation2 + $0x650] sm:$0xff] %v2670_v25  ;;  %2409 = vmatmul.bf16.gmra.mxu3 %v8974_v49  ;;  %2708 = vmatmul.bf16.gmra.mxu1 %v8870_v53  ;;  %v2981_v57 = vadd.f32 %v2980_v20, %v9805_v55 }
 0x418   :  { %3353 = vst [vmem:[#allocation2 + $0x640] sm:$0xff] %v2052_v50 }
 0x419   :  { %3360 = vst [vmem:[#allocation2 + $0x678] sm:$0xff] %v2981_v57 }
 0x41a   :  { %v2370_v42 = vpop.f32.mrf.mxu3 }
 0x41b   :  { %v2371_v58 = vadd.f32 %v2370_v42, %v9776_v38 }
 0x41c   :  { %v2671_v8 = vpop.f32.mrf.mxu1  ;;  %v2053_v0 = vpop.f32.mrf.mxu2 }
 0x41d   :  { %3370 = vst [vmem:[#allocation2 + $0x6c8] sm:$0xff] %v2371_v58  ;;  %v2672_v5 = vadd.f32 %v2671_v8, %v9809_v22  ;;  %v2054_v13 = vadd.f32 %v2053_v0, %v9821_v10 }
 0x41e   :  { %v2983_v3 = vpop.f32.mrf.mxu0 }
 0x41f   :  { %3359 = vst [vmem:[#allocation2 + $0x670] sm:$0xff] %v2672_v5  ;;  %v2984_v53 = vadd.f32 %v2983_v3, %v9805_v55 }
 0x420   :  { %3357 = vst [vmem:[#allocation2 + $0x660] sm:$0xff] %v2054_v13 }
 0x421   :  { %3364 = vst [vmem:[#allocation2 + $0x698] sm:$0xff] %v2984_v53  ;;  %2095 = vmatmul.bf16.gmra.mxu2 %v8910_v33  ;;  %3022 = vmatmul.bf16.gmra.mxu0 %v8910_v33 }
 0x422   :  { %v2372_v14 = vpop.f32.mrf.mxu3 }
 0x423   :  { %v2373_v61 = vadd.f32 %v2372_v14, %v9776_v38 }
 0x424   :  { %v2674_v2 = vpop.f32.mrf.mxu1  ;;  %v2056_v15 = vpop.f32.mrf.mxu2 }
 0x425   :  { %3374 = vst [vmem:[#allocation2 + $0x6e8] sm:$0xff] %v2373_v61  ;;  %v2675_v21 = vadd.f32 %v2674_v2, %v9809_v22  ;;  %v2057_v52 = vadd.f32 %v2056_v15, %v9821_v10 }
 0x426   :  { %v2985_v9 = vpop.f32.mrf.mxu0 }
 0x427   :  { %3363 = vst [vmem:[#allocation2 + $0x690] sm:$0xff] %v2675_v21  ;;  %2414 = vmatmul.bf16.gmra.mxu3 %v9014_v59  ;;  %2713 = vmatmul.bf16.gmra.mxu1 %v8910_v33  ;;  %v2986_v51 = vadd.f32 %v2985_v9, %v9805_v55 }
 0x428   :  { %3361 = vst [vmem:[#allocation2 + $0x680] sm:$0xff] %v2057_v52 }
 0x429   :  { %3368 = vst [vmem:[#allocation2 + $0x6b8] sm:$0xff] %v2986_v51 }
 0x42a   :  { %v2375_v44 = vpop.f32.mrf.mxu3 }
 0x42b   :  { %v2376_v32 = vadd.f32 %v2375_v44, %v9776_v38 }
 0x42c   :  { %v2676_v54 = vpop.f32.mrf.mxu1  ;;  %v2058_v24 = vpop.f32.mrf.mxu2 }
 0x42d   :  { %3378 = vst [vmem:[#allocation2 + $0x708] sm:$0xff] %v2376_v32  ;;  %v2677_v62 = vadd.f32 %v2676_v54, %v9809_v22  ;;  %v2059_v12 = vadd.f32 %v2058_v24, %v9821_v10 }
 0x42e   :  { %v2988_v41 = vpop.f32.mrf.mxu0 }
 0x42f   :  { %3367 = vst [vmem:[#allocation2 + $0x6b0] sm:$0xff] %v2677_v62  ;;  %v2989_v33 = vadd.f32 %v2988_v41, %v9805_v55 }
 0x430   :  { %3365 = vst [vmem:[#allocation2 + $0x6a0] sm:$0xff] %v2059_v12 }
 0x431   :  { %3372 = vst [vmem:[#allocation2 + $0x6d8] sm:$0xff] %v2989_v33  ;;  %2100 = vmatmul.bf16.gmra.mxu2 %v8974_v49  ;;  %3027 = vmatmul.bf16.gmra.mxu0 %v8974_v49 }
 0x432   :  { %v2377_v28 = vpop.f32.mrf.mxu3 }
 0x433   :  { %v2378_v4 = vadd.f32 %v2377_v28, %v9776_v38 }
 0x434   :  { %v2679_v1 = vpop.f32.mrf.mxu1  ;;  %v2061_v18 = vpop.f32.mrf.mxu2 }
 0x435   :  { %3382 = vst [vmem:[#allocation2 + $0x728] sm:$0xff] %v2378_v4  ;;  %v2680_v29 = vadd.f32 %v2679_v1, %v9809_v22  ;;  %v2062_v30 = vadd.f32 %v2061_v18, %v9821_v10 }
 0x436   :  { %v2990_v16 = vpop.f32.mrf.mxu0 }
 0x437   :  { %3371 = vst [vmem:[#allocation2 + $0x6d0] sm:$0xff] %v2680_v29  ;;  %2419 = vmatmul.bf16.gmra.mxu3 %v9054_v19  ;;  %2718 = vmatmul.bf16.gmra.mxu1 %v8974_v49  ;;  %v2991_v11 = vadd.f32 %v2990_v16, %v9805_v55 }
 0x438   :  { %3369 = vst [vmem:[#allocation2 + $0x6c0] sm:$0xff] %v2062_v30 }
 0x439   :  { %3376 = vst [vmem:[#allocation2 + $0x6f8] sm:$0xff] %v2991_v11 }
 0x43a   :  { %v2380_v48 = vpop.f32.mrf.mxu3 }
 0x43b   :  { %v2381_v23 = vadd.f32 %v2380_v48, %v9776_v38 }
 0x43c   :  { %v2681_v43 = vpop.f32.mrf.mxu1  ;;  %v2063_v40 = vpop.f32.mrf.mxu2 }
 0x43d   :  { %3386 = vst [vmem:[#allocation2 + $0x748] sm:$0xff] %v2381_v23  ;;  %v2682_v45 = vadd.f32 %v2681_v43, %v9809_v22  ;;  %v2064_v34 = vadd.f32 %v2063_v40, %v9821_v10 }
 0x43e   :  { %v2993_v60 = vpop.f32.mrf.mxu0 }
 0x43f   :  { %3375 = vst [vmem:[#allocation2 + $0x6f0] sm:$0xff] %v2682_v45  ;;  %v2994_v49 = vadd.f32 %v2993_v60, %v9805_v55 }
 0x440   :  { %3373 = vst [vmem:[#allocation2 + $0x6e0] sm:$0xff] %v2064_v34 }
 0x441   :  { %3380 = vst [vmem:[#allocation2 + $0x718] sm:$0xff] %v2994_v49  ;;  %2105 = vmatmul.bf16.gmra.mxu2 %v9014_v59  ;;  %3032 = vmatmul.bf16.gmra.mxu0 %v9014_v59 }
 0x442   :  { %v2382_v6 = vpop.f32.mrf.mxu3 }
 0x443   :  { %v2383_v7 = vadd.f32 %v2382_v6, %v9776_v38 }
 0x444   :  { %v2684_v31 = vpop.f32.mrf.mxu1  ;;  %v2066_v25 = vpop.f32.mrf.mxu2 }
 0x445   :  { %3390 = vst [vmem:[#allocation2 + $0x768] sm:$0xff] %v2383_v7  ;;  %v2685_v47 = vadd.f32 %v2684_v31, %v9809_v22  ;;  %v2067_v17 = vadd.f32 %v2066_v25, %v9821_v10 }
 0x446   :  { %v2995_v50 = vpop.f32.mrf.mxu0 }
 0x447   :  { %3379 = vst [vmem:[#allocation2 + $0x710] sm:$0xff] %v2685_v47  ;;  %2424 = vmatmul.bf16.gmra.mxu3 %v9106_v36  ;;  %2723 = vmatmul.bf16.gmra.mxu1 %v9014_v59  ;;  %v2996_v20 = vadd.f32 %v2995_v50, %v9805_v55 }
 0x448   :  { %3377 = vst [vmem:[#allocation2 + $0x700] sm:$0xff] %v2067_v17 }
 0x449   :  { %3384 = vst [vmem:[#allocation2 + $0x738] sm:$0xff] %v2996_v20 }
 0x44a   :  { %v2385_v57 = vpop.f32.mrf.mxu3 }
 0x44b   :  { %v2386_v42 = vadd.f32 %v2385_v57, %v9776_v38 }
 0x44c   :  { %v2686_v58 = vpop.f32.mrf.mxu1  ;;  %v2068_v5 = vpop.f32.mrf.mxu2 }
 0x44d   :  { %3394 = vst [vmem:[#allocation2 + $0x788] sm:$0xff] %v2386_v42  ;;  %v2687_v8 = vadd.f32 %v2686_v58, %v9809_v22  ;;  %v2069_v0 = vadd.f32 %v2068_v5, %v9821_v10 }
 0x44e   :  { %v2998_v13 = vpop.f32.mrf.mxu0 }
 0x44f   :  { %3383 = vst [vmem:[#allocation2 + $0x730] sm:$0xff] %v2687_v8  ;;  %v2999_v59 = vadd.f32 %v2998_v13, %v9805_v55 }
 0x450   :  { %3381 = vst [vmem:[#allocation2 + $0x720] sm:$0xff] %v2069_v0 }
 0x451   :  { %3388 = vst [vmem:[#allocation2 + $0x758] sm:$0xff] %v2999_v59  ;;  %2110 = vmatmul.bf16.gmra.mxu2 %v9054_v19  ;;  %3037 = vmatmul.bf16.gmra.mxu0 %v9054_v19 }
 0x452   :  { %v2387_v3 = vpop.f32.mrf.mxu3 }
 0x453   :  { %v2388_v53 = vadd.f32 %v2387_v3, %v9776_v38  ;;  %v14219_v3 = vld [vmem:[#allocation3_spill] sm:$0xff] }
 0x454   :  { %v2689_v14 = vpop.f32.mrf.mxu1  ;;  %v2071_v2 = vpop.f32.mrf.mxu2 }
 0x455   :  { %3398 = vst [vmem:[#allocation2 + $0x7a8] sm:$0xff] %v2388_v53  ;;  %v2690_v61 = vadd.f32 %v2689_v14, %v9809_v22  ;;  %v2072_v21 = vadd.f32 %v2071_v2, %v9821_v10 }
 0x456   :  { %v3000_v15 = vpop.f32.mrf.mxu0 }
 0x457   :  { %3387 = vst [vmem:[#allocation2 + $0x750] sm:$0xff] %v2690_v61  ;;  %2429 = vmatmul.bf16.gmra.mxu3 %v9158_v26  ;;  %2728 = vmatmul.bf16.gmra.mxu1 %v9054_v19  ;;  %v3001_v52 = vadd.f32 %v3000_v15, %v9805_v55 }
 0x458   :  { %3385 = vst [vmem:[#allocation2 + $0x740] sm:$0xff] %v2072_v21 }
 0x459   :  { %3392 = vst [vmem:[#allocation2 + $0x778] sm:$0xff] %v3001_v52 }
 0x45a   :  { %v2390_v9 = vpop.f32.mrf.mxu3 }
 0x45b   :  { %v2391_v51 = vadd.f32 %v2390_v9, %v9776_v38 }
 0x45c   :  { %v2691_v44 = vpop.f32.mrf.mxu1  ;;  %v2073_v54 = vpop.f32.mrf.mxu2 }
 0x45d   :  { %3402 = vst [vmem:[#allocation2 + $0x7c8] sm:$0xff] %v2391_v51  ;;  %v2692_v32 = vadd.f32 %v2691_v44, %v9809_v22  ;;  %v2074_v62 = vadd.f32 %v2073_v54, %v9821_v10 }
 0x45e   :  { %v3003_v24 = vpop.f32.mrf.mxu0 }
 0x45f   :  { %3391 = vst [vmem:[#allocation2 + $0x770] sm:$0xff] %v2692_v32  ;;  %v3004_v19 = vadd.f32 %v3003_v24, %v9805_v55 }
 0x460   :  { %3389 = vst [vmem:[#allocation2 + $0x760] sm:$0xff] %v2074_v62 }
 0x461   :  { %3396 = vst [vmem:[#allocation2 + $0x798] sm:$0xff] %v3004_v19  ;;  %2115 = vmatmul.bf16.gmra.mxu2 %v9106_v36  ;;  %3042 = vmatmul.bf16.gmra.mxu0 %v9106_v36 }
 0x462   :  { %v2392_v12 = vpop.f32.mrf.mxu3 }
 0x463   :  { %v2393_v41 = vadd.f32 %v2392_v12, %v9776_v38  ;;  %v14220_v12 = vld [vmem:[#allocation4_spill] sm:$0xff] }
 0x464   :  { %v2694_v33 = vpop.f32.mrf.mxu1  ;;  %v2076_v4 = vpop.f32.mrf.mxu2 }
 0x465   :  { %3406 = vst [vmem:[#allocation2 + $0x7e8] sm:$0xff] %v2393_v41  ;;  %v2695_v28 = vadd.f32 %v2694_v33, %v9809_v22  ;;  %v2077_v1 = vadd.f32 %v2076_v4, %v9821_v10 }
 0x466   :  { %v3005_v29 = vpop.f32.mrf.mxu0 }
 0x467   :  { %3395 = vst [vmem:[#allocation2 + $0x790] sm:$0xff] %v2695_v28  ;;  %2434 = vmatmul.bf16.gmra.mxu3 %v9203_v27  ;;  %2733 = vmatmul.bf16.gmra.mxu1 %v9106_v36  ;;  %v3006_v18 = vadd.f32 %v3005_v29, %v9805_v55 }
 0x468   :  { %3393 = vst [vmem:[#allocation2 + $0x780] sm:$0xff] %v2077_v1 }
 0x469   :  { %3400 = vst [vmem:[#allocation2 + $0x7b8] sm:$0xff] %v3006_v18 }
 0x46a   :  { %v2395_v30 = vpop.f32.mrf.mxu3 }
 0x46b   :  { %v2396_v16 = vadd.f32 %v2395_v30, %v9776_v38 }
 0x46c   :  { %v2696_v11 = vpop.f32.mrf.mxu1  ;;  %v2078_v23 = vpop.f32.mrf.mxu2 }
 0x46d   :  { %3410 = vst [vmem:[#allocation2 + $0x808] sm:$0xff] %v2396_v16  ;;  %v2697_v48 = vadd.f32 %v2696_v11, %v9809_v22  ;;  %v2079_v43 = vadd.f32 %v2078_v23, %v9821_v10 }
 0x46e   :  { %v3008_v45 = vpop.f32.mrf.mxu0 }
 0x46f   :  { %3399 = vst [vmem:[#allocation2 + $0x7b0] sm:$0xff] %v2697_v48  ;;  %v3009_v36 = vadd.f32 %v3008_v45, %v9805_v55 }
 0x470   :  { %3397 = vst [vmem:[#allocation2 + $0x7a0] sm:$0xff] %v2079_v43 }
 0x471   :  { %3404 = vst [vmem:[#allocation2 + $0x7d8] sm:$0xff] %v3009_v36  ;;  %2120 = vmatmul.bf16.gmra.mxu2 %v9158_v26  ;;  %3047 = vmatmul.bf16.gmra.mxu0 %v9158_v26 }
 0x472   :  { %v2397_v40 = vpop.f32.mrf.mxu3 }
 0x473   :  { %v2398_v34 = vadd.f32 %v2397_v40, %v9776_v38  ;;  %v14221_v40 = vld [vmem:[#allocation5_spill] sm:$0xff] }
 0x474   :  { %v2699_v60 = vpop.f32.mrf.mxu1  ;;  %v2081_v6 = vpop.f32.mrf.mxu2 }
 0x475   :  { %3414 = vst [vmem:[#allocation2 + $0x828] sm:$0xff] %v2398_v34  ;;  %v2700_v49 = vadd.f32 %v2699_v60, %v9809_v22  ;;  %v2082_v7 = vadd.f32 %v2081_v6, %v9821_v10 }
 0x476   :  { %v3010_v31 = vpop.f32.mrf.mxu0 }
 0x477   :  { %3403 = vst [vmem:[#allocation2 + $0x7d0] sm:$0xff] %v2700_v49  ;;  %2439 = vmatmul.bf16.gmra.mxu3 %v9243_v39  ;;  %2738 = vmatmul.bf16.gmra.mxu1 %v9158_v26  ;;  %v3011_v47 = vadd.f32 %v3010_v31, %v9805_v55 }
 0x478   :  { %3401 = vst [vmem:[#allocation2 + $0x7c0] sm:$0xff] %v2082_v7 }
 0x479   :  { %3408 = vst [vmem:[#allocation2 + $0x7f8] sm:$0xff] %v3011_v47 }
 0x47a   :  { %v2400_v25 = vpop.f32.mrf.mxu3 }
 0x47b   :  { %v2401_v17 = vadd.f32 %v2400_v25, %v9776_v38 }
 0x47c   :  { %v2701_v50 = vpop.f32.mrf.mxu1  ;;  %v2083_v57 = vpop.f32.mrf.mxu2 }
 0x47d   :  { %3418 = vst [vmem:[#allocation2 + $0x848] sm:$0xff] %v2401_v17  ;;  %v2702_v20 = vadd.f32 %v2701_v50, %v9809_v22  ;;  %v2084_v42 = vadd.f32 %v2083_v57, %v9821_v10 }
 0x47e   :  { %v3013_v58 = vpop.f32.mrf.mxu0 }
 0x47f   :  { %3407 = vst [vmem:[#allocation2 + $0x7f0] sm:$0xff] %v2702_v20  ;;  %v3014_v26 = vadd.f32 %v3013_v58, %v9805_v55 }
 0x480   :  { %3405 = vst [vmem:[#allocation2 + $0x7e0] sm:$0xff] %v2084_v42 }
 0x481   :  { %3412 = vst [vmem:[#allocation2 + $0x818] sm:$0xff] %v3014_v26  ;;  %2125 = vmatmul.bf16.gmra.mxu2 %v9203_v27  ;;  %3052 = vmatmul.bf16.gmra.mxu0 %v9203_v27 }
 0x482   :  { %v2402_v8 = vpop.f32.mrf.mxu3 }
 0x483   :  { %v2403_v5 = vadd.f32 %v2402_v8, %v9776_v38 }
 0x484   :  { %v2704_v0 = vpop.f32.mrf.mxu1  ;;  %v2086_v59 = vpop.f32.mrf.mxu2 }
 0x485   :  { %3422 = vst [vmem:[#allocation2 + $0x868] sm:$0xff] %v2403_v5  ;;  %v2705_v13 = vadd.f32 %v2704_v0, %v9809_v22  ;;  %v2087_v53 = vadd.f32 %v2086_v59, %v9821_v10  ;;  %v14222_v5 = vld [vmem:[#allocation6_spill] sm:$0xff] }
 0x486   :  { %v3015_v14 = vpop.f32.mrf.mxu0 }
 0x487   :  { %3411 = vst [vmem:[#allocation2 + $0x810] sm:$0xff] %v2705_v13  ;;  %2444 = vmatmul.bf16.gmra.mxu3 %v14219_v3  ;;  %2743 = vmatmul.bf16.gmra.mxu1 %v9203_v27  ;;  %v3016_v61 = vadd.f32 %v3015_v14, %v9805_v55 }
 0x488   :  { %3409 = vst [vmem:[#allocation2 + $0x800] sm:$0xff] %v2087_v53 }
 0x489   :  { %3416 = vst [vmem:[#allocation2 + $0x838] sm:$0xff] %v3016_v61 }
 0x48a   :  { %v2405_v2 = vpop.f32.mrf.mxu3 }
 0x48b   :  { %v2406_v21 = vadd.f32 %v2405_v2, %v9776_v38 }
 0x48c   :  { %v2706_v15 = vpop.f32.mrf.mxu1  ;;  %v2088_v9 = vpop.f32.mrf.mxu2 }
 0x48d   :  { %3426 = vst [vmem:[#allocation2 + $0x888] sm:$0xff] %v2406_v21  ;;  %v2707_v52 = vadd.f32 %v2706_v15, %v9809_v22  ;;  %v2089_v51 = vadd.f32 %v2088_v9, %v9821_v10 }
 0x48e   :  { %v3018_v44 = vpop.f32.mrf.mxu0 }
 0x48f   :  { %3415 = vst [vmem:[#allocation2 + $0x830] sm:$0xff] %v2707_v52  ;;  %v3019_v27 = vadd.f32 %v3018_v44, %v9805_v55 }
 0x490   :  { %3413 = vst [vmem:[#allocation2 + $0x820] sm:$0xff] %v2089_v51 }
 0x491   :  { %3420 = vst [vmem:[#allocation2 + $0x858] sm:$0xff] %v3019_v27  ;;  %2130 = vmatmul.bf16.gmra.mxu2 %v9243_v39  ;;  %3057 = vmatmul.bf16.gmra.mxu0 %v9243_v39 }
 0x492   :  { %v2407_v32 = vpop.f32.mrf.mxu3 }
 0x493   :  { %v2408_v54 = vadd.f32 %v2407_v32, %v9776_v38 }
 0x494   :  { %v2709_v62 = vpop.f32.mrf.mxu1  ;;  %v2091_v19 = vpop.f32.mrf.mxu2 }
 0x495   :  { %3430 = vst [vmem:[#allocation2 + $0x8a8] sm:$0xff] %v2408_v54  ;;  %v2710_v24 = vadd.f32 %v2709_v62, %v9809_v22  ;;  %v2092_v41 = vadd.f32 %v2091_v19, %v9821_v10 }
 0x496   :  { %v3020_v33 = vpop.f32.mrf.mxu0 }
 0x497   :  { %3419 = vst [vmem:[#allocation2 + $0x850] sm:$0xff] %v2710_v24  ;;  %2449 = vmatmul.bf16.gmra.mxu3 %v14220_v12  ;;  %2748 = vmatmul.bf16.gmra.mxu1 %v9243_v39  ;;  %v3021_v28 = vadd.f32 %v3020_v33, %v9805_v55 }
 0x498   :  { %3417 = vst [vmem:[#allocation2 + $0x840] sm:$0xff] %v2092_v41 }
 0x499   :  { %3424 = vst [vmem:[#allocation2 + $0x878] sm:$0xff] %v3021_v28 }
 0x49a   :  { %v2410_v4 = vpop.f32.mrf.mxu3 }
 0x49b   :  { %v2411_v1 = vadd.f32 %v2410_v4, %v9776_v38 }
 0x49c   :  { %v2711_v29 = vpop.f32.mrf.mxu1  ;;  %v2093_v30 = vpop.f32.mrf.mxu2 }
 0x49d   :  { %3434 = vst [vmem:[#allocation2 + $0x8c8] sm:$0xff] %v2411_v1  ;;  %v2712_v18 = vadd.f32 %v2711_v29, %v9809_v22  ;;  %v2094_v16 = vadd.f32 %v2093_v30, %v9821_v10 }
 0x49e   :  { %v3023_v11 = vpop.f32.mrf.mxu0 }
 0x49f   :  { %3423 = vst [vmem:[#allocation2 + $0x870] sm:$0xff] %v2712_v18  ;;  %v3024_v39 = vadd.f32 %v3023_v11, %v9805_v55 }
 0x4a0   :  { %3421 = vst [vmem:[#allocation2 + $0x860] sm:$0xff] %v2094_v16 }
 0x4a1   :  { %3428 = vst [vmem:[#allocation2 + $0x898] sm:$0xff] %v3024_v39  ;;  %2135 = vmatmul.bf16.gmra.mxu2 %v14219_v3  ;;  %3062 = vmatmul.bf16.gmra.mxu0 %v14219_v3 }
 0x4a2   :  { %v2412_v48 = vpop.f32.mrf.mxu3 }
 0x4a3   :  { %v2413_v23 = vadd.f32 %v2412_v48, %v9776_v38 }
 0x4a4   :  { %v2714_v43 = vpop.f32.mrf.mxu1  ;;  %v2096_v36 = vpop.f32.mrf.mxu2 }
 0x4a5   :  { %3438 = vst [vmem:[#allocation2 + $0x8e8] sm:$0xff] %v2413_v23  ;;  %v2715_v45 = vadd.f32 %v2714_v43, %v9809_v22  ;;  %v2097_v34 = vadd.f32 %v2096_v36, %v9821_v10 }
 0x4a6   :  { %v3025_v60 = vpop.f32.mrf.mxu0 }
 0x4a7   :  { %3427 = vst [vmem:[#allocation2 + $0x890] sm:$0xff] %v2715_v45  ;;  %2454 = vmatmul.bf16.gmra.mxu3 %v14221_v40  ;;  %2753 = vmatmul.bf16.gmra.mxu1 %v14219_v3  ;;  %v3026_v49 = vadd.f32 %v3025_v60, %v9805_v55 }
 0x4a8   :  { %3425 = vst [vmem:[#allocation2 + $0x880] sm:$0xff] %v2097_v34 }
 0x4a9   :  { %3432 = vst [vmem:[#allocation2 + $0x8b8] sm:$0xff] %v3026_v49 }
 0x4aa   :  { %v2415_v6 = vpop.f32.mrf.mxu3 }
 0x4ab   :  { %v2416_v7 = vadd.f32 %v2415_v6, %v9776_v38 }
 0x4ac   :  { %v2716_v31 = vpop.f32.mrf.mxu1  ;;  %v2098_v25 = vpop.f32.mrf.mxu2 }
 0x4ad   :  { %3442 = vst [vmem:[#allocation2 + $0x908] sm:$0xff] %v2416_v7  ;;  %v2717_v47 = vadd.f32 %v2716_v31, %v9809_v22  ;;  %v2099_v17 = vadd.f32 %v2098_v25, %v9821_v10 }
 0x4ae   :  { %v3028_v50 = vpop.f32.mrf.mxu0 }
 0x4af   :  { %3431 = vst [vmem:[#allocation2 + $0x8b0] sm:$0xff] %v2717_v47  ;;  %v3029_v20 = vadd.f32 %v3028_v50, %v9805_v55 }
 0x4b0   :  { %3429 = vst [vmem:[#allocation2 + $0x8a0] sm:$0xff] %v2099_v17 }
 0x4b1   :  { %3436 = vst [vmem:[#allocation2 + $0x8d8] sm:$0xff] %v3029_v20  ;;  %2140 = vmatmul.bf16.gmra.mxu2 %v14220_v12  ;;  %3067 = vmatmul.bf16.gmra.mxu0 %v14220_v12 }
 0x4b2   :  { %v2417_v57 = vpop.f32.mrf.mxu3 }
 0x4b3   :  { %v2418_v42 = vadd.f32 %v2417_v57, %v9776_v38 }
 0x4b4   :  { %v2719_v58 = vpop.f32.mrf.mxu1  ;;  %v2101_v8 = vpop.f32.mrf.mxu2 }
 0x4b5   :  { %3446 = vst [vmem:[#allocation2 + $0x928] sm:$0xff] %v2418_v42  ;;  %v2720_v26 = vadd.f32 %v2719_v58, %v9809_v22  ;;  %v2102_v0 = vadd.f32 %v2101_v8, %v9821_v10 }
 0x4b6   :  { %v3030_v13 = vpop.f32.mrf.mxu0 }
 0x4b7   :  { %3435 = vst [vmem:[#allocation2 + $0x8d0] sm:$0xff] %v2720_v26  ;;  %2459 = vmatmul.bf16.gmra.mxu3 %v14222_v5  ;;  %2758 = vmatmul.bf16.gmra.mxu1 %v14220_v12  ;;  %v3031_v59 = vadd.f32 %v3030_v13, %v9805_v55 }
 0x4b8   :  { %3433 = vst [vmem:[#allocation2 + $0x8c0] sm:$0xff] %v2102_v0 }
 0x4b9   :  { %3440 = vst [vmem:[#allocation2 + $0x8f8] sm:$0xff] %v3031_v59 }
 0x4ba   :  { %v2420_v3 = vpop.f32.mrf.mxu3 }
 0x4bb   :  { %v2421_v53 = vadd.f32 %v2420_v3, %v9776_v38 }
 0x4bc   :  { %v2721_v14 = vpop.f32.mrf.mxu1  ;;  %v2103_v2 = vpop.f32.mrf.mxu2 }
 0x4bd   :  { %3450 = vst [vmem:[#allocation2 + $0x948] sm:$0xff] %v2421_v53  ;;  %v2722_v61 = vadd.f32 %v2721_v14, %v9809_v22  ;;  %v2104_v21 = vadd.f32 %v2103_v2, %v9821_v10 }
 0x4be   :  { %v3033_v15 = vpop.f32.mrf.mxu0 }
 0x4bf   :  { %3439 = vst [vmem:[#allocation2 + $0x8f0] sm:$0xff] %v2722_v61  ;;  %v3034_v52 = vadd.f32 %v3033_v15, %v9805_v55 }
 0x4c0   :  { %3437 = vst [vmem:[#allocation2 + $0x8e0] sm:$0xff] %v2104_v21  ;;  %v14223_v21 = vld [vmem:[#allocation7_spill] sm:$0xff] }
 0x4c1   :  { %3444 = vst [vmem:[#allocation2 + $0x918] sm:$0xff] %v3034_v52  ;;  %2145 = vmatmul.bf16.gmra.mxu2 %v14221_v40  ;;  %3072 = vmatmul.bf16.gmra.mxu0 %v14221_v40 }
 0x4c2   :  { %v2422_v9 = vpop.f32.mrf.mxu3 }
 0x4c3   :  { %v2423_v51 = vadd.f32 %v2422_v9, %v9776_v38 }
 0x4c4   :  { %v2724_v44 = vpop.f32.mrf.mxu1  ;;  %v2106_v32 = vpop.f32.mrf.mxu2 }
 0x4c5   :  { %3454 = vst [vmem:[#allocation2 + $0x968] sm:$0xff] %v2423_v51  ;;  %v2725_v27 = vadd.f32 %v2724_v44, %v9809_v22  ;;  %v2107_v54 = vadd.f32 %v2106_v32, %v9821_v10 }
 0x4c6   :  { %v3035_v62 = vpop.f32.mrf.mxu0 }
 0x4c7   :  { %3443 = vst [vmem:[#allocation2 + $0x910] sm:$0xff] %v2725_v27  ;;  %2464 = vmatmul.bf16.gmra.mxu3 %v9491_v56  ;;  %2763 = vmatmul.bf16.gmra.mxu1 %v14221_v40  ;;  %v3036_v24 = vadd.f32 %v3035_v62, %v9805_v55 }
 0x4c8   :  { %3441 = vst [vmem:[#allocation2 + $0x900] sm:$0xff] %v2107_v54 }
 0x4c9   :  { %3448 = vst [vmem:[#allocation2 + $0x938] sm:$0xff] %v3036_v24 }
 0x4ca   :  { %v2425_v19 = vpop.f32.mrf.mxu3 }
 0x4cb   :  { %v2426_v12 = vadd.f32 %v2425_v19, %v9776_v38 }
 0x4cc   :  { %v2726_v41 = vpop.f32.mrf.mxu1  ;;  %v2108_v28 = vpop.f32.mrf.mxu2 }
 0x4cd   :  { %3458 = vst [vmem:[#allocation2 + $0x988] sm:$0xff] %v2426_v12  ;;  %v2727_v33 = vadd.f32 %v2726_v41, %v9809_v22  ;;  %v2109_v4 = vadd.f32 %v2108_v28, %v9821_v10 }
 0x4ce   :  { %v3038_v1 = vpop.f32.mrf.mxu0 }
 0x4cf   :  { %3447 = vst [vmem:[#allocation2 + $0x930] sm:$0xff] %v2727_v33  ;;  %v3039_v29 = vadd.f32 %v3038_v1, %v9805_v55 }
 0x4d0   :  { %3445 = vst [vmem:[#allocation2 + $0x920] sm:$0xff] %v2109_v4 }
 0x4d1   :  { %3452 = vst [vmem:[#allocation2 + $0x958] sm:$0xff] %v3039_v29  ;;  %2150 = vmatmul.bf16.gmra.mxu2 %v14222_v5  ;;  %3077 = vmatmul.bf16.gmra.mxu0 %v14222_v5 }
 0x4d2   :  { %v2427_v18 = vpop.f32.mrf.mxu3 }
 0x4d3   :  { %v2428_v30 = vadd.f32 %v2427_v18, %v9776_v38 }
 0x4d4   :  { %v2729_v16 = vpop.f32.mrf.mxu1  ;;  %v2111_v39 = vpop.f32.mrf.mxu2 }
 0x4d5   :  { %3462 = vst [vmem:[#allocation2 + $0x9a8] sm:$0xff] %v2428_v30  ;;  %v2730_v11 = vadd.f32 %v2729_v16, %v9809_v22  ;;  %v2112_v48 = vadd.f32 %v2111_v39, %v9821_v10 }
 0x4d6   :  { %v3040_v23 = vpop.f32.mrf.mxu0 }
 0x4d7   :  { %3451 = vst [vmem:[#allocation2 + $0x950] sm:$0xff] %v2730_v11  ;;  %2469 = vmatmul.bf16.gmra.mxu3 %v9531_v35  ;;  %2768 = vmatmul.bf16.gmra.mxu1 %v14222_v5  ;;  %v3041_v43 = vadd.f32 %v3040_v23, %v9805_v55 }
 0x4d8   :  { %3449 = vst [vmem:[#allocation2 + $0x940] sm:$0xff] %v2112_v48 }
 0x4d9   :  { %3456 = vst [vmem:[#allocation2 + $0x978] sm:$0xff] %v3041_v43 }
 0x4da   :  { %v2430_v45 = vpop.f32.mrf.mxu3 }
 0x4db   :  { %v2431_v36 = vadd.f32 %v2430_v45, %v9776_v38 }
 0x4dc   :  { %v2731_v40 = vpop.f32.mrf.mxu1  ;;  %v2113_v60 = vpop.f32.mrf.mxu2 }
 0x4dd   :  { %3466 = vst [vmem:[#allocation2 + $0x9c8] sm:$0xff] %v2431_v36  ;;  %v2732_v34 = vadd.f32 %v2731_v40, %v9809_v22  ;;  %v2114_v49 = vadd.f32 %v2113_v60, %v9821_v10  ;;  %v14224_v60 = vld [vmem:[#allocation8_spill] sm:$0xff] }
 0x4de   :  { %v3043_v6 = vpop.f32.mrf.mxu0 }
 0x4df   :  { %3455 = vst [vmem:[#allocation2 + $0x970] sm:$0xff] %v2732_v34  ;;  %v3044_v7 = vadd.f32 %v3043_v6, %v9805_v55 }
 0x4e0   :  { %3453 = vst [vmem:[#allocation2 + $0x960] sm:$0xff] %v2114_v49 }
 0x4e1   :  { %3460 = vst [vmem:[#allocation2 + $0x998] sm:$0xff] %v3044_v7  ;;  %2155 = vmatmul.bf16.gmra.mxu2 %v9491_v56  ;;  %3082 = vmatmul.bf16.gmra.mxu0 %v9491_v56 }
 0x4e2   :  { %v2432_v31 = vpop.f32.mrf.mxu3 }
 0x4e3   :  { %v2433_v47 = vadd.f32 %v2432_v31, %v9776_v38 }
 0x4e4   :  { %v2734_v25 = vpop.f32.mrf.mxu1  ;;  %v2116_v50 = vpop.f32.mrf.mxu2 }
 0x4e5   :  { %3470 = vst [vmem:[#allocation2 + $0x9e8] sm:$0xff] %v2433_v47  ;;  %v2735_v17 = vadd.f32 %v2734_v25, %v9809_v22  ;;  %v2117_v20 = vadd.f32 %v2116_v50, %v9821_v10 }
 0x4e6   :  { %v3045_v57 = vpop.f32.mrf.mxu0 }
 0x4e7   :  { %3459 = vst [vmem:[#allocation2 + $0x990] sm:$0xff] %v2735_v17  ;;  %2474 = vmatmul.bf16.gmra.mxu3 %v9571_v63  ;;  %2773 = vmatmul.bf16.gmra.mxu1 %v9491_v56  ;;  %v3046_v42 = vadd.f32 %v3045_v57, %v9805_v55 }
 0x4e8   :  { %3457 = vst [vmem:[#allocation2 + $0x980] sm:$0xff] %v2117_v20 }
 0x4e9   :  { %3464 = vst [vmem:[#allocation2 + $0x9b8] sm:$0xff] %v3046_v42 }
 0x4ea   :  { %v2435_v58 = vpop.f32.mrf.mxu3 }
 0x4eb   :  { %v2436_v26 = vadd.f32 %v2435_v58, %v9776_v38 }
 0x4ec   :  { %v2736_v8 = vpop.f32.mrf.mxu1  ;;  %v2118_v0 = vpop.f32.mrf.mxu2 }
 0x4ed   :  { %3474 = vst [vmem:[#allocation2 + $0xa08] sm:$0xff] %v2436_v26  ;;  %v2737_v5 = vadd.f32 %v2736_v8, %v9809_v22  ;;  %v2119_v13 = vadd.f32 %v2118_v0, %v9821_v10 }
 0x4ee   :  { %v3048_v59 = vpop.f32.mrf.mxu0 }
 0x4ef   :  { %3463 = vst [vmem:[#allocation2 + $0x9b0] sm:$0xff] %v2737_v5  ;;  %v3049_v56 = vadd.f32 %v3048_v59, %v9805_v55 }
 0x4f0   :  { %3461 = vst [vmem:[#allocation2 + $0x9a0] sm:$0xff] %v2119_v13  ;;  %v14225_v13 = vld [vmem:[#allocation9_spill] sm:$0xff] }
 0x4f1   :  { %3468 = vst [vmem:[#allocation2 + $0x9d8] sm:$0xff] %v3049_v56  ;;  %2160 = vmatmul.bf16.gmra.mxu2 %v9531_v35  ;;  %3087 = vmatmul.bf16.gmra.mxu0 %v9531_v35 }
 0x4f2   :  { %v2437_v3 = vpop.f32.mrf.mxu3 }
 0x4f3   :  { %v2438_v53 = vadd.f32 %v2437_v3, %v9776_v38 }
 0x4f4   :  { %v2739_v14 = vpop.f32.mrf.mxu1  ;;  %v2121_v2 = vpop.f32.mrf.mxu2 }
 0x4f5   :  { %3478 = vst [vmem:[#allocation2 + $0xa28] sm:$0xff] %v2438_v53  ;;  %v2740_v61 = vadd.f32 %v2739_v14, %v9809_v22  ;;  %v2122_v15 = vadd.f32 %v2121_v2, %v9821_v10 }
 0x4f6   :  { %v3050_v52 = vpop.f32.mrf.mxu0 }
 0x4f7   :  { %3467 = vst [vmem:[#allocation2 + $0x9d0] sm:$0xff] %v2740_v61  ;;  %2479 = vmatmul.bf16.gmra.mxu3 %v14223_v21  ;;  %2778 = vmatmul.bf16.gmra.mxu1 %v9531_v35  ;;  %v3051_v9 = vadd.f32 %v3050_v52, %v9805_v55 }
 0x4f8   :  { %3465 = vst [vmem:[#allocation2 + $0x9c0] sm:$0xff] %v2122_v15 }
 0x4f9   :  { %3472 = vst [vmem:[#allocation2 + $0x9f8] sm:$0xff] %v3051_v9 }
 0x4fa   :  { %v2440_v51 = vpop.f32.mrf.mxu3 }
 0x4fb   :  { %v2441_v44 = vadd.f32 %v2440_v51, %v9776_v38 }
 0x4fc   :  { %v2741_v27 = vpop.f32.mrf.mxu1  ;;  %v2123_v54 = vpop.f32.mrf.mxu2 }
 0x4fd   :  { %3482 = vst [vmem:[#allocation2 + $0xa48] sm:$0xff] %v2441_v44  ;;  %v2742_v32 = vadd.f32 %v2741_v27, %v9809_v22  ;;  %v2124_v62 = vadd.f32 %v2123_v54, %v9821_v10  ;;  %v14226_v54 = vld [vmem:[#allocation10_spill] sm:$0xff] }
 0x4fe   :  { %v3053_v24 = vpop.f32.mrf.mxu0 }
 0x4ff   :  { %3471 = vst [vmem:[#allocation2 + $0x9f0] sm:$0xff] %v2742_v32  ;;  %v3054_v35 = vadd.f32 %v3053_v24, %v9805_v55 }
 0x500   :  { %3469 = vst [vmem:[#allocation2 + $0x9e0] sm:$0xff] %v2124_v62 }
 0x501   :  { %3476 = vst [vmem:[#allocation2 + $0xa18] sm:$0xff] %v3054_v35  ;;  %2165 = vmatmul.bf16.gmra.mxu2 %v9571_v63  ;;  %3092 = vmatmul.bf16.gmra.mxu0 %v9571_v63 }
 0x502   :  { %v2442_v19 = vpop.f32.mrf.mxu3 }
 0x503   :  { %v2443_v12 = vadd.f32 %v2442_v19, %v9776_v38 }
 0x504   :  { %v2744_v41 = vpop.f32.mrf.mxu1  ;;  %v2126_v28 = vpop.f32.mrf.mxu2 }
 0x505   :  { %3486 = vst [vmem:[#allocation2 + $0xa68] sm:$0xff] %v2443_v12  ;;  %v2745_v33 = vadd.f32 %v2744_v41, %v9809_v22  ;;  %v2127_v4 = vadd.f32 %v2126_v28, %v9821_v10 }
 0x506   :  { %v3055_v1 = vpop.f32.mrf.mxu0 }
 0x507   :  { %3475 = vst [vmem:[#allocation2 + $0xa10] sm:$0xff] %v2745_v33  ;;  %2484 = vmatmul.bf16.gmra.mxu3 %v9644_v37  ;;  %2783 = vmatmul.bf16.gmra.mxu1 %v9571_v63  ;;  %v3056_v29 = vadd.f32 %v3055_v1, %v9805_v55 }
 0x508   :  { %3473 = vst [vmem:[#allocation2 + $0xa00] sm:$0xff] %v2127_v4 }
 0x509   :  { %3480 = vst [vmem:[#allocation2 + $0xa38] sm:$0xff] %v3056_v29 }
 0x50a   :  { %v2445_v18 = vpop.f32.mrf.mxu3 }
 0x50b   :  { %v2446_v30 = vadd.f32 %v2445_v18, %v9776_v38 }
 0x50c   :  { %v2746_v16 = vpop.f32.mrf.mxu1  ;;  %v2128_v39 = vpop.f32.mrf.mxu2 }
 0x50d   :  { %3490 = vst [vmem:[#allocation2 + $0xa88] sm:$0xff] %v2446_v30  ;;  %v2747_v11 = vadd.f32 %v2746_v16, %v9809_v22  ;;  %v2129_v48 = vadd.f32 %v2128_v39, %v9821_v10 }
 0x50e   :  { %v3058_v23 = vpop.f32.mrf.mxu0 }
 0x50f   :  { %3479 = vst [vmem:[#allocation2 + $0xa30] sm:$0xff] %v2747_v11  ;;  %v3059_v63 = vadd.f32 %v3058_v23, %v9805_v55 }
 0x510   :  { %3477 = vst [vmem:[#allocation2 + $0xa20] sm:$0xff] %v2129_v48  ;;  %v14227_v48 = vld [vmem:[#allocation11_spill] sm:$0xff] }
 0x511   :  { %3484 = vst [vmem:[#allocation2 + $0xa58] sm:$0xff] %v3059_v63  ;;  %2170 = vmatmul.bf16.gmra.mxu2 %v14223_v21  ;;  %3097 = vmatmul.bf16.gmra.mxu0 %v14223_v21 }
 0x512   :  { %v2447_v43 = vpop.f32.mrf.mxu3 }
 0x513   :  { %v2448_v45 = vadd.f32 %v2447_v43, %v9776_v38 }
 0x514   :  { %v2749_v36 = vpop.f32.mrf.mxu1  ;;  %v2131_v34 = vpop.f32.mrf.mxu2 }
 0x515   :  { %3494 = vst [vmem:[#allocation2 + $0xaa8] sm:$0xff] %v2448_v45  ;;  %v2750_v40 = vadd.f32 %v2749_v36, %v9809_v22  ;;  %v2132_v49 = vadd.f32 %v2131_v34, %v9821_v10 }
 0x516   :  { %v3060_v6 = vpop.f32.mrf.mxu0 }
 0x517   :  { %3483 = vst [vmem:[#allocation2 + $0xa50] sm:$0xff] %v2750_v40  ;;  %2489 = vmatmul.bf16.gmra.mxu3 %v14224_v60  ;;  %2788 = vmatmul.bf16.gmra.mxu1 %v14223_v21  ;;  %v3061_v7 = vadd.f32 %v3060_v6, %v9805_v55 }
 0x518   :  { %3481 = vst [vmem:[#allocation2 + $0xa40] sm:$0xff] %v2132_v49 }
 0x519   :  { %3488 = vst [vmem:[#allocation2 + $0xa78] sm:$0xff] %v3061_v7 }
 0x51a   :  { %v2450_v31 = vpop.f32.mrf.mxu3 }
 0x51b   :  { %v2451_v47 = vadd.f32 %v2450_v31, %v9776_v38 }
 0x51c   :  { %v2751_v25 = vpop.f32.mrf.mxu1  ;;  %v2133_v50 = vpop.f32.mrf.mxu2 }
 0x51d   :  { %3498 = vst [vmem:[#allocation2 + $0xac8] sm:$0xff] %v2451_v47  ;;  %v2752_v17 = vadd.f32 %v2751_v25, %v9809_v22  ;;  %v2134_v20 = vadd.f32 %v2133_v50, %v9821_v10 }
 0x51e   :  { %v3063_v57 = vpop.f32.mrf.mxu0 }
 0x51f   :  { %3487 = vst [vmem:[#allocation2 + $0xa70] sm:$0xff] %v2752_v17  ;;  %v3064_v42 = vadd.f32 %v3063_v57, %v9805_v55 }
 0x520   :  { %3485 = vst [vmem:[#allocation2 + $0xa60] sm:$0xff] %v2134_v20  ;;  %v14228_v20 = vld [vmem:[#allocation12_spill] sm:$0xff] }
 0x521   :  { %3492 = vst [vmem:[#allocation2 + $0xa98] sm:$0xff] %v3064_v42  ;;  %2175 = vmatmul.bf16.gmra.mxu2 %v9644_v37  ;;  %3102 = vmatmul.bf16.gmra.mxu0 %v9644_v37 }
 0x522   :  { %v2452_v58 = vpop.f32.mrf.mxu3 }
 0x523   :  { %v2453_v26 = vadd.f32 %v2452_v58, %v9776_v38 }
 0x524   :  { %v2754_v8 = vpop.f32.mrf.mxu1  ;;  %v2136_v0 = vpop.f32.mrf.mxu2 }
 0x525   :  { %3502 = vst [vmem:[#allocation2 + $0xae8] sm:$0xff] %v2453_v26  ;;  %v2755_v5 = vadd.f32 %v2754_v8, %v9809_v22  ;;  %v2137_v59 = vadd.f32 %v2136_v0, %v9821_v10 }
 0x526   :  { %v3065_v56 = vpop.f32.mrf.mxu0 }
 0x527   :  { %3491 = vst [vmem:[#allocation2 + $0xa90] sm:$0xff] %v2755_v5  ;;  %2494 = vmatmul.bf16.gmra.mxu3 %v14225_v13  ;;  %2793 = vmatmul.bf16.gmra.mxu1 %v9644_v37  ;;  %v3066_v3 = vadd.f32 %v3065_v56, %v9805_v55 }
 0x528   :  { %3489 = vst [vmem:[#allocation2 + $0xa80] sm:$0xff] %v2137_v59 }
 0x529   :  { %3496 = vst [vmem:[#allocation2 + $0xab8] sm:$0xff] %v3066_v3 }
 0x52a   :  { %v2455_v53 = vpop.f32.mrf.mxu3 }
 0x52b   :  { %v2456_v14 = vadd.f32 %v2455_v53, %v9776_v38 }
 0x52c   :  { %v2756_v61 = vpop.f32.mrf.mxu1  ;;  %v2138_v21 = vpop.f32.mrf.mxu2 }
 0x52d   :  { %3506 = vst [vmem:[#allocation2 + $0xb08] sm:$0xff] %v2456_v14  ;;  %v2757_v2 = vadd.f32 %v2756_v61, %v9809_v22  ;;  %v2139_v15 = vadd.f32 %v2138_v21, %v9821_v10 }
 0x52e   :  { %v3068_v52 = vpop.f32.mrf.mxu0 }
 0x52f   :  { %3495 = vst [vmem:[#allocation2 + $0xab0] sm:$0xff] %v2757_v2  ;;  %v3069_v37 = vadd.f32 %v3068_v52, %v9805_v55 }
 0x530   :  { %3493 = vst [vmem:[#allocation2 + $0xaa0] sm:$0xff] %v2139_v15  ;;  %v14229_v15 = vld [vmem:[#allocation13_spill] sm:$0xff] }
 0x531   :  { %3500 = vst [vmem:[#allocation2 + $0xad8] sm:$0xff] %v3069_v37  ;;  %2180 = vmatmul.bf16.gmra.mxu2 %v14224_v60  ;;  %3107 = vmatmul.bf16.gmra.mxu0 %v14224_v60 }
 0x532   :  { %v2457_v9 = vpop.f32.mrf.mxu3 }
 0x533   :  { %v2458_v51 = vadd.f32 %v2457_v9, %v9776_v38 }
 0x534   :  { %v2759_v44 = vpop.f32.mrf.mxu1  ;;  %v2141_v32 = vpop.f32.mrf.mxu2 }
 0x535   :  { %3510 = vst [vmem:[#allocation2 + $0xb28] sm:$0xff] %v2458_v51  ;;  %v2760_v27 = vadd.f32 %v2759_v44, %v9809_v22  ;;  %v2142_v62 = vadd.f32 %v2141_v32, %v9821_v10 }
 0x536   :  { %v3070_v24 = vpop.f32.mrf.mxu0 }
 0x537   :  { %3499 = vst [vmem:[#allocation2 + $0xad0] sm:$0xff] %v2760_v27  ;;  %2499 = vmatmul.bf16.gmra.mxu3 %v14226_v54  ;;  %2798 = vmatmul.bf16.gmra.mxu1 %v14224_v60  ;;  %v3071_v35 = vadd.f32 %v3070_v24, %v9805_v55 }
 0x538   :  { %3497 = vst [vmem:[#allocation2 + $0xac0] sm:$0xff] %v2142_v62 }
 0x539   :  { %3504 = vst [vmem:[#allocation2 + $0xaf8] sm:$0xff] %v3071_v35 }
 0x53a   :  { %v2460_v19 = vpop.f32.mrf.mxu3 }
 0x53b   :  { %v2461_v12 = vadd.f32 %v2460_v19, %v9776_v38 }
 0x53c   :  { %v2761_v41 = vpop.f32.mrf.mxu1  ;;  %v2143_v28 = vpop.f32.mrf.mxu2 }
 0x53d   :  { %3514 = vst [vmem:[#allocation2 + $0xb48] sm:$0xff] %v2461_v12  ;;  %v2762_v33 = vadd.f32 %v2761_v41, %v9809_v22  ;;  %v2144_v4 = vadd.f32 %v2143_v28, %v9821_v10 }
 0x53e   :  { %v3073_v1 = vpop.f32.mrf.mxu0 }
 0x53f   :  { %3503 = vst [vmem:[#allocation2 + $0xaf0] sm:$0xff] %v2762_v33  ;;  %v3074_v29 = vadd.f32 %v3073_v1, %v9805_v55 }
 0x540   :  { %3501 = vst [vmem:[#allocation2 + $0xae0] sm:$0xff] %v2144_v4  ;;  %v14230_v4 = vld [vmem:[#allocation14_spill] sm:$0xff] }
 0x541   :  { %3508 = vst [vmem:[#allocation2 + $0xb18] sm:$0xff] %v3074_v29  ;;  %2185 = vmatmul.bf16.gmra.mxu2 %v14225_v13  ;;  %3112 = vmatmul.bf16.gmra.mxu0 %v14225_v13 }
 0x542   :  { %v2462_v18 = vpop.f32.mrf.mxu3 }
 0x543   :  { %v2463_v30 = vadd.f32 %v2462_v18, %v9776_v38 }
 0x544   :  { %v2764_v16 = vpop.f32.mrf.mxu1  ;;  %v2146_v39 = vpop.f32.mrf.mxu2 }
 0x545   :  { %3518 = vst [vmem:[#allocation2 + $0xb68] sm:$0xff] %v2463_v30  ;;  %v2765_v11 = vadd.f32 %v2764_v16, %v9809_v22  ;;  %v2147_v23 = vadd.f32 %v2146_v39, %v9821_v10 }
 0x546   :  { %v3075_v63 = vpop.f32.mrf.mxu0 }
 0x547   :  { %3507 = vst [vmem:[#allocation2 + $0xb10] sm:$0xff] %v2765_v11  ;;  %2504 = vmatmul.bf16.gmra.mxu3 %v14227_v48  ;;  %2803 = vmatmul.bf16.gmra.mxu1 %v14225_v13  ;;  %v3076_v43 = vadd.f32 %v3075_v63, %v9805_v55 }
 0x548   :  { %3505 = vst [vmem:[#allocation2 + $0xb00] sm:$0xff] %v2147_v23 }
 0x549   :  { %3512 = vst [vmem:[#allocation2 + $0xb38] sm:$0xff] %v3076_v43 }
 0x54a   :  { %v2465_v45 = vpop.f32.mrf.mxu3 }
 0x54b   :  { %v2466_v36 = vadd.f32 %v2465_v45, %v9776_v38 }
 0x54c   :  { %v2766_v40 = vpop.f32.mrf.mxu1  ;;  %v2148_v60 = vpop.f32.mrf.mxu2 }
 0x54d   :  { %3522 = vst [vmem:[#allocation2 + $0xb88] sm:$0xff] %v2466_v36  ;;  %v2767_v34 = vadd.f32 %v2766_v40, %v9809_v22  ;;  %v2149_v49 = vadd.f32 %v2148_v60, %v9821_v10 }
 0x54e   :  { %v3078_v6 = vpop.f32.mrf.mxu0 }
 0x54f   :  { %3511 = vst [vmem:[#allocation2 + $0xb30] sm:$0xff] %v2767_v34  ;;  %v3079_v7 = vadd.f32 %v3078_v6, %v9805_v55 }
 0x550   :  { %3509 = vst [vmem:[#allocation2 + $0xb20] sm:$0xff] %v2149_v49  ;;  %v14231_v49 = vld [vmem:[#allocation15_spill] sm:$0xff] }
 0x551   :  { %3516 = vst [vmem:[#allocation2 + $0xb58] sm:$0xff] %v3079_v7  ;;  %2190 = vmatmul.bf16.gmra.mxu2 %v14226_v54  ;;  %3117 = vmatmul.bf16.gmra.mxu0 %v14226_v54 }
 0x552   :  { %v2467_v31 = vpop.f32.mrf.mxu3 }
 0x553   :  { %v2468_v47 = vadd.f32 %v2467_v31, %v9776_v38 }
 0x554   :  { %v2769_v25 = vpop.f32.mrf.mxu1  ;;  %v2151_v50 = vpop.f32.mrf.mxu2 }
 0x555   :  { %3526 = vst [vmem:[#allocation2 + $0xba8] sm:$0xff] %v2468_v47  ;;  %v2770_v17 = vadd.f32 %v2769_v25, %v9809_v22  ;;  %v2152_v57 = vadd.f32 %v2151_v50, %v9821_v10 }
 0x556   :  { %v3080_v42 = vpop.f32.mrf.mxu0 }
 0x557   :  { %3515 = vst [vmem:[#allocation2 + $0xb50] sm:$0xff] %v2770_v17  ;;  %2509 = vmatmul.bf16.gmra.mxu3 %v14228_v20  ;;  %2808 = vmatmul.bf16.gmra.mxu1 %v14226_v54  ;;  %v3081_v58 = vadd.f32 %v3080_v42, %v9805_v55 }
 0x558   :  { %3513 = vst [vmem:[#allocation2 + $0xb40] sm:$0xff] %v2152_v57 }
 0x559   :  { %3520 = vst [vmem:[#allocation2 + $0xb78] sm:$0xff] %v3081_v58 }
 0x55a   :  { %v2470_v26 = vpop.f32.mrf.mxu3 }
 0x55b   :  { %v2471_v8 = vadd.f32 %v2470_v26, %v9776_v38 }
 0x55c   :  { %v2771_v5 = vpop.f32.mrf.mxu1  ;;  %v2153_v13 = vpop.f32.mrf.mxu2 }
 0x55d   :  { %3530 = vst [vmem:[#allocation2 + $0xbc8] sm:$0xff] %v2471_v8  ;;  %v2772_v0 = vadd.f32 %v2771_v5, %v9809_v22  ;;  %v2154_v59 = vadd.f32 %v2153_v13, %v9821_v10 }
 0x55e   :  { %v3083_v56 = vpop.f32.mrf.mxu0 }
 0x55f   :  { %3519 = vst [vmem:[#allocation2 + $0xb70] sm:$0xff] %v2772_v0  ;;  %v3084_v3 = vadd.f32 %v3083_v56, %v9805_v55 }
 0x560   :  { %3517 = vst [vmem:[#allocation2 + $0xb60] sm:$0xff] %v2154_v59 }
 0x561   :  { %3524 = vst [vmem:[#allocation2 + $0xb98] sm:$0xff] %v3084_v3  ;;  %2195 = vmatmul.bf16.gmra.mxu2 %v14227_v48  ;;  %3122 = vmatmul.bf16.gmra.mxu0 %v14227_v48 }
 0x562   :  { %v2472_v53 = vpop.f32.mrf.mxu3 }
 0x563   :  { %v2473_v14 = vadd.f32 %v2472_v53, %v9776_v38 }
 0x564   :  { %v2774_v61 = vpop.f32.mrf.mxu1  ;;  %v2156_v21 = vpop.f32.mrf.mxu2 }
 0x565   :  { %3534 = vst [vmem:[#allocation2 + $0xbe8] sm:$0xff] %v2473_v14  ;;  %v2775_v2 = vadd.f32 %v2774_v61, %v9809_v22  ;;  %v2157_v52 = vadd.f32 %v2156_v21, %v9821_v10 }
 0x566   :  { %v3085_v37 = vpop.f32.mrf.mxu0 }
 0x567   :  { %3523 = vst [vmem:[#allocation2 + $0xb90] sm:$0xff] %v2775_v2  ;;  %2514 = vmatmul.bf16.gmra.mxu3 %v14229_v15  ;;  %2813 = vmatmul.bf16.gmra.mxu1 %v14227_v48  ;;  %v3086_v9 = vadd.f32 %v3085_v37, %v9805_v55 }
 0x568   :  { %3521 = vst [vmem:[#allocation2 + $0xb80] sm:$0xff] %v2157_v52 }
 0x569   :  { %3528 = vst [vmem:[#allocation2 + $0xbb8] sm:$0xff] %v3086_v9 }
 0x56a   :  { %v2475_v51 = vpop.f32.mrf.mxu3 }
 0x56b   :  { %v2476_v44 = vadd.f32 %v2475_v51, %v9776_v38 }
 0x56c   :  { %v2776_v27 = vpop.f32.mrf.mxu1  ;;  %v2158_v54 = vpop.f32.mrf.mxu2 }
 0x56d   :  { %3538 = vst [vmem:[#allocation2 + $0xc08] sm:$0xff] %v2476_v44  ;;  %v2777_v32 = vadd.f32 %v2776_v27, %v9809_v22  ;;  %v2159_v62 = vadd.f32 %v2158_v54, %v9821_v10 }
 0x56e   :  { %v3088_v24 = vpop.f32.mrf.mxu0 }
 0x56f   :  { %3527 = vst [vmem:[#allocation2 + $0xbb0] sm:$0xff] %v2777_v32  ;;  %v3089_v35 = vadd.f32 %v3088_v24, %v9805_v55 }
 0x570   :  { %3525 = vst [vmem:[#allocation2 + $0xba0] sm:$0xff] %v2159_v62 }
 0x571   :  { %3532 = vst [vmem:[#allocation2 + $0xbd8] sm:$0xff] %v3089_v35  ;;  %2200 = vmatmul.bf16.gmra.mxu2 %v14228_v20  ;;  %3127 = vmatmul.bf16.gmra.mxu0 %v14228_v20 }
 0x572   :  { %v2477_v19 = vpop.f32.mrf.mxu3 }
 0x573   :  { %v2478_v12 = vadd.f32 %v2477_v19, %v9776_v38 }
 0x574   :  { %v2779_v41 = vpop.f32.mrf.mxu1  ;;  %v2161_v28 = vpop.f32.mrf.mxu2 }
 0x575   :  { %3542 = vst [vmem:[#allocation2 + $0xc28] sm:$0xff] %v2478_v12  ;;  %v2780_v33 = vadd.f32 %v2779_v41, %v9809_v22  ;;  %v2162_v1 = vadd.f32 %v2161_v28, %v9821_v10 }
 0x576   :  { %v3090_v29 = vpop.f32.mrf.mxu0 }
 0x577   :  { %3531 = vst [vmem:[#allocation2 + $0xbd0] sm:$0xff] %v2780_v33  ;;  %2519 = vmatmul.bf16.gmra.mxu3 %v14230_v4  ;;  %2818 = vmatmul.bf16.gmra.mxu1 %v14228_v20  ;;  %v3091_v18 = vadd.f32 %v3090_v29, %v9805_v55 }
 0x578   :  { %3529 = vst [vmem:[#allocation2 + $0xbc0] sm:$0xff] %v2162_v1 }
 0x579   :  { %3536 = vst [vmem:[#allocation2 + $0xbf8] sm:$0xff] %v3091_v18 }
 0x57a   :  { %v2480_v30 = vpop.f32.mrf.mxu3 }
 0x57b   :  { %v2481_v16 = vadd.f32 %v2480_v30, %v9776_v38 }
 0x57c   :  { %v2781_v11 = vpop.f32.mrf.mxu1  ;;  %v2163_v48 = vpop.f32.mrf.mxu2 }
 0x57d   :  { %3546 = vst [vmem:[#allocation2 + $0xc48] sm:$0xff] %v2481_v16  ;;  %v2782_v39 = vadd.f32 %v2781_v11, %v9809_v22  ;;  %v2164_v23 = vadd.f32 %v2163_v48, %v9821_v10 }
 0x57e   :  { %v3093_v63 = vpop.f32.mrf.mxu0 }
 0x57f   :  { %3535 = vst [vmem:[#allocation2 + $0xbf0] sm:$0xff] %v2782_v39  ;;  %v3094_v43 = vadd.f32 %v3093_v63, %v9805_v55 }
 0x580   :  { %3533 = vst [vmem:[#allocation2 + $0xbe0] sm:$0xff] %v2164_v23 }
 0x581   :  { %3540 = vst [vmem:[#allocation2 + $0xc18] sm:$0xff] %v3094_v43  ;;  %2205 = vmatmul.bf16.gmra.mxu2 %v14229_v15  ;;  %3132 = vmatmul.bf16.gmra.mxu0 %v14229_v15 }
 0x582   :  { %v2482_v45 = vpop.f32.mrf.mxu3 }
 0x583   :  { %v2483_v36 = vadd.f32 %v2482_v45, %v9776_v38 }
 0x584   :  { %v2784_v40 = vpop.f32.mrf.mxu1  ;;  %v2166_v60 = vpop.f32.mrf.mxu2 }
 0x585   :  { %3550 = vst [vmem:[#allocation2 + $0xc68] sm:$0xff] %v2483_v36  ;;  %v2785_v34 = vadd.f32 %v2784_v40, %v9809_v22  ;;  %v2167_v6 = vadd.f32 %v2166_v60, %v9821_v10 }
 0x586   :  { %v3095_v7 = vpop.f32.mrf.mxu0 }
 0x587   :  { %3539 = vst [vmem:[#allocation2 + $0xc10] sm:$0xff] %v2785_v34  ;;  %2524 = vmatmul.bf16.gmra.mxu3 %v14231_v49  ;;  %2823 = vmatmul.bf16.gmra.mxu1 %v14229_v15  ;;  %v3096_v31 = vadd.f32 %v3095_v7, %v9805_v55 }
 0x588   :  { %3537 = vst [vmem:[#allocation2 + $0xc00] sm:$0xff] %v2167_v6 }
 0x589   :  { %3544 = vst [vmem:[#allocation2 + $0xc38] sm:$0xff] %v3096_v31 }
 0x58a   :  { %v2485_v47 = vpop.f32.mrf.mxu3 }
 0x58b   :  { %v2486_v25 = vadd.f32 %v2485_v47, %v9776_v38 }
 0x58c   :  { %v2786_v17 = vpop.f32.mrf.mxu1  ;;  %v2168_v20 = vpop.f32.mrf.mxu2 }
 0x58d   :  { %3554 = vst [vmem:[#allocation2 + $0xc88] sm:$0xff] %v2486_v25  ;;  %v2787_v50 = vadd.f32 %v2786_v17, %v9809_v22  ;;  %v2169_v57 = vadd.f32 %v2168_v20, %v9821_v10 }
 0x58e   :  { %v3098_v42 = vpop.f32.mrf.mxu0 }
 0x58f   :  { %3543 = vst [vmem:[#allocation2 + $0xc30] sm:$0xff] %v2787_v50  ;;  %v3099_v58 = vadd.f32 %v3098_v42, %v9805_v55 }
 0x590   :  { %3541 = vst [vmem:[#allocation2 + $0xc20] sm:$0xff] %v2169_v57 }
 0x591   :  { %3548 = vst [vmem:[#allocation2 + $0xc58] sm:$0xff] %v3099_v58  ;;  %2210 = vmatmul.bf16.gmra.mxu2 %v14230_v4  ;;  %3137 = vmatmul.bf16.gmra.mxu0 %v14230_v4 }
 0x592   :  { %v2487_v26 = vpop.f32.mrf.mxu3 }
 0x593   :  { %v2488_v8 = vadd.f32 %v2487_v26, %v9776_v38 }
 0x594   :  { %v2789_v5 = vpop.f32.mrf.mxu1  ;;  %v2171_v13 = vpop.f32.mrf.mxu2 }
 0x595   :  { %3558 = vst [vmem:[#allocation2 + $0xca8] sm:$0xff] %v2488_v8  ;;  %v2790_v0 = vadd.f32 %v2789_v5, %v9809_v22  ;;  %v2172_v59 = vadd.f32 %v2171_v13, %v9821_v10 }
 0x596   :  { %v3100_v56 = vpop.f32.mrf.mxu0 }
 0x597   :  { %3547 = vst [vmem:[#allocation2 + $0xc50] sm:$0xff] %v2790_v0  ;;  %2529 = vmatmul.bf16.gmra.mxu3 %v9826_v46  ;;  %2828 = vmatmul.bf16.gmra.mxu1 %v14230_v4  ;;  %v3101_v3 = vadd.f32 %v3100_v56, %v9805_v55 }
 0x598   :  { %3545 = vst [vmem:[#allocation2 + $0xc40] sm:$0xff] %v2172_v59 }
 0x599   :  { %3552 = vst [vmem:[#allocation2 + $0xc78] sm:$0xff] %v3101_v3 }
 0x59a   :  { %v2490_v53 = vpop.f32.mrf.mxu3 }
 0x59b   :  { %v2491_v14 = vadd.f32 %v2490_v53, %v9776_v38 }
 0x59c   :  { %v2791_v61 = vpop.f32.mrf.mxu1  ;;  %v2173_v21 = vpop.f32.mrf.mxu2 }
 0x59d   :  { %3562 = vst [vmem:[#allocation2 + $0xcc8] sm:$0xff] %v2491_v14  ;;  %v2792_v2 = vadd.f32 %v2791_v61, %v9809_v22  ;;  %v2174_v15 = vadd.f32 %v2173_v21, %v9821_v10 }
 0x59e   :  { %v3103_v52 = vpop.f32.mrf.mxu0 }
 0x59f   :  { %3551 = vst [vmem:[#allocation2 + $0xc70] sm:$0xff] %v2792_v2  ;;  %v3104_v37 = vadd.f32 %v3103_v52, %v9805_v55 }
 0x5a0   :  { %3549 = vst [vmem:[#allocation2 + $0xc60] sm:$0xff] %v2174_v15 }
 0x5a1   :  { %3556 = vst [vmem:[#allocation2 + $0xc98] sm:$0xff] %v3104_v37  ;;  %2215 = vmatmul.bf16.gmra.mxu2 %v14231_v49  ;;  %3142 = vmatmul.bf16.gmra.mxu0 %v14231_v49 }
 0x5a2   :  { %v2492_v9 = vpop.f32.mrf.mxu3 }
 0x5a3   :  { %v2493_v51 = vadd.f32 %v2492_v9, %v9776_v38 }
 0x5a4   :  { %v2794_v44 = vpop.f32.mrf.mxu1  ;;  %v2176_v32 = vpop.f32.mrf.mxu2 }
 0x5a5   :  { %3566 = vst [vmem:[#allocation2 + $0xce8] sm:$0xff] %v2493_v51  ;;  %v2795_v27 = vadd.f32 %v2794_v44, %v9809_v22  ;;  %v2177_v54 = vadd.f32 %v2176_v32, %v9821_v10 }
 0x5a6   :  { %v3105_v62 = vpop.f32.mrf.mxu0 }
 0x5a7   :  { %3555 = vst [vmem:[#allocation2 + $0xc90] sm:$0xff] %v2795_v27  ;;  %2833 = vmatmul.bf16.gmra.mxu1 %v14231_v49  ;;  %v3106_v24 = vadd.f32 %v3105_v62, %v9805_v55 }
 0x5a8   :  { %3553 = vst [vmem:[#allocation2 + $0xc80] sm:$0xff] %v2177_v54 }
 0x5a9   :  { %3560 = vst [vmem:[#allocation2 + $0xcb8] sm:$0xff] %v3106_v24 }
 0x5aa   :  { %v2495_v35 = vpop.f32.mrf.mxu3 }
 0x5ab   :  { %v2496_v19 = vadd.f32 %v2495_v35, %v9776_v38 }
 0x5ac   :  { %v2796_v12 = vpop.f32.mrf.mxu1  ;;  %v2178_v33 = vpop.f32.mrf.mxu2 }
 0x5ad   :  { %3570 = vst [vmem:[#allocation2 + $0xd08] sm:$0xff] %v2496_v19  ;;  %v2797_v41 = vadd.f32 %v2796_v12, %v9809_v22  ;;  %v2179_v28 = vadd.f32 %v2178_v33, %v9821_v10 }
 0x5ae   :  { %v3108_v4 = vpop.f32.mrf.mxu0 }
 0x5af   :  { %3559 = vst [vmem:[#allocation2 + $0xcb0] sm:$0xff] %v2797_v41  ;;  %v3109_v1 = vadd.f32 %v3108_v4, %v9805_v55 }
 0x5b0   :  { %3557 = vst [vmem:[#allocation2 + $0xca0] sm:$0xff] %v2179_v28 }
 0x5b1   :  { %3564 = vst [vmem:[#allocation2 + $0xcd8] sm:$0xff] %v3109_v1  ;;  %2220 = vmatmul.bf16.gmra.mxu2 %v9826_v46  ;;  %3147 = vmatmul.bf16.gmra.mxu0 %v9826_v46 }
 0x5b2   :  { %v2497_v29 = vpop.f32.mrf.mxu3 }
 0x5b3   :  { %v2498_v18 = vadd.f32 %v2497_v29, %v9776_v38 }
 0x5b4   :  { %v2799_v30 = vpop.f32.mrf.mxu1  ;;  %v2181_v11 = vpop.f32.mrf.mxu2 }
 0x5b5   :  { %3574 = vst [vmem:[#allocation2 + $0xd28] sm:$0xff] %v2498_v18  ;;  %v2800_v16 = vadd.f32 %v2799_v30, %v9809_v22  ;;  %v2182_v39 = vadd.f32 %v2181_v11, %v9821_v10 }
 0x5b6   :  { %v3110_v48 = vpop.f32.mrf.mxu0 }
 0x5b7   :  { %3563 = vst [vmem:[#allocation2 + $0xcd0] sm:$0xff] %v2800_v16  ;;  %2838 = vmatmul.bf16.gmra.mxu1 %v9826_v46  ;;  %v3111_v23 = vadd.f32 %v3110_v48, %v9805_v55 }
 0x5b8   :  { %3561 = vst [vmem:[#allocation2 + $0xcc0] sm:$0xff] %v2182_v39 }
 0x5b9   :  { %3568 = vst [vmem:[#allocation2 + $0xcf8] sm:$0xff] %v3111_v23 }
 0x5ba   :  { %v2500_v63 = vpop.f32.mrf.mxu3 }
 0x5bb   :  { %v2501_v43 = vadd.f32 %v2500_v63, %v9776_v38 }
 0x5bc   :  { %v2801_v45 = vpop.f32.mrf.mxu1  ;;  %v2183_v40 = vpop.f32.mrf.mxu2 }
 0x5bd   :  { %3578 = vst [vmem:[#allocation2 + $0xd48] sm:$0xff] %v2501_v43  ;;  %v2802_v36 = vadd.f32 %v2801_v45, %v9809_v22  ;;  %v2184_v34 = vadd.f32 %v2183_v40, %v9821_v10 }
 0x5be   :  { %v3113_v60 = vpop.f32.mrf.mxu0 }
 0x5bf   :  { %3567 = vst [vmem:[#allocation2 + $0xcf0] sm:$0xff] %v2802_v36  ;;  %v3114_v46 = vadd.f32 %v3113_v60, %v9805_v55 }
 0x5c0   :  { %3565 = vst [vmem:[#allocation2 + $0xce0] sm:$0xff] %v2184_v34 }
 0x5c1   :  { %3572 = vst [vmem:[#allocation2 + $0xd18] sm:$0xff] %v3114_v46 }
 0x5c2   :  { %v2502_v49 = vpop.f32.mrf.mxu3 }
 0x5c3   :  { %v2503_v6 = vadd.f32 %v2502_v49, %v9776_v38 }
 0x5c4   :  { %v2804_v7 = vpop.f32.mrf.mxu1  ;;  %v2186_v47 = vpop.f32.mrf.mxu2 }
 0x5c5   :  { %3582 = vst [vmem:[#allocation2 + $0xd68] sm:$0xff] %v2503_v6  ;;  %v2805_v31 = vadd.f32 %v2804_v7, %v9809_v22  ;;  %v2187_v25 = vadd.f32 %v2186_v47, %v9821_v10 }
 0x5c6   :  { %v3115_v17 = vpop.f32.mrf.mxu0 }
 0x5c7   :  { %3571 = vst [vmem:[#allocation2 + $0xd10] sm:$0xff] %v2805_v31  ;;  %v3116_v50 = vadd.f32 %v3115_v17, %v9805_v55 }
 0x5c8   :  { %3569 = vst [vmem:[#allocation2 + $0xd00] sm:$0xff] %v2187_v25 }
 0x5c9   :  { %3576 = vst [vmem:[#allocation2 + $0xd38] sm:$0xff] %v3116_v50 }
 0x5ca   :  { %v2505_v20 = vpop.f32.mrf.mxu3 }
 0x5cb   :  { %v2506_v57 = vadd.f32 %v2505_v20, %v9776_v38 }
 0x5cc   :  { %v2806_v42 = vpop.f32.mrf.mxu1  ;;  %v2188_v26 = vpop.f32.mrf.mxu2 }
 0x5cd   :  { %3586 = vst [vmem:[#allocation2 + $0xd88] sm:$0xff] %v2506_v57  ;;  %v2807_v58 = vadd.f32 %v2806_v42, %v9809_v22  ;;  %v2189_v8 = vadd.f32 %v2188_v26, %v9821_v10 }
 0x5ce   :  { %v3118_v5 = vpop.f32.mrf.mxu0 }
 0x5cf   :  { %3575 = vst [vmem:[#allocation2 + $0xd30] sm:$0xff] %v2807_v58  ;;  %v3119_v0 = vadd.f32 %v3118_v5, %v9805_v55 }
 0x5d0   :  { %3573 = vst [vmem:[#allocation2 + $0xd20] sm:$0xff] %v2189_v8 }
 0x5d1   :  { %3580 = vst [vmem:[#allocation2 + $0xd58] sm:$0xff] %v3119_v0 }
 0x5d2   :  { %v2507_v13 = vpop.f32.mrf.mxu3 }
 0x5d3   :  { %v2508_v59 = vadd.f32 %v2507_v13, %v9776_v38 }
 0x5d4   :  { %v2809_v56 = vpop.f32.mrf.mxu1  ;;  %v2191_v53 = vpop.f32.mrf.mxu2 }
 0x5d5   :  { %3590 = vst [vmem:[#allocation2 + $0xda8] sm:$0xff] %v2508_v59  ;;  %v2810_v3 = vadd.f32 %v2809_v56, %v9809_v22  ;;  %v2192_v14 = vadd.f32 %v2191_v53, %v9821_v10 }
 0x5d6   :  { %v3120_v61 = vpop.f32.mrf.mxu0 }
 0x5d7   :  { %3579 = vst [vmem:[#allocation2 + $0xd50] sm:$0xff] %v2810_v3  ;;  %v3121_v2 = vadd.f32 %v3120_v61, %v9805_v55 }
 0x5d8   :  { %3577 = vst [vmem:[#allocation2 + $0xd40] sm:$0xff] %v2192_v14 }
 0x5d9   :  { %3584 = vst [vmem:[#allocation2 + $0xd78] sm:$0xff] %v3121_v2 }
 0x5da   :  { %v2510_v21 = vpop.f32.mrf.mxu3 }
 0x5db   :  { %v2511_v15 = vadd.f32 %v2510_v21, %v9776_v38 }
 0x5dc   :  { %v2811_v52 = vpop.f32.mrf.mxu1  ;;  %v2193_v9 = vpop.f32.mrf.mxu2 }
 0x5dd   :  { %3594 = vst [vmem:[#allocation2 + $0xdc8] sm:$0xff] %v2511_v15  ;;  %v2812_v37 = vadd.f32 %v2811_v52, %v9809_v22  ;;  %v2194_v51 = vadd.f32 %v2193_v9, %v9821_v10 }
 0x5de   :  { %v3123_v44 = vpop.f32.mrf.mxu0 }
 0x5df   :  { %3583 = vst [vmem:[#allocation2 + $0xd70] sm:$0xff] %v2812_v37  ;;  %v3124_v27 = vadd.f32 %v3123_v44, %v9805_v55 }
 0x5e0   :  { %3581 = vst [vmem:[#allocation2 + $0xd60] sm:$0xff] %v2194_v51 }
 0x5e1   :  { %3588 = vst [vmem:[#allocation2 + $0xd98] sm:$0xff] %v3124_v27 }
 0x5e2   :  { %v2512_v32 = vpop.f32.mrf.mxu3 }
 0x5e3   :  { %v2513_v54 = vadd.f32 %v2512_v32, %v9776_v38 }
 0x5e4   :  { %v2814_v62 = vpop.f32.mrf.mxu1  ;;  %v2196_v35 = vpop.f32.mrf.mxu2 }
 0x5e5   :  { %3598 = vst [vmem:[#allocation2 + $0xde8] sm:$0xff] %v2513_v54  ;;  %v2815_v24 = vadd.f32 %v2814_v62, %v9809_v22  ;;  %v2197_v19 = vadd.f32 %v2196_v35, %v9821_v10 }
 0x5e6   :  { %v3125_v12 = vpop.f32.mrf.mxu0 }
 0x5e7   :  { %3587 = vst [vmem:[#allocation2 + $0xd90] sm:$0xff] %v2815_v24  ;;  %v3126_v41 = vadd.f32 %v3125_v12, %v9805_v55  ;;  %v10500_v12 = vld [vmem:[%s13990_s4] sm:$0xf] }
 0x5e8   :  { %3585 = vst [vmem:[#allocation2 + $0xd80] sm:$0xff] %v2197_v19  ;;  %v10495_v19 = vld [vmem:[%s13990_s4 + $0x4] sm:$0xf] }
 0x5e9   :  { %3592 = vst [vmem:[#allocation2 + $0xdb8] sm:$0xff] %v3126_v41 }
 0x5ea   :  { %v2515_v33 = vpop.f32.mrf.mxu3  ;;  %14232 = vst [vmem:[#allocation3_spill] sm:$0xff] %v10495_v19 }
 0x5eb   :  { %v2516_v28 = vadd.f32 %v2515_v33, %v9776_v38  ;;  %14233 = vst [vmem:[#allocation4_spill] sm:$0xff] %v10500_v12  ;;  %v10506_v33 = vld [vmem:[%s13990_s4 + $0x4] sm:$0xf]  ;;  %v11017_v12 = vld [vmem:[%s13990_s4 + $0xcc] sm:$0xf] }
 0x5ec   :  { %v2816_v4 = vpop.f32.mrf.mxu1  ;;  %v2198_v29 = vpop.f32.mrf.mxu2  ;;  %14234 = vst [vmem:[#allocation5_spill] sm:$0xff] %v10506_v33  ;;  %v11167_v33 = vld [vmem:[%s13991_s6 + $0xc] sm:$0xf] }
 0x5ed   :  { %3602 = vst [vmem:[#allocation2 + $0xe08] sm:$0xff] %v2516_v28  ;;  %v2817_v1 = vadd.f32 %v2816_v4, %v9809_v22  ;;  %v2199_v18 = vadd.f32 %v2198_v29, %v9821_v10  ;;  %v10511_v28 = vld [vmem:[%s13990_s4] sm:$0xf]  ;;  %v10516_v4 = vld [vmem:[%s13990_s4 + $0xc] sm:$0xf] }
 0x5ee   :  { %v3128_v30 = vpop.f32.mrf.mxu0  ;;  %14235 = vst [vmem:[#allocation6_spill] sm:$0xff] %v10516_v4  ;;  %v10526_v29 = vld [vmem:[%s13990_s4 + $0xc] sm:$0xf] }
 0x5ef   :  { %3591 = vst [vmem:[#allocation2 + $0xdb0] sm:$0xff] %v2817_v1  ;;  %v3129_v16 = vadd.f32 %v3128_v30, %v9805_v55  ;;  %v10532_v30 = vld [vmem:[%s13990_s4 + $0x8] sm:$0xf] }
 0x5f0   :  { %3589 = vst [vmem:[#allocation2 + $0xda0] sm:$0xff] %v2199_v18 }
 0x5f1   :  { %3596 = vst [vmem:[#allocation2 + $0xdd8] sm:$0xff] %v3129_v16  ;;  %v10537_v16 = vld [vmem:[%s13990_s4 + $0x10] sm:$0xf0] }
 0x5f2   :  { %v2517_v11 = vpop.f32.mrf.mxu3  ;;  %14237 = vst [vmem:[#allocation8_spill] sm:$0xff] %v10526_v29  ;;  %v11147_v29 = vld [vmem:[%s13991_s6 + $0x4] sm:$0xf] }
 0x5f3   :  { %v2518_v39 = vadd.f32 %v2517_v11, %v9776_v38  ;;  %14238 = vst [vmem:[#allocation9_spill] sm:$0xff] %v10532_v30  ;;  %v10542_v11 = vld [vmem:[%s13990_s4 + $0xc] sm:$0xf0]  ;;  %v11142_v30 = vld [vmem:[%s13990_s4 + $0xf4] sm:$0xf0] }
 0x5f4   :  { %v2819_v48 = vpop.f32.mrf.mxu1  ;;  %v2201_v63 = vpop.f32.mrf.mxu2  ;;  %14239 = vst [vmem:[#allocation10_spill] sm:$0xff] %v10537_v16  ;;  %v10804_v16 = vld [vmem:[%s13990_s4 + $0x78] sm:$0xf0] }
 0x5f5   :  { %3606 = vst [vmem:[#allocation2 + $0xe28] sm:$0xff] %v2518_v39  ;;  %v2820_v23 = vadd.f32 %v2819_v48, %v9809_v22  ;;  %v2202_v43 = vadd.f32 %v2201_v63, %v9821_v10  ;;  %v10547_v39 = vld [vmem:[%s13990_s4 + $0x10] sm:$0xf0]  ;;  %v10552_v48 = vld [vmem:[%s13990_s4 + $0xc] sm:$0xf0] }
 0x5f6   :  { %v3130_v45 = vpop.f32.mrf.mxu0  ;;  %14240 = vst [vmem:[#allocation11_spill] sm:$0xff] %v10542_v11  ;;  %v10557_v63 = vld [vmem:[%s13990_s4 + $0x18] sm:$0xf0]  ;;  %v11007_v11 = vld [vmem:[%s13990_s4 + $0xcc] sm:$0xf] }
 0x5f7   :  { %3595 = vst [vmem:[#allocation2 + $0xdd0] sm:$0xff] %v2820_v23  ;;  %v3131_v36 = vadd.f32 %v3130_v45, %v9805_v55 }
 0x5f8   :  { %3593 = vst [vmem:[#allocation2 + $0xdc0] sm:$0xff] %v2202_v43  ;;  %v10562_v43 = vld [vmem:[%s13990_s4 + $0x14] sm:$0xf0] }
 0x5f9   :  { %3600 = vst [vmem:[#allocation2 + $0xdf8] sm:$0xff] %v3131_v36  ;;  %v10568_v36 = vld [vmem:[%s13990_s4 + $0x18] sm:$0xf0] }
 0x5fa   :  { %v2520_v40 = vpop.f32.mrf.mxu3  ;;  %14241 = vst [vmem:[#allocation12_spill] sm:$0xff] %v10547_v39  ;;  %v12431_v39 = vmov 0.0  }
 0x5fb   :  { %v2521_v34 = vadd.f32 %v2520_v40, %v9776_v38  ;;  %14242 = vst [vmem:[#allocation13_spill] sm:$0xff] %v10552_v48  ;;  %v10573_v40 = vld [vmem:[%s13990_s4 + $0x14] sm:$0xf0]  ;;  %v12435_v48 = vmov 0.0  }
 0x5fc   :  { %v2821_v60 = vpop.f32.mrf.mxu1  ;;  %v2203_v49 = vpop.f32.mrf.mxu2  ;;  %14243 = vst [vmem:[#allocation14_spill] sm:$0xff] %v10557_v63  ;;  %v10851_v63 = vld [vmem:[%s13990_s4 + $0x88] sm:$0xf] }
 0x5fd   :  { %3610 = vst [vmem:[#allocation2 + $0xe48] sm:$0xff] %v2521_v34  ;;  %v2822_v46 = vadd.f32 %v2821_v60, %v9809_v22  ;;  %v2204_v6 = vadd.f32 %v2203_v49, %v9821_v10  ;;  %v10578_v34 = vld [vmem:[%s13990_s4 + $0x24] sm:$0xf] }
 0x5fe   :  { %v3133_v7 = vpop.f32.mrf.mxu0  ;;  %14244 = vst [vmem:[#allocation15_spill] sm:$0xff] %v10562_v43  ;;  %v10588_v49 = vld [vmem:[%s13990_s4 + $0x24] sm:$0xf]  ;;  %v10861_v43 = vld [vmem:[%s13990_s4 + $0x88] sm:$0xf] }
 0x5ff   :  { %3599 = vst [vmem:[#allocation2 + $0xdf0] sm:$0xff] %v2822_v46  ;;  %v3134_v31 = vadd.f32 %v3133_v7, %v9805_v55  ;;  %v10583_v46 = vld [vmem:[%s13990_s4 + $0x20] sm:$0xf] }
 0x600   :  { %3597 = vst [vmem:[#allocation2 + $0xde0] sm:$0xff] %v2204_v6  ;;  %v10593_v6 = vld [vmem:[%s13990_s4 + $0x20] sm:$0xf] }
 0x601   :  { %3604 = vst [vmem:[#allocation2 + $0xe18] sm:$0xff] %v3134_v31  ;;  %v10599_v31 = vld [vmem:[%s13990_s4 + $0x2c] sm:$0xf] }
 0x602   :  { %v2522_v47 = vpop.f32.mrf.mxu3  ;;  %14245 = vst [vmem:[#allocation16_spill] sm:$0xff] %v10568_v36  ;;  %v11162_v36 = vld [vmem:[%s13991_s6] sm:$0xf] }
 0x603   :  { %v2523_v25 = vadd.f32 %v2522_v47, %v9776_v38  ;;  %14246 = vst [vmem:[#allocation17_spill] sm:$0xff] %v10573_v40  ;;  %v10604_v47 = vld [vmem:[%s13990_s4 + $0x28] sm:$0xf]  ;;  %v11127_v40 = vld [vmem:[%s13990_s4 + $0xf8] sm:$0xf0] }
 0x604   :  { %v2824_v17 = vpop.f32.mrf.mxu1  ;;  %v2206_v20 = vpop.f32.mrf.mxu2  ;;  %14247 = vst [vmem:[#allocation18_spill] sm:$0xff] %v10578_v34  ;;  %v10809_v34 = vld [vmem:[%s13990_s4 + $0x74] sm:$0xf0] }
 0x605   :  { %3614 = vst [vmem:[#allocation2 + $0xe68] sm:$0xff] %v2523_v25  ;;  %v2825_v50 = vadd.f32 %v2824_v17, %v9809_v22  ;;  %v2207_v57 = vadd.f32 %v2206_v20, %v9821_v10  ;;  %v10609_v25 = vld [vmem:[%s13990_s4 + $0x2c] sm:$0xf]  ;;  %v10614_v17 = vld [vmem:[%s13990_s4 + $0x28] sm:$0xf] }
 0x606   :  { %v3135_v42 = vpop.f32.mrf.mxu0  ;;  %14248 = vst [vmem:[#allocation19_spill] sm:$0xff] %v10583_v46  ;;  %v11027_v46 = vld [vmem:[%s13990_s4 + $0xd0] sm:$0xf0] }
 0x607   :  { %3603 = vst [vmem:[#allocation2 + $0xe10] sm:$0xff] %v2825_v50  ;;  %v3136_v58 = vadd.f32 %v3135_v42, %v9805_v55  ;;  %v10619_v50 = vld [vmem:[%s13990_s4 + $0x30] sm:$0xf0] }
 0x608   :  { %3601 = vst [vmem:[#allocation2 + $0xe00] sm:$0xff] %v2207_v57  ;;  %v10624_v57 = vld [vmem:[%s13990_s4 + $0x2c] sm:$0xf0]  ;;  %v10629_v42 = vld [vmem:[%s13990_s4 + $0x30] sm:$0xf0] }
 0x609   :  { %3608 = vst [vmem:[#allocation2 + $0xe38] sm:$0xff] %v3136_v58 }
 0x60a   :  { %v2525_v26 = vpop.f32.mrf.mxu3  ;;  %14249 = vst [vmem:[#allocation20_spill] sm:$0xff] %v10593_v6 }
 0x60b   :  { %v2526_v8 = vadd.f32 %v2525_v26, %v9776_v38  ;;  %14250 = vst [vmem:[#allocation21_spill] sm:$0xff] %v10599_v31  ;;  %v10635_v26 = vld [vmem:[%s13990_s4 + $0x2c] sm:$0xf0] }
 0x60c   :  { %v2826_v5 = vpop.f32.mrf.mxu1  ;;  %v2208_v13 = vpop.f32.mrf.mxu2  ;;  %14251 = vst [vmem:[#allocation22_spill] sm:$0xff] %v10604_v47  ;;  %v10892_v47 = vld [vmem:[%s13990_s4 + $0x94] sm:$0xf0] }
 0x60d   :  { %3618 = vst [vmem:[#allocation2 + $0xe88] sm:$0xff] %v2526_v8  ;;  %v2827_v0 = vadd.f32 %v2826_v5, %v9809_v22  ;;  %v2209_v59 = vadd.f32 %v2208_v13, %v9821_v10  ;;  %v10640_v8 = vld [vmem:[%s13990_s4 + $0x38] sm:$0xf0]  ;;  %v10645_v5 = vld [vmem:[%s13990_s4 + $0x34] sm:$0xf0] }
 0x60e   :  { %v3138_v56 = vpop.f32.mrf.mxu0  ;;  %14252 = vst [vmem:[#allocation23_spill] sm:$0xff] %v10614_v17  ;;  %v10655_v13 = vld [vmem:[%s13990_s4 + $0x34] sm:$0xf0] }
 0x60f   :  { %3607 = vst [vmem:[#allocation2 + $0xe30] sm:$0xff] %v2827_v0  ;;  %v3139_v3 = vadd.f32 %v3138_v56, %v9805_v55  ;;  %v10650_v0 = vld [vmem:[%s13990_s4 + $0x38] sm:$0xf0] }
 0x610   :  { %3605 = vst [vmem:[#allocation2 + $0xe20] sm:$0xff] %v2209_v59  ;;  %v10660_v59 = vld [vmem:[%s13990_s4 + $0x44] sm:$0xf] }
 0x611   :  { %3612 = vst [vmem:[#allocation2 + $0xe58] sm:$0xff] %v3139_v3  ;;  %v10665_v3 = vld [vmem:[%s13990_s4 + $0x40] sm:$0xf] }
 0x612   :  { %v2527_v53 = vpop.f32.mrf.mxu3  ;;  %14253 = vst [vmem:[#allocation24_spill] sm:$0xff] %v10619_v50 }
 0x613   :  { %v2528_v14 = vadd.f32 %v2527_v53, %v9776_v38  ;;  %14254 = vst [vmem:[#allocation25_spill] sm:$0xff] %v10624_v57  ;;  %v10670_v53 = vld [vmem:[%s13990_s4 + $0x44] sm:$0xf]  ;;  %v11022_v57 = vld [vmem:[%s13990_s4 + $0xc8] sm:$0xf] }
 0x614   :  { %v2829_v61 = vpop.f32.mrf.mxu1  ;;  %v2211_v21 = vpop.f32.mrf.mxu2  ;;  %14255 = vst [vmem:[#allocation26_spill] sm:$0xff] %v10640_v8  ;;  %v10881_v8 = vld [vmem:[%s13990_s4 + $0x8c] sm:$0xf0] }
 0x615   :  { %3622 = vst [vmem:[#allocation2 + $0xea8] sm:$0xff] %v2528_v14  ;;  %v2830_v2 = vadd.f32 %v2829_v61, %v9809_v22  ;;  %v2212_v15 = vadd.f32 %v2211_v21, %v9821_v10  ;;  %v10676_v61 = vld [vmem:[%s13990_s4 + $0x40] sm:$0xf]  ;;  %v10686_v21 = vld [vmem:[%s13990_s4 + $0x48] sm:$0xf] }
 0x616   :  { %v3140_v52 = vpop.f32.mrf.mxu0  ;;  %14256 = vst [vmem:[#allocation27_spill] sm:$0xff] %v10645_v5 }
 0x617   :  { %3611 = vst [vmem:[#allocation2 + $0xe50] sm:$0xff] %v2830_v2  ;;  %v3141_v37 = vadd.f32 %v3140_v52, %v9805_v55  ;;  %v10681_v2 = vld [vmem:[%s13990_s4 + $0x4c] sm:$0xf] }
 0x618   :  { %3609 = vst [vmem:[#allocation2 + $0xe40] sm:$0xff] %v2212_v15  ;;  %v10691_v52 = vld [vmem:[%s13990_s4 + $0x4c] sm:$0xf] }
 0x619   :  { %3616 = vst [vmem:[#allocation2 + $0xe78] sm:$0xff] %v3141_v37  ;;  %v10696_v37 = vld [vmem:[%s13990_s4 + $0x48] sm:$0xf] }
 0x61a   :  { %v2530_v9 = vpop.f32.mrf.mxu3  ;;  %14257 = vst [vmem:[#allocation28_spill] sm:$0xff] %v10650_v0 }
 0x61b   :  { %v2531_v51 = vadd.f32 %v2530_v9, %v9776_v38  ;;  %14258 = vst [vmem:[#allocation29_spill] sm:$0xff] %v10655_v13  ;;  %v10701_v9 = vld [vmem:[%s13990_s4 + $0x50] sm:$0xf0] }
 0x61c   :  { %v2831_v44 = vpop.f32.mrf.mxu1  ;;  %v2213_v32 = vpop.f32.mrf.mxu2  ;;  %14259 = vst [vmem:[#allocation30_spill] sm:$0xff] %v10660_v59  ;;  %v10815_v59 = vld [vmem:[%s13990_s4 + $0x78] sm:$0xf0] }
 0x61d   :  { %3626 = vst [vmem:[#allocation2 + $0xec8] sm:$0xff] %v2531_v51  ;;  %v2832_v27 = vadd.f32 %v2831_v44, %v9809_v22  ;;  %v2214_v54 = vadd.f32 %v2213_v32, %v9821_v10  ;;  %v10707_v44 = vld [vmem:[%s13990_s4 + $0x4c] sm:$0xf0] }
 0x61e   :  { %v3143_v62 = vpop.f32.mrf.mxu0  ;;  %14260 = vst [vmem:[#allocation31_spill] sm:$0xff] %v10665_v3  ;;  %v10717_v32 = vld [vmem:[%s13990_s4 + $0x4c] sm:$0xf0]  ;;  %v11047_v3 = vld [vmem:[%s13990_s4 + $0xd8] sm:$0xf0] }
 0x61f   :  { %3615 = vst [vmem:[#allocation2 + $0xe70] sm:$0xff] %v2832_v27  ;;  %v3144_v24 = vadd.f32 %v3143_v62, %v9805_v55  ;;  %v10712_v27 = vld [vmem:[%s13990_s4 + $0x50] sm:$0xf0]  ;;  %v10727_v62 = vld [vmem:[%s13990_s4 + $0x54] sm:$0xf0] }
 0x620   :  { %3613 = vst [vmem:[#allocation2 + $0xe60] sm:$0xff] %v2214_v54  ;;  %v10722_v54 = vld [vmem:[%s13990_s4 + $0x58] sm:$0xf0] }
 0x621   :  { %3620 = vst [vmem:[#allocation2 + $0xe98] sm:$0xff] %v3144_v24 }
 0x622   :  { %v2532_v35 = vpop.f32.mrf.mxu3  ;;  %14261 = vst [vmem:[#allocation32_spill] sm:$0xff] %v10681_v2  ;;  %v10902_v2 = vld [vmem:[%s13990_s4 + $0x94] sm:$0xf0] }
 0x623   :  { %v2533_v41 = vadd.f32 %v2532_v35, %v9776_v38  ;;  %v10521_v38 = vld [vmem:[%s13990_s4 + $0x8] sm:$0xf]  ;;  %14262 = vst [vmem:[#allocation33_spill] sm:$0xff] %v10686_v21  ;;  %v10732_v35 = vld [vmem:[%s13990_s4 + $0x58] sm:$0xf0] }
 0x624   :  { %v2834_v1 = vpop.f32.mrf.mxu1  ;;  %14236 = vst [vmem:[#allocation7_spill] sm:$0xff] %v10521_v38  ;;  %v2216_v23 = vpop.f32.mrf.mxu2  ;;  %v10866_v38 = vld [vmem:[%s13990_s4 + $0x90] sm:$0xf0]  ;;  %v10932_v21 = vld [vmem:[%s13990_s4 + $0xa8] sm:$0xf] }
 0x625   :  { %3630 = vst [vmem:[#allocation2 + $0xee8] sm:$0xff] %v2533_v41  ;;  %v2835_v18 = vadd.f32 %v2834_v1, %v9809_v22  ;;  %v2217_v45 = vadd.f32 %v2216_v23, %v9821_v10  ;;  %v10737_v41 = vld [vmem:[%s13990_s4 + $0x54] sm:$0xf0]  ;;  %v10748_v23 = vld [vmem:[%s13990_s4 + $0x60] sm:$0xf] }
 0x626   :  { %v3145_v60 = vpop.f32.mrf.mxu0  ;;  %14263 = vst [vmem:[#allocation34_spill] sm:$0xff] %v10701_v9  ;;  %v10820_v9 = vld [vmem:[%s13990_s4 + $0x74] sm:$0xf0] }
 0x627   :  { %3619 = vst [vmem:[#allocation2 + $0xe90] sm:$0xff] %v2835_v18  ;;  %v3146_v7 = vadd.f32 %v3145_v60, %v9805_v55  ;;  %v10743_v18 = vld [vmem:[%s13990_s4 + $0x64] sm:$0xf]  ;;  %v10758_v60 = vld [vmem:[%s13990_s4 + $0x60] sm:$0xf] }
 0x628   :  { %3617 = vst [vmem:[#allocation2 + $0xe80] sm:$0xff] %v2217_v45  ;;  %v10753_v45 = vld [vmem:[%s13990_s4 + $0x64] sm:$0xf] }
 0x629   :  { %3624 = vst [vmem:[#allocation2 + $0xeb8] sm:$0xff] %v3146_v7  ;;  %v10763_v7 = vld [vmem:[%s13990_s4 + $0x6c] sm:$0xf] }
 0x62a   :  { %14264 = vst [vmem:[#allocation35_spill] sm:$0xff] %v10707_v44  ;;  %v11042_v44 = vld [vmem:[%s13990_s4 + $0xcc] sm:$0xf0] }
 0x62b   :  { %14265 = vst [vmem:[#allocation36_spill] sm:$0xff] %v10722_v54  ;;  %v10907_v54 = vld [vmem:[%s13990_s4 + $0xa4] sm:$0xf] }
 0x62c   :  { %v2836_v20 = vpop.f32.mrf.mxu1  ;;  %v2218_v56 = vpop.f32.mrf.mxu2  ;;  %14266 = vst [vmem:[#allocation37_spill] sm:$0xff] %v10727_v62  ;;  %v10922_v62 = vld [vmem:[%s13990_s4 + $0xa0] sm:$0xf] }
 0x62d   :  { %v2837_v58 = vadd.f32 %v2836_v20, %v9809_v22  ;;  %v2219_v14 = vadd.f32 %v2218_v56, %v9821_v10  ;;  %14267 = vst [vmem:[#allocation38_spill] sm:$0xff] %v10743_v18  ;;  %v10768_v20 = vld [vmem:[%s13990_s4 + $0x68] sm:$0xf]  ;;  %v10773_v56 = vld [vmem:[%s13990_s4 + $0x6c] sm:$0xf] }
 0x62e   :  { %v3148_v15 = vpop.f32.mrf.mxu0  ;;  %14268 = vst [vmem:[#allocation39_spill] sm:$0xff] %v10748_v23  ;;  %v10825_v18 = vld [vmem:[%s13990_s4 + $0x84] sm:$0xf]  ;;  %v11062_v23 = vld [vmem:[%s13990_s4 + $0xd4] sm:$0xf0] }
 0x62f   :  { %3623 = vst [vmem:[#allocation2 + $0xeb0] sm:$0xff] %v2837_v58  ;;  %v3149_v51 = vadd.f32 %v3148_v15, %v9805_v55 }
 0x630   :  { %3621 = vst [vmem:[#allocation2 + $0xea0] sm:$0xff] %v2219_v14  ;;  %v10778_v14 = vld [vmem:[%s13990_s4 + $0x68] sm:$0xf] }
 0x631   :  { %3628 = vst [vmem:[#allocation2 + $0xed8] sm:$0xff] %v3149_v51  ;;  %v10784_v51 = vld [vmem:[%s13990_s4 + $0x70] sm:$0xf0] }
 0x632   :  { %14269 = vst [vmem:[#allocation40_spill] sm:$0xff] %v10763_v7  ;;  %v10937_v7 = vld [vmem:[%s13990_s4 + $0xac] sm:$0xf] }
 0x633   :  { %14270 = vst [vmem:[#allocation41_spill] sm:$0xff] %v10768_v20  ;;  %v10957_v20 = vld [vmem:[%s13990_s4 + $0xb0] sm:$0xf0] }
 0x634   :  { %v2839_v24 = vpop.f32.mrf.mxu1  ;;  %v2221_v58 = vpop.f32.mrf.mxu2  ;;  %14271 = vst [vmem:[#allocation42_spill] sm:$0xff] %v10778_v14 }
 0x635   :  { %v2840_v1 = vadd.f32 %v2839_v24, %v9809_v22  ;;  %v2222_v15 = vadd.f32 %v2221_v58, %v9821_v10  ;;  %14272 = vst [vmem:[#allocation43_spill] sm:$0xff] %v10784_v51  ;;  %v10789_v24 = vld [vmem:[%s13990_s4 + $0x6c] sm:$0xf0]  ;;  %v10840_v51 = vld [vmem:[%s13990_s4 + $0x80] sm:$0xf] }
 0x636   :  { %14273 = vst [vmem:[#allocation44_spill] sm:$0xff] %v10789_v24  ;;  %v3150_v19 = vpop.f32.mrf.mxu0  ;;  %v10799_v58 = vld [vmem:[%s13990_s4 + $0x6c] sm:$0xf0]  ;;  %v11057_v24 = vld [vmem:[%s13990_s4 + $0xd8] sm:$0xf0] }
 0x637   :  { %3627 = vst [vmem:[#allocation2 + $0xed0] sm:$0xff] %v2840_v1  ;;  %v10794_v1 = vld [vmem:[%s13990_s4 + $0x70] sm:$0xf0]  ;;  %v3151_v50 = vadd.f32 %v3150_v19, %v9805_v55  ;;  %v10835_v55 = vld [vmem:[%s13990_s4 + $0x84] sm:$0xf] }
 0x638   :  { %14274 = vst [vmem:[#allocation45_spill] sm:$0xff] %v10794_v1 }
 0x639   :  { %14275 = vst [vmem:[#allocation46_spill] sm:$0xff] %v10804_v16  ;;  %v10947_v16 = vld [vmem:[%s13990_s4 + $0xb0] sm:$0xf0] }
 0x63a   :  { %14276 = vst [vmem:[#allocation47_spill] sm:$0xff] %v10809_v34  ;;  %v10952_v34 = vld [vmem:[%s13990_s4 + $0xac] sm:$0xf0] }
 0x63b   :  { %3625 = vst [vmem:[#allocation2 + $0xec0] sm:$0xff] %v2222_v15  ;;  %v10830_v15 = vld [vmem:[%s13990_s4 + $0x80] sm:$0xf] }
 0x63c   :  { %14277 = vst [vmem:[#allocation48_spill] sm:$0xff] %v10820_v9  ;;  %v2841_v19 = vpop.f32.mrf.mxu1  ;;  %v2223_v31 = vpop.f32.mrf.mxu2 }
 0x63d   :  { %14278 = vst [vmem:[#allocation49_spill] sm:$0xff] %v10825_v18  ;;  %v10845_v18 = vld [vmem:[%s13990_s4 + $0x8c] sm:$0xf]  ;;  %v2842_v4 = vadd.f32 %v2841_v19, %v9809_v22  ;;  %v10871_v22 = vld [vmem:[%s13990_s4 + $0x8c] sm:$0xf0]  ;;  %v2224_v5 = vadd.f32 %v2223_v31, %v9821_v10 }
 0x63e   :  { %14279 = vst [vmem:[#allocation50_spill] sm:$0xff] %v10830_v15  ;;  %v10876_v19 = vld [vmem:[%s13990_s4 + $0x90] sm:$0xf0]  ;;  %v10912_v10 = vld [vmem:[%s13990_s4 + $0xa0] sm:$0xf] }
 0x63f   :  { %3632 = vst [vmem:[#allocation2 + $0xef8] sm:$0xff] %v3151_v50  ;;  %v10856_v50 = vld [vmem:[%s13990_s4 + $0x8c] sm:$0xf]  ;;  %v10917_v31 = vld [vmem:[%s13990_s4 + $0xa4] sm:$0xf] }
 0x640   :  { %14280 = vst [vmem:[#allocation51_spill] sm:$0xff] %v10845_v18  ;;  %v10962_v18 = vld [vmem:[%s13990_s4 + $0xac] sm:$0xf0]  ;;  %v11082_v15 = vld [vmem:[%s13990_s4 + $0xe0] sm:$0xf] }
 0x641   :  { %14281 = vst [vmem:[#allocation52_spill] sm:$0xff] %v10851_v63  ;;  %v10982_v63 = vld [vmem:[%s13990_s4 + $0xb4] sm:$0xf0] }
 0x642   :  { %14282 = vst [vmem:[#allocation53_spill] sm:$0xff] %v10866_v38  ;;  %v10886_v38 = vld [vmem:[%s13990_s4 + $0x98] sm:$0xf0] }
 0x643   :  { %14283 = vst [vmem:[#allocation54_spill] sm:$0xff] %v10871_v22  ;;  %v11067_v22 = vld [vmem:[%s13990_s4 + $0xe4] sm:$0xf] }
 0x644   :  { %14284 = vst [vmem:[#allocation55_spill] sm:$0xff] %v10876_v19 }
 0x645   :  { %3631 = vst [vmem:[#allocation2 + $0xef0] sm:$0xff] %v2842_v4  ;;  %v10897_v4 = vld [vmem:[%s13990_s4 + $0x98] sm:$0xf0] }
 0x646   :  { %14285 = vst [vmem:[#allocation56_spill] sm:$0xff] %v10881_v8 }
 0x647   :  { %14286 = vst [vmem:[#allocation57_spill] sm:$0xff] %v10886_v38  ;;  %v10967_v38 = vld [vmem:[%s13990_s4 + $0xb8] sm:$0xf0] }
 0x648   :  { %14287 = vst [vmem:[#allocation58_spill] sm:$0xff] %v10892_v47  ;;  %v10977_v47 = vld [vmem:[%s13990_s4 + $0xb8] sm:$0xf0] }
 0x649   :  { %14288 = vst [vmem:[#allocation59_spill] sm:$0xff] %v10897_v4 }
 0x64a   :  { %14289 = vst [vmem:[#allocation60_spill] sm:$0xff] %v10902_v2 }
 0x64b   :  { %14290 = vst [vmem:[#allocation61_spill] sm:$0xff] %v10907_v54  ;;  %v10927_v54 = vld [vmem:[%s13990_s4 + $0xac] sm:$0xf] }
 0x64c   :  { %14291 = vst [vmem:[#allocation62_spill] sm:$0xff] %v10912_v10  ;;  %v11097_v10 = vld [vmem:[%s13990_s4 + $0xec] sm:$0xf] }
 0x64d   :  { %3629 = vst [vmem:[#allocation2 + $0xee0] sm:$0xff] %v2224_v5  ;;  %v10942_v5 = vld [vmem:[%s13990_s4 + $0xa8] sm:$0xf] }
 0x64e   :  { %14292 = vst [vmem:[#allocation63_spill] sm:$0xff] %v10927_v54  ;;  %v10987_v54 = vld [vmem:[%s13990_s4 + $0xc4] sm:$0xf] }
 0x64f   :  { %14293 = vst [vmem:[#allocation64_spill] sm:$0xff] %v10932_v21  ;;  %v11002_v21 = vld [vmem:[%s13990_s4 + $0xc0] sm:$0xf] }
 0x650   :  { %14294 = vst [vmem:[#allocation65_spill] sm:$0xff] %v10937_v7 }
 0x651   :  { %14295 = vst [vmem:[#allocation66_spill] sm:$0xff] %v10942_v5 }
 0x652   :  { %14296 = vst [vmem:[#allocation67_spill] sm:$0xff] %v10947_v16  ;;  %v10972_v16 = vld [vmem:[%s13990_s4 + $0xb4] sm:$0xf0] }
 0x653   :  { %14297 = vst [vmem:[#allocation68_spill] sm:$0xff] %v10952_v34  ;;  %v11087_v34 = vld [vmem:[%s13990_s4 + $0xec] sm:$0xf] }
 0x654   :  { %14298 = vst [vmem:[#allocation69_spill] sm:$0xff] %v10957_v20 }
 0x655   :  { %14299 = vst [vmem:[#allocation70_spill] sm:$0xff] %v10962_v18 }
 0x656   :  { %14300 = vst [vmem:[#allocation71_spill] sm:$0xff] %v10967_v38  ;;  %v10992_v38 = vld [vmem:[%s13990_s4 + $0xc0] sm:$0xf] }
 0x657   :  { %14301 = vst [vmem:[#allocation72_spill] sm:$0xff] %v10972_v16  ;;  %v10997_v16 = vld [vmem:[%s13990_s4 + $0xc4] sm:$0xf] }
 0x658   :  { %14302 = vst [vmem:[#allocation73_spill] sm:$0xff] %v10987_v54  ;;  %v11012_v54 = vld [vmem:[%s13990_s4 + $0xc8] sm:$0xf] }
 0x659   :  { %14303 = vst [vmem:[#allocation74_spill] sm:$0xff] %v10992_v38  ;;  %v11107_v38 = vld [vmem:[%s13990_s4 + $0xf0] sm:$0xf0] }
 0x65a   :  { %14304 = vst [vmem:[#allocation75_spill] sm:$0xff] %v10997_v16 }
 0x65b   :  { %14305 = vst [vmem:[#allocation76_spill] sm:$0xff] %v11002_v21 }
 0x65c   :  { %14306 = vst [vmem:[#allocation77_spill] sm:$0xff] %v11007_v11  ;;  %v11032_v11 = vld [vmem:[%s13990_s4 + $0xcc] sm:$0xf0] }
 0x65d   :  { %14307 = vst [vmem:[#allocation78_spill] sm:$0xff] %v11012_v54  ;;  %v11037_v54 = vld [vmem:[%s13990_s4 + $0xd0] sm:$0xf0] }
 0x65e   :  { %14308 = vst [vmem:[#allocation79_spill] sm:$0xff] %v11017_v12 }
 0x65f   :  { %14309 = vst [vmem:[#allocation80_spill] sm:$0xff] %v11027_v46  ;;  %v11052_v46 = vld [vmem:[%s13990_s4 + $0xd4] sm:$0xf0] }
 0x660   :  { %14310 = vst [vmem:[#allocation81_spill] sm:$0xff] %v11032_v11  ;;  %v11102_v11 = vld [vmem:[%s13990_s4 + $0xe8] sm:$0xf] }
 0x661   :  { %14311 = vst [vmem:[#allocation82_spill] sm:$0xff] %v11047_v3  ;;  %v11072_v3 = vld [vmem:[%s13990_s4 + $0xe0] sm:$0xf] }
 0x662   :  { %14312 = vst [vmem:[#allocation83_spill] sm:$0xff] %v11052_v46  ;;  %v11077_v46 = vld [vmem:[%s13990_s4 + $0xe4] sm:$0xf] }
 0x663   :  { %14313 = vst [vmem:[#allocation84_spill] sm:$0xff] %v11067_v22  ;;  %v11092_v22 = vld [vmem:[%s13990_s4 + $0xe8] sm:$0xf] }
 0x664   :  { %14314 = vst [vmem:[#allocation85_spill] sm:$0xff] %v11072_v3  ;;  %v11122_v3 = vld [vmem:[%s13990_s4 + $0xec] sm:$0xf0] }
 0x665   :  { %14315 = vst [vmem:[#allocation86_spill] sm:$0xff] %v11082_v15 }
 0x666   :  { %14316 = vst [vmem:[#allocation87_spill] sm:$0xff] %v11087_v34  ;;  %v11112_v34 = vld [vmem:[%s13990_s4 + $0xec] sm:$0xf0] }
 0x667   :  { %14317 = vst [vmem:[#allocation88_spill] sm:$0xff] %v11092_v22  ;;  %v11117_v22 = vld [vmem:[%s13990_s4 + $0xf0] sm:$0xf0] }
 0x668   :  { %14318 = vst [vmem:[#allocation89_spill] sm:$0xff] %v11097_v10 }
 0x669   :  { %14319 = vst [vmem:[#allocation90_spill] sm:$0xff] %v11102_v11 }
 0x66a   :  { %14320 = vst [vmem:[#allocation91_spill] sm:$0xff] %v11107_v38  ;;  %v11132_v38 = vld [vmem:[%s13990_s4 + $0xf4] sm:$0xf0] }
 0x66b   :  { %14321 = vst [vmem:[#allocation92_spill] sm:$0xff] %v11112_v34  ;;  %v11137_v34 = vld [vmem:[%s13990_s4 + $0xf8] sm:$0xf0] }
 0x66c   :  { %14322 = vst [vmem:[#allocation93_spill] sm:$0xff] %v11117_v22 }
 0x66d   :  { %14323 = vst [vmem:[#allocation94_spill] sm:$0xff] %v11122_v3 }
 0x66e   :  { %14324 = vst [vmem:[#allocation95_spill] sm:$0xff] %v11127_v40  ;;  %v11152_v40 = vld [vmem:[%s13991_s6] sm:$0xf] }
 0x66f   :  { %14325 = vst [vmem:[#allocation96_spill] sm:$0xff] %v11132_v38  ;;  %v11157_v38 = vld [vmem:[%s13991_s6 + $0x4] sm:$0xf] }
 0x670   :  { %14326 = vst [vmem:[#allocation97_spill] sm:$0xff] %v11147_v29  ;;  %v11172_v29 = vld [vmem:[%s13991_s6 + $0x8] sm:$0xf] }
 0x671   :  { %14327 = vst [vmem:[#allocation98_spill] sm:$0xff] %v11152_v40  ;;  %v11177_v40 = vld [vmem:[%s13991_s6 + $0xc] sm:$0xf] }
 0x672   :  { %14328 = vst [vmem:[#allocation99_spill] sm:$0xff] %v11157_v38  ;;  %v11182_v38 = vld [vmem:[%s13991_s6 + $0x8] sm:$0xf] }
 0x673   :  { %14329 = vst [vmem:[#allocation100_spill] sm:$0xff] %v11162_v36  ;;  %v11187_v36 = vld [vmem:[%s13991_s6 + $0x10] sm:$0xf0] }
 0x674   :  { %14330 = vst [vmem:[#allocation101_spill] sm:$0xff] %v11167_v33  ;;  %v11192_v33 = vld [vmem:[%s13991_s6 + $0xc] sm:$0xf0] }
 0x675   :  { %14331 = vst [vmem:[#allocation102_spill] sm:$0xff] %v11172_v29  ;;  %v11197_v29 = vld [vmem:[%s13991_s6 + $0x10] sm:$0xf0] }
 0x676   :  { %14332 = vst [vmem:[#allocation103_spill] sm:$0xff] %v11177_v40  ;;  %v11202_v40 = vld [vmem:[%s13991_s6 + $0xc] sm:$0xf0] }
 0x677   :  { %14333 = vst [vmem:[#allocation104_spill] sm:$0xff] %v11182_v38  ;;  %v11207_v38 = vld [vmem:[%s13991_s6 + $0x18] sm:$0xf0] }
 0x678   :  { %14334 = vst [vmem:[#allocation105_spill] sm:$0xff] %v11187_v36  ;;  %v11212_v36 = vld [vmem:[%s13991_s6 + $0x14] sm:$0xf0] }
 0x679   :  { %14335 = vst [vmem:[#allocation106_spill] sm:$0xff] %v11192_v33  ;;  %v11217_v33 = vld [vmem:[%s13991_s6 + $0x18] sm:$0xf0] }
 0x67a   :  { %14336 = vst [vmem:[#allocation107_spill] sm:$0xff] %v11197_v29  ;;  %v11222_v29 = vld [vmem:[%s13991_s6 + $0x14] sm:$0xf0] }
 0x67b   :  { %14337 = vst [vmem:[#allocation108_spill] sm:$0xff] %v11202_v40  ;;  %v11227_v40 = vld [vmem:[%s13991_s6 + $0x24] sm:$0xf] }
 0x67c   :  { %14338 = vst [vmem:[#allocation109_spill] sm:$0xff] %v11207_v38  ;;  %v11232_v38 = vld [vmem:[%s13991_s6 + $0x20] sm:$0xf] }
 0x67d   :  { %14339 = vst [vmem:[#allocation110_spill] sm:$0xff] %v11212_v36  ;;  %v11237_v36 = vld [vmem:[%s13991_s6 + $0x24] sm:$0xf] }
 0x67e   :  { %14340 = vst [vmem:[#allocation111_spill] sm:$0xff] %v11217_v33  ;;  %v11242_v33 = vld [vmem:[%s13991_s6 + $0x20] sm:$0xf] }
 0x67f   :  { %14341 = vst [vmem:[#allocation112_spill] sm:$0xff] %v11222_v29  ;;  %v11247_v29 = vld [vmem:[%s13991_s6 + $0x2c] sm:$0xf] }
 0x680   :  { %14342 = vst [vmem:[#allocation113_spill] sm:$0xff] %v11227_v40  ;;  %v11252_v40 = vld [vmem:[%s13991_s6 + $0x28] sm:$0xf] }
 0x681   :  { %14343 = vst [vmem:[#allocation114_spill] sm:$0xff] %v11232_v38  ;;  %v11257_v38 = vld [vmem:[%s13991_s6 + $0x2c] sm:$0xf] }
 0x682   :  { %14344 = vst [vmem:[#allocation115_spill] sm:$0xff] %v11237_v36  ;;  %v11262_v36 = vld [vmem:[%s13991_s6 + $0x28] sm:$0xf] }
 0x683   :  { %14345 = vst [vmem:[#allocation116_spill] sm:$0xff] %v11242_v33  ;;  %v11267_v33 = vld [vmem:[%s13991_s6 + $0x30] sm:$0xf0] }
 0x684   :  { %14346 = vst [vmem:[#allocation117_spill] sm:$0xff] %v11247_v29  ;;  %v11272_v29 = vld [vmem:[%s13991_s6 + $0x2c] sm:$0xf0] }
 0x685   :  { %14347 = vst [vmem:[#allocation118_spill] sm:$0xff] %v11252_v40  ;;  %v11277_v40 = vld [vmem:[%s13991_s6 + $0x30] sm:$0xf0] }
 0x686   :  { %14348 = vst [vmem:[#allocation119_spill] sm:$0xff] %v11257_v38  ;;  %v11282_v38 = vld [vmem:[%s13991_s6 + $0x2c] sm:$0xf0] }
 0x687   :  { %14349 = vst [vmem:[#allocation120_spill] sm:$0xff] %v11262_v36  ;;  %v11287_v36 = vld [vmem:[%s13991_s6 + $0x38] sm:$0xf0] }
 0x688   :  { %14350 = vst [vmem:[#allocation121_spill] sm:$0xff] %v11267_v33  ;;  %v11292_v33 = vld [vmem:[%s13991_s6 + $0x34] sm:$0xf0] }
 0x689   :  { %14351 = vst [vmem:[#allocation122_spill] sm:$0xff] %v11272_v29  ;;  %v11297_v29 = vld [vmem:[%s13991_s6 + $0x38] sm:$0xf0] }
 0x68a   :  { %14352 = vst [vmem:[#allocation123_spill] sm:$0xff] %v11277_v40  ;;  %v11302_v40 = vld [vmem:[%s13991_s6 + $0x34] sm:$0xf0] }
 0x68b   :  { %14353 = vst [vmem:[#allocation124_spill] sm:$0xff] %v11282_v38  ;;  %v11307_v38 = vld [vmem:[%s13991_s6 + $0x44] sm:$0xf] }
 0x68c   :  { %14354 = vst [vmem:[#allocation125_spill] sm:$0xff] %v11287_v36  ;;  %v11312_v36 = vld [vmem:[%s13991_s6 + $0x40] sm:$0xf] }
 0x68d   :  { %14355 = vst [vmem:[#allocation126_spill] sm:$0xff] %v11292_v33  ;;  %v11317_v33 = vld [vmem:[%s13991_s6 + $0x44] sm:$0xf] }
 0x68e   :  { %14356 = vst [vmem:[#allocation127_spill] sm:$0xff] %v11297_v29  ;;  %v11322_v29 = vld [vmem:[%s13991_s6 + $0x40] sm:$0xf] }
 0x68f   :  { %14357 = vst [vmem:[#allocation128_spill] sm:$0xff] %v11302_v40  ;;  %v11327_v40 = vld [vmem:[%s13991_s6 + $0x4c] sm:$0xf] }
 0x690   :  { %14358 = vst [vmem:[#allocation129_spill] sm:$0xff] %v11307_v38  ;;  %v11332_v38 = vld [vmem:[%s13991_s6 + $0x48] sm:$0xf] }
 0x691   :  { %14359 = vst [vmem:[#allocation130_spill] sm:$0xff] %v11312_v36  ;;  %v11337_v36 = vld [vmem:[%s13991_s6 + $0x4c] sm:$0xf] }
 0x692   :  { %14360 = vst [vmem:[#allocation131_spill] sm:$0xff] %v11317_v33  ;;  %v11342_v33 = vld [vmem:[%s13991_s6 + $0x48] sm:$0xf] }
 0x693   :  { %14361 = vst [vmem:[#allocation132_spill] sm:$0xff] %v11322_v29  ;;  %v11347_v29 = vld [vmem:[%s13991_s6 + $0x50] sm:$0xf0] }
 0x694   :  { %14362 = vst [vmem:[#allocation133_spill] sm:$0xff] %v11327_v40  ;;  %v11352_v40 = vld [vmem:[%s13991_s6 + $0x4c] sm:$0xf0] }
 0x695   :  { %14363 = vst [vmem:[#allocation134_spill] sm:$0xff] %v11332_v38  ;;  %v11357_v38 = vld [vmem:[%s13991_s6 + $0x50] sm:$0xf0] }
 0x696   :  { %14364 = vst [vmem:[#allocation135_spill] sm:$0xff] %v11337_v36  ;;  %v11362_v36 = vld [vmem:[%s13991_s6 + $0x4c] sm:$0xf0] }
 0x697   :  { %14365 = vst [vmem:[#allocation136_spill] sm:$0xff] %v11342_v33  ;;  %v11367_v33 = vld [vmem:[%s13991_s6 + $0x58] sm:$0xf0] }
 0x698   :  { %14366 = vst [vmem:[#allocation137_spill] sm:$0xff] %v11347_v29  ;;  %v11372_v29 = vld [vmem:[%s13991_s6 + $0x54] sm:$0xf0] }
 0x699   :  { %14367 = vst [vmem:[#allocation138_spill] sm:$0xff] %v11352_v40  ;;  %v11377_v40 = vld [vmem:[%s13991_s6 + $0x58] sm:$0xf0] }
 0x69a   :  { %14368 = vst [vmem:[#allocation139_spill] sm:$0xff] %v11357_v38  ;;  %v11382_v38 = vld [vmem:[%s13991_s6 + $0x54] sm:$0xf0] }
 0x69b   :  { %14369 = vst [vmem:[#allocation140_spill] sm:$0xff] %v11362_v36  ;;  %v11387_v36 = vld [vmem:[%s13991_s6 + $0x64] sm:$0xf] }
 0x69c   :  { %14370 = vst [vmem:[#allocation141_spill] sm:$0xff] %v11367_v33  ;;  %v11392_v33 = vld [vmem:[%s13991_s6 + $0x60] sm:$0xf] }
 0x69d   :  { %14371 = vst [vmem:[#allocation142_spill] sm:$0xff] %v11372_v29  ;;  %v11397_v29 = vld [vmem:[%s13991_s6 + $0x64] sm:$0xf] }
 0x69e   :  { %14372 = vst [vmem:[#allocation143_spill] sm:$0xff] %v11377_v40  ;;  %v11402_v40 = vld [vmem:[%s13991_s6 + $0x60] sm:$0xf] }
 0x69f   :  { %14373 = vst [vmem:[#allocation144_spill] sm:$0xff] %v11382_v38  ;;  %v11407_v38 = vld [vmem:[%s13991_s6 + $0x6c] sm:$0xf] }
 0x6a0   :  { %14374 = vst [vmem:[#allocation145_spill] sm:$0xff] %v11387_v36  ;;  %v11412_v36 = vld [vmem:[%s13991_s6 + $0x68] sm:$0xf] }
 0x6a1   :  { %14375 = vst [vmem:[#allocation146_spill] sm:$0xff] %v11392_v33  ;;  %v11417_v33 = vld [vmem:[%s13991_s6 + $0x6c] sm:$0xf] }
 0x6a2   :  { %14376 = vst [vmem:[#allocation147_spill] sm:$0xff] %v11397_v29  ;;  %v11422_v29 = vld [vmem:[%s13991_s6 + $0x68] sm:$0xf] }
 0x6a3   :  { %14377 = vst [vmem:[#allocation148_spill] sm:$0xff] %v11402_v40  ;;  %v11427_v40 = vld [vmem:[%s13991_s6 + $0x70] sm:$0xf0] }
 0x6a4   :  { %14378 = vst [vmem:[#allocation149_spill] sm:$0xff] %v11407_v38  ;;  %v11432_v38 = vld [vmem:[%s13991_s6 + $0x6c] sm:$0xf0] }
 0x6a5   :  { %14379 = vst [vmem:[#allocation150_spill] sm:$0xff] %v11412_v36  ;;  %v11437_v36 = vld [vmem:[%s13991_s6 + $0x70] sm:$0xf0] }
 0x6a6   :  { %14380 = vst [vmem:[#allocation151_spill] sm:$0xff] %v11417_v33  ;;  %v11442_v33 = vld [vmem:[%s13991_s6 + $0x6c] sm:$0xf0] }
 0x6a7   :  { %14381 = vst [vmem:[#allocation152_spill] sm:$0xff] %v11422_v29  ;;  %v11447_v29 = vld [vmem:[%s13991_s6 + $0x78] sm:$0xf0] }
 0x6a8   :  { %14382 = vst [vmem:[#allocation153_spill] sm:$0xff] %v11427_v40  ;;  %v11452_v40 = vld [vmem:[%s13991_s6 + $0x74] sm:$0xf0] }
 0x6a9   :  { %14383 = vst [vmem:[#allocation154_spill] sm:$0xff] %v11432_v38  ;;  %v11457_v38 = vld [vmem:[%s13991_s6 + $0x78] sm:$0xf0] }
 0x6aa   :  { %14384 = vst [vmem:[#allocation155_spill] sm:$0xff] %v11437_v36  ;;  %v11462_v36 = vld [vmem:[%s13991_s6 + $0x74] sm:$0xf0] }
 0x6ab   :  { %14385 = vst [vmem:[#allocation156_spill] sm:$0xff] %v11442_v33  ;;  %v11467_v33 = vld [vmem:[%s13991_s6 + $0x84] sm:$0xf] }
 0x6ac   :  { %14386 = vst [vmem:[#allocation157_spill] sm:$0xff] %v11447_v29  ;;  %v11472_v29 = vld [vmem:[%s13991_s6 + $0x80] sm:$0xf] }
 0x6ad   :  { %14387 = vst [vmem:[#allocation158_spill] sm:$0xff] %v11452_v40  ;;  %v11477_v40 = vld [vmem:[%s13991_s6 + $0x84] sm:$0xf] }
 0x6ae   :  { %14388 = vst [vmem:[#allocation159_spill] sm:$0xff] %v11457_v38  ;;  %v11482_v38 = vld [vmem:[%s13991_s6 + $0x80] sm:$0xf] }
 0x6af   :  { %14389 = vst [vmem:[#allocation160_spill] sm:$0xff] %v11462_v36  ;;  %v11487_v36 = vld [vmem:[%s13991_s6 + $0x8c] sm:$0xf] }
 0x6b0   :  { %14390 = vst [vmem:[#allocation161_spill] sm:$0xff] %v11467_v33  ;;  %v11492_v33 = vld [vmem:[%s13991_s6 + $0x88] sm:$0xf] }
 0x6b1   :  { %14391 = vst [vmem:[#allocation162_spill] sm:$0xff] %v11472_v29  ;;  %v11497_v29 = vld [vmem:[%s13991_s6 + $0x8c] sm:$0xf] }
 0x6b2   :  { %14392 = vst [vmem:[#allocation163_spill] sm:$0xff] %v11477_v40  ;;  %v11502_v40 = vld [vmem:[%s13991_s6 + $0x88] sm:$0xf] }
 0x6b3   :  { %14393 = vst [vmem:[#allocation164_spill] sm:$0xff] %v11482_v38  ;;  %v11507_v38 = vld [vmem:[%s13991_s6 + $0x90] sm:$0xf0] }
 0x6b4   :  { %14394 = vst [vmem:[#allocation165_spill] sm:$0xff] %v11487_v36  ;;  %v11512_v36 = vld [vmem:[%s13991_s6 + $0x8c] sm:$0xf0] }
 0x6b5   :  { %14395 = vst [vmem:[#allocation166_spill] sm:$0xff] %v11492_v33  ;;  %v11517_v33 = vld [vmem:[%s13991_s6 + $0x90] sm:$0xf0] }
 0x6b6   :  { %14396 = vst [vmem:[#allocation167_spill] sm:$0xff] %v11497_v29  ;;  %v11522_v29 = vld [vmem:[%s13991_s6 + $0x8c] sm:$0xf0] }
 0x6b7   :  { %14397 = vst [vmem:[#allocation168_spill] sm:$0xff] %v11502_v40  ;;  %v11527_v40 = vld [vmem:[%s13991_s6 + $0x98] sm:$0xf0] }
 0x6b8   :  { %14398 = vst [vmem:[#allocation169_spill] sm:$0xff] %v11507_v38  ;;  %v11532_v38 = vld [vmem:[%s13991_s6 + $0x94] sm:$0xf0] }
 0x6b9   :  { %14399 = vst [vmem:[#allocation170_spill] sm:$0xff] %v11512_v36  ;;  %v11537_v36 = vld [vmem:[%s13991_s6 + $0x98] sm:$0xf0] }
 0x6ba   :  { %14400 = vst [vmem:[#allocation171_spill] sm:$0xff] %v11517_v33  ;;  %v11542_v33 = vld [vmem:[%s13991_s6 + $0x94] sm:$0xf0] }
 0x6bb   :  { %14401 = vst [vmem:[#allocation172_spill] sm:$0xff] %v11522_v29  ;;  %v11547_v29 = vld [vmem:[%s13991_s6 + $0xa4] sm:$0xf] }
 0x6bc   :  { %14402 = vst [vmem:[#allocation173_spill] sm:$0xff] %v11527_v40  ;;  %v11552_v40 = vld [vmem:[%s13991_s6 + $0xa0] sm:$0xf] }
 0x6bd   :  { %14403 = vst [vmem:[#allocation174_spill] sm:$0xff] %v11532_v38  ;;  %v11557_v38 = vld [vmem:[%s13991_s6 + $0xa4] sm:$0xf] }
 0x6be   :  { %14404 = vst [vmem:[#allocation175_spill] sm:$0xff] %v11537_v36  ;;  %v11562_v36 = vld [vmem:[%s13991_s6 + $0xa0] sm:$0xf] }
 0x6bf   :  { %14405 = vst [vmem:[#allocation176_spill] sm:$0xff] %v11542_v33  ;;  %v11567_v33 = vld [vmem:[%s13991_s6 + $0xac] sm:$0xf] }
 0x6c0   :  { %14406 = vst [vmem:[#allocation177_spill] sm:$0xff] %v11547_v29  ;;  %v11572_v29 = vld [vmem:[%s13991_s6 + $0xa8] sm:$0xf] }
 0x6c1   :  { %14407 = vst [vmem:[#allocation178_spill] sm:$0xff] %v11552_v40  ;;  %v11577_v40 = vld [vmem:[%s13991_s6 + $0xac] sm:$0xf] }
 0x6c2   :  { %14408 = vst [vmem:[#allocation179_spill] sm:$0xff] %v11557_v38  ;;  %v11582_v38 = vld [vmem:[%s13991_s6 + $0xa8] sm:$0xf] }
 0x6c3   :  { %14409 = vst [vmem:[#allocation180_spill] sm:$0xff] %v11562_v36  ;;  %v11587_v36 = vld [vmem:[%s13991_s6 + $0xb0] sm:$0xf0] }
 0x6c4   :  { %14410 = vst [vmem:[#allocation181_spill] sm:$0xff] %v11567_v33  ;;  %v11592_v33 = vld [vmem:[%s13991_s6 + $0xac] sm:$0xf0] }
 0x6c5   :  { %14411 = vst [vmem:[#allocation182_spill] sm:$0xff] %v11572_v29  ;;  %v11597_v29 = vld [vmem:[%s13991_s6 + $0xb0] sm:$0xf0] }
 0x6c6   :  { %14412 = vst [vmem:[#allocation183_spill] sm:$0xff] %v11577_v40  ;;  %v11602_v40 = vld [vmem:[%s13991_s6 + $0xac] sm:$0xf0] }
 0x6c7   :  { %14413 = vst [vmem:[#allocation184_spill] sm:$0xff] %v11582_v38  ;;  %v11607_v38 = vld [vmem:[%s13991_s6 + $0xb8] sm:$0xf0] }
 0x6c8   :  { %14414 = vst [vmem:[#allocation185_spill] sm:$0xff] %v11587_v36  ;;  %v11612_v36 = vld [vmem:[%s13991_s6 + $0xb4] sm:$0xf0] }
 0x6c9   :  { %14415 = vst [vmem:[#allocation186_spill] sm:$0xff] %v11592_v33  ;;  %v11617_v33 = vld [vmem:[%s13991_s6 + $0xb8] sm:$0xf0] }
 0x6ca   :  { %14416 = vst [vmem:[#allocation187_spill] sm:$0xff] %v11597_v29  ;;  %v11622_v29 = vld [vmem:[%s13991_s6 + $0xb4] sm:$0xf0] }
 0x6cb   :  { %14417 = vst [vmem:[#allocation188_spill] sm:$0xff] %v11602_v40  ;;  %v11627_v40 = vld [vmem:[%s13991_s6 + $0xc4] sm:$0xf] }
 0x6cc   :  { %14418 = vst [vmem:[#allocation189_spill] sm:$0xff] %v11607_v38  ;;  %v11632_v38 = vld [vmem:[%s13991_s6 + $0xc0] sm:$0xf] }
 0x6cd   :  { %14419 = vst [vmem:[#allocation190_spill] sm:$0xff] %v11612_v36  ;;  %v11637_v36 = vld [vmem:[%s13991_s6 + $0xc4] sm:$0xf] }
 0x6ce   :  { %14420 = vst [vmem:[#allocation191_spill] sm:$0xff] %v11617_v33  ;;  %v11642_v33 = vld [vmem:[%s13991_s6 + $0xc0] sm:$0xf] }
 0x6cf   :  { %14421 = vst [vmem:[#allocation192_spill] sm:$0xff] %v11622_v29  ;;  %v11647_v29 = vld [vmem:[%s13991_s6 + $0xcc] sm:$0xf] }
 0x6d0   :  { %14422 = vst [vmem:[#allocation193_spill] sm:$0xff] %v11627_v40  ;;  %v11652_v40 = vld [vmem:[%s13991_s6 + $0xc8] sm:$0xf] }
 0x6d1   :  { %14423 = vst [vmem:[#allocation194_spill] sm:$0xff] %v11632_v38  ;;  %v11657_v38 = vld [vmem:[%s13991_s6 + $0xcc] sm:$0xf] }
 0x6d2   :  { %14424 = vst [vmem:[#allocation195_spill] sm:$0xff] %v11637_v36  ;;  %v11662_v36 = vld [vmem:[%s13991_s6 + $0xc8] sm:$0xf] }
 0x6d3   :  { %14425 = vst [vmem:[#allocation196_spill] sm:$0xff] %v11642_v33  ;;  %v11667_v33 = vld [vmem:[%s13991_s6 + $0xd0] sm:$0xf0] }
 0x6d4   :  { %14426 = vst [vmem:[#allocation197_spill] sm:$0xff] %v11647_v29  ;;  %v11672_v29 = vld [vmem:[%s13991_s6 + $0xcc] sm:$0xf0] }
 0x6d5   :  { %14427 = vst [vmem:[#allocation198_spill] sm:$0xff] %v11652_v40  ;;  %v11677_v40 = vld [vmem:[%s13991_s6 + $0xd0] sm:$0xf0] }
 0x6d6   :  { %14428 = vst [vmem:[#allocation199_spill] sm:$0xff] %v11657_v38  ;;  %v11682_v38 = vld [vmem:[%s13991_s6 + $0xcc] sm:$0xf0] }
 0x6d7   :  { %14429 = vst [vmem:[#allocation200_spill] sm:$0xff] %v11662_v36  ;;  %v11687_v36 = vld [vmem:[%s13991_s6 + $0xd8] sm:$0xf0] }
 0x6d8   :  { %14430 = vst [vmem:[#allocation201_spill] sm:$0xff] %v11667_v33  ;;  %v11692_v33 = vld [vmem:[%s13991_s6 + $0xd4] sm:$0xf0] }
 0x6d9   :  { %14431 = vst [vmem:[#allocation202_spill] sm:$0xff] %v11672_v29  ;;  %v11697_v29 = vld [vmem:[%s13991_s6 + $0xd8] sm:$0xf0] }
 0x6da   :  { %14432 = vst [vmem:[#allocation203_spill] sm:$0xff] %v11677_v40  ;;  %v11702_v40 = vld [vmem:[%s13991_s6 + $0xd4] sm:$0xf0] }
 0x6db   :  { %14433 = vst [vmem:[#allocation204_spill] sm:$0xff] %v11682_v38  ;;  %v11707_v38 = vld [vmem:[%s13991_s6 + $0xe4] sm:$0xf] }
 0x6dc   :  { %14434 = vst [vmem:[#allocation205_spill] sm:$0xff] %v11687_v36  ;;  %v11712_v36 = vld [vmem:[%s13991_s6 + $0xe0] sm:$0xf] }
 0x6dd   :  { %14435 = vst [vmem:[#allocation206_spill] sm:$0xff] %v11692_v33  ;;  %v11717_v33 = vld [vmem:[%s13991_s6 + $0xe4] sm:$0xf] }
 0x6de   :  { %14436 = vst [vmem:[#allocation207_spill] sm:$0xff] %v11697_v29  ;;  %v11722_v29 = vld [vmem:[%s13991_s6 + $0xe0] sm:$0xf] }
 0x6df   :  { %14437 = vst [vmem:[#allocation208_spill] sm:$0xff] %v11702_v40  ;;  %v11727_v40 = vld [vmem:[%s13991_s6 + $0xec] sm:$0xf] }
 0x6e0   :  { %14438 = vst [vmem:[#allocation209_spill] sm:$0xff] %v11707_v38  ;;  %v11732_v38 = vld [vmem:[%s13991_s6 + $0xe8] sm:$0xf] }
 0x6e1   :  { %14439 = vst [vmem:[#allocation210_spill] sm:$0xff] %v11712_v36  ;;  %v11737_v36 = vld [vmem:[%s13991_s6 + $0xec] sm:$0xf] }
 0x6e2   :  { %14440 = vst [vmem:[#allocation211_spill] sm:$0xff] %v11717_v33  ;;  %v11742_v33 = vld [vmem:[%s13991_s6 + $0xe8] sm:$0xf] }
 0x6e3   :  { %14441 = vst [vmem:[#allocation212_spill] sm:$0xff] %v11722_v29  ;;  %v11747_v29 = vld [vmem:[%s13991_s6 + $0xf0] sm:$0xf0] }
 0x6e4   :  { %14442 = vst [vmem:[#allocation213_spill] sm:$0xff] %v11727_v40  ;;  %v11752_v40 = vld [vmem:[%s13991_s6 + $0xec] sm:$0xf0] }
 0x6e5   :  { %14443 = vst [vmem:[#allocation214_spill] sm:$0xff] %v11732_v38  ;;  %v11757_v38 = vld [vmem:[%s13991_s6 + $0xf0] sm:$0xf0] }
 0x6e6   :  { %14444 = vst [vmem:[#allocation215_spill] sm:$0xff] %v11737_v36  ;;  %v11762_v36 = vld [vmem:[%s13991_s6 + $0xec] sm:$0xf0] }
 0x6e7   :  { %14445 = vst [vmem:[#allocation216_spill] sm:$0xff] %v11742_v33  ;;  %v11767_v33 = vld [vmem:[%s13991_s6 + $0xf8] sm:$0xf0] }
 0x6e8   :  { %14446 = vst [vmem:[#allocation217_spill] sm:$0xff] %v11747_v29  ;;  %v11772_v29 = vld [vmem:[%s13991_s6 + $0xf4] sm:$0xf0] }
 0x6e9   :  { %14447 = vst [vmem:[#allocation218_spill] sm:$0xff] %v11752_v40  ;;  %v11777_v40 = vld [vmem:[%s13991_s6 + $0xf8] sm:$0xf0] }
 0x6ea   :  { %14448 = vst [vmem:[#allocation219_spill] sm:$0xff] %v11757_v38  ;;  %v11782_v38 = vld [vmem:[%s13991_s6 + $0xf4] sm:$0xf0] }
 0x6eb   :  { %14449 = vst [vmem:[#allocation220_spill] sm:$0xff] %v11762_v36  ;;  %v11787_v36 = vld [vmem:[%s13991_s6 + $0x104] sm:$0xf] }
 0x6ec   :  { %14450 = vst [vmem:[#allocation221_spill] sm:$0xff] %v11767_v33  ;;  %v11792_v33 = vld [vmem:[%s13991_s6 + $0x100] sm:$0xf] }
 0x6ed   :  { %14451 = vst [vmem:[#allocation222_spill] sm:$0xff] %v11772_v29  ;;  %v11797_v29 = vld [vmem:[%s13991_s6 + $0x104] sm:$0xf] }
 0x6ee   :  { %14452 = vst [vmem:[#allocation223_spill] sm:$0xff] %v11777_v40  ;;  %v11802_v40 = vld [vmem:[%s13991_s6 + $0x100] sm:$0xf] }
 0x6ef   :  { %14453 = vst [vmem:[#allocation224_spill] sm:$0xff] %v11782_v38  ;;  %v11807_v38 = vld [vmem:[%s13991_s6 + $0x10c] sm:$0xf] }
 0x6f0   :  { %14454 = vst [vmem:[#allocation225_spill] sm:$0xff] %v11787_v36  ;;  %v11812_v36 = vld [vmem:[%s13991_s6 + $0x108] sm:$0xf] }
 0x6f1   :  { %14455 = vst [vmem:[#allocation226_spill] sm:$0xff] %v11792_v33  ;;  %v11817_v33 = vld [vmem:[%s13991_s6 + $0x10c] sm:$0xf] }
 0x6f2   :  { %14456 = vst [vmem:[#allocation227_spill] sm:$0xff] %v11797_v29  ;;  %v11822_v29 = vld [vmem:[%s13991_s6 + $0x108] sm:$0xf] }
 0x6f3   :  { %14457 = vst [vmem:[#allocation228_spill] sm:$0xff] %v11802_v40  ;;  %v11827_v40 = vld [vmem:[%s13991_s6 + $0x110] sm:$0xf0] }
 0x6f4   :  { %14458 = vst [vmem:[#allocation229_spill] sm:$0xff] %v11807_v38  ;;  %v11832_v38 = vld [vmem:[%s13991_s6 + $0x10c] sm:$0xf0] }
 0x6f5   :  { %14459 = vst [vmem:[#allocation230_spill] sm:$0xff] %v11812_v36  ;;  %v11837_v36 = vld [vmem:[%s13991_s6 + $0x110] sm:$0xf0] }
 0x6f6   :  { %14460 = vst [vmem:[#allocation231_spill] sm:$0xff] %v11817_v33  ;;  %v11842_v33 = vld [vmem:[%s13991_s6 + $0x10c] sm:$0xf0] }
 0x6f7   :  { %14461 = vst [vmem:[#allocation232_spill] sm:$0xff] %v11822_v29  ;;  %v11847_v29 = vld [vmem:[%s13991_s6 + $0x118] sm:$0xf0] }
 0x6f8   :  { %14462 = vst [vmem:[#allocation233_spill] sm:$0xff] %v11827_v40  ;;  %v11852_v40 = vld [vmem:[%s13991_s6 + $0x114] sm:$0xf0] }
 0x6f9   :  { %14463 = vst [vmem:[#allocation234_spill] sm:$0xff] %v11832_v38  ;;  %v11857_v38 = vld [vmem:[%s13991_s6 + $0x118] sm:$0xf0] }
 0x6fa   :  { %14464 = vst [vmem:[#allocation235_spill] sm:$0xff] %v11837_v36  ;;  %v11862_v36 = vld [vmem:[%s13991_s6 + $0x114] sm:$0xf0] }
 0x6fb   :  { %14465 = vst [vmem:[#allocation236_spill] sm:$0xff] %v11842_v33  ;;  %v11867_v33 = vld [vmem:[%s13991_s6 + $0x124] sm:$0xf] }
 0x6fc   :  { %14466 = vst [vmem:[#allocation237_spill] sm:$0xff] %v11847_v29  ;;  %v11872_v29 = vld [vmem:[%s13991_s6 + $0x120] sm:$0xf] }
 0x6fd   :  { %14467 = vst [vmem:[#allocation238_spill] sm:$0xff] %v11852_v40  ;;  %v11877_v40 = vld [vmem:[%s13991_s6 + $0x124] sm:$0xf] }
 0x6fe   :  { %14468 = vst [vmem:[#allocation239_spill] sm:$0xff] %v11857_v38  ;;  %v11882_v38 = vld [vmem:[%s13991_s6 + $0x120] sm:$0xf] }
 0x6ff   :  { %14469 = vst [vmem:[#allocation240_spill] sm:$0xff] %v11862_v36  ;;  %v11887_v36 = vld [vmem:[%s13991_s6 + $0x12c] sm:$0xf] }
 0x700   :  { %14470 = vst [vmem:[#allocation241_spill] sm:$0xff] %v11867_v33  ;;  %v11892_v33 = vld [vmem:[%s13991_s6 + $0x128] sm:$0xf] }
 0x701   :  { %14471 = vst [vmem:[#allocation242_spill] sm:$0xff] %v11872_v29  ;;  %v11897_v29 = vld [vmem:[%s13991_s6 + $0x12c] sm:$0xf] }
 0x702   :  { %14472 = vst [vmem:[#allocation243_spill] sm:$0xff] %v11877_v40  ;;  %v11902_v40 = vld [vmem:[%s13991_s6 + $0x128] sm:$0xf] }
 0x703   :  { %14473 = vst [vmem:[#allocation244_spill] sm:$0xff] %v11882_v38  ;;  %v11907_v38 = vld [vmem:[%s13991_s6 + $0x130] sm:$0xf0] }
 0x704   :  { %14474 = vst [vmem:[#allocation245_spill] sm:$0xff] %v11887_v36  ;;  %v11912_v36 = vld [vmem:[%s13991_s6 + $0x12c] sm:$0xf0] }
 0x705   :  { %14475 = vst [vmem:[#allocation246_spill] sm:$0xff] %v11892_v33  ;;  %v11917_v33 = vld [vmem:[%s13991_s6 + $0x130] sm:$0xf0] }
 0x706   :  { %14476 = vst [vmem:[#allocation247_spill] sm:$0xff] %v11897_v29  ;;  %v11922_v29 = vld [vmem:[%s13991_s6 + $0x12c] sm:$0xf0] }
 0x707   :  { %14477 = vst [vmem:[#allocation248_spill] sm:$0xff] %v11902_v40  ;;  %v11927_v40 = vld [vmem:[%s13991_s6 + $0x138] sm:$0xf0] }
 0x708   :  { %14478 = vst [vmem:[#allocation249_spill] sm:$0xff] %v11907_v38  ;;  %v11932_v38 = vld [vmem:[%s13991_s6 + $0x134] sm:$0xf0] }
 0x709   :  { %14479 = vst [vmem:[#allocation250_spill] sm:$0xff] %v11912_v36  ;;  %v11937_v36 = vld [vmem:[%s13991_s6 + $0x138] sm:$0xf0] }
 0x70a   :  { %14480 = vst [vmem:[#allocation251_spill] sm:$0xff] %v11917_v33  ;;  %v11942_v33 = vld [vmem:[%s13991_s6 + $0x134] sm:$0xf0] }
 0x70b   :  { %14481 = vst [vmem:[#allocation252_spill] sm:$0xff] %v11922_v29  ;;  %v11947_v29 = vld [vmem:[%s13991_s6 + $0x144] sm:$0xf] }
 0x70c   :  { %14482 = vst [vmem:[#allocation253_spill] sm:$0xff] %v11927_v40  ;;  %v11952_v40 = vld [vmem:[%s13991_s6 + $0x140] sm:$0xf] }
 0x70d   :  { %14483 = vst [vmem:[#allocation254_spill] sm:$0xff] %v11932_v38  ;;  %v11957_v38 = vld [vmem:[%s13991_s6 + $0x144] sm:$0xf] }
 0x70e   :  { %14484 = vst [vmem:[#allocation255_spill] sm:$0xff] %v11937_v36  ;;  %v11962_v36 = vld [vmem:[%s13991_s6 + $0x140] sm:$0xf] }
 0x70f   :  { %14485 = vst [vmem:[#allocation256_spill] sm:$0xff] %v11942_v33  ;;  %v11967_v33 = vld [vmem:[%s13991_s6 + $0x14c] sm:$0xf] }
 0x710   :  { %14486 = vst [vmem:[#allocation257_spill] sm:$0xff] %v11947_v29  ;;  %v11972_v29 = vld [vmem:[%s13991_s6 + $0x148] sm:$0xf] }
 0x711   :  { %14487 = vst [vmem:[#allocation258_spill] sm:$0xff] %v11952_v40  ;;  %v11977_v40 = vld [vmem:[%s13991_s6 + $0x14c] sm:$0xf] }
 0x712   :  { %14488 = vst [vmem:[#allocation259_spill] sm:$0xff] %v11957_v38  ;;  %v11982_v38 = vld [vmem:[%s13991_s6 + $0x148] sm:$0xf] }
 0x713   :  { %14489 = vst [vmem:[#allocation260_spill] sm:$0xff] %v11962_v36  ;;  %v11987_v36 = vld [vmem:[%s13991_s6 + $0x150] sm:$0xf0] }
 0x714   :  { %14490 = vst [vmem:[#allocation261_spill] sm:$0xff] %v11967_v33  ;;  %v11992_v33 = vld [vmem:[%s13991_s6 + $0x14c] sm:$0xf0] }
 0x715   :  { %14491 = vst [vmem:[#allocation262_spill] sm:$0xff] %v11972_v29  ;;  %v11997_v29 = vld [vmem:[%s13991_s6 + $0x150] sm:$0xf0] }
 0x716   :  { %14492 = vst [vmem:[#allocation263_spill] sm:$0xff] %v11977_v40  ;;  %v12002_v40 = vld [vmem:[%s13991_s6 + $0x14c] sm:$0xf0] }
 0x717   :  { %14493 = vst [vmem:[#allocation264_spill] sm:$0xff] %v11982_v38  ;;  %v12007_v38 = vld [vmem:[%s13991_s6 + $0x158] sm:$0xf0] }
 0x718   :  { %14494 = vst [vmem:[#allocation265_spill] sm:$0xff] %v11987_v36  ;;  %v12012_v36 = vld [vmem:[%s13991_s6 + $0x154] sm:$0xf0] }
 0x719   :  { %14495 = vst [vmem:[#allocation266_spill] sm:$0xff] %v11992_v33  ;;  %v12017_v33 = vld [vmem:[%s13991_s6 + $0x158] sm:$0xf0] }
 0x71a   :  { %14496 = vst [vmem:[#allocation267_spill] sm:$0xff] %v11997_v29  ;;  %v12022_v29 = vld [vmem:[%s13991_s6 + $0x154] sm:$0xf0] }
 0x71b   :  { %14497 = vst [vmem:[#allocation268_spill] sm:$0xff] %v12002_v40  ;;  %v12027_v40 = vld [vmem:[%s13991_s6 + $0x164] sm:$0xf] }
 0x71c   :  { %14498 = vst [vmem:[#allocation269_spill] sm:$0xff] %v12007_v38  ;;  %v12032_v38 = vld [vmem:[%s13991_s6 + $0x160] sm:$0xf] }
 0x71d   :  { %14499 = vst [vmem:[#allocation270_spill] sm:$0xff] %v12012_v36  ;;  %v12037_v36 = vld [vmem:[%s13991_s6 + $0x164] sm:$0xf] }
 0x71e   :  { %14500 = vst [vmem:[#allocation271_spill] sm:$0xff] %v12017_v33  ;;  %v12042_v33 = vld [vmem:[%s13991_s6 + $0x160] sm:$0xf] }
 0x71f   :  { %14501 = vst [vmem:[#allocation272_spill] sm:$0xff] %v12022_v29  ;;  %v12047_v29 = vld [vmem:[%s13991_s6 + $0x16c] sm:$0xf] }
 0x720   :  { %14502 = vst [vmem:[#allocation273_spill] sm:$0xff] %v12027_v40  ;;  %v12052_v40 = vld [vmem:[%s13991_s6 + $0x168] sm:$0xf] }
 0x721   :  { %14503 = vst [vmem:[#allocation274_spill] sm:$0xff] %v12032_v38  ;;  %v12057_v38 = vld [vmem:[%s13991_s6 + $0x16c] sm:$0xf] }
 0x722   :  { %14504 = vst [vmem:[#allocation275_spill] sm:$0xff] %v12037_v36  ;;  %v12062_v36 = vld [vmem:[%s13991_s6 + $0x168] sm:$0xf] }
 0x723   :  { %14505 = vst [vmem:[#allocation276_spill] sm:$0xff] %v12042_v33  ;;  %v12067_v33 = vld [vmem:[%s13991_s6 + $0x170] sm:$0xf0] }
 0x724   :  { %14506 = vst [vmem:[#allocation277_spill] sm:$0xff] %v12047_v29  ;;  %v12072_v29 = vld [vmem:[%s13991_s6 + $0x16c] sm:$0xf0] }
 0x725   :  { %14507 = vst [vmem:[#allocation278_spill] sm:$0xff] %v12052_v40  ;;  %v12077_v40 = vld [vmem:[%s13991_s6 + $0x170] sm:$0xf0] }
 0x726   :  { %14508 = vst [vmem:[#allocation279_spill] sm:$0xff] %v12057_v38  ;;  %v12082_v38 = vld [vmem:[%s13991_s6 + $0x16c] sm:$0xf0] }
 0x727   :  { %14509 = vst [vmem:[#allocation280_spill] sm:$0xff] %v12062_v36  ;;  %v12087_v36 = vld [vmem:[%s13991_s6 + $0x178] sm:$0xf0] }
 0x728   :  { %14510 = vst [vmem:[#allocation281_spill] sm:$0xff] %v12067_v33  ;;  %v12092_v33 = vld [vmem:[%s13991_s6 + $0x174] sm:$0xf0] }
 0x729   :  { %14511 = vst [vmem:[#allocation282_spill] sm:$0xff] %v12072_v29  ;;  %v12097_v29 = vld [vmem:[%s13991_s6 + $0x178] sm:$0xf0] }
 0x72a   :  { %14512 = vst [vmem:[#allocation283_spill] sm:$0xff] %v12077_v40  ;;  %v12102_v40 = vld [vmem:[%s13991_s6 + $0x174] sm:$0xf0] }
 0x72b   :  { %14513 = vst [vmem:[#allocation284_spill] sm:$0xff] %v12082_v38  ;;  %v12107_v38 = vld [vmem:[%s13991_s6 + $0x184] sm:$0xf] }
 0x72c   :  { %14514 = vst [vmem:[#allocation285_spill] sm:$0xff] %v12087_v36  ;;  %v12112_v36 = vld [vmem:[%s13991_s6 + $0x180] sm:$0xf] }
 0x72d   :  { %14515 = vst [vmem:[#allocation286_spill] sm:$0xff] %v12092_v33  ;;  %v12117_v33 = vld [vmem:[%s13991_s6 + $0x184] sm:$0xf] }
 0x72e   :  { %14516 = vst [vmem:[#allocation287_spill] sm:$0xff] %v12097_v29  ;;  %v12122_v29 = vld [vmem:[%s13991_s6 + $0x180] sm:$0xf] }
 0x72f   :  { %14517 = vst [vmem:[#allocation288_spill] sm:$0xff] %v12102_v40  ;;  %v12127_v40 = vld [vmem:[%s13991_s6 + $0x18c] sm:$0xf] }
 0x730   :  { %14518 = vst [vmem:[#allocation289_spill] sm:$0xff] %v12107_v38  ;;  %v12132_v38 = vld [vmem:[%s13991_s6 + $0x188] sm:$0xf] }
 0x731   :  { %14519 = vst [vmem:[#allocation290_spill] sm:$0xff] %v12112_v36  ;;  %v12137_v36 = vld [vmem:[%s13991_s6 + $0x18c] sm:$0xf] }
 0x732   :  { %14520 = vst [vmem:[#allocation291_spill] sm:$0xff] %v12117_v33  ;;  %v12142_v33 = vld [vmem:[%s13991_s6 + $0x188] sm:$0xf] }
 0x733   :  { %14521 = vst [vmem:[#allocation292_spill] sm:$0xff] %v12122_v29  ;;  %v12147_v29 = vld [vmem:[%s13991_s6 + $0x190] sm:$0xf0] }
 0x734   :  { %14522 = vst [vmem:[#allocation293_spill] sm:$0xff] %v12127_v40  ;;  %v12152_v40 = vld [vmem:[%s13991_s6 + $0x18c] sm:$0xf0] }
 0x735   :  { %14523 = vst [vmem:[#allocation294_spill] sm:$0xff] %v12132_v38  ;;  %v12157_v38 = vld [vmem:[%s13991_s6 + $0x190] sm:$0xf0] }
 0x736   :  { %14524 = vst [vmem:[#allocation295_spill] sm:$0xff] %v12137_v36  ;;  %v12162_v36 = vld [vmem:[%s13991_s6 + $0x18c] sm:$0xf0] }
 0x737   :  { %14525 = vst [vmem:[#allocation296_spill] sm:$0xff] %v12142_v33  ;;  %v12167_v33 = vld [vmem:[%s13991_s6 + $0x198] sm:$0xf0] }
 0x738   :  { %14526 = vst [vmem:[#allocation297_spill] sm:$0xff] %v12147_v29  ;;  %v12172_v29 = vld [vmem:[%s13991_s6 + $0x194] sm:$0xf0] }
 0x739   :  { %14527 = vst [vmem:[#allocation298_spill] sm:$0xff] %v12152_v40  ;;  %v12177_v40 = vld [vmem:[%s13991_s6 + $0x198] sm:$0xf0] }
 0x73a   :  { %14528 = vst [vmem:[#allocation299_spill] sm:$0xff] %v12157_v38  ;;  %v12182_v38 = vld [vmem:[%s13991_s6 + $0x194] sm:$0xf0] }
 0x73b   :  { %14529 = vst [vmem:[#allocation300_spill] sm:$0xff] %v12162_v36  ;;  %v12187_v36 = vld [vmem:[%s13991_s6 + $0x1a4] sm:$0xf] }
 0x73c   :  { %14530 = vst [vmem:[#allocation301_spill] sm:$0xff] %v12167_v33  ;;  %v12192_v33 = vld [vmem:[%s13991_s6 + $0x1a0] sm:$0xf] }
 0x73d   :  { %14531 = vst [vmem:[#allocation302_spill] sm:$0xff] %v12172_v29  ;;  %v12197_v29 = vld [vmem:[%s13991_s6 + $0x1a4] sm:$0xf] }
 0x73e   :  { %14532 = vst [vmem:[#allocation303_spill] sm:$0xff] %v12177_v40  ;;  %v12202_v40 = vld [vmem:[%s13991_s6 + $0x1a0] sm:$0xf] }
 0x73f   :  { %14533 = vst [vmem:[#allocation304_spill] sm:$0xff] %v12182_v38  ;;  %v12207_v38 = vld [vmem:[%s13991_s6 + $0x1ac] sm:$0xf] }
 0x740   :  { %14534 = vst [vmem:[#allocation305_spill] sm:$0xff] %v12187_v36  ;;  %v12212_v36 = vld [vmem:[%s13991_s6 + $0x1a8] sm:$0xf] }
 0x741   :  { %14535 = vst [vmem:[#allocation306_spill] sm:$0xff] %v12192_v33  ;;  %v12217_v33 = vld [vmem:[%s13991_s6 + $0x1ac] sm:$0xf] }
 0x742   :  { %14536 = vst [vmem:[#allocation307_spill] sm:$0xff] %v12197_v29  ;;  %v12222_v29 = vld [vmem:[%s13991_s6 + $0x1a8] sm:$0xf] }
 0x743   :  { %14537 = vst [vmem:[#allocation308_spill] sm:$0xff] %v12202_v40  ;;  %v12227_v40 = vld [vmem:[%s13991_s6 + $0x1b0] sm:$0xf0] }
 0x744   :  { %14538 = vst [vmem:[#allocation309_spill] sm:$0xff] %v12207_v38  ;;  %v12232_v38 = vld [vmem:[%s13991_s6 + $0x1ac] sm:$0xf0] }
 0x745   :  { %14539 = vst [vmem:[#allocation310_spill] sm:$0xff] %v12212_v36  ;;  %v12237_v36 = vld [vmem:[%s13991_s6 + $0x1b0] sm:$0xf0] }
 0x746   :  { %14540 = vst [vmem:[#allocation311_spill] sm:$0xff] %v12217_v33  ;;  %v12242_v33 = vld [vmem:[%s13991_s6 + $0x1ac] sm:$0xf0] }
 0x747   :  { %14541 = vst [vmem:[#allocation312_spill] sm:$0xff] %v12222_v29  ;;  %v12247_v29 = vld [vmem:[%s13991_s6 + $0x1b8] sm:$0xf0] }
 0x748   :  { %14542 = vst [vmem:[#allocation313_spill] sm:$0xff] %v12227_v40  ;;  %v12252_v40 = vld [vmem:[%s13991_s6 + $0x1b4] sm:$0xf0] }
 0x749   :  { %14543 = vst [vmem:[#allocation314_spill] sm:$0xff] %v12232_v38  ;;  %v12257_v38 = vld [vmem:[%s13991_s6 + $0x1b8] sm:$0xf0] }
 0x74a   :  { %14544 = vst [vmem:[#allocation315_spill] sm:$0xff] %v12237_v36  ;;  %v12262_v36 = vld [vmem:[%s13991_s6 + $0x1b4] sm:$0xf0] }
 0x74b   :  { %14545 = vst [vmem:[#allocation316_spill] sm:$0xff] %v12242_v33  ;;  %v12267_v33 = vld [vmem:[%s13991_s6 + $0x1c4] sm:$0xf] }
 0x74c   :  { %14546 = vst [vmem:[#allocation317_spill] sm:$0xff] %v12247_v29  ;;  %v12272_v29 = vld [vmem:[%s13991_s6 + $0x1c0] sm:$0xf] }
 0x74d   :  { %14547 = vst [vmem:[#allocation318_spill] sm:$0xff] %v12252_v40  ;;  %v12277_v40 = vld [vmem:[%s13991_s6 + $0x1c4] sm:$0xf] }
 0x74e   :  { %14548 = vst [vmem:[#allocation319_spill] sm:$0xff] %v12257_v38  ;;  %v12282_v38 = vld [vmem:[%s13991_s6 + $0x1c0] sm:$0xf] }
 0x74f   :  { %14549 = vst [vmem:[#allocation320_spill] sm:$0xff] %v12262_v36  ;;  %v12287_v36 = vld [vmem:[%s13991_s6 + $0x1cc] sm:$0xf] }
 0x750   :  { %14550 = vst [vmem:[#allocation321_spill] sm:$0xff] %v12267_v33  ;;  %v12292_v33 = vld [vmem:[%s13991_s6 + $0x1c8] sm:$0xf] }
 0x751   :  { %14551 = vst [vmem:[#allocation322_spill] sm:$0xff] %v12272_v29  ;;  %v12297_v29 = vld [vmem:[%s13991_s6 + $0x1cc] sm:$0xf] }
 0x752   :  { %14552 = vst [vmem:[#allocation323_spill] sm:$0xff] %v12277_v40  ;;  %v12302_v40 = vld [vmem:[%s13991_s6 + $0x1c8] sm:$0xf] }
 0x753   :  { %14553 = vst [vmem:[#allocation324_spill] sm:$0xff] %v12282_v38  ;;  %v12307_v38 = vld [vmem:[%s13991_s6 + $0x1d0] sm:$0xf0] }
 0x754   :  { %14554 = vst [vmem:[#allocation325_spill] sm:$0xff] %v12287_v36  ;;  %v12312_v36 = vld [vmem:[%s13991_s6 + $0x1cc] sm:$0xf0] }
 0x755   :  { %14555 = vst [vmem:[#allocation326_spill] sm:$0xff] %v12292_v33  ;;  %v12317_v33 = vld [vmem:[%s13991_s6 + $0x1d0] sm:$0xf0] }
 0x756   :  { %14556 = vst [vmem:[#allocation327_spill] sm:$0xff] %v12297_v29  ;;  %v12322_v29 = vld [vmem:[%s13991_s6 + $0x1cc] sm:$0xf0] }
 0x757   :  { %14557 = vst [vmem:[#allocation328_spill] sm:$0xff] %v12302_v40  ;;  %v12327_v40 = vld [vmem:[%s13991_s6 + $0x1d8] sm:$0xf0] }
 0x758   :  { %14558 = vst [vmem:[#allocation329_spill] sm:$0xff] %v12307_v38  ;;  %v12332_v38 = vld [vmem:[%s13991_s6 + $0x1d4] sm:$0xf0] }
 0x759   :  { %14559 = vst [vmem:[#allocation330_spill] sm:$0xff] %v12312_v36  ;;  %v12337_v36 = vld [vmem:[%s13991_s6 + $0x1d8] sm:$0xf0] }
 0x75a   :  { %14560 = vst [vmem:[#allocation331_spill] sm:$0xff] %v12317_v33  ;;  %v12342_v33 = vld [vmem:[%s13991_s6 + $0x1d4] sm:$0xf0] }
 0x75b   :  { %14561 = vst [vmem:[#allocation332_spill] sm:$0xff] %v12322_v29  ;;  %v12347_v29 = vld [vmem:[%s13991_s6 + $0x1e4] sm:$0xf] }
 0x75c   :  { %14562 = vst [vmem:[#allocation333_spill] sm:$0xff] %v12327_v40  ;;  %v12352_v40 = vld [vmem:[%s13991_s6 + $0x1e0] sm:$0xf] }
 0x75d   :  { %14563 = vst [vmem:[#allocation334_spill] sm:$0xff] %v12332_v38  ;;  %v12357_v38 = vld [vmem:[%s13991_s6 + $0x1e4] sm:$0xf] }
 0x75e   :  { %14564 = vst [vmem:[#allocation335_spill] sm:$0xff] %v12337_v36  ;;  %v12362_v36 = vld [vmem:[%s13991_s6 + $0x1e0] sm:$0xf] }
 0x75f   :  { %14565 = vst [vmem:[#allocation336_spill] sm:$0xff] %v12342_v33  ;;  %v12367_v33 = vld [vmem:[%s13991_s6 + $0x1ec] sm:$0xf] }
 0x760   :  { %14566 = vst [vmem:[#allocation337_spill] sm:$0xff] %v12347_v29  ;;  %v12372_v29 = vld [vmem:[%s13991_s6 + $0x1e8] sm:$0xf] }
 0x761   :  { %14567 = vst [vmem:[#allocation338_spill] sm:$0xff] %v12352_v40  ;;  %v12377_v40 = vld [vmem:[%s13991_s6 + $0x1ec] sm:$0xf] }
 0x762   :  { %14568 = vst [vmem:[#allocation339_spill] sm:$0xff] %v12357_v38  ;;  %v12382_v38 = vld [vmem:[%s13991_s6 + $0x1e8] sm:$0xf] }
 0x763   :  { %14569 = vst [vmem:[#allocation340_spill] sm:$0xff] %v12362_v36  ;;  %v12387_v36 = vld [vmem:[%s13991_s6 + $0x1f0] sm:$0xf0] }
 0x764   :  { %14570 = vst [vmem:[#allocation341_spill] sm:$0xff] %v12367_v33  ;;  %v12392_v33 = vld [vmem:[%s13991_s6 + $0x1ec] sm:$0xf0] }
 0x765   :  { %14571 = vst [vmem:[#allocation342_spill] sm:$0xff] %v12372_v29  ;;  %v12397_v29 = vld [vmem:[%s13991_s6 + $0x1f0] sm:$0xf0] }
 0x766   :  { %14572 = vst [vmem:[#allocation343_spill] sm:$0xff] %v12377_v40  ;;  %v12402_v40 = vld [vmem:[%s13991_s6 + $0x1ec] sm:$0xf0] }
 0x767   :  { %14573 = vst [vmem:[#allocation344_spill] sm:$0xff] %v12382_v38  ;;  %v12407_v38 = vld [vmem:[%s13991_s6 + $0x1f8] sm:$0xf0] }
 0x768   :  { %14574 = vst [vmem:[#allocation345_spill] sm:$0xff] %v12387_v36  ;;  %v12412_v36 = vld [vmem:[%s13991_s6 + $0x1f4] sm:$0xf0] }
 0x769   :  { %14575 = vst [vmem:[#allocation346_spill] sm:$0xff] %v12392_v33  ;;  %v12417_v33 = vld [vmem:[%s13991_s6 + $0x1f8] sm:$0xf0] }
 0x76a   :  { %14576 = vst [vmem:[#allocation347_spill] sm:$0xff] %v12397_v29  ;;  %v12422_v29 = vld [vmem:[%s13991_s6 + $0x1f4] sm:$0xf0] }
 0x76b   :  { %14577 = vst [vmem:[#allocation348_spill] sm:$0xff] %v12402_v40  ;;  %v12427_v40 = vld [vmem:[%s13992_s7] sm:$0xf] }
 0x76c   :  { %14578 = vst [vmem:[#allocation349_spill] sm:$0xff] %v12407_v38  ;;  %v12429_v38 = vmov 0.0  }
 0x76d   :  { %14579 = vst [vmem:[#allocation350_spill] sm:$0xff] %v12412_v36  ;;  %v12433_v36 = vmov 0.0  }
 0x76e   :  { %14580 = vst [vmem:[#allocation351_spill] sm:$0xff] %v12417_v33 }
 0x76f   :  { %14581 = vst [vmem:[#allocation352_spill] sm:$0xff] %v12422_v29 }
 0x770   :  { %14582 = vst [vmem:[#allocation353_spill] sm:$0xff] %v12427_v40 }
 0x771 LB: > { %14583 = vst [vmem:[#allocation354_spill] sm:$0xff] %v8249_v38  ;;  %v14586_v15 = vld [vmem:[#allocation86_spill] sm:$0xff]  ;;  %v14588_v22 = vld [vmem:[#allocation93_spill] sm:$0xff]  ;;  %v14591_v21 = vld [vmem:[#allocation76_spill] sm:$0xff]  ;;  %s6772_s6 = sshll.u32 %s8265_s14, 3  ;;  %s3735_s14 = sadd.s32 1, %s8265_s14   ;;  %s8265_s14 = sphi %s12437_s14, %s3735_s14   ;;  %v8261_v48 = vphi %v12435_v48, %v12690_v48   ;;  %v8257_v36 = vphi %v12433_v36, %v12683_v36   ;;  %v8253_v39 = vphi %v12431_v39, %v14754_v39   ;;  %v8249_v38 = vphi %v12429_v38, %v4525_v38  }
 0x772   : > { %14584 = vst [vmem:[#allocation355_spill] sm:$0xff] %v8253_v39  ;;  %v14587_v3 = vld [vmem:[#allocation94_spill] sm:$0xff]  ;;  %v6894_v29 = vor.u32 %v11077_v46, %v14588_v22  ;;  %v14589_v10 = vld [vmem:[#allocation89_spill] sm:$0xff]  ;;  %v14592_v16 = vld [vmem:[#allocation75_spill] sm:$0xff]  ;;  %s3741_s7 = sshra.s32 %s6772_s6, 3  ;;  %p3732_p0 = scmp.ge.s32.totalorder %s3735_s14, 120  }
 0x773   : > { %14585 = vst [vmem:[#allocation356_spill] sm:$0xff] %v8257_v36  ;;  %v6890_v40 = vor.u32 %v14587_v3, %v14586_v15  ;;  %v6902_v38 = vor.u32 %v14589_v10, %v11137_v34  ;;  %v14590_v11 = vld [vmem:[#allocation90_spill] sm:$0xff]  ;;  %v6874_v36 = vor.u32 %v11042_v44, %v14591_v21  ;;  %v6878_v33 = vor.u32 %v14592_v16, %v11037_v54  ;;  %v14593_v12 = vld [vmem:[#allocation79_spill] sm:$0xff]  ;;  %v14595_v20 = vld [vmem:[#allocation69_spill] sm:$0xff]  ;;  %s7968_s15 = sshll.u32 %s3741_s7, 5 }
 0x774   : > { %v6898_v39 = vor.u32 %v11142_v30, %v14590_v11  ;;  %3924 = vmatpush.bf16.msra.mxu1 %v6894_v29  ;;  %v6886_v3 = vor.u32 %v14593_v12, %v11057_v24  ;;  %v6882_v15 = vor.u32 %v11062_v23, %v11022_v57  ;;  %v14594_v18 = vld [vmem:[#allocation70_spill] sm:$0xff]  ;;  %v6862_v29 = vor.u32 %v10917_v31, %v14595_v20  ;;  %v14596_v7 = vld [vmem:[#allocation65_spill] sm:$0xff]  ;;  %v14598_v8 = vld [vmem:[#allocation56_spill] sm:$0xff]  ;;  %s12587_s16 = scalar_lea.vmem [#allocation2], %s7968_s15 }
 0x775   : > { %3911 = vmatpush.bf16.msra.mxu0 %v6890_v40  ;;  %3950 = vmatpush.bf16.msra.mxu3 %v6902_v38  ;;  %v6858_v40 = vor.u32 %v14594_v18, %v10922_v62  ;;  %v6870_v10 = vor.u32 %v14596_v7, %v10977_v47  ;;  %v14597_v5 = vld [vmem:[#allocation66_spill] sm:$0xff]  ;;  %v14599_v19 = vld [vmem:[#allocation55_spill] sm:$0xff]  ;;  %v14601_v2 = vld [vmem:[#allocation60_spill] sm:$0xff] }
 0x776   : > { %3937 = vmatpush.bf16.msra.mxu2 %v6898_v39  ;;  %v6866_v38 = vor.u32 %v10982_v63, %v14597_v5  ;;  %v6842_v39 = vor.u32 %v14598_v8, %v10840_v51  ;;  %v14600_v4 = vld [vmem:[#allocation59_spill] sm:$0xff]  ;;  %v14602_v1 = vld [vmem:[#allocation45_spill] sm:$0xff]  ;;  %v14603_v14 = vld [vmem:[#allocation42_spill] sm:$0xff] }
 0x777   : > { %v14604_v9 = vld [vmem:[#allocation48_spill] sm:$0xff]  ;;  %v14607_v17 = vld [vmem:[#allocation23_spill] sm:$0xff]  ;;  %v14608_v13 = vld [vmem:[#allocation29_spill] sm:$0xff] }
 0x778   : > { %3925 = vmatpush.bf16.msra.mxu1 %v6878_v33  ;;  %v6846_v33 = vor.u32 %v10835_v55, %v14599_v19  ;;  %v14605_v6 = vld [vmem:[#allocation20_spill] sm:$0xff]  ;;  %v14615_v7 = vld [vmem:[#allocation17_spill] sm:$0xff]  ;;  %v14617_v8 = vld [vmem:[#allocation339_spill] sm:$0xff] }
 0x779   : > { %3912 = vmatpush.bf16.msra.mxu0 %v6874_v36  ;;  %3951 = vmatpush.bf16.msra.mxu3 %v6886_v3  ;;  %v6854_v36 = vor.u32 %v10856_v50, %v14600_v4  ;;  %v6850_v3 = vor.u32 %v14601_v2, %v10861_v43  ;;  %v14606_v0 = vld [vmem:[#allocation28_spill] sm:$0xff]  ;;  %v14690_v11 = vld [vmem:[#allocation319_spill] sm:$0xff]  ;;  %v7995_v63 = vld [vmem:[%s13987_s3 + $0xcc] sm:$0xf0] (%p3732_p0) }
 0x77a   : > { %3938 = vmatpush.bf16.msra.mxu2 %v6882_v15  ;;  %v6826_v15 = vor.u32 %v10799_v58, %v10758_v60  ;;  %v14612_v4 = vld [vmem:[#allocation16_spill] sm:$0xff]  ;;  %v14728_v16 = vld [vmem:[#allocation135_spill] sm:$0xff]  ;;  %v7996_v46 = vld [vmem:[%s13987_s3 + $0xd4] sm:$0xf0] (%p3732_p0) }
 0x77b   : > { %v14613_v5 = vld [vmem:[#allocation8_spill] sm:$0xff]  ;;  %v7263_v30 = vld [vmem:[%s13987_s3 + $0xc0] sm:$0xf] (%p3732_p0)  ;;  %v14757_v47 = vld [vmem:[#allocation74_spill] sm:$0xff] (%p3732_p0) }
 0x77c   : > { %3926 = vmatpush.bf16.msra.mxu1 %v6862_v29  ;;  %v6838_v29 = vor.u32 %v10773_v56, %v10815_v59  ;;  %v7271_v34 = vld [vmem:[%s13987_s3 + $0xc8] sm:$0xf] (%p3732_p0)  ;;  %v14759_v62 = vld [vmem:[#allocation62_spill] sm:$0xff] (%p3732_p0)  ;;  %v7231_v51 = vld [vmem:[%s13987_s3 + $0x80] sm:$0xf] (%p3732_p0) }
 0x77d   : > { %3913 = vmatpush.bf16.msra.mxu0 %v6858_v40  ;;  %3952 = vmatpush.bf16.msra.mxu3 %v6870_v10  ;;  %v6830_v40 = vor.u32 %v10753_v45, %v14602_v1  ;;  %v6834_v10 = vor.u32 %v14604_v9, %v14603_v14  ;;  %v14611_v1 = vld [vmem:[#allocation5_spill] sm:$0xff]  ;;  %v14726_v14 = vld [vmem:[#allocation144_spill] sm:$0xff]  ;;  %v7272_v59 = vor.u32 (%p3732_p0), %v7996_v46, %v7271_v34  ;;  %v7257_v60 = vld [vmem:[%s13987_s3 + $0xb8] sm:$0xf0] (%p3732_p0) }
 0x77e   : > { %3939 = vmatpush.bf16.msra.mxu2 %v6866_v38  ;;  %v6810_v38 = vor.u32 %v10717_v32, %v10676_v61  ;;  %v7247_v61 = vld [vmem:[%s13987_s3 + $0xa0] sm:$0xf] (%p3732_p0)  ;;  %v7255_v44 = vld [vmem:[%s13987_s3 + $0xa8] sm:$0xf] (%p3732_p0)  ;;  %v7273_v32 = vld [vmem:[%s13987_s3 + $0xd8] sm:$0xf0] (%p3732_p0) }
 0x77f   :  { %v7990_v45 = vld [vmem:[%s13987_s3 + $0xac] sm:$0xf] (%p3732_p0)  ;;  %v7987_v24 = vld [vmem:[%s13987_s3 + $0x8c] sm:$0xf0] (%p3732_p0)  ;;  %v7239_v58 = vld [vmem:[%s13987_s3 + $0x88] sm:$0xf] (%p3732_p0) }
 0x780   : > { %3927 = vmatpush.bf16.msra.mxu1 %v6846_v33  ;;  %v6822_v33 = vor.u32 %v10691_v52, %v10732_v35  ;;  %v7991_v52 = vld [vmem:[%s13987_s3 + $0xac] sm:$0xf0] (%p3732_p0)  ;;  %v14760_v35 = vld [vmem:[#allocation68_spill] sm:$0xff] (%p3732_p0)  ;;  %v7988_v55 = vld [vmem:[%s13987_s3 + $0x94] sm:$0xf0] (%p3732_p0)  ;;  %v7260_v50 = vor.u32 (%p3732_p0), %v7990_v45, %v7257_v60 }
 0x781   : > { %3914 = vmatpush.bf16.msra.mxu0 %v6842_v39  ;;  %3953 = vmatpush.bf16.msra.mxu3 %v6854_v36  ;;  %v6814_v39 = vor.u32 %v10670_v53, %v10712_v27  ;;  %v6818_v36 = vor.u32 %v10737_v41, %v10696_v37  ;;  %v7994_v37 = vld [vmem:[%s13987_s3 + $0xcc] sm:$0xf] (%p3732_p0)  ;;  %v7992_v27 = vld [vmem:[%s13987_s3 + $0xb4] sm:$0xf0] (%p3732_p0)  ;;  %v12787_v41 = vor.u32 (%p3732_p0), %v14760_v35, %v14759_v62  ;;  %v7209_v34 = vld [vmem:[%s13987_s3 + $0x58] sm:$0xf0] (%p3732_p0) }
 0x782   : > { %3940 = vmatpush.bf16.msra.mxu2 %v6850_v3  ;;  %v6794_v3 = vor.u32 %v10635_v26, %v14605_v6  ;;  %v6790_v6 = vor.u32 %v14613_v5, %v14612_v4  ;;  %v14619_v4 = vld [vmem:[#allocation323_spill] sm:$0xff]  ;;  %v7289_v26 = vld [vmem:[%s13987_s3 + $0xf8] sm:$0xf0] (%p3732_p0)  ;;  %v7276_v54 = vor.u32 (%p3732_p0), %v7994_v37, %v7273_v32  ;;  %v7248_v23 = vor.u32 (%p3732_p0), %v7991_v52, %v7247_v61  ;;  %v7974_v37 = vld [vmem:[%s13987_s3 + $0x2c] sm:$0xf] (%p3732_p0) }
 0x783   :  { %v7256_v56 = vor.u32 (%p3732_p0), %v7992_v27, %v7255_v44  ;;  %v14761_v31 = vld [vmem:[#allocation50_spill] sm:$0xff] (%p3732_p0)  ;;  %v7167_v32 = vld [vmem:[%s13987_s3] sm:$0xf] (%p3732_p0)  ;;  %v7997_v62 = vld [vmem:[%s13987_s3 + $0xe4] sm:$0xf] (%p3732_p0) }
 0x784   : > { %3928 = vmatpush.bf16.msra.mxu1 %v6830_v40  ;;  %v6806_v40 = vor.u32 %v10609_v25, %v14606_v0  ;;  %v14758_v25 = vld [vmem:[#allocation81_spill] sm:$0xff] (%p3732_p0)  ;;  %v7193_v44 = vld [vmem:[%s13987_s3 + $0x38] sm:$0xf0] (%p3732_p0)  ;;  %v7972_v45 = vld [vmem:[%s13987_s3 + $0x14] sm:$0xf0] (%p3732_p0) }
 0x785   : > { %3915 = vmatpush.bf16.msra.mxu0 %v6826_v15  ;;  %3954 = vmatpush.bf16.msra.mxu3 %v6838_v29  ;;  %v6798_v15 = vor.u32 %v10588_v49, %v10629_v42  ;;  %v6802_v29 = vor.u32 %v14608_v13, %v14607_v17  ;;  %v7998_v49 = vld [vmem:[%s13987_s3 + $0xec] sm:$0xf] (%p3732_p0)  ;;  %v12761_v57 = vor.u32 (%p3732_p0), %v14758_v25, %v14757_v47  ;;  %v7975_v47 = vld [vmem:[%s13987_s3 + $0x2c] sm:$0xf0] (%p3732_p0)  ;;  %v7191_v25 = vld [vmem:[%s13987_s3 + $0x28] sm:$0xf] (%p3732_p0) }
 0x786   : > { %3941 = vmatpush.bf16.msra.mxu2 %v6834_v10  ;;  %v14609_v10 = vld [vmem:[#allocation13_spill] sm:$0xff]  ;;  %v7264_v42 = vor.u32 (%p3732_p0), %v7995_v63, %v7263_v30  ;;  %v7292_v53 = vor.u32 (%p3732_p0), %v7998_v49, %v7289_v26  ;;  %v7183_v49 = vld [vmem:[%s13987_s3 + $0x20] sm:$0xf] (%p3732_p0)  ;;  %v7196_v60 = vor.u32 (%p3732_p0), %v7974_v37, %v7193_v44 }
 0x787   :  { %v7184_v52 = vor.u32 (%p3732_p0), %v7975_v47, %v7183_v49  ;;  %v7281_v35 = vld [vmem:[%s13987_s3 + $0xf0] sm:$0xf0] (%p3732_p0)  ;;  %v14789_v49 = vld [vmem:[#allocation63_spill] sm:$0xff] (%p3732_p0) }
 0x788   : > { %3929 = vmatpush.bf16.msra.mxu1 %v6814_v39  ;;  %v14610_v39 = vld [vmem:[#allocation12_spill] sm:$0xff]  ;;  %v14794_v37 = vld [vmem:[#allocation57_spill] sm:$0xff] (%p3732_p0)  ;;  %v14795_v44 = vld [vmem:[#allocation51_spill] sm:$0xff] (%p3732_p0) }
 0x789   : > { %3916 = vmatpush.bf16.msra.mxu0 %v6810_v38  ;;  %3955 = vmatpush.bf16.msra.mxu3 %v6822_v33  ;;  %v6778_v38 = vor.u32 %v14609_v10, %v10511_v28  ;;  %v6782_v2 = vor.u32 %v14611_v1, %v14610_v39  ;;  %v14614_v33 = vld [vmem:[#allocation9_spill] sm:$0xff]  ;;  %v14618_v1 = vld [vmem:[#allocation331_spill] sm:$0xff]  ;;  %v14628_v39 = vld [vmem:[#allocation196_spill] sm:$0xff] }
 0x78a   : > { %3942 = vmatpush.bf16.msra.mxu2 %v6818_v36  ;;  %v6786_v0 = vor.u32 %v14615_v7, %v14614_v33  ;;  %v14616_v36 = vld [vmem:[#allocation347_spill] sm:$0xff]  ;;  %v7137_v5 = vor.u32 %v14619_v4, %v14618_v1  ;;  %v14620_v7 = vld [vmem:[#allocation212_spill] sm:$0xff]  ;;  %v8000_v28 = vld [vmem:[%s13987_s3 + $0xf4] sm:$0xf0] (%p3732_p0) }
 0x78b   : > { %v7153_v9 = vor.u32 %v14617_v8, %v14616_v36  ;;  %v14622_v8 = vld [vmem:[#allocation219_spill] sm:$0xff]  ;;  %v14629_v33 = vld [vmem:[#allocation204_spill] sm:$0xff] }
 0x78c   : > { %3930 = vmatpush.bf16.msra.mxu1 %v6798_v15  ;;  %v14621_v15 = vld [vmem:[#allocation220_spill] sm:$0xff]  ;;  %v7005_v36 = vor.u32 %v14629_v33, %v14628_v39  ;;  %v14631_v1 = vld [vmem:[#allocation195_spill] sm:$0xff] }
 0x78d   : > { %3917 = vmatpush.bf16.msra.mxu0 %v6794_v3  ;;  %3956 = vmatpush.bf16.msra.mxu3 %v6806_v40  ;;  %v3750_v3 = vpack.c.bf16 %v8261_v48, %v8261_v48  ;;  %v7021_v40 = vor.u32 %v14621_v15, %v14620_v7  ;;  %v14624_v48 = vld [vmem:[#allocation340_spill] sm:$0xff] }
 0x78e   : > { %3943 = vmatpush.bf16.msra.mxu2 %v6802_v29  ;;  %v14623_v29 = vld [vmem:[#allocation211_spill] sm:$0xff]  ;;  %v14633_v7 = vld [vmem:[#allocation332_spill] sm:$0xff] }
 0x78f   : > { %v7025_v10 = vor.u32 %v14623_v29, %v14622_v8  ;;  %v14635_v8 = vld [vmem:[#allocation291_spill] sm:$0xff]  ;;  %v14641_v39 = vld [vmem:[#allocation316_spill] sm:$0xff] }
 0x790   : > { %3931 = vmatpush.bf16.msra.mxu1 %v6782_v2  ;;  %v14626_v2 = vld [vmem:[#allocation315_spill] sm:$0xff] }
 0x791   : > { %3918 = vmatpush.bf16.msra.mxu0 %v6778_v38  ;;  %3957 = vmatpush.bf16.msra.mxu3 %v6790_v6  ;;  %v14625_v6 = vld [vmem:[#allocation348_spill] sm:$0xff] }
 0x792   : > { %3944 = vmatpush.bf16.msra.mxu2 %v6786_v0  ;;  %v7149_v0 = vor.u32 %v14625_v6, %v14624_v48  ;;  %v14637_v48 = vld [vmem:[#allocation188_spill] sm:$0xff] }
 0x793   : > { %3932 = vmatmul.bf16.vlgmr.msra.gmra.mxu1 %v3750_v3 }
 0x794   : > { %3919 = vmatmul.bf16.vlgmr.msra.gmra.mxu0 %v3750_v3  ;;  %3958 = vmatmul.bf16.vlgmr.msra.gmra.mxu3 %v3750_v3 }
 0x795   : > { %4400 = vmatpush.bf16.msrb.mxu3 %v7153_v9  ;;  %3945 = vmatmul.bf16.vlgmr.msra.gmra.mxu2 %v3750_v3  ;;  %v14627_v9 = vld [vmem:[#allocation307_spill] sm:$0xff] }
 0x796   : > { %4361 = vmatpush.bf16.msrb.mxu0 %v7021_v40  ;;  %4387 = vmatpush.bf16.msrb.mxu2 %v7025_v10  ;;  %v7121_v38 = vor.u32 %v14627_v9, %v14626_v2  ;;  %v14630_v3 = vld [vmem:[#allocation203_spill] sm:$0xff]  ;;  %v14636_v10 = vld [vmem:[#allocation180_spill] sm:$0xff] }
 0x797   : > { %4374 = vmatpush.bf16.msrb.mxu1 %v7149_v0  ;;  %v7009_v4 = vor.u32 %v14631_v1, %v14630_v3  ;;  %v14634_v40 = vld [vmem:[#allocation299_spill] sm:$0xff]  ;;  %v6989_v6 = vor.u32 %v14637_v48, %v14636_v10  ;;  %v14649_v10 = vld [vmem:[#allocation300_spill] sm:$0xff] }
 0x798   : > { %v7105_v29 = vor.u32 %v14635_v8, %v14634_v40  ;;  %v14638_v0 = vld [vmem:[#allocation187_spill] sm:$0xff] }
 0x799   : > { %4401 = vmatpush.bf16.msrb.mxu3 %v7137_v5  ;;  %v14632_v5 = vld [vmem:[#allocation324_spill] sm:$0xff]  ;;  %v14639_v2 = vld [vmem:[#allocation179_spill] sm:$0xff] }
 0x79a   : > { %4362 = vmatpush.bf16.msrb.mxu0 %v7005_v36  ;;  %4388 = vmatpush.bf16.msrb.mxu2 %v7009_v4  ;;  %v7133_v15 = vor.u32 %v14633_v7, %v14632_v5  ;;  %v6993_v9 = vor.u32 %v14639_v2, %v14638_v0  ;;  %v14642_v36 = vld [vmem:[#allocation283_spill] sm:$0xff]  ;;  %v14644_v4 = vld [vmem:[#allocation164_spill] sm:$0xff] }
 0x79b   : > { %v14643_v3 = vld [vmem:[#allocation275_spill] sm:$0xff]  ;;  %v14645_v5 = vld [vmem:[#allocation172_spill] sm:$0xff] }
 0x79c   : > { %4375 = vmatpush.bf16.msrb.mxu1 %v7133_v15  ;;  %v7089_v1 = vor.u32 %v14643_v3, %v14642_v36  ;;  %v6973_v7 = vor.u32 %v14645_v5, %v14644_v4  ;;  %v14646_v15 = vld [vmem:[#allocation171_spill] sm:$0xff]  ;;  %v14657_v4 = vld [vmem:[#allocation284_spill] sm:$0xff] }
 0x79d   : > { %4402 = vmatpush.bf16.msrb.mxu3 %v7121_v38  ;;  %v14640_v38 = vld [vmem:[#allocation308_spill] sm:$0xff]  ;;  %v14647_v40 = vld [vmem:[#allocation163_spill] sm:$0xff] }
 0x79e   : > { %4363 = vmatpush.bf16.msrb.mxu0 %v6989_v6  ;;  %4389 = vmatpush.bf16.msrb.mxu2 %v6993_v9  ;;  %v7117_v33 = vor.u32 %v14641_v39, %v14640_v38  ;;  %v6977_v8 = vor.u32 %v14647_v40, %v14646_v15  ;;  %v14650_v6 = vld [vmem:[#allocation267_spill] sm:$0xff]  ;;  %v14652_v9 = vld [vmem:[#allocation148_spill] sm:$0xff] }
 0x79f   : > { %v14651_v0 = vld [vmem:[#allocation259_spill] sm:$0xff]  ;;  %v14653_v38 = vld [vmem:[#allocation156_spill] sm:$0xff] }
 0x7a0   : > { %4376 = vmatpush.bf16.msrb.mxu1 %v7117_v33  ;;  %v7073_v2 = vor.u32 %v14651_v0, %v14650_v6  ;;  %v6957_v39 = vor.u32 %v14653_v38, %v14652_v9  ;;  %v14654_v33 = vld [vmem:[#allocation155_spill] sm:$0xff]  ;;  %v14665_v9 = vld [vmem:[#allocation268_spill] sm:$0xff] }
 0x7a1   : > { %4403 = vmatpush.bf16.msrb.mxu3 %v7105_v29  ;;  %v14648_v29 = vld [vmem:[#allocation292_spill] sm:$0xff]  ;;  %v14655_v36 = vld [vmem:[#allocation147_spill] sm:$0xff] }
 0x7a2   : > { %4364 = vmatpush.bf16.msrb.mxu0 %v6973_v7  ;;  %4390 = vmatpush.bf16.msrb.mxu2 %v6977_v8  ;;  %v7101_v48 = vor.u32 %v14649_v10, %v14648_v29  ;;  %v6961_v3 = vor.u32 %v14655_v36, %v14654_v33  ;;  %v14658_v7 = vld [vmem:[#allocation251_spill] sm:$0xff]  ;;  %v14660_v8 = vld [vmem:[#allocation132_spill] sm:$0xff] }
 0x7a3   : > { %v14659_v15 = vld [vmem:[#allocation243_spill] sm:$0xff]  ;;  %v14661_v29 = vld [vmem:[#allocation140_spill] sm:$0xff] }
 0x7a4   : > { %4377 = vmatpush.bf16.msrb.mxu1 %v7101_v48  ;;  %v7057_v40 = vor.u32 %v14659_v15, %v14658_v7  ;;  %v6941_v10 = vor.u32 %v14661_v29, %v14660_v8  ;;  %v14662_v48 = vld [vmem:[#allocation139_spill] sm:$0xff]  ;;  %v14671_v7 = vld [vmem:[#allocation124_spill] sm:$0xff] }
 0x7a5   : > { %4404 = vmatpush.bf16.msrb.mxu3 %v7089_v1  ;;  %v14656_v1 = vld [vmem:[#allocation276_spill] sm:$0xff]  ;;  %v14663_v6 = vld [vmem:[#allocation131_spill] sm:$0xff] }
 0x7a6   : > { %4365 = vmatpush.bf16.msrb.mxu0 %v6957_v39  ;;  %4391 = vmatpush.bf16.msrb.mxu2 %v6961_v3  ;;  %v7085_v5 = vor.u32 %v14657_v4, %v14656_v1  ;;  %v6945_v0 = vor.u32 %v14663_v6, %v14662_v48  ;;  %v14666_v39 = vld [vmem:[#allocation235_spill] sm:$0xff]  ;;  %v14675_v48 = vld [vmem:[#allocation252_spill] sm:$0xff] }
 0x7a7   : > { %v14667_v33 = vld [vmem:[#allocation227_spill] sm:$0xff] }
 0x7a8   : > { %4378 = vmatpush.bf16.msrb.mxu1 %v7085_v5  ;;  %v7041_v36 = vor.u32 %v14667_v33, %v14666_v39  ;;  %v14668_v3 = vld [vmem:[#allocation351_spill] sm:$0xff]  ;;  %v14670_v5 = vld [vmem:[#allocation116_spill] sm:$0xff] }
 0x7a9   : > { %4405 = vmatpush.bf16.msrb.mxu3 %v7073_v2  ;;  %v14664_v2 = vld [vmem:[#allocation260_spill] sm:$0xff]  ;;  %v14669_v1 = vld [vmem:[#allocation343_spill] sm:$0xff]  ;;  %v6925_v15 = vor.u32 %v14671_v7, %v14670_v5 }
 0x7aa   : > { %4366 = vmatpush.bf16.msrb.mxu0 %v6941_v10  ;;  %4392 = vmatpush.bf16.msrb.mxu2 %v6945_v0  ;;  %v7069_v38 = vor.u32 %v14665_v9, %v14664_v2  ;;  %v7161_v4 = vor.u32 %v14669_v1, %v14668_v3  ;;  %v14673_v8 = vld [vmem:[#allocation115_spill] sm:$0xff]  ;;  %v14674_v10 = vld [vmem:[#allocation244_spill] sm:$0xff] }
 0x7ab   : > { %v7053_v6 = vor.u32 %v14675_v48, %v14674_v10  ;;  %v14676_v0 = vld [vmem:[#allocation335_spill] sm:$0xff]  ;;  %v14678_v39 = vld [vmem:[#allocation100_spill] sm:$0xff] }
 0x7ac   : > { %4379 = vmatpush.bf16.msrb.mxu1 %v7069_v38  ;;  %v14677_v2 = vld [vmem:[#allocation327_spill] sm:$0xff]  ;;  %v14679_v33 = vld [vmem:[#allocation108_spill] sm:$0xff] }
 0x7ad   : > { %4406 = vmatpush.bf16.msrb.mxu3 %v7057_v40  ;;  %v14672_v40 = vld [vmem:[#allocation123_spill] sm:$0xff]  ;;  %v7145_v9 = vor.u32 %v14677_v2, %v14676_v0  ;;  %v6909_v38 = vor.u32 %v14679_v33, %v14678_v39  ;;  %v3747_v5 = vld [vmem:[%s12587_s16 + $0x8] sm:$0xff] }
 0x7ae   : > { %v6929_v29 = vor.u32 %v14673_v8, %v14672_v40  ;;  %4367 = vmatpush.bf16.msrb.mxu0 %v6925_v15  ;;  %v14681_v3 = vld [vmem:[#allocation99_spill] sm:$0xff]  ;;  %v14682_v7 = vld [vmem:[#allocation216_spill] sm:$0xff] }
 0x7af   : > { %v14683_v15 = vld [vmem:[#allocation224_spill] sm:$0xff]  ;;  %v14684_v8 = vld [vmem:[#allocation223_spill] sm:$0xff] }
 0x7b0   : > { %4393 = vmatpush.bf16.msrb.mxu2 %v6929_v29  ;;  %4380 = vmatpush.bf16.msrb.mxu1 %v7053_v6  ;;  %v7029_v40 = vor.u32 %v14683_v15, %v14682_v7  ;;  %v14685_v29 = vld [vmem:[#allocation215_spill] sm:$0xff]  ;;  %v14686_v48 = vld [vmem:[#allocation228_spill] sm:$0xff] }
 0x7b1   : > { %4407 = vmatpush.bf16.msrb.mxu3 %v7041_v36  ;;  %v14680_v36 = vld [vmem:[#allocation107_spill] sm:$0xff]  ;;  %v7033_v10 = vor.u32 %v14685_v29, %v14684_v8  ;;  %v14687_v6 = vld [vmem:[#allocation236_spill] sm:$0xff] }
 0x7b2   : > { %v6913_v1 = vor.u32 %v14681_v3, %v14680_v36  ;;  %4368 = vmatpush.bf16.msrb.mxu0 %v6909_v38  ;;  %v7037_v0 = vor.u32 %v14687_v6, %v14686_v48  ;;  %v14688_v33 = vld [vmem:[#allocation344_spill] sm:$0xff]  ;;  %v14694_v29 = vld [vmem:[#allocation207_spill] sm:$0xff] }
 0x7b3   : > { %v14689_v36 = vld [vmem:[#allocation352_spill] sm:$0xff]  ;;  %v14695_v48 = vld [vmem:[#allocation199_spill] sm:$0xff] }
 0x7b4   : > { %4394 = vmatpush.bf16.msrb.mxu2 %v6913_v1  ;;  %v7157_v3 = vor.u32 %v14689_v36, %v14688_v33  ;;  %4381 = vmatpush.bf16.msrb.mxu1 %v7037_v0  ;;  %v14692_v38 = vld [vmem:[#allocation200_spill] sm:$0xff]  ;;  %v7017_v6 = vor.u32 %v14695_v48, %v14694_v29  ;;  %v14707_v48 = vld [vmem:[#allocation287_spill] sm:$0xff] }
 0x7b5   : > { %4452 = vmatpush.bf16.msra.mxu3 %v7161_v4  ;;  %v3746_v4 = vld [vmem:[%s12587_s16] sm:$0xff]  ;;  %v14693_v1 = vld [vmem:[#allocation208_spill] sm:$0xff] }
 0x7b6   : > { %4413 = vmatpush.bf16.msra.mxu0 %v7029_v40  ;;  %v7013_v8 = vor.u32 %v14693_v1, %v14692_v38  ;;  %v14696_v33 = vld [vmem:[#allocation328_spill] sm:$0xff] }
 0x7b7   : > { %v14697_v36 = vld [vmem:[#allocation336_spill] sm:$0xff] }
 0x7b8   : > { %4439 = vmatpush.bf16.msra.mxu2 %v7033_v10  ;;  %4426 = vmatpush.bf16.msra.mxu1 %v7157_v3  ;;  %v7141_v13 = vor.u32 %v14697_v36, %v14696_v33  ;;  %v14701_v0 = vld [vmem:[#allocation192_spill] sm:$0xff]  ;;  %v14703_v3 = vld [vmem:[#allocation183_spill] sm:$0xff] }
 0x7b9   : > { %4453 = vmatpush.bf16.msra.mxu3 %v7145_v9  ;;  %v14691_v9 = vld [vmem:[#allocation311_spill] sm:$0xff]  ;;  %v14705_v1 = vld [vmem:[#allocation312_spill] sm:$0xff] }
 0x7ba   : > { %v7129_v12 = vor.u32 %v14691_v9, %v14690_v11  ;;  %4414 = vmatpush.bf16.msra.mxu0 %v7013_v8  ;;  %v14698_v11 = vld [vmem:[#allocation303_spill] sm:$0xff]  ;;  %v14706_v8 = vld [vmem:[#allocation320_spill] sm:$0xff] }
 0x7bb   : > { %v14699_v9 = vld [vmem:[#allocation295_spill] sm:$0xff]  ;;  %v7125_v29 = vor.u32 %v14706_v8, %v14705_v1  ;;  %v14713_v1 = vld [vmem:[#allocation296_spill] sm:$0xff] }
 0x7bc   : > { %4440 = vmatpush.bf16.msra.mxu2 %v7017_v6  ;;  %4427 = vmatpush.bf16.msra.mxu1 %v7141_v13  ;;  %v14708_v6 = vld [vmem:[#allocation279_spill] sm:$0xff]  ;;  %v14710_v13 = vld [vmem:[#allocation176_spill] sm:$0xff] }
 0x7bd   : > { %4454 = vmatpush.bf16.msra.mxu3 %v7129_v12  ;;  %v3749_v12 = vld [vmem:[%s12587_s16 + $0x18] sm:$0xff]  ;;  %v7097_v33 = vor.u32 %v14708_v6, %v14707_v48  ;;  %v14715_v48 = vld [vmem:[#allocation271_spill] sm:$0xff] }
 0x7c0   : > { %4428 = vmatpush.bf16.msra.mxu1 %v7125_v29  ;;  %v3748_v29 = vld [vmem:[%s12587_s16 + $0x10] sm:$0xff] }
 0x810   : > { %v3933_v39 = vpop.f32.mrf.mxu1 }
 0x811   : > { %v3920_v2 = vpop.f32.mrf.mxu0  ;;  %v3964_v15 = vadd.f32 %v3933_v39, %v3747_v5  ;;  %v14700_v5 = vld [vmem:[#allocation184_spill] sm:$0xff]  ;;  %v14702_v39 = vld [vmem:[#allocation191_spill] sm:$0xff] }
 0x812   : > { %v3963_v7 = vadd.f32 %v3920_v2, %v3746_v4  ;;  %v7113_v4 = vor.u32 %v14699_v9, %v14698_v11  ;;  %v6997_v2 = vor.u32 %v14701_v0, %v14700_v5  ;;  %v7001_v38 = vor.u32 %v14703_v3, %v14702_v39  ;;  %v14711_v0 = vld [vmem:[#allocation175_spill] sm:$0xff] }
 0x813   : > { %v6904_v10 = vmul.f32 -1.442695, %v3964_v15  ;;  %v14712_v39 = vld [vmem:[#allocation167_spill] sm:$0xff] }
 0x814   : > { %v6903_v40 = vmul.f32 -1.442695, %v3963_v7  ;;  %4455 = vmatpush.bf16.msra.mxu3 %v7113_v4  ;;  %v14704_v7 = vld [vmem:[#allocation355_spill] sm:$0xff]  ;;  %4415 = vmatpush.bf16.msra.mxu0 %v6997_v2  ;;  %v6985_v3 = vor.u32 %v14712_v39, %v14711_v0 }
 0x815   : > { %v12616_v15 = vpack.c.bf16 %v14704_v7, %v14704_v7  ;;  %4441 = vmatpush.bf16.msra.mxu2 %v7001_v38  ;;  %v14716_v2 = vld [vmem:[#allocation263_spill] sm:$0xff] }
 0x816   : > { %8066 = vpow2.f32 %v6903_v40  ;;  %v7081_v38 = vor.u32 %v14716_v2, %v14715_v48  ;;  %v14719_v39 = vld [vmem:[#allocation159_spill] sm:$0xff] }
 0x817   : > { %8068 = vpow2.f32 %v6904_v10  ;;  %v3959_v36 = vpop.f32.mrf.mxu3  ;;  %v14709_v10 = vld [vmem:[#allocation168_spill] sm:$0xff]  ;;  %4408 = vmatmul.bf16.vlgmr.msrb.gmra.mxu3 %v12616_v15  ;;  %4382 = vmatmul.bf16.vlgmr.msrb.gmra.mxu1 %v12616_v15  ;;  %v14723_v48 = vld [vmem:[#allocation255_spill] sm:$0xff] }
 0x818   : > { %v3946_v11 = vpop.f32.mrf.mxu2  ;;  %v3966_v40 = vadd.f32 %v3959_v36, %v3749_v12  ;;  %v3935_v5 = vpop.f32.mrf.mxu1  ;;  %v6981_v4 = vor.u32 %v14710_v13, %v14709_v10  ;;  %4456 = vmatpush.bf16.msra.mxu3 %v7097_v33  ;;  %v14714_v12 = vld [vmem:[#allocation304_spill] sm:$0xff]  ;;  %v14724_v2 = vld [vmem:[#allocation247_spill] sm:$0xff] }
 0x819   : > { %v3922_v9 = vpop.f32.mrf.mxu0  ;;  %v7109_v8 = vor.u32 %v14714_v12, %v14713_v1  ;;  %4442 = vmatpush.bf16.msra.mxu2 %v6985_v3  ;;  %v14717_v10 = vld [vmem:[#allocation152_spill] sm:$0xff]  ;;  %v14720_v1 = vld [vmem:[#allocation151_spill] sm:$0xff] }
 0x81a   : > { %v6905_v7 = vmul.f32 -1.442695, %v3966_v40  ;;  %4416 = vmatpush.bf16.msra.mxu0 %v6981_v4  ;;  %v14718_v13 = vld [vmem:[#allocation160_spill] sm:$0xff]  ;;  %v6969_v12 = vor.u32 %v14720_v1, %v14719_v39 }
 0x81b   : > { %4429 = vmatpush.bf16.msra.mxu1 %v7109_v8  ;;  %v6965_v0 = vor.u32 %v14718_v13, %v14717_v10  ;;  %v14722_v4 = vld [vmem:[#allocation288_spill] sm:$0xff]  ;;  %v3965_v8 = vadd.f32 %v3946_v11, %v3748_v29 }
 0x81c   : > { %v8067_v6 = vpop.eup %8066  ;;  %8070 = vpow2.f32 %v6905_v7  ;;  %4457 = vmatpush.bf16.msra.mxu3 %v7081_v38  ;;  %v14721_v7 = vld [vmem:[#allocation280_spill] sm:$0xff] }
 0x81d   : > { %v8069_v36 = vpop.eup %8068  ;;  %v12632_v9 = vadd.f32 1.0, %v8067_v6  ;;  %v7093_v3 = vor.u32 %v14722_v4, %v14721_v7  ;;  %v7065_v6 = vor.u32 %v14724_v2, %v14723_v48  ;;  %4443 = vmatpush.bf16.msra.mxu2 %v6969_v12  ;;  %v14725_v38 = vld [vmem:[#allocation136_spill] sm:$0xff]  ;;  %v14731_v7 = vld [vmem:[#allocation239_spill] sm:$0xff] }
 0x81e   : > { %v12634_v5 = vadd.f32 1.0, %v8069_v36  ;;  %4417 = vmatpush.bf16.msra.mxu0 %v6965_v0  ;;  %v14729_v13 = vld [vmem:[#allocation264_spill] sm:$0xff]  ;;  %v14732_v4 = vld [vmem:[#allocation231_spill] sm:$0xff] }
 0x81f   : > { %8072 = vrcp.f32 %v12632_v9  ;;  %v3961_v33 = vpop.f32.mrf.mxu3  ;;  %4430 = vmatpush.bf16.msra.mxu1 %v7093_v3  ;;  %v14730_v39 = vld [vmem:[#allocation272_spill] sm:$0xff]  ;;  %v7049_v48 = vor.u32 %v14732_v4, %v14731_v7  ;;  %v14735_v3 = vld [vmem:[#allocation127_spill] sm:$0xff]  ;;  %v3980_v4 = vand.u32 2147483647, %v12632_v9  ;;  %v3982_v18 = vand.u32 2147483648, %v12632_v9 }
 0x820   : > { %8074 = vrcp.f32 %v12634_v5  ;;  %v3948_v40 = vpop.f32.mrf.mxu2  ;;  %v6949_v33 = vor.u32 %v14726_v14, %v14725_v38  ;;  %4458 = vmatpush.bf16.msra.mxu3 %v7065_v6  ;;  %v7077_v1 = vor.u32 %v14730_v39, %v14729_v13  ;;  %v14734_v0 = vld [vmem:[#allocation128_spill] sm:$0xff]  ;;  %v14736_v6 = vld [vmem:[#allocation119_spill] sm:$0xff]  ;;  %vm3976_vm0 = vweird.f32 %v12632_v9 }
 0x821   : > { %v14727_v40 = vld [vmem:[#allocation143_spill] sm:$0xff]  ;;  %v14738_v13 = vld [vmem:[#allocation256_spill] sm:$0xff]  ;;  %vm3995_vm2 = vweird.f32 %v12634_v5  ;;  %vm3981_vm5 = vcmp.eq.f32.partialorder %v3980_v4, 8.507059e+37 }
 0x822   : > { %v8071_v36 = vpop.eup %8070  ;;  %v6953_v17 = vor.u32 %v14728_v16, %v14727_v40  ;;  %4418 = vmatpush.bf16.msra.mxu0 %v6949_v33  ;;  %v14733_v16 = vld [vmem:[#allocation120_spill] sm:$0xff]  ;;  %v3999_v33 = vand.u32 2147483647, %v12634_v5 }
 0x823   : > { %v12651_v10 = vadd.f32 1.0, %v8071_v36  ;;  %v6933_v12 = vor.u32 %v14734_v0, %v14733_v16  ;;  %v6937_v36 = vor.u32 %v14736_v6, %v14735_v3  ;;  %4431 = vmatpush.bf16.msra.mxu1 %v7077_v1  ;;  %v14737_v40 = vld [vmem:[#allocation248_spill] sm:$0xff]  ;;  %v14741_v0 = vld [vmem:[#allocation111_spill] sm:$0xff] }
 0x824   : > { %4444 = vmatpush.bf16.msra.mxu2 %v6953_v17  ;;  %4459 = vmatpush.bf16.msra.mxu3 %v7049_v48  ;;  %v7061_v39 = vor.u32 %v14738_v13, %v14737_v40  ;;  %v14739_v1 = vld [vmem:[#allocation104_spill] sm:$0xff]  ;;  %v14742_v3 = vld [vmem:[#allocation103_spill] sm:$0xff]  ;;  %vm4000_vm6 = vcmp.eq.f32.partialorder %v3999_v33, 8.507059e+37 }
 0x825   : > { %v8073_v2 = vpop.eup %8072  ;;  %8076 = vrcp.f32 %v12651_v10  ;;  %v14740_v48 = vld [vmem:[#allocation112_spill] sm:$0xff]  ;;  %vm4015_vm8 = vweird.f32 %v12651_v10 }
 0x826   : > { %v8075_v11 = vpop.eup %8074  ;;  %v3972_v29 = vmul.f32 %v8073_v2, %v12632_v9  ;;  %8078 = vtanh.f32 %v3965_v8  ;;  %v4001_v8 = vand.u32 2147483648, %v12634_v5  ;;  %vm3977_vm14 = vweird.f32 %v8073_v2  ;;  %4419 = vmatpush.bf16.msra.mxu0 %v6933_v12  ;;  %v14744_v13 = vld [vmem:[#allocation240_spill] sm:$0xff] }
 0x827   : > { %v3991_v14 = vmul.f32 %v8075_v11, %v12634_v5  ;;  %vm3996_vm15 = vweird.f32 %v8075_v11  ;;  %4460 = vmatmul.bf16.vlgmr.msra.gmra.mxu3 %v12616_v15  ;;  %4432 = vmatpush.bf16.msra.mxu1 %v7061_v39  ;;  %vm3978_vm3 = vmor %vm3976_vm0, %vm3977_vm14  ;;  %v14745_v5 = vld [vmem:[#allocation356_spill] sm:$0xff] }
 0x828   : > { %v3973_v38 = vsub.f32 1.0, %v3972_v29  ;;  %4445 = vmatpush.bf16.msra.mxu2 %v6937_v36  ;;  %v6917_v29 = vor.u32 %v14740_v48, %v14739_v1  ;;  %v3983_v36 = vor.u32 1.1754944e-38, %v3982_v18  ;;  %vm3997_vm4 = vmor %vm3995_vm2, %vm3996_vm15  ;;  %4770 = vmatpush.bf16.msra.mxu3 (%p3732_p0), %v7292_v53  ;;  %v14771_v53 = vld [vmem:[#allocation25_spill] sm:$0xff] (%p3732_p0) }
 0x829   : > { %v3992_v7 = vsub.f32 1.0, %v3991_v14  ;;  %v6921_v14 = vor.u32 %v14742_v3, %v14741_v0 }
 0x82a   : > { %v3974_v17 = vmul.f32 %v8073_v2, %v3973_v38  ;;  %v14743_v38 = vld [vmem:[#allocation232_spill] sm:$0xff]  ;;  %4420 = vmatpush.bf16.msra.mxu0 %v6917_v29 }
 0x82b   : > { %v3993_v16 = vmul.f32 %v8075_v11, %v3992_v7  ;;  %v8077_v6 = vpop.eup %8076  ;;  %v7045_v19 = vor.u32 %v14744_v13, %v14743_v38 }
 0x82c   : > { %v3975_v40 = vadd.f32 %v8073_v2, %v3974_v17  ;;  %v8079_v7 = vpop.eup %8078  ;;  %v4011_v12 = vmul.f32 %v8077_v6, %v12651_v10  ;;  %v4002_v17 = vor.u32 1.1754944e-38, %v4001_v8  ;;  %4446 = vmatpush.bf16.msra.mxu2 %v6921_v14  ;;  %vm4016_vm7 = vweird.f32 %v8077_v6  ;;  %4771 = vmatpush.bf16.msra.mxu3 (%p3732_p0), %v7276_v54  ;;  %v7971_v54 = vld [vmem:[%s13987_s3 + $0xc] sm:$0xf0] (%p3732_p0) }
 0x82d   : > { %v3994_v1 = vadd.f32 %v8075_v11, %v3993_v16  ;;  %4433 = vmatpush.bf16.msra.mxu1 %v7045_v19  ;;  %vm4017_vm9 = vmor %vm4015_vm8, %vm4016_vm7 }
 0x82e   : > { %v3979_v48 = vsel %vm3978_vm3, %v8073_v2, %v3975_v40  ;;  %v4012_v9 = vsub.f32 1.0, %v4011_v12  ;;  %v4021_v2 = vand.u32 2147483648, %v12651_v10  ;;  %v14746_v12 = vld [vmem:[#allocation353_spill] sm:$0xff] }
 0x82f   : > { %v3984_v0 = vsel %vm3981_vm5, %v3983_v36, %v3979_v48  ;;  %v3998_v39 = vsel %vm3997_vm4, %v8075_v11, %v3994_v1  ;;  %v4019_v11 = vand.u32 2147483647, %v12651_v10  ;;  %v12695_v1 = vperm.slane %v14746_v12, 0 }
 0x830   : > { %v4003_v3 = vsel %vm4000_vm6, %v4002_v17, %v3998_v39  ;;  %v4026_v38 = vmul.f32 %v8079_v7, %v3984_v0  ;;  %v4013_v20 = vmul.f32 %v8077_v6, %v4012_v9  ;;  %4434 = vmatmul.bf16.vlgmr.msra.gmra.mxu1 %v12616_v15  ;;  %v4022_v19 = vor.u32 1.1754944e-38, %v4021_v2  ;;  %4772 = vmatpush.bf16.msra.mxu3 (%p3732_p0), %v7260_v50  ;;  %v7177_v50 = vld [vmem:[%s13987_s3 + $0x18] sm:$0xf0] (%p3732_p0) }
 0x831   : > { %v4025_v13 = vmul.f32 %v14745_v5, %v4003_v3  ;;  %vm4020_vm10 = vcmp.eq.f32.partialorder %v4019_v11, 8.507059e+37  ;;  %14747 = vst [vmem:[#allocation357_spill] sm:$0xff] %v12695_v1  ;;  %v12699_v39 = vperm.slane %v14746_v12, 1 }
 0x832   : > { %v4014_v18 = vadd.f32 %v8077_v6, %v4013_v20 }
 0x833   : > { %v12683_v36 = vadd.f32 %v4026_v38, %v4025_v13   ;;  %14748 = vst [vmem:[#allocation358_spill] sm:$0xff] %v12699_v39  ;;  %v14749_v3 = vmov %v12699_v39 }
 0x834   : > { %v4018_v4 = vsel %vm4017_vm9, %v8077_v6, %v4014_v18 }
 0x835   : > { %8080 = vtanh.f32 %v12683_v36  ;;  %v4023_v33 = vsel %vm4020_vm10, %v4022_v19, %v4018_v4  ;;  %v14762_v36 = vld [vmem:[#allocation54_spill] sm:$0xff] (%p3732_p0) }
 0x83b   : > { %v8081_v8 = vpop.eup %8080 }
 0x83c   : > { %v12690_v48 = vmul.f32 %v8081_v8, %v4023_v33  }
 0x83e   : > { %v4030_v20 = vpack.c.bf16 %v12690_v48, %v12690_v48 }
 0x840   : > { %4369 = vmatmul.bf16.vlgmr.msrb.gmra.mxu0 %v4030_v20  ;;  %4395 = vmatmul.bf16.vlgmr.msrb.gmra.mxu2 %v4030_v20 }
 0x850   : > { %4421 = vmatmul.bf16.vlgmr.msra.gmra.mxu0 %v4030_v20  ;;  %4447 = vmatmul.bf16.vlgmr.msra.gmra.mxu2 %v4030_v20 }
 0x894   : > { %v4383_v16 = vpop.f32.mrf.mxu1 }
 0x89a   : > { %v4409_v15 = vpop.f32.mrf.mxu3 }
 0x89c   : > { %v4385_v14 = vpop.f32.mrf.mxu1 }
 0x8a2   : > { %v4411_v29 = vpop.f32.mrf.mxu3 }
 0x8aa   : > { %v4461_v10 = vpop.f32.mrf.mxu3 }
 0x8ad   : > { %v4435_v40 = vpop.f32.mrf.mxu1 }
 0x8b2   : > { %v4463_v6 = vpop.f32.mrf.mxu3 }
 0x8b5   : > { %v4437_v7 = vpop.f32.mrf.mxu1 }
 0x8bd   : > { %v4370_v17 = vpop.f32.mrf.mxu0 }
 0x8be   : > { %v4371_v9 = vadd.f32 %v4370_v17, %v12695_v1  ;;  %v12706_v17 = vperm.slane %v14746_v12, 2 }
 0x8c0   : > { %v4384_v0 = vadd.f32 %v4383_v16, %v4371_v9  ;;  %v12703_v16 = vperm.slane %v14746_v12, 3  ;;  %14751 = vst [vmem:[#allocation360_spill] sm:$0xff] %v12706_v17 }
 0x8c2   : > { %v7162_v38 = vmul.f32 -1.442695, %v4384_v0  ;;  %14750 = vst [vmem:[#allocation359_spill] sm:$0xff] %v12703_v16 }
 0x8c3   : > { %v4396_v5 = vpop.f32.mrf.mxu2 }
 0x8c4   : > { %8082 = vpow2.f32 %v7162_v38  ;;  %v4397_v13 = vadd.f32 %v4396_v5, %v14749_v3  ;;  %v14895_v3 = vld [vmem:[#allocation341_spill] sm:$0xff] (%p3732_p0) }
 0x8c5   : > { %v4372_v18 = vpop.f32.mrf.mxu0 }
 0x8c6   : > { %v4410_v2 = vadd.f32 %v4409_v15, %v4397_v13 }
 0x8c8   : > { %v7163_v11 = vmul.f32 -1.442695, %v4410_v2 }
 0x8ca   : > { %v8083_v4 = vpop.eup %8082  ;;  %8084 = vpow2.f32 %v7163_v11 }
 0x8cb   : > { %v4468_v19 = vadd.f32 1.0, %v8083_v4  ;;  %v4398_v8 = vpop.f32.mrf.mxu2 }
 0x8cd   : > { %8086 = vrcp.f32 %v4468_v19  ;;  %v4422_v33 = vpop.f32.mrf.mxu0  ;;  %v4480_v22 = vand.u32 2147483648, %v4468_v19  ;;  %vm4474_vm12 = vweird.f32 %v4468_v19 }
 0x8ce   : > { %v4423_v38 = vadd.f32 %v4422_v33, %v12706_v17  ;;  %v14894_v17 = vld [vmem:[#allocation349_spill] sm:$0xff] (%p3732_p0) }
 0x8cf   :  { %v13181_v1 = vor.u32 (%p3732_p0), %v14895_v3, %v14894_v17  ;;  %v14906_v17 = vld [vmem:[#allocation333_spill] sm:$0xff] (%p3732_p0) }
 0x8d0   : > { %v8085_v20 = vpop.eup %8084  ;;  %v4436_v8 = vadd.f32 %v4435_v40, %v4423_v38 }
 0x8d1   : > { %v4487_v29 = vadd.f32 1.0, %v8085_v20  ;;  %14896 = vst [vmem:[#allocation120_spill] sm:$0xff] (%p3732_p0), %v13181_v1 }
 0x8d3   : > { %v8087_v14 = vpop.eup %8086  ;;  %8088 = vrcp.f32 %v4487_v29  ;;  %v4448_v6 = vpop.f32.mrf.mxu2  ;;  %v4499_v20 = vand.u32 2147483648, %v4487_v29  ;;  %vm4493_vm13 = vweird.f32 %v4487_v29 }
 0x8d4   : > { %v4470_v7 = vmul.f32 %v8087_v14, %v4468_v19  ;;  %v4449_v15 = vadd.f32 %v4448_v6, %v12703_v16  ;;  %vm4475_vm1 = vweird.f32 %v8087_v14  ;;  %v4497_v6 = vand.u32 2147483647, %v4487_v29 }
 0x8d5   : > { %v4424_v9 = vpop.f32.mrf.mxu0  ;;  %vm4476_vm14 = vmor %vm4474_vm12, %vm4475_vm1 }
 0x8d6   : > { %v4471_v0 = vsub.f32 1.0, %v4470_v7  ;;  %v4462_v39 = vadd.f32 %v4461_v10, %v4449_v15  ;;  %v4478_v7 = vand.u32 2147483647, %v4468_v19  ;;  %v4500_v9 = vor.u32 1.1754944e-38, %v4499_v20 }
 0x8d7   : > { %vm4498_vm0 = vcmp.eq.f32.partialorder %v4497_v6, 8.507059e+37 }
 0x8d8   : > { %v7164_v5 = vmul.f32 -1.442695, %v4462_v39  ;;  %v4472_v18 = vmul.f32 %v8087_v14, %v4471_v0  ;;  %v4481_v39 = vor.u32 1.1754944e-38, %v4480_v22  ;;  %vm4479_vm2 = vcmp.eq.f32.partialorder %v4478_v7, 8.507059e+37 }
 0x8d9   : > { %v8089_v13 = vpop.eup %8088 }
 0x8da   : > { %v4489_v2 = vmul.f32 %v8089_v13, %v4487_v29  ;;  %8090 = vpow2.f32 %v7164_v5  ;;  %v4473_v21 = vadd.f32 %v8087_v14, %v4472_v18  ;;  %vm4494_vm11 = vweird.f32 %v8089_v13  ;;  %v14752_v18 = vld [vmem:[#allocation354_spill] sm:$0xff] }
 0x8db   : > { %v4450_v11 = vpop.f32.mrf.mxu2  ;;  %8092 = vtanh.f32 %v4436_v8  ;;  %vm4495_vm15 = vmor %vm4493_vm13, %vm4494_vm11 }
 0x8dc   : > { %v4490_v4 = vsub.f32 1.0, %v4489_v2  ;;  %v4477_v15 = vsel %vm4476_vm14, %v8087_v14, %v4473_v21 }
 0x8dd   : > { %v4482_v5 = vsel %vm4479_vm2, %v4481_v39, %v4477_v15  ;;  %v7999_v15 = vld [vmem:[%s13987_s3 + $0xec] sm:$0xf0] (%p3732_p0) }
 0x8de   : > { %v4491_v12 = vmul.f32 %v8089_v13, %v4490_v4 }
 0x8e0   : > { %v8091_v10 = vpop.eup %8090  ;;  %v4492_v33 = vadd.f32 %v8089_v13, %v4491_v12 }
 0x8e1   : > { %v4507_v0 = vadd.f32 1.0, %v8091_v10  ;;  %v8093_v11 = vpop.eup %8092 }
 0x8e2   : > { %v4496_v40 = vsel %vm4495_vm15, %v8089_v13, %v4492_v33  ;;  %v4524_v19 = vmul.f32 %v8093_v11, %v4482_v5  ;;  %v7279_v33 = vld [vmem:[%s13987_s3 + $0xe0] sm:$0xf] (%p3732_p0)  ;;  %v7240_v11 = vor.u32 (%p3732_p0), %v7988_v55, %v7239_v58  ;;  %v7168_v58 = vor.u32 (%p3732_p0), %v7971_v54, %v7167_v32  ;;  %v7970_v55 = vld [vmem:[%s13987_s3 + $0xc] sm:$0xf] (%p3732_p0)  ;;  %v14797_v54 = vld [vmem:[#allocation41_spill] sm:$0xff] (%p3732_p0) }
 0x8e3   : > { %v4501_v38 = vsel %vm4498_vm0, %v4500_v9, %v4496_v40  ;;  %8094 = vrcp.f32 %v4507_v0  ;;  %v4519_v21 = vand.u32 2147483648, %v4507_v0  ;;  %v4517_v8 = vand.u32 2147483647, %v4507_v0  ;;  %v7287_v9 = vld [vmem:[%s13987_s3 + $0xe8] sm:$0xf] (%p3732_p0) }
 0x8e4   : > { %v4523_v2 = vmul.f32 %v14752_v18, %v4501_v38  ;;  %vm4513_vm4 = vweird.f32 %v4507_v0  ;;  %v14756_v40 = vld [vmem:[#allocation92_spill] sm:$0xff] (%p3732_p0)  ;;  %v7280_v48 = vor.u32 (%p3732_p0), %v7999_v15, %v7279_v33  ;;  %v7288_v43 = vor.u32 (%p3732_p0), %v8000_v28, %v7287_v9  ;;  %v7199_v33 = vld [vmem:[%s13987_s3 + $0x40] sm:$0xf] (%p3732_p0)  ;;  %v7979_v15 = vld [vmem:[%s13987_s3 + $0x4c] sm:$0xf0] (%p3732_p0) }
 0x8e5   : > { %v4520_v13 = vor.u32 1.1754944e-38, %v4519_v21  ;;  %vm4518_vm6 = vcmp.eq.f32.partialorder %v4517_v8, 8.507059e+37  ;;  %v7986_v18 = vld [vmem:[%s13987_s3 + $0x8c] sm:$0xf] (%p3732_p0)  ;;  %v7207_v9 = vld [vmem:[%s13987_s3 + $0x48] sm:$0xf] (%p3732_p0)  ;;  %v7200_v63 = vor.u32 (%p3732_p0), %v7979_v15, %v7199_v33 }
 0x8e6   : > { %v4525_v38 = vadd.f32 %v4524_v19, %v4523_v2   ;;  %4731 = vmatpush.bf16.msra.mxu1 (%p3732_p0), %v7280_v48  ;;  %4757 = vmatpush.bf16.msra.mxu2 (%p3732_p0), %v7288_v43  ;;  %v7241_v2 = vld [vmem:[%s13987_s3 + $0x98] sm:$0xf0] (%p3732_p0)  ;;  %v7215_v19 = vld [vmem:[%s13987_s3 + $0x60] sm:$0xf] (%p3732_p0)  ;;  %v14765_v8 = vld [vmem:[#allocation44_spill] sm:$0xff] (%p3732_p0)  ;;  %v8267_v33 = vmov (%p3732_p0), 0  }
 0x8e7   :  { %v7244_v21 = vor.u32 (%p3732_p0), %v7986_v18, %v7241_v2  ;;  %v14767_v48 = vld [vmem:[#allocation31_spill] sm:$0xff] (%p3732_p0)  ;;  %v7978_v43 = vld [vmem:[%s13987_s3 + $0x4c] sm:$0xf] (%p3732_p0)  ;;  %v14783_v15 = vld [vmem:[#allocation82_spill] sm:$0xff] (%p3732_p0) }
 0x8e8   : > { %8096 = vtanh.f32 %v4525_v38  ;;  %v7232_v38 = vor.u32 (%p3732_p0), %v7987_v24, %v7231_v51  ;;  %v14768_v28 = vld [vmem:[#allocation35_spill] sm:$0xff] (%p3732_p0)  ;;  %v7212_v26 = vor.u32 (%p3732_p0), %v7978_v43, %v7209_v34  ;;  %v14777_v18 = vld [vmem:[#allocation96_spill] sm:$0xff] (%p3732_p0)  ;;  %v7233_v34 = vld [vmem:[%s13987_s3 + $0x90] sm:$0xf0] (%p3732_p0) }
 0x8e9   : > { %v8095_v4 = vpop.eup %8094  ;;  %4773 = vmatpush.bf16.msra.mxu3 (%p3732_p0), %v7244_v21  ;;  %v12856_v30 = vor.u32 (%p3732_p0), %v14768_v28, %v14767_v48  ;;  %v14774_v51 = vld [vmem:[#allocation11_spill] sm:$0xff] (%p3732_p0)  ;;  %v14786_v48 = vld [vmem:[#allocation64_spill] sm:$0xff] (%p3732_p0) }
 0x8ea   : > { %v4509_v29 = vmul.f32 %v8095_v4, %v4507_v0  ;;  %vm4514_vm3 = vweird.f32 %v8095_v4  ;;  %v14755_v0 = vld [vmem:[#allocation85_spill] sm:$0xff] (%p3732_p0)  ;;  %4732 = vmatpush.bf16.msra.mxu1 (%p3732_p0), %v7264_v42  ;;  %4758 = vmatpush.bf16.msra.mxu2 (%p3732_p0), %v7272_v59  ;;  %v7976_v42 = vld [vmem:[%s13987_s3 + $0x34] sm:$0xf0] (%p3732_p0)  ;;  %v14770_v59 = vld [vmem:[#allocation19_spill] sm:$0xff] (%p3732_p0) }
 0x8eb   : > { %vm4515_vm5 = vmor %vm4513_vm4, %vm4514_vm3  ;;  %v12738_v5 = vor.u32 (%p3732_p0), %v14756_v40, %v14755_v0  ;;  %v7980_v0 = vld [vmem:[%s13987_s3 + $0x54] sm:$0xf0] (%p3732_p0)  ;;  %14769 = vst [vmem:[#allocation9_spill] sm:$0xff] (%p3732_p0), %v12856_v30  ;;  %v12879_v61 = vor.u32 (%p3732_p0), %v14771_v53, %v14770_v59  ;;  %v7192_v27 = vor.u32 (%p3732_p0), %v7976_v42, %v7191_v25  ;;  %v14779_v21 = vld [vmem:[#allocation87_spill] sm:$0xff] (%p3732_p0) }
 0x8ec   : > { %v4510_v12 = vsub.f32 1.0, %v4509_v29  ;;  %v7223_v29 = vld [vmem:[%s13987_s3 + $0x68] sm:$0xf] (%p3732_p0)  ;;  %v7208_v46 = vor.u32 (%p3732_p0), %v7980_v0, %v7207_v9  ;;  %v14784_v9 = vld [vmem:[#allocation77_spill] sm:$0xff] (%p3732_p0)  ;;  %v7985_v43 = vld [vmem:[%s13987_s3 + $0x84] sm:$0xf] (%p3732_p0) }
 0x8ed   :  { %4943 = vmatpush.bf16.msra.mxu0 (%p3732_p0), %v12738_v5  ;;  %14772 = vst [vmem:[#allocation12_spill] sm:$0xff] (%p3732_p0), %v12879_v61  ;;  %v12951_v0 = vor.u32 (%p3732_p0), %v14784_v9, %v14783_v15  ;;  %v14787_v28 = vld [vmem:[#allocation72_spill] sm:$0xff] (%p3732_p0)  ;;  %v7236_v25 = vor.u32 (%p3732_p0), %v7985_v43, %v7233_v34  ;;  %v7981_v53 = vld [vmem:[%s13987_s3 + $0x64] sm:$0xf] (%p3732_p0) }
 0x8ee   : > { %v4511_v14 = vmul.f32 %v8095_v4, %v4510_v12  ;;  %v8097_v6 = vpop.eup %8096  ;;  %4733 = vmatpush.bf16.msra.mxu1 (%p3732_p0), %v7248_v23  ;;  %4759 = vmatpush.bf16.msra.mxu2 (%p3732_p0), %v7256_v56  ;;  %v7984_v12 = vld [vmem:[%s13987_s3 + $0x74] sm:$0xf0] (%p3732_p0)  ;;  %v7175_v23 = vld [vmem:[%s13987_s3 + $0x8] sm:$0xf] (%p3732_p0)  ;;  %v14818_v43 = vld [vmem:[#allocation7_spill] sm:$0xff] (%p3732_p0) }
 0x8ef   :  { %v14773_v56 = vld [vmem:[#allocation4_spill] sm:$0xff] (%p3732_p0)  ;;  %14785 = vst [vmem:[#allocation17_spill] sm:$0xff] (%p3732_p0), %v12951_v0  ;;  %v14819_v34 = vld [vmem:[#allocation15_spill] sm:$0xff] (%p3732_p0) }
 0x8f0   : > { %v4512_v22 = vadd.f32 %v8095_v4, %v4511_v14  ;;  %v14764_v14 = vld [vmem:[#allocation39_spill] sm:$0xff] (%p3732_p0)  ;;  %v12908_v24 = vor.u32 (%p3732_p0), %v14774_v51, %v14773_v56  ;;  %v14791_v42 = vld [vmem:[#allocation52_spill] sm:$0xff] (%p3732_p0) }
 0x8f1   :  { %4944 = vmatpush.bf16.msra.mxu0 (%p3732_p0), %v12761_v57  ;;  %v14801_v56 = vld [vmem:[#allocation40_spill] sm:$0xff] (%p3732_p0) }
 0x8f2   : > { %v4516_v20 = vsel %vm4515_vm5, %v8095_v4, %v4512_v22  ;;  %v7983_v4 = vld [vmem:[%s13987_s3 + $0x6c] sm:$0xf0] (%p3732_p0)  ;;  %v12833_v22 = vor.u32 (%p3732_p0), %v14765_v8, %v14764_v14  ;;  %4734 = vmatpush.bf16.msra.mxu1 (%p3732_p0), %v7232_v38  ;;  %4760 = vmatpush.bf16.msra.mxu2 (%p3732_p0), %v7240_v11  ;;  %14775 = vst [vmem:[#allocation13_spill] sm:$0xff] (%p3732_p0), %v12908_v24  ;;  %v14776_v38 = vld [vmem:[#allocation88_spill] sm:$0xff] (%p3732_p0)  ;;  %v7993_v11 = vld [vmem:[%s13987_s3 + $0xc4] sm:$0xf] (%p3732_p0) }
 0x8f3   : > { %v4521_v7 = vsel %vm4518_vm6, %v4520_v13, %v4516_v20  ;;  %3734 = sbr.rel (!%p3732_p0) target bundleno = 1905 (0x771), region = 68  ;;  %v7216_v13 = vor.u32 (%p3732_p0), %v7983_v4, %v7215_v19  ;;  %v7982_v20 = vld [vmem:[%s13987_s3 + $0x6c] sm:$0xf] (%p3732_p0)  ;;  %v12918_v2 = vor.u32 (%p3732_p0), %v14777_v18, %v14776_v38  ;;  %v7265_v19 = vld [vmem:[%s13987_s3 + $0xd0] sm:$0xf0] (%p3732_p0)  ;;  %v7180_v4 = vor.u32 (%p3732_p0), %v7970_v55, %v7177_v50 }
 0x8f4   : > { %v12711_v39 = vmul.f32 %v8097_v6, %v4521_v7   ;;  %14766 = vst [vmem:[#allocation8_spill] sm:$0xff] (%p3732_p0), %v12833_v22  ;;  %v7225_v6 = vld [vmem:[%s13987_s3 + $0x78] sm:$0xf0] (%p3732_p0)  ;;  %v7224_v7 = vor.u32 (%p3732_p0), %v7984_v12, %v7223_v29  ;;  %v14778_v12 = vld [vmem:[#allocation95_spill] sm:$0xff] (%p3732_p0)  ;;  %v7268_v8 = vor.u32 (%p3732_p0), %v7993_v11, %v7265_v19  ;;  %v14803_v55 = vld [vmem:[#allocation33_spill] sm:$0xff] (%p3732_p0) }
 0x8f5   :  { %4945 = vmatpush.bf16.msra.mxu0 (%p3732_p0), %v12787_v41  ;;  %v7228_v40 = vor.u32 (%p3732_p0), %v7982_v20, %v7225_v6  ;;  %v12933_v14 = vor.u32 (%p3732_p0), %v14779_v21, %v14778_v12  ;;  %v14782_v20 = vld [vmem:[#allocation83_spill] sm:$0xff] (%p3732_p0)  ;;  %v14804_v50 = vld [vmem:[#allocation37_spill] sm:$0xff] (%p3732_p0)  ;;  %v14806_v18 = vld [vmem:[#allocation36_spill] sm:$0xff] (%p3732_p0) }
 0x8f6   : > { %v14753_v10 = vmov %v12711_v39  ;;  %4735 = vmatpush.bf16.msra.mxu1 (%p3732_p0), %v7216_v13  ;;  %4761 = vmatpush.bf16.msra.mxu2 (%p3732_p0), %v7224_v7  ;;  %v14781_v13 = vld [vmem:[#allocation78_spill] sm:$0xff] (%p3732_p0)  ;;  %v7989_v7 = vld [vmem:[%s13987_s3 + $0xa4] sm:$0xf] (%p3732_p0)  ;;  %v7185_v38 = vld [vmem:[%s13987_s3 + $0x30] sm:$0xf0] (%p3732_p0) }
 0x8f7   : > { %v14754_v39 = vmov %v14753_v10  ;;  %4774 = vmatpush.bf16.msra.mxu3 (%p3732_p0), %v7228_v40  ;;  %v12929_v29 = vpack.c.bf16 (%p3732_p0), %v14753_v10, %v14753_v10  ;;  %14780 = vst [vmem:[#allocation16_spill] sm:$0xff] (%p3732_p0), %v12933_v14  ;;  %v12938_v6 = vor.u32 (%p3732_p0), %v14782_v20, %v14781_v13  ;;  %v7249_v10 = vld [vmem:[%s13987_s3 + $0xb0] sm:$0xf0] (%p3732_p0)  ;;  %v14807_v11 = vld [vmem:[#allocation32_spill] sm:$0xff] (%p3732_p0)  ;;  %v14809_v12 = vld [vmem:[#allocation22_spill] sm:$0xff] (%p3732_p0) }
 0x8f8   :  { %v12810_v39 = vor.u32 %v14762_v36, %v14761_v31  ;;  %v7284_v31 = vor.u32 %v7997_v62, %v7281_v35  ;;  %v7176_v36 = vor.u32 %v7972_v45, %v7175_v23  ;;  %v7252_v40 = vor.u32 %v7989_v7, %v7249_v10  ;;  %v14798_v62 = vld [vmem:[#allocation47_spill] sm:$0xff]  ;;  %v7201_v45 = vld [vmem:[%s13987_s3 + $0x50] sm:$0xf0]  ;;  %v14812_v7 = vld [vmem:[#allocation26_spill] sm:$0xff] }
 0x8f9   :  { %v12990_v35 = vor.u32 %v14798_v62, %v14797_v54  ;;  %v7977_v23 = vld [vmem:[%s13987_s3 + $0x44] sm:$0xf]  ;;  %v13017_v19 = vor.u32 %v14807_v11, %v14806_v18  ;;  %v7169_v20 = vld [vmem:[%s13987_s3 + $0x10] sm:$0xf0]  ;;  %v14842_v18 = vld [vmem:[#allocation10_spill] sm:$0xff] }
 0x8fa   :  { %14763 = vst [vmem:[#allocation5_spill] sm:$0xff] %v12810_v39  ;;  %4946 = vmatpush.bf16.msra.mxu0 %v12810_v39  ;;  %4736 = vmatpush.bf16.msra.mxu1 %v7200_v63  ;;  %v12957_v63 = vor.u32 %v14787_v28, %v14786_v48  ;;  %v14810_v21 = vld [vmem:[#allocation27_spill] sm:$0xff]  ;;  %v14813_v10 = vld [vmem:[#allocation21_spill] sm:$0xff]  ;;  %v14816_v48 = vld [vmem:[#allocation84_spill] sm:$0xff] }
 0x8fb   :  { %4762 = vmatpush.bf16.msra.mxu2 %v7208_v46  ;;  %4775 = vmatpush.bf16.msra.mxu3 %v7212_v26  ;;  %v14788_v46 = vld [vmem:[#allocation71_spill] sm:$0xff]  ;;  %v14792_v26 = vld [vmem:[#allocation58_spill] sm:$0xff]  ;;  %14799 = vst [vmem:[#allocation29_spill] sm:$0xff] %v12990_v35  ;;  %v13033_v15 = vor.u32 %v14813_v10, %v14812_v7  ;;  %v14830_v54 = vld [vmem:[#allocation53_spill] sm:$0xff] }
 0x8fc   :  { %v12969_v47 = vor.u32 %v14789_v49, %v14788_v46  ;;  %v12974_v59 = vor.u32 %v14792_v26, %v14791_v42  ;;  %14808 = vst [vmem:[#allocation48_spill] sm:$0xff] %v13017_v19  ;;  %v7969_v13 = vld [vmem:[%s13987_s3 + $0x4] sm:$0xf]  ;;  %v13042_v46 = vor.u32 %v14819_v34, %v14818_v43  ;;  %v14821_v49 = vld [vmem:[#allocation14_spill] sm:$0xff]  ;;  %v14824_v26 = vld [vmem:[#allocation80_spill] sm:$0xff] }
 0x8fd   :  { %14814 = vst [vmem:[#allocation56_spill] sm:$0xff] %v13033_v15  ;;  %v7172_v9 = vor.u32 %v7969_v13, %v7169_v20  ;;  %v14831_v62 = vld [vmem:[#allocation49_spill] sm:$0xff]  ;;  %v14843_v11 = vld [vmem:[#allocation3_spill] sm:$0xff] }
 0x8fe   :  { %4947 = vmatpush.bf16.msra.mxu0 %v12833_v22  ;;  %4737 = vmatpush.bf16.msra.mxu1 %v7184_v52  ;;  %14790 = vst [vmem:[#allocation20_spill] sm:$0xff] %v12969_v47  ;;  %v7217_v52 = vld [vmem:[%s13987_s3 + $0x70] sm:$0xf0] }
 0x8ff   :  { %4763 = vmatpush.bf16.msra.mxu2 %v7192_v27  ;;  %4776 = vmatpush.bf16.msra.mxu3 %v7196_v60  ;;  %14793 = vst [vmem:[#allocation23_spill] sm:$0xff] %v12974_v59  ;;  %v12985_v27 = vor.u32 %v14795_v44, %v14794_v37  ;;  %v7220_v32 = vor.u32 %v7981_v53, %v7217_v52  ;;  %v14800_v60 = vld [vmem:[#allocation46_spill] sm:$0xff]  ;;  %v14825_v53 = vld [vmem:[#allocation73_spill] sm:$0xff]  ;;  %v14827_v37 = vld [vmem:[#allocation67_spill] sm:$0xff] }
 0x900   :  { %v13001_v51 = vor.u32 %v14801_v56, %v14800_v60  ;;  %14820 = vst [vmem:[#allocation60_spill] sm:$0xff] %v13042_v46  ;;  %v13053_v52 = vor.u32 %v14825_v53, %v14824_v26  ;;  %v14828_v44 = vld [vmem:[#allocation61_spill] sm:$0xff]  ;;  %v14836_v56 = vld [vmem:[#allocation34_spill] sm:$0xff] }
 0x901   :  { %14796 = vst [vmem:[#allocation28_spill] sm:$0xff] %v12985_v27  ;;  %v14847_v20 = vld [vmem:[#allocation345_spill] sm:$0xff] }
 0x902   :  { %4948 = vmatpush.bf16.msra.mxu0 %v12856_v30  ;;  %4738 = vmatpush.bf16.msra.mxu1 %v7168_v58  ;;  %14802 = vst [vmem:[#allocation42_spill] sm:$0xff] %v13001_v51  ;;  %v7204_v58 = vor.u32 %v7977_v23, %v7201_v45  ;;  %v13067_v23 = vor.u32 %v14831_v62, %v14830_v54  ;;  %v14833_v45 = vld [vmem:[#allocation43_spill] sm:$0xff]  ;;  %v14848_v7 = vld [vmem:[#allocation337_spill] sm:$0xff]  ;;  %v14862_v54 = vld [vmem:[#allocation290_spill] sm:$0xff] }
 0x903   :  { %4764 = vmatpush.bf16.msra.mxu2 %v7176_v36  ;;  %4777 = vmatpush.bf16.msra.mxu3 %v7180_v4  ;;  %v7973_v36 = vld [vmem:[%s13987_s3 + $0x24] sm:$0xf]  ;;  %14826 = vst [vmem:[#allocation66_spill] sm:$0xff] %v13053_v52  ;;  %v13097_v10 = vor.u32 %v14848_v7, %v14847_v20  ;;  %v14853_v43 = vld [vmem:[#allocation329_spill] sm:$0xff]  ;;  %v14863_v62 = vld [vmem:[#allocation298_spill] sm:$0xff] }
 0x904   :  { %v7188_v4 = vor.u32 %v7973_v36, %v7185_v38  ;;  %14832 = vst [vmem:[#allocation70_spill] sm:$0xff] %v13067_v23  ;;  %v14840_v36 = vld [vmem:[#allocation18_spill] sm:$0xff]  ;;  %v14854_v34 = vld [vmem:[#allocation321_spill] sm:$0xff] }
 0x905   :  { %4739 = vmatmul.bf16.vlgmr.msra.gmra.mxu1 %v12929_v29  ;;  %14849 = vst [vmem:[#allocation89_spill] sm:$0xff] %v13097_v10  ;;  %v14859_v53 = vld [vmem:[#allocation313_spill] sm:$0xff]  ;;  %v14873_v7 = vld [vmem:[#allocation258_spill] sm:$0xff] }
 0x906   :  { %4949 = vmatpush.bf16.msra.mxu0 %v12879_v61  ;;  %4744 = vmatpush.bf16.msrb.mxu1 %v7284_v31  ;;  %v13006_v31 = vor.u32 %v14804_v50, %v14803_v55  ;;  %v14839_v50 = vld [vmem:[#allocation24_spill] sm:$0xff]  ;;  %v14928_v30 = vld [vmem:[#allocation302_spill] sm:$0xff]  ;;  %v14943_v22 = vld [vmem:[#allocation277_spill] sm:$0xff] }
 0x907   :  { %4969 = vmatpush.bf16.msrb.mxu2 %v12918_v2  ;;  %4982 = vmatpush.bf16.msrb.mxu3 %v12933_v14  ;;  %v13082_v38 = vor.u32 %v14840_v36, %v14839_v50  ;;  %v14867_v50 = vld [vmem:[#allocation274_spill] sm:$0xff]  ;;  %v14955_v39 = vld [vmem:[#allocation261_spill] sm:$0xff] }
 0x908   :  { %4765 = vmatmul.bf16.vlgmr.msra.gmra.mxu2 %v12929_v29  ;;  %4778 = vmatmul.bf16.vlgmr.msra.gmra.mxu3 %v12929_v29  ;;  %14805 = vst [vmem:[#allocation45_spill] sm:$0xff] %v13006_v31  ;;  %v14868_v36 = vld [vmem:[#allocation282_spill] sm:$0xff] }
 0x909   :  { %14841 = vst [vmem:[#allocation79_spill] sm:$0xff] %v13082_v38 }
 0x90a   :  { %4950 = vmatpush.bf16.msra.mxu0 %v12908_v24  ;;  %4745 = vmatpush.bf16.msrb.mxu1 %v7268_v8  ;;  %v13022_v8 = vor.u32 %v14810_v21, %v14809_v12  ;;  %v14844_v12 = vld [vmem:[#allocation338_spill] sm:$0xff] }
 0x90b   :  { %4970 = vmatpush.bf16.msrb.mxu2 %v12938_v6  ;;  %4983 = vmatpush.bf16.msrb.mxu3 %v12951_v0  ;;  %v14845_v21 = vld [vmem:[#allocation346_spill] sm:$0xff] }
 0x90c   :  { %14811 = vst [vmem:[#allocation55_spill] sm:$0xff] %v13022_v8  ;;  %v13093_v13 = vor.u32 %v14845_v21, %v14844_v12  ;;  %v14871_v12 = vld [vmem:[#allocation273_spill] sm:$0xff] }
 0x90d   :  { %4951 = vmatmul.bf16.vlgmr.msra.gmra.mxu0 %v8267_v33 }
 0x90e   :  { %4746 = vmatpush.bf16.msrb.mxu1 %v7252_v40  ;;  %v14815_v40 = vld [vmem:[#allocation91_spill] sm:$0xff]  ;;  %14846 = vst [vmem:[#allocation86_spill] sm:$0xff] %v13093_v13 }
 0x90f   :  { %4971 = vmatpush.bf16.msrb.mxu2 %v12957_v63  ;;  %4984 = vmatpush.bf16.msrb.mxu3 %v12969_v47  ;;  %v13038_v28 = vor.u32 %v14816_v48, %v14815_v40  ;;  %v14851_v40 = vld [vmem:[#allocation330_spill] sm:$0xff] }
 0x911   :  { %14817 = vst [vmem:[#allocation59_spill] sm:$0xff] %v13038_v28 }
 0x912   :  { %4747 = vmatpush.bf16.msrb.mxu1 %v7236_v25  ;;  %v14822_v25 = vld [vmem:[#allocation6_spill] sm:$0xff] }
 0x913   :  { %4972 = vmatpush.bf16.msrb.mxu2 %v12974_v59  ;;  %4985 = vmatpush.bf16.msrb.mxu3 %v12985_v27  ;;  %v13047_v42 = vor.u32 %v14822_v25, %v14821_v49  ;;  %v13107_v49 = vor.u32 %v14854_v34, %v14853_v43  ;;  %v14857_v25 = vld [vmem:[#allocation314_spill] sm:$0xff]  ;;  %v14876_v43 = vld [vmem:[#allocation265_spill] sm:$0xff] }
 0x914   :  { %v14877_v34 = vld [vmem:[#allocation257_spill] sm:$0xff] }
 0x915   :  { %14823 = vst [vmem:[#allocation65_spill] sm:$0xff] %v13047_v42 }
 0x916   :  { %4748 = vmatpush.bf16.msrb.mxu1 %v7220_v32  ;;  %v13061_v32 = vor.u32 %v14828_v44, %v14827_v37  ;;  %14855 = vst [vmem:[#allocation93_spill] sm:$0xff] %v13107_v49  ;;  %v14860_v37 = vld [vmem:[#allocation305_spill] sm:$0xff] }
 0x917   :  { %4973 = vmatpush.bf16.msrb.mxu2 %v12990_v35  ;;  %4986 = vmatpush.bf16.msrb.mxu3 %v13001_v51  ;;  %v13117_v44 = vor.u32 %v14860_v37, %v14859_v53  ;;  %v14879_v53 = vld [vmem:[#allocation242_spill] sm:$0xff] }
 0x918   :  { %14829 = vst [vmem:[#allocation69_spill] sm:$0xff] %v13061_v32  ;;  %v14880_v37 = vld [vmem:[#allocation250_spill] sm:$0xff] }
 0x919   :  { %14861 = vst [vmem:[#allocation99_spill] sm:$0xff] %v13117_v44 }
 0x91a   :  { %4749 = vmatpush.bf16.msrb.mxu1 %v7204_v58  ;;  %v14837_v58 = vld [vmem:[#allocation30_spill] sm:$0xff] }
 0x91b   :  { %4974 = vmatpush.bf16.msrb.mxu2 %v13006_v31  ;;  %4987 = vmatpush.bf16.msrb.mxu3 %v13017_v19  ;;  %v13077_v55 = vor.u32 %v14837_v58, %v14836_v56  ;;  %v14865_v56 = vld [vmem:[#allocation289_spill] sm:$0xff] }
 0x91c   :  { %v14919_v31 = vld [vmem:[#allocation309_spill] sm:$0xff] }
 0x91d   :  { %14838 = vst [vmem:[#allocation76_spill] sm:$0xff] %v13077_v55 }
 0x91e   :  { %4750 = vmatpush.bf16.msrb.mxu1 %v7188_v4  ;;  %v13087_v4 = vor.u32 %v14843_v11, %v14842_v18  ;;  %v13133_v18 = vor.u32 %v14868_v36, %v14867_v50  ;;  %v14870_v11 = vld [vmem:[#allocation281_spill] sm:$0xff] }
 0x91f   :  { %4975 = vmatpush.bf16.msrb.mxu2 %v13022_v8  ;;  %4988 = vmatpush.bf16.msrb.mxu3 %v13033_v15  ;;  %v13137_v21 = vor.u32 %v14871_v12, %v14870_v11 }
 0x920   :  { %14869 = vst [vmem:[#allocation103_spill] sm:$0xff] %v13133_v18 }
 0x921   :  { %14872 = vst [vmem:[#allocation104_spill] sm:$0xff] %v13137_v21 }
 0x922   :  { %4751 = vmatpush.bf16.msrb.mxu1 %v7172_v9  ;;  %v14850_v9 = vld [vmem:[#allocation322_spill] sm:$0xff] }
 0x923   :  { %4976 = vmatpush.bf16.msrb.mxu2 %v13042_v46  ;;  %4989 = vmatpush.bf16.msrb.mxu3 %v13047_v42  ;;  %v13103_v48 = vor.u32 %v14851_v40, %v14850_v9  ;;  %v14874_v9 = vld [vmem:[#allocation266_spill] sm:$0xff]  ;;  %v14907_v46 = vld [vmem:[#allocation325_spill] sm:$0xff] }
 0x924   :  { %v13145_v40 = vor.u32 %v14874_v9, %v14873_v7  ;;  %v14885_v7 = vld [vmem:[#allocation226_spill] sm:$0xff]  ;;  %v13201_v24 = vor.u32 %v14907_v46, %v14906_v17 }
 0x925   :  { %4752 = vmatmul.bf16.vlgmr.msrb.gmra.mxu1 %v12929_v29  ;;  %v14834_v29 = vld [vmem:[#allocation38_spill] sm:$0xff]  ;;  %14852 = vst [vmem:[#allocation90_spill] sm:$0xff] %v13103_v48 }
 0x926   :  { %4956 = vmatpush.bf16.msra.mxu1 %v13038_v28  ;;  %4977 = vmatmul.bf16.vlgmr.msrb.gmra.mxu2 %v8267_v33  ;;  %v13072_v60 = vor.u32 %v14834_v29, %v14833_v45  ;;  %v13123_v45 = vor.u32 %v14863_v62, %v14862_v54  ;;  %v14864_v29 = vld [vmem:[#allocation297_spill] sm:$0xff]  ;;  %14875 = vst [vmem:[#allocation107_spill] sm:$0xff] %v13145_v40  ;;  %v14886_v9 = vld [vmem:[#allocation234_spill] sm:$0xff] }
 0x927   :  { %4990 = vmatmul.bf16.vlgmr.msrb.gmra.mxu3 %v8267_v33  ;;  %v13127_v58 = vor.u32 %v14865_v56, %v14864_v29  ;;  %v13155_v54 = vor.u32 %v14880_v37, %v14879_v53  ;;  %v14882_v62 = vld [vmem:[#allocation249_spill] sm:$0xff]  ;;  %14908 = vst [vmem:[#allocation128_spill] sm:$0xff] %v13201_v24  ;;  %v14915_v46 = vld [vmem:[#allocation310_spill] sm:$0xff] }
 0x928   :  { %14835 = vst [vmem:[#allocation75_spill] sm:$0xff] %v13072_v60  ;;  %5432 = vmatpush.bf16.msra.mxu3 %v13097_v10  ;;  %v14883_v29 = vld [vmem:[#allocation241_spill] sm:$0xff]  ;;  %v14916_v17 = vld [vmem:[#allocation318_spill] sm:$0xff] }
 0x929   :  { %14866 = vst [vmem:[#allocation100_spill] sm:$0xff] %v13127_v58  ;;  %v13159_v56 = vor.u32 %v14883_v29, %v14882_v62  ;;  %v14889_v53 = vld [vmem:[#allocation225_spill] sm:$0xff]  ;;  %v14891_v62 = vld [vmem:[#allocation342_spill] sm:$0xff] }
 0x92a   :  { %4957 = vmatpush.bf16.msra.mxu1 %v13053_v52  ;;  %14881 = vst [vmem:[#allocation111_spill] sm:$0xff] %v13155_v54  ;;  %v14892_v29 = vld [vmem:[#allocation350_spill] sm:$0xff] }
 0x92b   :  { %14884 = vst [vmem:[#allocation112_spill] sm:$0xff] %v13159_v56  ;;  %v13177_v16 = vor.u32 %v14892_v29, %v14891_v62  ;;  %v14903_v62 = vld [vmem:[#allocation326_spill] sm:$0xff] }
 0x92c   :  { %5433 = vmatpush.bf16.msra.mxu3 %v13107_v49  ;;  %v14904_v29 = vld [vmem:[#allocation334_spill] sm:$0xff] }
 0x92d   :  { %14893 = vst [vmem:[#allocation119_spill] sm:$0xff] %v13177_v16  ;;  %v13197_v3 = vor.u32 %v14904_v29, %v14903_v62  ;;  %v14912_v62 = vld [vmem:[#allocation201_spill] sm:$0xff] }
 0x92e   :  { %4958 = vmatpush.bf16.msra.mxu1 %v13061_v32  ;;  %v14913_v29 = vld [vmem:[#allocation193_spill] sm:$0xff] }
 0x92f   :  { %14905 = vst [vmem:[#allocation127_spill] sm:$0xff] %v13197_v3  ;;  %v13213_v61 = vor.u32 %v14913_v29, %v14912_v62  ;;  %v14924_v62 = vld [vmem:[#allocation185_spill] sm:$0xff] }
 0x930   :  { %5434 = vmatpush.bf16.msra.mxu3 %v13117_v44  ;;  %v14925_v29 = vld [vmem:[#allocation177_spill] sm:$0xff] }
 0x931   :  { %14914 = vst [vmem:[#allocation132_spill] sm:$0xff] %v13213_v61 }
 0x932   :  { %4959 = vmatpush.bf16.msra.mxu1 %v13067_v23 }
 0x934   :  { %5435 = vmatpush.bf16.msra.mxu3 %v13127_v58 }
 0x936   :  { %4960 = vmatpush.bf16.msra.mxu1 %v13072_v60 }
 0x938   :  { %5436 = vmatpush.bf16.msra.mxu3 %v13137_v21 }
 0x93a   :  { %4961 = vmatpush.bf16.msra.mxu1 %v13077_v55 }
 0x93e   :  { %4962 = vmatpush.bf16.msra.mxu1 %v13082_v38 }
 0x942   :  { %4963 = vmatpush.bf16.msra.mxu1 %v13087_v4 }
 0x945   :  { %4964 = vmatmul.bf16.vlgmr.msra.gmra.mxu1 %v8267_v33  ;;  %v14856_v33 = vld [vmem:[#allocation306_spill] sm:$0xff] }
 0x946   :  { %5406 = vmatpush.bf16.msrb.mxu1 %v13093_v13  ;;  %v13113_v26 = vor.u32 %v14857_v25, %v14856_v33  ;;  %v13149_v33 = vor.u32 %v14877_v34, %v14876_v43  ;;  %v13169_v43 = vor.u32 %v14886_v9, %v14885_v7  ;;  %v14888_v34 = vld [vmem:[#allocation233_spill] sm:$0xff] }
 0x947   :  { %v13173_v37 = vor.u32 %v14889_v53, %v14888_v34  ;;  %v14900_v9 = vld [vmem:[#allocation217_spill] sm:$0xff] }
 0x948   :  { %14858 = vst [vmem:[#allocation94_spill] sm:$0xff] %v13113_v26  ;;  %5437 = vmatpush.bf16.msra.mxu3 %v13149_v33  ;;  %v14901_v34 = vld [vmem:[#allocation209_spill] sm:$0xff] }
 0x949   :  { %14878 = vst [vmem:[#allocation108_spill] sm:$0xff] %v13149_v33  ;;  %v13193_v53 = vor.u32 %v14901_v34, %v14900_v9  ;;  %v14910_v9 = vld [vmem:[#allocation202_spill] sm:$0xff] }
 0x94a   :  { %5407 = vmatpush.bf16.msrb.mxu1 %v13103_v48  ;;  %14887 = vst [vmem:[#allocation115_spill] sm:$0xff] %v13169_v43 }
 0x94b   :  { %14890 = vst [vmem:[#allocation116_spill] sm:$0xff] %v13173_v37  ;;  %5419 = vmatpush.bf16.msra.mxu2 %v13193_v53 }
 0x94c   :  { %5438 = vmatpush.bf16.msra.mxu3 %v13159_v56  ;;  %14902 = vst [vmem:[#allocation124_spill] sm:$0xff] %v13193_v53 }
 0x94e   :  { %5408 = vmatpush.bf16.msrb.mxu1 %v13113_v26 }
 0x94f   :  { %5420 = vmatpush.bf16.msra.mxu2 %v13213_v61  ;;  %v14942_v61 = vld [vmem:[#allocation285_spill] sm:$0xff] }
 0x950   :  { %5439 = vmatpush.bf16.msra.mxu3 %v13173_v37 }
 0x952   :  { %5409 = vmatpush.bf16.msrb.mxu1 %v13123_v45 }
 0x954   :  { %5484 = vmatpush.bf16.msrb.mxu3 %v13181_v1 }
 0x956   :  { %5410 = vmatpush.bf16.msrb.mxu1 %v13133_v18 }
 0x958   :  { %5485 = vmatpush.bf16.msrb.mxu3 %v13201_v24 }
 0x95a   :  { %5411 = vmatpush.bf16.msrb.mxu1 %v13145_v40 }
 0x95e   :  { %5412 = vmatpush.bf16.msrb.mxu1 %v13155_v54 }
 0x962   :  { %5413 = vmatpush.bf16.msrb.mxu1 %v13169_v43 }
 0x966   :  { %5458 = vmatpush.bf16.msra.mxu1 %v13177_v16 }
 0x96a   :  { %5459 = vmatpush.bf16.msra.mxu1 %v13197_v3 }
 0x982   :  { %v4740_v25 = vpop.f32.mrf.mxu1 }
 0x98a   :  { %v13139_v20 = vpop.f32.mrf.mxu0  ;;  %v4742_v11 = vpop.f32.mrf.mxu1 }
 0x98b   :  { %v13161_v50 = vpop.f32.mrf.mxu2  ;;  %v13165_v12 = vpop.f32.mrf.mxu3  ;;  %v14898_v11 = vld [vmem:[#allocation218_spill] sm:$0xff] }
 0x992   :  { %v4954_v36 = vpop.f32.mrf.mxu0 }
 0x993   :  { %v14897_v36 = vld [vmem:[#allocation210_spill] sm:$0xff]  ;;  %v4768_v8 = vpop.f32.mrf.mxu2 }
 0x994   :  { %v13189_v7 = vor.u32 %v14898_v11, %v14897_v36  ;;  %v4781_v36 = vpop.f32.mrf.mxu3  ;;  %v14909_v11 = vld [vmem:[#allocation194_spill] sm:$0xff]  ;;  %v13217_v8 = vor.u32 %v14916_v17, %v14915_v46  ;;  %v13233_v46 = vor.u32 %v14925_v29, %v14924_v62  ;;  %v14936_v29 = vld [vmem:[#allocation169_spill] sm:$0xff] }
 0x995   :  { %v13209_v34 = vor.u32 %v14910_v9, %v14909_v11  ;;  %v14921_v36 = vld [vmem:[#allocation178_spill] sm:$0xff] }
 0x996   :  { %14899 = vst [vmem:[#allocation123_spill] sm:$0xff] %v13189_v7  ;;  %5393 = vmatpush.bf16.msrb.mxu0 %v13189_v7  ;;  %v14918_v7 = vld [vmem:[#allocation317_spill] sm:$0xff]  ;;  %5460 = vmatpush.bf16.msra.mxu1 %v13217_v8  ;;  %v14922_v11 = vld [vmem:[#allocation186_spill] sm:$0xff] }
 0x997   :  { %14911 = vst [vmem:[#allocation131_spill] sm:$0xff] %v13209_v34  ;;  %v13221_v53 = vor.u32 %v14919_v31, %v14918_v7  ;;  %v13229_v9 = vor.u32 %v14922_v11, %v14921_v36  ;;  %v14927_v17 = vld [vmem:[#allocation294_spill] sm:$0xff]  ;;  %v14930_v7 = vld [vmem:[#allocation301_spill] sm:$0xff]  ;;  %5421 = vmatpush.bf16.msra.mxu2 %v13233_v46  ;;  %v13250_v36 = vld [vmem:[%s13989_s5] sm:$0xf] }
 0x998   :  { %14917 = vst [vmem:[#allocation135_spill] sm:$0xff] %v13217_v8  ;;  %v13237_v31 = vor.u32 %v14928_v30, %v14927_v17  ;;  %v14933_v11 = vld [vmem:[#allocation162_spill] sm:$0xff] }
 0x999   :  { %14920 = vst [vmem:[#allocation136_spill] sm:$0xff] %v13221_v53  ;;  %5486 = vmatpush.bf16.msrb.mxu3 %v13221_v53  ;;  %v14934_v30 = vld [vmem:[#allocation170_spill] sm:$0xff] }
 0x99a   :  { %5394 = vmatpush.bf16.msrb.mxu0 %v13209_v34  ;;  %14923 = vst [vmem:[#allocation139_spill] sm:$0xff] %v13229_v9  ;;  %v14931_v34 = vld [vmem:[#allocation293_spill] sm:$0xff]  ;;  %5461 = vmatpush.bf16.msra.mxu1 %v13237_v31  ;;  %v13254_v62 = vor.u32 %v14934_v30, %v14933_v11  ;;  %v14945_v30 = vld [vmem:[#allocation146_spill] sm:$0xff] }
 0x99b   :  { %14926 = vst [vmem:[#allocation140_spill] sm:$0xff] %v13233_v46  ;;  %v13241_v35 = vor.u32 %v14931_v34, %v14930_v7  ;;  %v14937_v34 = vld [vmem:[#allocation161_spill] sm:$0xff]  ;;  %v14939_v7 = vld [vmem:[#allocation278_spill] sm:$0xff] }
 0x99c   :  { %14929 = vst [vmem:[#allocation143_spill] sm:$0xff] %v13237_v31  ;;  %v13258_v17 = vor.u32 %v14937_v34, %v14936_v29  ;;  %v4563_v31 = vperm.slane %v13250_v36, 0  ;;  %v14946_v29 = vld [vmem:[#allocation154_spill] sm:$0xff]  ;;  %v14948_v34 = vld [vmem:[#allocation153_spill] sm:$0xff] }
 0x99d   :  { %14932 = vst [vmem:[#allocation144_spill] sm:$0xff] %v13241_v35  ;;  %5487 = vmatpush.bf16.msrb.mxu3 %v13241_v35  ;;  %v13266_v35 = vor.u32 %v14943_v22, %v14942_v61  ;;  %v14951_v61 = vld [vmem:[#allocation262_spill] sm:$0xff] }
 0x99e   :  { %5395 = vmatpush.bf16.msrb.mxu0 %v13229_v9  ;;  %14935 = vst [vmem:[#allocation147_spill] sm:$0xff] %v13254_v62  ;;  %v14940_v9 = vld [vmem:[#allocation286_spill] sm:$0xff]  ;;  %5422 = vmatpush.bf16.msra.mxu2 %v13258_v17 }
 0x99f   :  { %14938 = vst [vmem:[#allocation148_spill] sm:$0xff] %v13258_v17  ;;  %v13262_v46 = vor.u32 %v14940_v9, %v14939_v7  ;;  %v13277_v9 = vor.u32 %v14946_v29, %v14945_v30  ;;  %v14949_v7 = vld [vmem:[#allocation145_spill] sm:$0xff]  ;;  %v14958_v30 = vld [vmem:[#allocation130_spill] sm:$0xff] }
 0x9a0   :  { %14944 = vst [vmem:[#allocation152_spill] sm:$0xff] %v13266_v35  ;;  %v13281_v22 = vor.u32 %v14949_v7, %v14948_v34  ;;  %v14954_v17 = vld [vmem:[#allocation269_spill] sm:$0xff]  ;;  %v14959_v29 = vld [vmem:[#allocation138_spill] sm:$0xff] }
 0x9a1   :  { %14941 = vst [vmem:[#allocation151_spill] sm:$0xff] %v13262_v46  ;;  %5462 = vmatpush.bf16.msra.mxu1 %v13262_v46  ;;  %5488 = vmatpush.bf16.msrb.mxu3 %v13266_v35  ;;  %v13289_v53 = vor.u32 %v14955_v39, %v14954_v17  ;;  %v13293_v35 = vadd.f32 %v4740_v25, %v4563_v31  ;;  %v14962_v7 = vld [vmem:[#allocation129_spill] sm:$0xff]  ;;  %v14964_v39 = vld [vmem:[#allocation246_spill] sm:$0xff] }
 0x9a2   :  { %5396 = vmatpush.bf16.msrb.mxu0 %v13254_v62  ;;  %v13273_v11 = vpop.f32.mrf.mxu1  ;;  %14947 = vst [vmem:[#allocation155_spill] sm:$0xff] %v13277_v9  ;;  %v14952_v62 = vld [vmem:[#allocation270_spill] sm:$0xff]  ;;  %5423 = vmatpush.bf16.msra.mxu2 %v13281_v22  ;;  %v13299_v34 = vor.u32 %v14959_v29, %v14958_v30 }
 0x9a3   :  { %14950 = vst [vmem:[#allocation156_spill] sm:$0xff] %v13281_v22  ;;  %v13285_v59 = vor.u32 %v14952_v62, %v14951_v61  ;;  %v14961_v62 = vld [vmem:[#allocation137_spill] sm:$0xff]  ;;  %v14965_v17 = vld [vmem:[#allocation254_spill] sm:$0xff]  ;;  %v4995_v31 = vadd.f32 %v13139_v20, %v13293_v35 }
 0x9a4   :  { %14956 = vst [vmem:[#allocation160_spill] sm:$0xff] %v13289_v53  ;;  %v13303_v61 = vor.u32 %v14962_v7, %v14961_v62  ;;  %v13307_v46 = vor.u32 %v14965_v17, %v14964_v39  ;;  %v14968_v22 = vld [vmem:[#allocation245_spill] sm:$0xff]  ;;  %v14970_v62 = vld [vmem:[#allocation114_spill] sm:$0xff] }
 0x9a5   :  { %14953 = vst [vmem:[#allocation159_spill] sm:$0xff] %v13285_v59  ;;  %5463 = vmatpush.bf16.msra.mxu1 %v13285_v59  ;;  %5489 = vmatpush.bf16.msrb.mxu3 %v13289_v53  ;;  %v14971_v7 = vld [vmem:[#allocation122_spill] sm:$0xff]  ;;  %v14979_v20 = vld [vmem:[#allocation237_spill] sm:$0xff] }
 0x9a6   :  { %5397 = vmatpush.bf16.msrb.mxu0 %v13277_v9  ;;  %14957 = vst [vmem:[#allocation163_spill] sm:$0xff] %v13293_v35  ;;  %v14967_v9 = vld [vmem:[#allocation253_spill] sm:$0xff]  ;;  %5424 = vmatpush.bf16.msra.mxu2 %v13303_v61  ;;  %v13323_v39 = vor.u32 %v14971_v7, %v14970_v62  ;;  %v14977_v53 = vld [vmem:[#allocation238_spill] sm:$0xff]  ;;  %v8268_v62 = vmov 0.0|0.0  }
 0x9a7   :  { %14960 = vst [vmem:[#allocation164_spill] sm:$0xff] %v13299_v34  ;;  %v13311_v25 = vor.u32 %v14968_v22, %v14967_v9  ;;  %v14973_v9 = vld [vmem:[#allocation121_spill] sm:$0xff]  ;;  %5414 = vmatmul.bf16.vlgmr.msrb.gmra.mxu1 %v8268_v62  ;;  %5440 = vmatmul.bf16.vlgmr.msra.gmra.mxu3 %v8268_v62  ;;  %v14982_v7 = vld [vmem:[#allocation98_spill] sm:$0xff] }
 0x9a8   :  { %14963 = vst [vmem:[#allocation167_spill] sm:$0xff] %v13303_v61  ;;  %v14974_v22 = vld [vmem:[#allocation113_spill] sm:$0xff]  ;;  %v14976_v61 = vld [vmem:[#allocation230_spill] sm:$0xff] }
 0x9a9   :  { %14966 = vst [vmem:[#allocation168_spill] sm:$0xff] %v13307_v46  ;;  %v13317_v30 = vpop.f32.mrf.mxu2  ;;  %5464 = vmatpush.bf16.msra.mxu1 %v13307_v46  ;;  %5490 = vmatpush.bf16.msrb.mxu3 %v13311_v25  ;;  %v13327_v17 = vor.u32 %v14974_v22, %v14973_v9  ;;  %v13331_v59 = vor.u32 %v14977_v53, %v14976_v61  ;;  %v14980_v35 = vld [vmem:[#allocation229_spill] sm:$0xff]  ;;  %v14983_v9 = vld [vmem:[#allocation106_spill] sm:$0xff] }
 0x9aa   :  { %14969 = vst [vmem:[#allocation171_spill] sm:$0xff] %v13311_v25  ;;  %5398 = vmatpush.bf16.msrb.mxu0 %v13299_v34  ;;  %v4755_v29 = vpop.f32.mrf.mxu1  ;;  %v4991_v34 = vpop.f32.mrf.mxu3  ;;  %v13335_v8 = vor.u32 %v14980_v35, %v14979_v20  ;;  %v13343_v53 = vor.u32 %v14983_v9, %v14982_v7  ;;  %v14985_v61 = vld [vmem:[#allocation105_spill] sm:$0xff]  ;;  %v4566_v20 = vperm.slane %v13250_v36, 3 }
 0x9ab   :  { %14972 = vst [vmem:[#allocation172_spill] sm:$0xff] %v13323_v39  ;;  %5425 = vmatpush.bf16.msra.mxu2 %v13327_v17  ;;  %v7421_v29 = vmul.f32 -1.442695, %v4995_v31  ;;  %v14986_v22 = vld [vmem:[#allocation97_spill] sm:$0xff]  ;;  %v14988_v31 = vld [vmem:[#allocation214_spill] sm:$0xff] }
 0x9ac   :  { %14975 = vst [vmem:[#allocation175_spill] sm:$0xff] %v13327_v17  ;;  %v13347_v35 = vor.u32 %v14986_v22, %v14985_v61  ;;  %v14989_v17 = vld [vmem:[#allocation222_spill] sm:$0xff]  ;;  %v13365_v9 = vadd.f32 %v13165_v12, %v4566_v20  ;;  %v14998_v22 = vld [vmem:[#allocation205_spill] sm:$0xff] }
 0x9ad   :  { %14978 = vst [vmem:[#allocation176_spill] sm:$0xff] %v13331_v59  ;;  %5465 = vmatpush.bf16.msra.mxu1 %v13331_v59  ;;  %5491 = vmatpush.bf16.msrb.mxu3 %v13335_v8  ;;  %v14991_v59 = vld [vmem:[#allocation221_spill] sm:$0xff]  ;;  %8099 = vpow2.f32 %v7421_v29  ;;  %v15001_v20 = vld [vmem:[#allocation182_spill] sm:$0xff] }
 0x9ae   :  { %14981 = vst [vmem:[#allocation179_spill] sm:$0xff] %v13335_v8  ;;  %5399 = vmatpush.bf16.msrb.mxu0 %v13323_v39  ;;  %v13354_v39 = vor.u32 %v14989_v17, %v14988_v31  ;;  %v14992_v8 = vld [vmem:[#allocation213_spill] sm:$0xff]  ;;  %v4998_v12 = vadd.f32 %v4991_v34, %v13365_v9  ;;  %v4564_v34 = vperm.slane %v13250_v36, 1 }
 0x9af   :  { %14984 = vst [vmem:[#allocation180_spill] sm:$0xff] %v13343_v53  ;;  %v13358_v25 = vor.u32 %v14992_v8, %v14991_v59  ;;  %5426 = vmatpush.bf16.msra.mxu2 %v13347_v35  ;;  %v14995_v59 = vld [vmem:[#allocation198_spill] sm:$0xff]  ;;  %v14999_v31 = vld [vmem:[#allocation197_spill] sm:$0xff] }
 0x9b0   :  { %14987 = vst [vmem:[#allocation183_spill] sm:$0xff] %v13347_v35  ;;  %v14996_v8 = vld [vmem:[#allocation206_spill] sm:$0xff]  ;;  %v13375_v29 = vor.u32 %v14999_v31, %v14998_v22  ;;  %v7423_v31 = vmul.f32 -1.442695, %v4998_v12 }
 0x9b1   :  { %5573 = vmatpush.bf16.msrb.mxu1 %v13038_v28  ;;  %5599 = vmatpush.bf16.msra.mxu3 %v12933_v14  ;;  %14990 = vst [vmem:[#allocation184_spill] sm:$0xff] %v13354_v39  ;;  %v4980_v7 = vpop.f32.mrf.mxu2  ;;  %v13371_v17 = vor.u32 %v14996_v8, %v14995_v59  ;;  %v15004_v59 = vld [vmem:[#allocation189_spill] sm:$0xff]  ;;  %v4565_v14 = vperm.slane %v13250_v36, 2 }
 0x9b2   :  { %14993 = vst [vmem:[#allocation187_spill] sm:$0xff] %v13358_v25  ;;  %5400 = vmatpush.bf16.msrb.mxu0 %v13343_v53  ;;  %v4993_v61 = vpop.f32.mrf.mxu3  ;;  %v15005_v8 = vld [vmem:[#allocation181_spill] sm:$0xff] }
 0x9b3   :  { %5471 = vmatpush.bf16.msrb.mxu2 %v13358_v25  ;;  %14994 = vst [vmem:[#allocation188_spill] sm:$0xff] %v13365_v9  ;;  %v8100_v7 = vpop.eup %8099  ;;  %v15002_v61 = vld [vmem:[#allocation190_spill] sm:$0xff]  ;;  %v13466_v36 = vadd.f32 %v13161_v50, %v4565_v14 }
 0x9b4   :  { %14997 = vst [vmem:[#allocation191_spill] sm:$0xff] %v13371_v17  ;;  %v13392_v22 = vadd.f32 1.0, %v8100_v7  ;;  %v13408_v7 = vadd.f32 %v13273_v11, %v4564_v34 }
 0x9b5   :  { %5574 = vmatpush.bf16.msrb.mxu1 %v13053_v52  ;;  %5600 = vmatpush.bf16.msra.mxu3 %v12951_v0  ;;  %15000 = vst [vmem:[#allocation192_spill] sm:$0xff] %v13375_v29  ;;  %v13384_v0 = vor.u32 %v15002_v61, %v15001_v20  ;;  %v13388_v52 = vor.u32 %v15005_v8, %v15004_v59  ;;  %v15008_v20 = vld [vmem:[#allocation174_spill] sm:$0xff]  ;;  %v15011_v59 = vld [vmem:[#allocation165_spill] sm:$0xff] }
 0x9b6   :  { %5445 = vmatpush.bf16.msra.mxu0 %v13354_v39  ;;  %8101 = vrcp.f32 %v13392_v22  ;;  %15013 = vst [vmem:[#allocation203_spill] sm:$0xff] %v13408_v7  ;;  %vm5008_vm7 = vweird.f32 %v13392_v22  ;;  %v5012_v14 = vand.u32 2147483647, %v13392_v22  ;;  %v5014_v50 = vand.u32 2147483648, %v13392_v22 }
 0x9b7   :  { %5472 = vmatpush.bf16.msrb.mxu2 %v13375_v29  ;;  %15003 = vst [vmem:[#allocation195_spill] sm:$0xff] %v13384_v0  ;;  %5466 = vmatmul.bf16.vlgmr.msra.gmra.mxu1 %v8268_v62  ;;  %8103 = vpow2.f32 %v7423_v31  ;;  %v15021_v31 = vld [vmem:[#allocation142_spill] sm:$0xff] }
 0x9b8   :  { %15006 = vst [vmem:[#allocation196_spill] sm:$0xff] %v13388_v52  ;;  %5492 = vmatmul.bf16.vlgmr.msrb.gmra.mxu3 %v8268_v62  ;;  %v15020_v62 = vld [vmem:[#allocation134_spill] sm:$0xff]  ;;  %vm5013_vm10 = vcmp.eq.f32.partialorder %v5012_v14, 8.507059e+37 }
 0x9b9   :  { %5575 = vmatpush.bf16.msrb.mxu1 %v13061_v32  ;;  %5601 = vmatpush.bf16.msra.mxu3 %v12969_v47  ;;  %v15007_v47 = vld [vmem:[#allocation166_spill] sm:$0xff]  ;;  %v15010_v32 = vld [vmem:[#allocation173_spill] sm:$0xff]  ;;  %15038 = vst [vmem:[#allocation220_spill] sm:$0xff] %v13466_v36 }
 0x9ba   :  { %5446 = vmatpush.bf16.msra.mxu0 %v13371_v17  ;;  %v13399_v61 = vor.u32 %v15008_v20, %v15007_v47  ;;  %v13403_v8 = vor.u32 %v15011_v59, %v15010_v32  ;;  %v15014_v47 = vld [vmem:[#allocation150_spill] sm:$0xff]  ;;  %v15017_v59 = vld [vmem:[#allocation157_spill] sm:$0xff] }
 0x9bb   :  { %5473 = vmatpush.bf16.msrb.mxu2 %v13388_v52  ;;  %v15015_v32 = vld [vmem:[#allocation158_spill] sm:$0xff] }
 0x9bc   :  { %15009 = vst [vmem:[#allocation199_spill] sm:$0xff] %v13399_v61  ;;  %v13415_v20 = vor.u32 %v15015_v32, %v15014_v47  ;;  %v15023_v47 = vld [vmem:[#allocation141_spill] sm:$0xff] }
 0x9bd   :  { %5576 = vmatpush.bf16.msrb.mxu1 %v13067_v23  ;;  %5602 = vmatpush.bf16.msra.mxu3 %v12985_v27  ;;  %15012 = vst [vmem:[#allocation200_spill] sm:$0xff] %v13403_v8  ;;  %v15018_v27 = vld [vmem:[#allocation149_spill] sm:$0xff] }
 0x9be   :  { %5447 = vmatpush.bf16.msra.mxu0 %v13384_v0  ;;  %15016 = vst [vmem:[#allocation204_spill] sm:$0xff] %v13415_v20  ;;  %v13419_v23 = vor.u32 %v15018_v27, %v15017_v59  ;;  %v15024_v32 = vld [vmem:[#allocation133_spill] sm:$0xff]  ;;  %v8102_v27 = vpop.eup %8101 }
 0x9bf   :  { %5474 = vmatpush.bf16.msrb.mxu2 %v13403_v8  ;;  %vm5009_vm8 = vweird.f32 %v8102_v27 }
 0x9c0   :  { %15019 = vst [vmem:[#allocation207_spill] sm:$0xff] %v13419_v23  ;;  %vm13479_vm9 = vmor %vm5008_vm7, %vm5009_vm8 }
 0x9c1   :  { %5577 = vmatpush.bf16.msrb.mxu1 %v13072_v60  ;;  %5603 = vmatpush.bf16.msra.mxu3 %v13001_v51  ;;  %v13428_v51 = vor.u32 %v15021_v31, %v15020_v62  ;;  %v13432_v60 = vor.u32 %v15024_v32, %v15023_v47  ;;  %v15029_v31 = vld [vmem:[#allocation125_spill] sm:$0xff] }
 0x9c2   :  { %5448 = vmatpush.bf16.msra.mxu0 %v13399_v61  ;;  %v4965_v12 = vpop.f32.mrf.mxu1 }
 0x9c3   :  { %v4996_v11 = vadd.f32 %v4965_v12, %v13408_v7  ;;  %5475 = vmatpush.bf16.msrb.mxu2 %v13419_v23  ;;  %15022 = vst [vmem:[#allocation208_spill] sm:$0xff] %v13428_v51  ;;  %v8104_v12 = vpop.eup %8103 }
 0x9c4   :  { %15025 = vst [vmem:[#allocation211_spill] sm:$0xff] %v13432_v60  ;;  %v13447_v32 = vadd.f32 1.0, %v8104_v12 }
 0x9c5   :  { %v7422_v34 = vmul.f32 -1.442695, %v4996_v11  ;;  %5578 = vmatpush.bf16.msrb.mxu1 %v13077_v55  ;;  %5604 = vmatpush.bf16.msra.mxu3 %v13017_v19  ;;  %v15026_v11 = vld [vmem:[#allocation118_spill] sm:$0xff]  ;;  %v15030_v55 = vld [vmem:[#allocation117_spill] sm:$0xff] }
 0x9c6   :  { %5449 = vmatpush.bf16.msra.mxu0 %v13415_v20  ;;  %v15027_v19 = vld [vmem:[#allocation126_spill] sm:$0xff]  ;;  %v13444_v47 = vor.u32 %v15030_v55, %v15029_v31  ;;  %v15035_v31 = vld [vmem:[#allocation109_spill] sm:$0xff]  ;;  %vm5047_vm14 = vweird.f32 %v13447_v32 }
 0x9c7   :  { %8105 = vpow2.f32 %v7422_v34  ;;  %5476 = vmatpush.bf16.msrb.mxu2 %v13432_v60  ;;  %v13440_v62 = vor.u32 %v15027_v19, %v15026_v11  ;;  %v5004_v34 = vmul.f32 %v8102_v27, %v13392_v22  ;;  %v15032_v19 = vld [vmem:[#allocation102_spill] sm:$0xff] }
 0x9c8   :  { %15031 = vst [vmem:[#allocation215_spill] sm:$0xff] %v13444_v47  ;;  %v15033_v11 = vld [vmem:[#allocation110_spill] sm:$0xff]  ;;  %8107 = vrcp.f32 %v13447_v32 }
 0x9c9   :  { %5579 = vmatpush.bf16.msrb.mxu1 %v13082_v38  ;;  %5605 = vmatpush.bf16.msra.mxu3 %v13033_v15  ;;  %15028 = vst [vmem:[#allocation212_spill] sm:$0xff] %v13440_v62  ;;  %v13456_v55 = vor.u32 %v15033_v11, %v15032_v19  ;;  %v15036_v38 = vld [vmem:[#allocation101_spill] sm:$0xff]  ;;  %v5005_v28 = vsub.f32 1.0, %v5004_v34 }
 0x9ca   :  { %5450 = vmatpush.bf16.msra.mxu0 %v13428_v51  ;;  %v4967_v59 = vpop.f32.mrf.mxu1  ;;  %v13460_v12 = vor.u32 %v15036_v38, %v15035_v31  ;;  %v4997_v38 = vadd.f32 %v13317_v30, %v13466_v36 }
 0x9cb   :  { %5477 = vmatpush.bf16.msrb.mxu2 %v13444_v47  ;;  %15034 = vst [vmem:[#allocation216_spill] sm:$0xff] %v13456_v55 }
 0x9cc   :  { %15037 = vst [vmem:[#allocation219_spill] sm:$0xff] %v13460_v12 }
 0x9cd   :  { %v8106_v59 = vpop.eup %8105  ;;  %5580 = vmatpush.bf16.msrb.mxu1 %v13087_v4  ;;  %5606 = vmatpush.bf16.msra.mxu3 %v13047_v42 }
 0x9ce   :  { %5451 = vmatpush.bf16.msra.mxu0 %v13440_v62  ;;  %v5021_v15 = vadd.f32 1.0, %v8106_v59  ;;  %v5006_v59 = vmul.f32 %v8102_v27, %v5005_v28  ;;  %v8108_v34 = vpop.eup %8107  ;;  %v5053_v28 = vand.u32 2147483648, %v13447_v32 }
 0x9cf   :  { %5478 = vmatpush.bf16.msrb.mxu2 %v13460_v12  ;;  %v5043_v30 = vmul.f32 %v8108_v34, %v13447_v32  ;;  %vm5048_vm15 = vweird.f32 %v8108_v34 }
 0x9d0   :  { %8109 = vrcp.f32 %v5021_v15  ;;  %v5007_v11 = vadd.f32 %v8102_v27, %v5006_v59  ;;  %vm5027_vm11 = vweird.f32 %v5021_v15  ;;  %vm5049_vm0 = vmor %vm5047_vm14, %vm5048_vm15 }
 0x9d1   :  { %5694 = vmatpush.bf16.msra.mxu1 %v13093_v13  ;;  %5720 = vmatpush.bf16.msrb.mxu3 %v13097_v10  ;;  %8111 = vtanh.f32 %v4997_v38  ;;  %v5033_v10 = vand.u32 2147483648, %v5021_v15  ;;  %v5031_v13 = vand.u32 2147483647, %v5021_v15 }
 0x9d2   :  { %5452 = vmatpush.bf16.msra.mxu0 %v13456_v55  ;;  %v5011_v22 = vsel %vm13479_vm9, %v8102_v27, %v5007_v11 }
 0x9d3   :  { %vm5032_vm13 = vcmp.eq.f32.partialorder %v5031_v13, 8.507059e+37 }
 0x9d5   :  { %5695 = vmatpush.bf16.msra.mxu1 %v13103_v48  ;;  %5721 = vmatpush.bf16.msrb.mxu3 %v13107_v49  ;;  %v5015_v48 = vor.u32 1.1754944e-38, %v5014_v50 }
 0x9d6   :  { %v8110_v19 = vpop.eup %8109 }
 0x9d7   :  { %v5023_v31 = vmul.f32 %v8110_v19, %v5021_v15  ;;  %vm5028_vm1 = vweird.f32 %v8110_v19  ;;  %v8112_v38 = vpop.eup %8111  ;;  %v5016_v42 = vsel %vm5013_vm10, %v5015_v48, %v5011_v22  ;;  %v5054_v48 = vor.u32 1.1754944e-38, %v5053_v28  ;;  %v15043_v22 = vld [vmem:[#allocation5_spill] sm:$0xff] }
 0x9d8   :  { %vm5029_vm12 = vmor %vm5027_vm11, %vm5028_vm1  ;;  %v5058_v50 = vmul.f32 %v8112_v38, %v5016_v42  ;;  %v15045_v38 = vld [vmem:[#allocation143_spill] sm:$0xff]  ;;  %v15052_v28 = vld [vmem:[#allocation45_spill] sm:$0xff] }
 0x9d9   :  { %5696 = vmatpush.bf16.msra.mxu1 %v13113_v26  ;;  %5722 = vmatpush.bf16.msrb.mxu3 %v13117_v44  ;;  %v5024_v49 = vsub.f32 1.0, %v5023_v31  ;;  %v5044_v44 = vsub.f32 1.0, %v5043_v30  ;;  %v5034_v31 = vor.u32 1.1754944e-38, %v5033_v10  ;;  %v5051_v10 = vand.u32 2147483647, %v13447_v32  ;;  %v15041_v32 = vld [vmem:[#allocation135_spill] sm:$0xff] }
 0x9db   :  { %v5025_v59 = vmul.f32 %v8110_v19, %v5024_v49  ;;  %v5045_v49 = vmul.f32 %v8108_v34, %v5044_v44  ;;  %vm5052_vm2 = vcmp.eq.f32.partialorder %v5051_v10, 8.507059e+37  ;;  %v15054_v10 = vld [vmem:[#allocation160_spill] sm:$0xff] }
 0x9dd   :  { %5697 = vmatpush.bf16.msra.mxu1 %v13123_v45  ;;  %5723 = vmatpush.bf16.msrb.mxu3 %v13127_v58  ;;  %v5026_v26 = vadd.f32 %v8110_v19, %v5025_v59  ;;  %v5046_v13 = vadd.f32 %v8108_v34, %v5045_v49  ;;  %v15044_v59 = vld [vmem:[#allocation23_spill] sm:$0xff]  ;;  %v15048_v49 = vld [vmem:[#allocation29_spill] sm:$0xff] }
 0x9df   :  { %v5030_v14 = vsel %vm5029_vm12, %v8110_v19, %v5026_v26  ;;  %v5050_v42 = vsel %vm5049_vm0, %v8108_v34, %v5046_v13  ;;  %v15042_v34 = vld [vmem:[#allocation136_spill] sm:$0xff]  ;;  %v15053_v13 = vld [vmem:[#allocation159_spill] sm:$0xff] }
 0x9e0   :  { %v5035_v27 = vsel %vm5032_vm13, %v5034_v31, %v5030_v14  ;;  %v5055_v44 = vsel %vm5052_vm2, %v5054_v48, %v5050_v42  ;;  %v15046_v31 = vld [vmem:[#allocation144_spill] sm:$0xff]  ;;  %v15056_v42 = vld [vmem:[#allocation55_spill] sm:$0xff] }
 0x9e1   :  { %5698 = vmatpush.bf16.msra.mxu1 %v13133_v18  ;;  %5724 = vmatpush.bf16.msrb.mxu3 %v13137_v21  ;;  %v5057_v11 = vmul.f32 0.0, %v5035_v27  ;;  %v15047_v14 = vld [vmem:[#allocation8_spill] sm:$0xff]  ;;  %v15049_v27 = vld [vmem:[#allocation151_spill] sm:$0xff] }
 0x9e2   :  { %v15055_v48 = vld [vmem:[#allocation12_spill] sm:$0xff] }
 0x9e3   :  { %v13492_v15 = vadd.f32 %v5058_v50, %v5057_v11  ;;  %v15050_v50 = vld [vmem:[#allocation152_spill] sm:$0xff]  ;;  %v15051_v11 = vld [vmem:[#allocation9_spill] sm:$0xff] }
 0x9e5   :  { %5699 = vmatpush.bf16.msra.mxu1 %v13145_v40  ;;  %5725 = vmatpush.bf16.msrb.mxu3 %v13149_v33  ;;  %8113 = vtanh.f32 %v13492_v15 }
 0x9e9   :  { %5700 = vmatpush.bf16.msra.mxu1 %v13155_v54  ;;  %5726 = vmatpush.bf16.msrb.mxu3 %v13159_v56 }
 0x9eb   :  { %v8114_v26 = vpop.eup %8113 }
 0x9ec   :  { %v5061_v19 = vmul.f32 %v8114_v26, %v5055_v44  ;;  %v15057_v26 = vld [vmem:[#allocation171_spill] sm:$0xff]  ;;  %v15058_v44 = vld [vmem:[#allocation13_spill] sm:$0xff] }
 0x9ed   :  { %5701 = vmatpush.bf16.msra.mxu1 %v13169_v43  ;;  %5727 = vmatpush.bf16.msrb.mxu3 %v13173_v37 }
 0x9ee   :  { %v5062_v30 = vpack.c.bf16 %v5061_v19, %v5061_v19  ;;  %v15059_v19 = vld [vmem:[#allocation60_spill] sm:$0xff] }
 0x9f0   :  { %5401 = vmatmul.bf16.vlgmr.msrb.gmra.mxu0 %v5062_v30  ;;  %5427 = vmatmul.bf16.vlgmr.msra.gmra.mxu2 %v5062_v30 }
 0x9f1   :  { %5581 = vmatmul.bf16.vlgmr.msrb.gmra.mxu1 %v5062_v30  ;;  %5607 = vmatmul.bf16.vlgmr.msra.gmra.mxu3 %v5062_v30 }
 0x9f2   :  { %5560 = vmatpush.bf16.msrb.mxu0 %v12738_v5  ;;  %5586 = vmatpush.bf16.msra.mxu2 %v12918_v2 }
 0x9f3   :  { %5746 = vmatpush.bf16.msrb.mxu1 %v13177_v16  ;;  %5772 = vmatpush.bf16.msra.mxu3 %v13181_v1  ;;  %v15075_v1 = vld [vmem:[#allocation175_spill] sm:$0xff] }
 0x9f6   :  { %5561 = vmatpush.bf16.msrb.mxu0 %v12761_v57  ;;  %5587 = vmatpush.bf16.msra.mxu2 %v12938_v6 }
 0x9f7   :  { %5747 = vmatpush.bf16.msrb.mxu1 %v13197_v3  ;;  %5773 = vmatpush.bf16.msra.mxu3 %v13201_v24  ;;  %v15070_v24 = vld [vmem:[#allocation155_spill] sm:$0xff]  ;;  %v15071_v3 = vld [vmem:[#allocation156_spill] sm:$0xff] }
 0x9fa   :  { %5562 = vmatpush.bf16.msrb.mxu0 %v12787_v41  ;;  %5588 = vmatpush.bf16.msra.mxu2 %v12957_v63 }
 0x9fb   :  { %5748 = vmatpush.bf16.msrb.mxu1 %v15041_v32  ;;  %5774 = vmatpush.bf16.msra.mxu3 %v15042_v34  ;;  %v15068_v34 = vld [vmem:[#allocation147_spill] sm:$0xff]  ;;  %v15069_v32 = vld [vmem:[#allocation148_spill] sm:$0xff] }
 0x9fe   :  { %5563 = vmatpush.bf16.msrb.mxu0 %v15043_v22  ;;  %5589 = vmatpush.bf16.msra.mxu2 %v15044_v59 }
 0x9ff   :  { %5749 = vmatpush.bf16.msrb.mxu1 %v15045_v38  ;;  %5775 = vmatpush.bf16.msra.mxu3 %v15046_v31  ;;  %v15062_v31 = vld [vmem:[#allocation176_spill] sm:$0xff] }
 0xa00   :  { %5453 = vmatmul.bf16.vlgmr.msra.gmra.mxu0 %v5062_v30  ;;  %5479 = vmatmul.bf16.vlgmr.msrb.gmra.mxu2 %v5062_v30  ;;  %v15065_v38 = vld [vmem:[#allocation132_spill] sm:$0xff] }
 0xa02   :  { %5564 = vmatpush.bf16.msrb.mxu0 %v15047_v14  ;;  %5590 = vmatpush.bf16.msra.mxu2 %v15048_v49 }
 0xa03   :  { %5750 = vmatpush.bf16.msrb.mxu1 %v15049_v27  ;;  %5776 = vmatpush.bf16.msra.mxu3 %v15050_v50  ;;  %v15060_v50 = vld [vmem:[#allocation123_spill] sm:$0xff]  ;;  %v15061_v27 = vld [vmem:[#allocation124_spill] sm:$0xff] }
 0xa06   :  { %5565 = vmatpush.bf16.msrb.mxu0 %v15051_v11  ;;  %5591 = vmatpush.bf16.msra.mxu2 %v15052_v28 }
 0xa07   :  { %5751 = vmatpush.bf16.msrb.mxu1 %v15053_v13  ;;  %5777 = vmatpush.bf16.msra.mxu3 %v15054_v10  ;;  %v15063_v13 = vld [vmem:[#allocation179_spill] sm:$0xff] }
 0xa08   :  { %v15064_v10 = vld [vmem:[#allocation131_spill] sm:$0xff] }
 0xa0a   :  { %5566 = vmatpush.bf16.msrb.mxu0 %v15055_v48  ;;  %5592 = vmatpush.bf16.msra.mxu2 %v15056_v42 }
 0xa0b   :  { %5752 = vmatpush.bf16.msrb.mxu1 %v13307_v46  ;;  %5778 = vmatpush.bf16.msra.mxu3 %v15057_v26  ;;  %v15066_v46 = vld [vmem:[#allocation139_spill] sm:$0xff]  ;;  %v15067_v26 = vld [vmem:[#allocation140_spill] sm:$0xff] }
 0xa0e   :  { %5567 = vmatpush.bf16.msrb.mxu0 %v15058_v44  ;;  %5593 = vmatpush.bf16.msra.mxu2 %v15059_v19 }
 0xa0f   :  { %5753 = vmatpush.bf16.msrb.mxu1 %v15062_v31  ;;  %5779 = vmatpush.bf16.msra.mxu3 %v15063_v13  ;;  %v15072_v31 = vld [vmem:[#allocation164_spill] sm:$0xff]  ;;  %v15073_v13 = vld [vmem:[#allocation167_spill] sm:$0xff] }
 0xa11   :  { %5568 = vmatmul.bf16.vlgmr.msrb.gmra.mxu0 %v5062_v30  ;;  %5594 = vmatmul.bf16.vlgmr.msra.gmra.mxu2 %v5062_v30  ;;  %v15074_v30 = vld [vmem:[#allocation172_spill] sm:$0xff] }
 0xa12   :  { %5681 = vmatpush.bf16.msra.mxu0 %v15060_v50  ;;  %5707 = vmatpush.bf16.msrb.mxu2 %v15061_v27 }
 0xa16   :  { %5682 = vmatpush.bf16.msra.mxu0 %v15064_v10  ;;  %5708 = vmatpush.bf16.msrb.mxu2 %v15065_v38 }
 0xa1a   :  { %5683 = vmatpush.bf16.msra.mxu0 %v15066_v46  ;;  %5709 = vmatpush.bf16.msrb.mxu2 %v15067_v26 }
 0xa1e   :  { %5684 = vmatpush.bf16.msra.mxu0 %v15068_v34  ;;  %5710 = vmatpush.bf16.msrb.mxu2 %v15069_v32 }
 0xa22   :  { %5685 = vmatpush.bf16.msra.mxu0 %v15070_v24  ;;  %5711 = vmatpush.bf16.msrb.mxu2 %v15071_v3 }
 0xa24   :  { %v5415_v32 = vpop.f32.mrf.mxu1 }
 0xa26   :  { %5686 = vmatpush.bf16.msra.mxu0 %v15072_v31  ;;  %5712 = vmatpush.bf16.msrb.mxu2 %v15073_v13 }
 0xa2a   :  { %5687 = vmatpush.bf16.msra.mxu0 %v15074_v30  ;;  %5713 = vmatpush.bf16.msrb.mxu2 %v15075_v1  ;;  %v5441_v31 = vpop.f32.mrf.mxu3 }
 0xa2c   :  { %v5417_v30 = vpop.f32.mrf.mxu1 }
 0xa2e   :  { %5688 = vmatpush.bf16.msra.mxu0 %v13343_v53  ;;  %5714 = vmatpush.bf16.msrb.mxu2 %v13347_v35 }
 0xa32   :  { %5733 = vmatpush.bf16.msrb.mxu0 %v13354_v39  ;;  %5759 = vmatpush.bf16.msra.mxu2 %v13358_v25  ;;  %v5443_v35 = vpop.f32.mrf.mxu3 }
 0xa34   :  { %v5467_v25 = vpop.f32.mrf.mxu1 }
 0xa36   :  { %5734 = vmatpush.bf16.msrb.mxu0 %v13371_v17  ;;  %5760 = vmatpush.bf16.msra.mxu2 %v13375_v29 }
 0xa3a   :  { %5735 = vmatpush.bf16.msrb.mxu0 %v13384_v0  ;;  %5761 = vmatpush.bf16.msra.mxu2 %v13388_v52 }
 0xa3b   :  { %v5493_v29 = vpop.f32.mrf.mxu3 }
 0xa3c   :  { %v5469_v30 = vpop.f32.mrf.mxu1 }
 0xa3e   :  { %5736 = vmatpush.bf16.msrb.mxu0 %v13399_v61  ;;  %5762 = vmatpush.bf16.msra.mxu2 %v13403_v8 }
 0xa42   :  { %5737 = vmatpush.bf16.msrb.mxu0 %v13415_v20  ;;  %5763 = vmatpush.bf16.msra.mxu2 %v13419_v23  ;;  %v15076_v20 = vld [vmem:[#allocation357_spill] sm:$0xff] }
 0xa43   :  { %v5495_v35 = vpop.f32.mrf.mxu3 }
 0xa46   :  { %5738 = vmatpush.bf16.msrb.mxu0 %v13428_v51  ;;  %5764 = vmatpush.bf16.msra.mxu2 %v13432_v60  ;;  %v15077_v60 = vld [vmem:[#allocation358_spill] sm:$0xff] }
 0xa4a   :  { %5739 = vmatpush.bf16.msrb.mxu0 %v13440_v62  ;;  %5765 = vmatpush.bf16.msra.mxu2 %v13444_v47 }
 0xa4e   :  { %5740 = vmatpush.bf16.msrb.mxu0 %v13456_v55  ;;  %5766 = vmatpush.bf16.msra.mxu2 %v13460_v12 }
 0xa6d   :  { %v5402_v8 = vpop.f32.mrf.mxu0 }
 0xa6e   :  { %v5403_v61 = vadd.f32 %v5402_v8, %v15076_v20  ;;  %v5582_v23 = vpop.f32.mrf.mxu1 }
 0xa6f   :  { %v5613_v30 = vadd.f32 %v5582_v23, %v13408_v7 }
 0xa70   :  { %v5416_v52 = vadd.f32 %v5415_v32, %v5403_v61 }
 0xa71   :  { %v7684_v13 = vmul.f32 -1.442695, %v5613_v30 }
 0xa72   :  { %v7680_v0 = vmul.f32 -1.442695, %v5416_v52  ;;  %v15078_v52 = vld [vmem:[#allocation360_spill] sm:$0xff] }
 0xa73   :  { %v5428_v51 = vpop.f32.mrf.mxu2 }
 0xa74   :  { %8115 = vpow2.f32 %v7680_v0  ;;  %v5429_v17 = vadd.f32 %v5428_v51, %v15077_v60  ;;  %v5608_v39 = vpop.f32.mrf.mxu3 }
 0xa75   :  { %v5404_v62 = vpop.f32.mrf.mxu0 }
 0xa76   :  { %v5442_v53 = vadd.f32 %v5441_v31, %v5429_v17  ;;  %v5584_v47 = vpop.f32.mrf.mxu1  ;;  %v5615_v17 = vadd.f32 %v5608_v39, %v13365_v9 }
 0xa78   :  { %v7681_v55 = vmul.f32 -1.442695, %v5442_v53  ;;  %v7685_v30 = vmul.f32 -1.442695, %v5615_v17 }
 0xa7a   :  { %v8116_v1 = vpop.eup %8115  ;;  %8117 = vpow2.f32 %v7681_v55 }
 0xa7b   :  { %v5500_v35 = vadd.f32 1.0, %v8116_v1  ;;  %v5430_v12 = vpop.f32.mrf.mxu2 }
 0xa7c   :  { %v5610_v8 = vpop.f32.mrf.mxu3  ;;  %v15079_v12 = vld [vmem:[#allocation359_spill] sm:$0xff] }
 0xa7d   :  { %8119 = vrcp.f32 %v5500_v35  ;;  %v5454_v61 = vpop.f32.mrf.mxu0  ;;  %v5512_v8 = vand.u32 2147483648, %v5500_v35  ;;  %vm5506_vm4 = vweird.f32 %v5500_v35 }
 0xa7e   :  { %v5455_v32 = vadd.f32 %v5454_v61, %v15078_v52  ;;  %8121 = vpow2.f32 %v7684_v13  ;;  %v5510_v61 = vand.u32 2147483647, %v5500_v35 }
 0xa80   :  { %v8118_v0 = vpop.eup %8117  ;;  %v5468_v62 = vadd.f32 %v5467_v25, %v5455_v32  ;;  %v5513_v32 = vor.u32 1.1754944e-38, %v5512_v8  ;;  %vm5511_vm6 = vcmp.eq.f32.partialorder %v5510_v61, 8.507059e+37 }
 0xa81   :  { %v5519_v51 = vadd.f32 1.0, %v8118_v0 }
 0xa83   :  { %v8120_v60 = vpop.eup %8119  ;;  %8123 = vrcp.f32 %v5519_v51  ;;  %v5480_v23 = vpop.f32.mrf.mxu2  ;;  %vm5525_vm8 = vweird.f32 %v5519_v51 }
 0xa84   :  { %v5502_v53 = vmul.f32 %v8120_v60, %v5500_v35  ;;  %v8122_v55 = vpop.eup %8121  ;;  %v5481_v31 = vadd.f32 %v5480_v23, %v15079_v12  ;;  %8125 = vtanh.f32 %v5468_v62  ;;  %vm5507_vm3 = vweird.f32 %v8120_v60  ;;  %v15080_v35 = vld [vmem:[#allocation163_spill] sm:$0xff] }
 0xa85   :  { %v5456_v47 = vpop.f32.mrf.mxu0  ;;  %v13572_v52 = vadd.f32 1.0, %v8122_v55  ;;  %8127 = vpow2.f32 %v7685_v30  ;;  %vm5508_vm5 = vmor %vm5506_vm4, %vm5507_vm3  ;;  %v5531_v62 = vand.u32 2147483648, %v5519_v51  ;;  %v5529_v55 = vand.u32 2147483647, %v5519_v51 }
 0xa86   :  { %v5503_v1 = vsub.f32 1.0, %v5502_v53  ;;  %v5494_v13 = vadd.f32 %v5493_v29, %v5481_v31 }
 0xa87   :  { %vm5530_vm10 = vcmp.eq.f32.partialorder %v5529_v55, 8.507059e+37  ;;  %vm5644_vm15 = vweird.f32 %v13572_v52 }
 0xa88   :  { %v5504_v7 = vmul.f32 %v8120_v60, %v5503_v1  ;;  %v7682_v25 = vmul.f32 -1.442695, %v5494_v13 }
 0xa89   :  { %v8124_v0 = vpop.eup %8123 }
 0xa8a   :  { %v5521_v20 = vmul.f32 %v8124_v0, %v5519_v51  ;;  %v5505_v39 = vadd.f32 %v8120_v60, %v5504_v7  ;;  %8129 = vpow2.f32 %v7682_v25  ;;  %v8126_v17 = vpop.eup %8125  ;;  %vm5526_vm7 = vweird.f32 %v8124_v0 }
 0xa8b   :  { %v5482_v53 = vpop.f32.mrf.mxu2  ;;  %8131 = vrcp.f32 %v13572_v52  ;;  %v8128_v8 = vpop.eup %8127  ;;  %vm5527_vm9 = vmor %vm5525_vm8, %vm5526_vm7 }
 0xa8c   :  { %v5522_v47 = vsub.f32 1.0, %v5521_v20  ;;  %v5509_v23 = vsel %vm5508_vm5, %v8120_v60, %v5505_v39  ;;  %v5532_v53 = vor.u32 1.1754944e-38, %v5531_v62  ;;  %v13582_v62 = vadd.f32 1.0, %v8128_v8 }
 0xa8d   :  { %v5514_v29 = vsel %vm5511_vm6, %v5513_v32, %v5509_v23 }
 0xa8e   :  { %v5523_v1 = vmul.f32 %v8124_v0, %v5522_v47  ;;  %v5556_v31 = vmul.f32 %v8126_v17, %v5514_v29  ;;  %v5569_v7 = vpop.f32.mrf.mxu0  ;;  %vm5664_vm8 = vweird.f32 %v13582_v62 }
 0xa8f   :  { %v5612_v13 = vadd.f32 %v5569_v7, %v15080_v35 }
 0xa90   :  { %v5524_v30 = vadd.f32 %v8124_v0, %v5523_v1  ;;  %v8130_v20 = vpop.eup %8129 }
 0xa91   :  { %v7683_v60 = vmul.f32 -1.442695, %v5612_v13  ;;  %v13576_v39 = vpop.eup %8131  ;;  %v5539_v32 = vadd.f32 1.0, %v8130_v20 }
 0xa92   :  { %v5528_v61 = vsel %vm5527_vm9, %v8124_v0, %v5524_v30  ;;  %v5640_v51 = vmul.f32 %v13576_v39, %v13572_v52  ;;  %vm5645_vm12 = vweird.f32 %v13576_v39 }
 0xa93   :  { %v5533_v25 = vsel %vm5530_vm10, %v5532_v53, %v5528_v61  ;;  %8133 = vpow2.f32 %v7683_v60  ;;  %v5549_v61 = vand.u32 2147483647, %v5539_v32  ;;  %vm5545_vm11 = vweird.f32 %v5539_v32  ;;  %vm13597_vm0 = vmor %vm5644_vm15, %vm5645_vm12 }
 0xa94   :  { %v5555_v47 = vmul.f32 0.0, %v5533_v25  ;;  %v5595_v23 = vpop.f32.mrf.mxu2  ;;  %8135 = vrcp.f32 %v5539_v32  ;;  %v5641_v55 = vsub.f32 1.0, %v5640_v51 }
 0xa95   :  { %8137 = vrcp.f32 %v13582_v62  ;;  %vm5550_vm14 = vcmp.eq.f32.partialorder %v5549_v61, 8.507059e+37 }
 0xa96   :  { %v13578_v17 = vadd.f32 %v5556_v31, %v5555_v47  ;;  %v5571_v29 = vpop.f32.mrf.mxu0  ;;  %v5642_v60 = vmul.f32 %v13576_v39, %v5641_v55  ;;  %v5551_v31 = vand.u32 2147483648, %v5539_v32  ;;  %v5614_v47 = vadd.f32 %v5595_v23, %v13466_v36 }
 0xa98   :  { %15081 = vst [vmem:[#allocation223_spill] sm:$0xff] %v13578_v17  ;;  %v5552_v55 = vor.u32 1.1754944e-38, %v5551_v31 }
 0xa99   :  { %v8134_v1 = vpop.eup %8133 }
 0xa9a   :  { %v5619_v7 = vadd.f32 1.0, %v8134_v1  ;;  %v8136_v0 = vpop.eup %8135  ;;  %v5643_v1 = vadd.f32 %v13576_v39, %v5642_v60 }
 0xa9b   :  { %v5541_v13 = vmul.f32 %v8136_v0, %v5539_v32  ;;  %vm5546_vm1 = vweird.f32 %v8136_v0  ;;  %v13587_v8 = vpop.eup %8137  ;;  %v5648_v32 = vand.u32 2147483647, %v13572_v52 }
 0xa9c   :  { %8139 = vrcp.f32 %v5619_v7  ;;  %v5597_v30 = vpop.f32.mrf.mxu2  ;;  %vm5547_vm13 = vmor %vm5545_vm11, %vm5546_vm1  ;;  %v5631_v60 = vand.u32 2147483648, %v5619_v7  ;;  %v5629_v9 = vand.u32 2147483647, %v5619_v7  ;;  %vm5625_vm3 = vweird.f32 %v5619_v7 }
 0xa9d   :  { %v5542_v53 = vsub.f32 1.0, %v5541_v13  ;;  %8141 = vtanh.f32 %v13578_v17  ;;  %v5650_v13 = vand.u32 2147483648, %v13572_v52  ;;  %v5660_v30 = vmul.f32 %v13587_v8, %v13582_v62 }
 0xa9e   :  { %8143 = vtanh.f32 %v5614_v47  ;;  %vm5649_vm4 = vcmp.eq.f32.partialorder %v5648_v32, 8.507059e+37  ;;  %vm5630_vm6 = vcmp.eq.f32.partialorder %v5629_v9, 8.507059e+37  ;;  %v15088_v32 = vld [vmem:[#allocation17_spill] sm:$0xff]  ;;  %vm5665_vm7 = vweird.f32 %v13587_v8 }
 0xa9f   :  { %v5543_v20 = vmul.f32 %v8136_v0, %v5542_v53  ;;  %v5651_v61 = vor.u32 1.1754944e-38, %v5650_v13  ;;  %v5670_v9 = vand.u32 2147483648, %v13582_v62  ;;  %vm5666_vm9 = vmor %vm5664_vm8, %vm5665_vm7 }
 0xaa1   :  { %v5544_v29 = vadd.f32 %v8136_v0, %v5543_v20 }
 0xaa2   :  { %v8140_v25 = vpop.eup %8139 }
 0xaa3   :  { %v5621_v51 = vmul.f32 %v8140_v25, %v5619_v7  ;;  %v5548_v53 = vsel %vm5547_vm13, %v8136_v0, %v5544_v29  ;;  %v8142_v17 = vpop.eup %8141  ;;  %vm5626_vm2 = vweird.f32 %v8140_v25  ;;  %v5647_v0 = vsel %vm13597_vm0, %v13576_v39, %v5643_v1 }
 0xaa4   :  { %v5553_v20 = vsel %vm5550_vm14, %v5552_v55, %v5548_v53  ;;  %v5661_v29 = vsub.f32 1.0, %v5660_v30  ;;  %vm5627_vm5 = vmor %vm5625_vm3, %vm5626_vm2  ;;  %v5632_v55 = vor.u32 1.1754944e-38, %v5631_v60  ;;  %v5652_v47 = vsel %vm5649_vm4, %v5651_v61, %v5647_v0  ;;  %v15085_v53 = vld [vmem:[#allocation59_spill] sm:$0xff]  ;;  %v8144_v36 = vpop.eup %8143  ;;  %v15087_v30 = vld [vmem:[#allocation66_spill] sm:$0xff] }
 0xaa5   :  { %v5622_v23 = vsub.f32 1.0, %v5621_v51  ;;  %v13601_v31 = vmul.f32 %v8142_v17, %v5553_v20  ;;  %v5674_v13 = vmul.f32 %v5652_v47, %v13492_v15  ;;  %v5668_v20 = vand.u32 2147483647, %v13582_v62  ;;  %v15089_v15 = vld [vmem:[#allocation69_spill] sm:$0xff]  ;;  %v15090_v60 = vld [vmem:[#allocation20_spill] sm:$0xff]  ;;  %v15093_v62 = vld [vmem:[#allocation75_spill] sm:$0xff] }
 0xaa6   :  { %v5662_v39 = vmul.f32 %v13587_v8, %v5661_v29  ;;  %v5671_v61 = vor.u32 1.1754944e-38, %v5670_v9  ;;  %v15092_v47 = vld [vmem:[#allocation28_spill] sm:$0xff]  ;;  %v15101_v9 = vld [vmem:[#allocation89_spill] sm:$0xff] }
 0xaa7   :  { %15084 = vst [vmem:[#allocation224_spill] sm:$0xff] %v13601_v31  ;;  %v5623_v35 = vmul.f32 %v8140_v25, %v5622_v23  ;;  %v5680_v52 = vpack.c.bf16 %v13601_v31, %v13601_v31  ;;  %v15086_v23 = vld [vmem:[#allocation16_spill] sm:$0xff]  ;;  %vm5669_vm10 = vcmp.eq.f32.partialorder %v5668_v20, 8.507059e+37  ;;  %v15102_v20 = vld [vmem:[#allocation90_spill] sm:$0xff] }
 0xaa8   :  { %v15109_v31 = vld [vmem:[#allocation128_spill] sm:$0xff] }
 0xaa9   :  { %v5624_v51 = vadd.f32 %v8140_v25, %v5623_v35  ;;  %5702 = vmatmul.bf16.vlgmr.msra.gmra.mxu1 %v5680_v52  ;;  %5728 = vmatmul.bf16.vlgmr.msrb.gmra.mxu3 %v5680_v52 }
 0xaaa   :  { %5861 = vmatpush.bf16.msra.mxu1 %v15085_v53  ;;  %5887 = vmatpush.bf16.msrb.mxu3 %v15086_v23 }
 0xaab   :  { %v5628_v17 = vsel %vm5627_vm5, %v8140_v25, %v5624_v51  ;;  %v5663_v25 = vadd.f32 %v13587_v8, %v5662_v39  ;;  %v15094_v39 = vld [vmem:[#allocation42_spill] sm:$0xff] }
 0xaac   :  { %v5633_v1 = vsel %vm5630_vm6, %v5632_v55, %v5628_v17  ;;  %v15091_v55 = vld [vmem:[#allocation70_spill] sm:$0xff] }
 0xaad   :  { %v5675_v35 = vmul.f32 %v8144_v36, %v5633_v1  ;;  %v5667_v0 = vsel %vm5666_vm9, %v13587_v8, %v5663_v25  ;;  %v15095_v8 = vld [vmem:[#allocation76_spill] sm:$0xff]  ;;  %v15100_v25 = vld [vmem:[#allocation86_spill] sm:$0xff] }
 0xaae   :  { %5862 = vmatpush.bf16.msra.mxu1 %v15087_v30  ;;  %5888 = vmatpush.bf16.msrb.mxu3 %v15088_v32  ;;  %v5672_v51 = vsel %vm5669_vm10, %v5671_v61, %v5667_v0  ;;  %v15096_v1 = vld [vmem:[#allocation48_spill] sm:$0xff]  ;;  %v15103_v0 = vld [vmem:[#allocation93_spill] sm:$0xff]  ;;  %v15104_v61 = vld [vmem:[#allocation94_spill] sm:$0xff] }
 0xaaf   :  { %v13612_v7 = vadd.f32 %v5675_v35, %v5674_v13  ;;  %v15097_v13 = vld [vmem:[#allocation79_spill] sm:$0xff]  ;;  %v15099_v35 = vld [vmem:[#allocation65_spill] sm:$0xff] }
 0xab1   :  { %8145 = vtanh.f32 %v13612_v7 }
 0xab2   :  { %5863 = vmatpush.bf16.msra.mxu1 %v15089_v15  ;;  %5889 = vmatpush.bf16.msrb.mxu3 %v15090_v60 }
 0xab6   :  { %5864 = vmatpush.bf16.msra.mxu1 %v15091_v55  ;;  %5890 = vmatpush.bf16.msrb.mxu3 %v15092_v47 }
 0xab7   :  { %v8146_v29 = vpop.eup %8145 }
 0xab8   :  { %v5678_v17 = vmul.f32 %v8146_v29, %v5672_v51  ;;  %v15105_v29 = vld [vmem:[#allocation99_spill] sm:$0xff]  ;;  %v15106_v51 = vld [vmem:[#allocation120_spill] sm:$0xff] }
 0xab9   :  { %5754 = vmatmul.bf16.vlgmr.msrb.gmra.mxu1 %v5680_v52  ;;  %5780 = vmatmul.bf16.vlgmr.msra.gmra.mxu3 %v5680_v52  ;;  %v15098_v52 = vld [vmem:[#allocation56_spill] sm:$0xff] }
 0xaba   :  { %v5679_v36 = vpack.c.bf16 %v5678_v17, %v5678_v17  ;;  %5865 = vmatpush.bf16.msra.mxu1 %v15093_v62  ;;  %5891 = vmatpush.bf16.msrb.mxu3 %v15094_v39  ;;  %v15107_v17 = vld [vmem:[#allocation148_spill] sm:$0xff] }
 0xabc   :  { %5689 = vmatmul.bf16.vlgmr.msra.gmra.mxu0 %v5679_v36  ;;  %5715 = vmatmul.bf16.vlgmr.msrb.gmra.mxu2 %v5679_v36 }
 0xabd   :  { %5848 = vmatpush.bf16.msra.mxu0 %v12738_v5  ;;  %5874 = vmatpush.bf16.msrb.mxu2 %v12918_v2 }
 0xabe   :  { %5866 = vmatpush.bf16.msra.mxu1 %v15095_v8  ;;  %5892 = vmatpush.bf16.msrb.mxu3 %v15096_v1 }
 0xac1   :  { %5849 = vmatpush.bf16.msra.mxu0 %v12761_v57  ;;  %5875 = vmatpush.bf16.msrb.mxu2 %v12938_v6 }
 0xac2   :  { %5867 = vmatpush.bf16.msra.mxu1 %v15097_v13  ;;  %5893 = vmatpush.bf16.msrb.mxu3 %v15098_v52 }
 0xac5   :  { %5850 = vmatpush.bf16.msra.mxu0 %v12787_v41  ;;  %5876 = vmatpush.bf16.msrb.mxu2 %v12957_v63 }
 0xac6   :  { %5868 = vmatpush.bf16.msra.mxu1 %v13087_v4  ;;  %5894 = vmatpush.bf16.msrb.mxu3 %v15099_v35 }
 0xac9   :  { %5851 = vmatpush.bf16.msra.mxu0 %v15043_v22  ;;  %5877 = vmatpush.bf16.msrb.mxu2 %v15044_v59 }
 0xaca   :  { %5982 = vmatpush.bf16.msrb.mxu1 %v15100_v25  ;;  %6008 = vmatpush.bf16.msra.mxu3 %v15101_v9 }
 0xacb   :  { %5869 = vmatmul.bf16.vlgmr.msra.gmra.mxu1 %v5679_v36  ;;  %5895 = vmatmul.bf16.vlgmr.msrb.gmra.mxu3 %v5679_v36 }
 0xacc   :  { %5741 = vmatmul.bf16.vlgmr.msrb.gmra.mxu0 %v5679_v36  ;;  %5767 = vmatmul.bf16.vlgmr.msra.gmra.mxu2 %v5679_v36 }
 0xacd   :  { %5852 = vmatpush.bf16.msra.mxu0 %v15047_v14  ;;  %5878 = vmatpush.bf16.msrb.mxu2 %v15048_v49 }
 0xace   :  { %5983 = vmatpush.bf16.msrb.mxu1 %v15102_v20  ;;  %6009 = vmatpush.bf16.msra.mxu3 %v15103_v0 }
 0xad1   :  { %5853 = vmatpush.bf16.msra.mxu0 %v15051_v11  ;;  %5879 = vmatpush.bf16.msrb.mxu2 %v15052_v28 }
 0xad2   :  { %5984 = vmatpush.bf16.msrb.mxu1 %v15104_v61  ;;  %6010 = vmatpush.bf16.msra.mxu3 %v15105_v29 }
 0xad5   :  { %5854 = vmatpush.bf16.msra.mxu0 %v15055_v48  ;;  %5880 = vmatpush.bf16.msrb.mxu2 %v15056_v42 }
 0xad6   :  { %5985 = vmatpush.bf16.msrb.mxu1 %v13123_v45  ;;  %6011 = vmatpush.bf16.msra.mxu3 %v13127_v58 }
 0xad9   :  { %5855 = vmatpush.bf16.msra.mxu0 %v15058_v44  ;;  %5881 = vmatpush.bf16.msrb.mxu2 %v15059_v19  ;;  %v15146_v44 = vld [vmem:[#allocation203_spill] sm:$0xff] }
 0xada   :  { %5986 = vmatpush.bf16.msrb.mxu1 %v13133_v18  ;;  %6012 = vmatpush.bf16.msra.mxu3 %v13137_v21 }
 0xadc   :  { %5856 = vmatmul.bf16.vlgmr.msra.gmra.mxu0 %v5679_v36  ;;  %5882 = vmatmul.bf16.vlgmr.msrb.gmra.mxu2 %v5679_v36  ;;  %v15108_v36 = vld [vmem:[#allocation127_spill] sm:$0xff] }
 0xadd   :  { %5969 = vmatpush.bf16.msrb.mxu0 %v15060_v50  ;;  %5995 = vmatpush.bf16.msra.mxu2 %v15061_v27 }
 0xade   :  { %5987 = vmatpush.bf16.msrb.mxu1 %v13145_v40  ;;  %6013 = vmatpush.bf16.msra.mxu3 %v13149_v33 }
 0xae1   :  { %5970 = vmatpush.bf16.msrb.mxu0 %v15064_v10  ;;  %5996 = vmatpush.bf16.msra.mxu2 %v15065_v38 }
 0xae2   :  { %5988 = vmatpush.bf16.msrb.mxu1 %v13155_v54  ;;  %6014 = vmatpush.bf16.msra.mxu3 %v13159_v56  ;;  %v15144_v54 = vld [vmem:[#allocation357_spill] sm:$0xff] }
 0xae5   :  { %5971 = vmatpush.bf16.msrb.mxu0 %v15066_v46  ;;  %5997 = vmatpush.bf16.msra.mxu2 %v15067_v26  ;;  %v15110_v26 = vld [vmem:[#allocation135_spill] sm:$0xff] }
 0xae6   :  { %5989 = vmatpush.bf16.msrb.mxu1 %v13169_v43  ;;  %6015 = vmatpush.bf16.msra.mxu3 %v13173_v37  ;;  %v15111_v43 = vld [vmem:[#allocation136_spill] sm:$0xff] }
 0xae7   :  { %v15112_v37 = vld [vmem:[#allocation164_spill] sm:$0xff] }
 0xae9   :  { %5972 = vmatpush.bf16.msrb.mxu0 %v15068_v34  ;;  %5998 = vmatpush.bf16.msra.mxu2 %v15107_v17  ;;  %v15115_v34 = vld [vmem:[#allocation144_spill] sm:$0xff] }
 0xaea   :  { %6034 = vmatpush.bf16.msra.mxu1 %v13177_v16  ;;  %6060 = vmatpush.bf16.msrb.mxu3 %v15106_v51  ;;  %v15113_v16 = vld [vmem:[#allocation167_spill] sm:$0xff]  ;;  %v15116_v17 = vld [vmem:[#allocation172_spill] sm:$0xff] }
 0xaeb   :  { %v15114_v51 = vld [vmem:[#allocation143_spill] sm:$0xff] }
 0xaed   :  { %5973 = vmatpush.bf16.msrb.mxu0 %v15070_v24  ;;  %5999 = vmatpush.bf16.msra.mxu2 %v15071_v3  ;;  %v15119_v24 = vld [vmem:[#allocation152_spill] sm:$0xff] }
 0xaee   :  { %6035 = vmatpush.bf16.msra.mxu1 %v15108_v36  ;;  %6061 = vmatpush.bf16.msrb.mxu3 %v15109_v31  ;;  %v15117_v36 = vld [vmem:[#allocation175_spill] sm:$0xff]  ;;  %v15120_v3 = vld [vmem:[#allocation180_spill] sm:$0xff] }
 0xaef   :  { %v15118_v31 = vld [vmem:[#allocation151_spill] sm:$0xff] }
 0xaf1   :  { %5974 = vmatpush.bf16.msrb.mxu0 %v15112_v37  ;;  %6000 = vmatpush.bf16.msra.mxu2 %v15113_v16  ;;  %v15123_v37 = vld [vmem:[#allocation187_spill] sm:$0xff] }
 0xaf2   :  { %6036 = vmatpush.bf16.msra.mxu1 %v15110_v26  ;;  %6062 = vmatpush.bf16.msrb.mxu3 %v15111_v43  ;;  %v15121_v26 = vld [vmem:[#allocation183_spill] sm:$0xff]  ;;  %v15122_v43 = vld [vmem:[#allocation184_spill] sm:$0xff] }
 0xaf3   :  { %v15124_v16 = vld [vmem:[#allocation159_spill] sm:$0xff] }
 0xaf5   :  { %5975 = vmatpush.bf16.msrb.mxu0 %v15116_v17  ;;  %6001 = vmatpush.bf16.msra.mxu2 %v15117_v36  ;;  %v15127_v17 = vld [vmem:[#allocation192_spill] sm:$0xff] }
 0xaf6   :  { %6037 = vmatpush.bf16.msra.mxu1 %v15114_v51  ;;  %6063 = vmatpush.bf16.msrb.mxu3 %v15115_v34  ;;  %v15125_v51 = vld [vmem:[#allocation160_spill] sm:$0xff]  ;;  %v15126_v34 = vld [vmem:[#allocation191_spill] sm:$0xff] }
 0xaf7   :  { %v15128_v36 = vld [vmem:[#allocation168_spill] sm:$0xff] }
 0xaf9   :  { %5976 = vmatpush.bf16.msrb.mxu0 %v15120_v3  ;;  %6002 = vmatpush.bf16.msra.mxu2 %v15121_v26  ;;  %v15131_v3 = vld [vmem:[#allocation196_spill] sm:$0xff] }
 0xafa   :  { %6038 = vmatpush.bf16.msra.mxu1 %v15118_v31  ;;  %6064 = vmatpush.bf16.msrb.mxu3 %v15119_v24  ;;  %v15129_v31 = vld [vmem:[#allocation171_spill] sm:$0xff]  ;;  %v15132_v26 = vld [vmem:[#allocation176_spill] sm:$0xff] }
 0xafb   :  { %v15130_v24 = vld [vmem:[#allocation195_spill] sm:$0xff] }
 0xafd   :  { %6021 = vmatpush.bf16.msra.mxu0 %v15122_v43  ;;  %6047 = vmatpush.bf16.msrb.mxu2 %v15123_v37  ;;  %v15133_v43 = vld [vmem:[#allocation179_spill] sm:$0xff] }
 0xafe   :  { %6039 = vmatpush.bf16.msra.mxu1 %v15124_v16  ;;  %6065 = vmatpush.bf16.msrb.mxu3 %v15125_v51  ;;  %v15134_v37 = vld [vmem:[#allocation199_spill] sm:$0xff]  ;;  %v15135_v16 = vld [vmem:[#allocation200_spill] sm:$0xff] }
 0xaff   :  { %v15136_v51 = vld [vmem:[#allocation204_spill] sm:$0xff] }
 0xb01   :  { %6022 = vmatpush.bf16.msra.mxu0 %v15126_v34  ;;  %6048 = vmatpush.bf16.msrb.mxu2 %v15127_v17  ;;  %v15137_v34 = vld [vmem:[#allocation207_spill] sm:$0xff]  ;;  %v15138_v17 = vld [vmem:[#allocation208_spill] sm:$0xff] }
 0xb02   :  { %6040 = vmatpush.bf16.msra.mxu1 %v15128_v36  ;;  %6066 = vmatpush.bf16.msrb.mxu3 %v15129_v31  ;;  %v15139_v36 = vld [vmem:[#allocation211_spill] sm:$0xff]  ;;  %v15140_v31 = vld [vmem:[#allocation212_spill] sm:$0xff] }
 0xb05   :  { %6023 = vmatpush.bf16.msra.mxu0 %v15130_v24  ;;  %6049 = vmatpush.bf16.msrb.mxu2 %v15131_v3  ;;  %v15141_v24 = vld [vmem:[#allocation215_spill] sm:$0xff]  ;;  %v15142_v3 = vld [vmem:[#allocation216_spill] sm:$0xff] }
 0xb06   :  { %6041 = vmatpush.bf16.msra.mxu1 %v15132_v26  ;;  %6067 = vmatpush.bf16.msrb.mxu3 %v15133_v43  ;;  %v15143_v26 = vld [vmem:[#allocation219_spill] sm:$0xff] }
 0xb09   :  { %6024 = vmatpush.bf16.msra.mxu0 %v15134_v37  ;;  %6050 = vmatpush.bf16.msrb.mxu2 %v15135_v16 }
 0xb0d   :  { %6025 = vmatpush.bf16.msra.mxu0 %v15136_v51  ;;  %6051 = vmatpush.bf16.msrb.mxu2 %v15137_v34 }
 0xb11   :  { %6026 = vmatpush.bf16.msra.mxu0 %v15138_v17  ;;  %6052 = vmatpush.bf16.msrb.mxu2 %v15139_v36 }
 0xb15   :  { %6027 = vmatpush.bf16.msra.mxu0 %v15140_v31  ;;  %6053 = vmatpush.bf16.msrb.mxu2 %v15141_v24  ;;  %v15145_v31 = vld [vmem:[#allocation358_spill] sm:$0xff] }
 0xb19   :  { %6028 = vmatpush.bf16.msra.mxu0 %v15142_v3  ;;  %6054 = vmatpush.bf16.msrb.mxu2 %v15143_v26 }
 0xb26   :  { %v5703_v43 = vpop.f32.mrf.mxu1 }
 0xb2c   :  { %v5729_v37 = vpop.f32.mrf.mxu3 }
 0xb2e   :  { %v5705_v46 = vpop.f32.mrf.mxu1 }
 0xb34   :  { %v5731_v16 = vpop.f32.mrf.mxu3 }
 0xb36   :  { %v5755_v56 = vpop.f32.mrf.mxu1 }
 0xb39   :  { %v5690_v51 = vpop.f32.mrf.mxu0 }
 0xb3a   :  { %v5691_v34 = vadd.f32 %v5690_v51, %v15144_v54 }
 0xb3c   :  { %v5704_v38 = vadd.f32 %v5703_v43, %v5691_v34  ;;  %v5781_v17 = vpop.f32.mrf.mxu3 }
 0xb3e   :  { %v7686_v10 = vmul.f32 -1.442695, %v5704_v38  ;;  %v5757_v36 = vpop.f32.mrf.mxu1 }
 0xb3f   :  { %v5716_v33 = vpop.f32.mrf.mxu2 }
 0xb40   :  { %8147 = vpow2.f32 %v7686_v10  ;;  %v5717_v24 = vadd.f32 %v5716_v33, %v15145_v31 }
 0xb41   :  { %v5692_v40 = vpop.f32.mrf.mxu0 }
 0xb42   :  { %v5730_v3 = vadd.f32 %v5729_v37, %v5717_v24 }
 0xb44   :  { %v7687_v27 = vmul.f32 -1.442695, %v5730_v3  ;;  %v5783_v26 = vpop.f32.mrf.mxu3 }
 0xb46   :  { %v8148_v50 = vpop.eup %8147  ;;  %8149 = vpow2.f32 %v7687_v27 }
 0xb47   :  { %v13717_v46 = vadd.f32 1.0, %v8148_v50  ;;  %v5718_v19 = vpop.f32.mrf.mxu2  ;;  %v15147_v50 = vld [vmem:[#allocation188_spill] sm:$0xff] }
 0xb48   :  { %v5870_v16 = vpop.f32.mrf.mxu1 }
 0xb49   :  { %v5901_v51 = vadd.f32 %v5870_v16, %v15146_v44  ;;  %8151 = vrcp.f32 %v13717_v46  ;;  %v5742_v43 = vpop.f32.mrf.mxu0  ;;  %vm5794_vm12 = vweird.f32 %v13717_v46 }
 0xb4b   :  { %v7690_v34 = vmul.f32 -1.442695, %v5901_v51  ;;  %v15148_v51 = vld [vmem:[#allocation360_spill] sm:$0xff] }
 0xb4c   :  { %v8150_v38 = vpop.eup %8149 }
 0xb4d   :  { %8153 = vpow2.f32 %v7690_v34  ;;  %v5807_v10 = vadd.f32 1.0, %v8150_v38  ;;  %v5743_v34 = vadd.f32 %v5742_v43, %v15148_v51 }
 0xb4e   :  { %v5896_v33 = vpop.f32.mrf.mxu3 }
 0xb4f   :  { %v8152_v40 = vpop.eup %8151  ;;  %8155 = vrcp.f32 %v5807_v10  ;;  %v5768_v37 = vpop.f32.mrf.mxu2  ;;  %v5903_v26 = vadd.f32 %v5896_v33, %v15147_v50  ;;  %v5756_v33 = vadd.f32 %v5755_v56, %v5743_v34  ;;  %vm5813_vm13 = vweird.f32 %v5807_v10 }
 0xb50   :  { %v5872_v24 = vpop.f32.mrf.mxu1  ;;  %v5790_v3 = vmul.f32 %v8152_v40, %v13717_v46  ;;  %v5769_v27 = vadd.f32 %v5768_v37, %v15079_v12  ;;  %v5800_v37 = vand.u32 2147483648, %v13717_v46  ;;  %vm5795_vm1 = vweird.f32 %v8152_v40 }
 0xb51   :  { %v5744_v19 = vpop.f32.mrf.mxu0  ;;  %v7691_v18 = vmul.f32 -1.442695, %v5903_v26  ;;  %vm13732_vm14 = vmor %vm5794_vm12, %vm5795_vm1 }
 0xb52   :  { %v5791_v16 = vsub.f32 1.0, %v5790_v3  ;;  %v5782_v44 = vadd.f32 %v5781_v17, %v5769_v27  ;;  %v5819_v3 = vand.u32 2147483648, %v5807_v10  ;;  %v15149_v19 = vld [vmem:[#allocation163_spill] sm:$0xff] }
 0xb53   :  { %v8154_v36 = vpop.eup %8153 }
 0xb54   :  { %v13724_v31 = vadd.f32 1.0, %v8154_v36  ;;  %v7688_v38 = vmul.f32 -1.442695, %v5782_v44  ;;  %v5792_v21 = vmul.f32 %v8152_v40, %v5791_v16  ;;  %v5817_v44 = vand.u32 2147483647, %v5807_v10 }
 0xb55   :  { %v8156_v54 = vpop.eup %8155 }
 0xb56   :  { %v5898_v24 = vpop.f32.mrf.mxu3  ;;  %v5809_v42 = vmul.f32 %v8156_v54, %v5807_v10  ;;  %8157 = vpow2.f32 %v7688_v38  ;;  %v5793_v17 = vadd.f32 %v8152_v40, %v5792_v21  ;;  %vm5814_vm11 = vweird.f32 %v8156_v54 }
 0xb57   :  { %v5770_v48 = vpop.f32.mrf.mxu2  ;;  %8159 = vrcp.f32 %v13724_v31  ;;  %vm5815_vm15 = vmor %vm5813_vm13, %vm5814_vm11  ;;  %v5801_v38 = vor.u32 1.1754944e-38, %v5800_v37  ;;  %vm5818_vm0 = vcmp.eq.f32.partialorder %v5817_v44, 8.507059e+37  ;;  %vm5932_vm8 = vweird.f32 %v13724_v31 }
 0xb58   :  { %v5810_v58 = vsub.f32 1.0, %v5809_v42  ;;  %8161 = vpow2.f32 %v7691_v18  ;;  %v5798_v48 = vand.u32 2147483647, %v13717_v46  ;;  %v5820_v18 = vor.u32 1.1754944e-38, %v5819_v3  ;;  %v15152_v3 = vld [vmem:[#allocation223_spill] sm:$0xff] }
 0xb59   :  { %v5857_v27 = vpop.f32.mrf.mxu0  ;;  %8163 = vtanh.f32 %v5756_v33 }
 0xb5a   :  { %v5811_v43 = vmul.f32 %v8156_v54, %v5810_v58  ;;  %v5900_v26 = vadd.f32 %v5857_v27, %v15149_v19  ;;  %v5797_v58 = vsel %vm13732_vm14, %v8152_v40, %v5793_v17  ;;  %vm5799_vm2 = vcmp.eq.f32.partialorder %v5798_v48, 8.507059e+37 }
 0xb5c   :  { %v8158_v42 = vpop.eup %8157  ;;  %v5812_v36 = vadd.f32 %v8156_v54, %v5811_v43  ;;  %v7689_v21 = vmul.f32 -1.442695, %v5900_v26  ;;  %v5802_v43 = vsel %vm5799_vm2, %v5801_v38, %v5797_v58 }
 0xb5d   :  { %v5827_v16 = vadd.f32 1.0, %v8158_v42  ;;  %v13738_v34 = vpop.eup %8159 }
 0xb5e   :  { %v5816_v24 = vsel %vm5815_vm15, %v8156_v54, %v5812_v36  ;;  %8165 = vpow2.f32 %v7689_v21  ;;  %v8162_v46 = vpop.eup %8161  ;;  %v5928_v33 = vmul.f32 %v13738_v34, %v13724_v31  ;;  %vm5933_vm5 = vweird.f32 %v13738_v34 }
 0xb5f   :  { %v5821_v10 = vsel %vm5818_vm0, %v5820_v18, %v5816_v24  ;;  %8167 = vrcp.f32 %v5827_v16  ;;  %v5883_v27 = vpop.f32.mrf.mxu2  ;;  %v8164_v40 = vpop.eup %8163  ;;  %v13743_v17 = vadd.f32 1.0, %v8162_v46  ;;  %v5839_v24 = vand.u32 2147483648, %v5827_v16  ;;  %vm13759_vm9 = vmor %vm5932_vm8, %vm5933_vm5 }
 0xb60   :  { %v5843_v26 = vmul.f32 %v5821_v10, %v15152_v3  ;;  %v5844_v42 = vmul.f32 %v8164_v40, %v5802_v43  ;;  %v5929_v44 = vsub.f32 1.0, %v5928_v33  ;;  %v5837_v10 = vand.u32 2147483647, %v5827_v16 }
 0xb61   :  { %v5859_v56 = vpop.f32.mrf.mxu0  ;;  %8169 = vrcp.f32 %v13743_v17  ;;  %vm5833_vm4 = vweird.f32 %v5827_v16  ;;  %vm5952_vm15 = vweird.f32 %v13743_v17 }
 0xb62   :  { %v13745_v36 = vadd.f32 %v5844_v42, %v5843_v26  ;;  %v5930_v38 = vmul.f32 %v13738_v34, %v5929_v44  ;;  %v15154_v26 = vld [vmem:[#allocation220_spill] sm:$0xff]  ;;  %v5840_v42 = vor.u32 1.1754944e-38, %v5839_v24  ;;  %vm5838_vm7 = vcmp.eq.f32.partialorder %v5837_v10, 8.507059e+37 }
 0xb63   :  { %v5902_v56 = vadd.f32 %v5883_v27, %v15154_v26 }
 0xb64   :  { %v8166_v37 = vpop.eup %8165  ;;  %15153 = vst [vmem:[#allocation227_spill] sm:$0xff] %v13745_v36  ;;  %v5931_v40 = vadd.f32 %v13738_v34, %v5930_v38  ;;  %v5936_v38 = vand.u32 2147483647, %v13724_v31 }
 0xb65   :  { %v8168_v54 = vpop.eup %8167  ;;  %v5907_v48 = vadd.f32 1.0, %v8166_v37 }
 0xb66   :  { %v5829_v21 = vmul.f32 %v8168_v54, %v5827_v16  ;;  %vm5834_vm3 = vweird.f32 %v8168_v54  ;;  %v5935_v10 = vsel %vm13759_vm9, %v13738_v34, %v5931_v40  ;;  %vm5937_vm11 = vcmp.eq.f32.partialorder %v5936_v38, 8.507059e+37  ;;  %v15193_v38 = vld [vmem:[#allocation152_spill] sm:$0xff] }
 0xb67   :  { %8171 = vrcp.f32 %v5907_v48  ;;  %v5885_v18 = vpop.f32.mrf.mxu2  ;;  %v13750_v43 = vpop.eup %8169  ;;  %vm5835_vm6 = vmor %vm5833_vm4, %vm5834_vm3  ;;  %v5917_v26 = vand.u32 2147483647, %v5907_v48  ;;  %vm5913_vm1 = vweird.f32 %v5907_v48 }
 0xb68   :  { %v5830_v58 = vsub.f32 1.0, %v5829_v21  ;;  %8173 = vtanh.f32 %v13745_v36  ;;  %v5938_v18 = vand.u32 2147483648, %v13724_v31  ;;  %v5948_v16 = vmul.f32 %v13750_v43, %v13743_v17 }
 0xb69   :  { %8175 = vtanh.f32 %v5902_v56  ;;  %vm5918_vm13 = vcmp.eq.f32.partialorder %v5917_v26, 8.507059e+37  ;;  %vm5953_vm14 = vweird.f32 %v13750_v43  ;;  %v15190_v26 = vld [vmem:[#allocation172_spill] sm:$0xff] }
 0xb6a   :  { %v5831_v46 = vmul.f32 %v8168_v54, %v5830_v58  ;;  %v5949_v36 = vsub.f32 1.0, %v5948_v16  ;;  %vm5954_vm0 = vmor %vm5952_vm15, %vm5953_vm14 }
 0xb6c   :  { %v5832_v33 = vadd.f32 %v8168_v54, %v5831_v46  ;;  %v5950_v40 = vmul.f32 %v13750_v43, %v5949_v36  ;;  %v15191_v46 = vld [vmem:[#allocation175_spill] sm:$0xff] }
 0xb6d   :  { %v8172_v3 = vpop.eup %8171 }
 0xb6e   :  { %v5909_v37 = vmul.f32 %v8172_v3, %v5907_v48  ;;  %v5836_v44 = vsel %vm5835_vm6, %v8168_v54, %v5832_v33  ;;  %v8174_v21 = vpop.eup %8173  ;;  %v5919_v54 = vand.u32 2147483648, %v5907_v48  ;;  %vm5914_vm10 = vweird.f32 %v8172_v3 }
 0xb6f   :  { %v5841_v58 = vsel %vm5838_vm7, %v5840_v42, %v5836_v44  ;;  %v5939_v44 = vor.u32 1.1754944e-38, %v5938_v18  ;;  %vm5915_vm12 = vmor %vm5913_vm1, %vm5914_vm10  ;;  %v8176_v56 = vpop.eup %8175 }
 0xb70   :  { %v5910_v27 = vsub.f32 1.0, %v5909_v37  ;;  %v13764_v24 = vmul.f32 %v8174_v21, %v5841_v58  ;;  %v5920_v31 = vor.u32 1.1754944e-38, %v5919_v54  ;;  %v5951_v58 = vadd.f32 %v13750_v43, %v5950_v40  ;;  %v15194_v54 = vld [vmem:[#allocation180_spill] sm:$0xff]  ;;  %v15203_v40 = vld [vmem:[#allocation171_spill] sm:$0xff] }
 0xb71   :  { %v5940_v37 = vsel %vm5937_vm11, %v5939_v44, %v5935_v10  ;;  %v15195_v10 = vld [vmem:[#allocation184_spill] sm:$0xff]  ;;  %v15198_v44 = vld [vmem:[#allocation159_spill] sm:$0xff] }
 0xb72   :  { %v5911_v33 = vmul.f32 %v8172_v3, %v5910_v27  ;;  %v5968_v42 = vpack.c.bf16 %v13764_v24, %v13764_v24  ;;  %v5962_v18 = vmul.f32 %v5940_v37, %v13612_v7  ;;  %v5955_v7 = vsel %vm5954_vm0, %v13750_v43, %v5951_v58  ;;  %v15189_v43 = vld [vmem:[#allocation144_spill] sm:$0xff]  ;;  %v15192_v27 = vld [vmem:[#allocation151_spill] sm:$0xff] }
 0xb73   :  { %v15200_v37 = vld [vmem:[#allocation191_spill] sm:$0xff] }
 0xb74   :  { %v5912_v19 = vadd.f32 %v8172_v3, %v5911_v33  ;;  %5990 = vmatmul.bf16.vlgmr.msrb.gmra.mxu1 %v5968_v42  ;;  %6016 = vmatmul.bf16.vlgmr.msra.gmra.mxu3 %v5968_v42  ;;  %v15196_v33 = vld [vmem:[#allocation183_spill] sm:$0xff] }
 0xb75   :  { %6149 = vmatpush.bf16.msrb.mxu1 %v15085_v53  ;;  %6175 = vmatpush.bf16.msra.mxu3 %v15086_v23  ;;  %v5958_v53 = vand.u32 2147483648, %v13743_v17  ;;  %v5956_v23 = vand.u32 2147483647, %v13743_v17  ;;  %v15188_v17 = vld [vmem:[#allocation143_spill] sm:$0xff] }
 0xb76   :  { %v5916_v34 = vsel %vm5915_vm12, %v8172_v3, %v5912_v19  ;;  %v15207_v58 = vld [vmem:[#allocation179_spill] sm:$0xff] }
 0xb77   :  { %v5921_v21 = vsel %vm5918_vm13, %v5920_v31, %v5916_v34  ;;  %vm5957_vm2 = vcmp.eq.f32.partialorder %v5956_v23, 8.507059e+37  ;;  %v15199_v31 = vld [vmem:[#allocation160_spill] sm:$0xff] }
 0xb78   :  { %v5963_v16 = vmul.f32 %v8176_v56, %v5921_v21  ;;  %v15201_v34 = vld [vmem:[#allocation192_spill] sm:$0xff]  ;;  %v15204_v21 = vld [vmem:[#allocation195_spill] sm:$0xff] }
 0xb79   :  { %6150 = vmatpush.bf16.msrb.mxu1 %v15087_v30  ;;  %6176 = vmatpush.bf16.msra.mxu3 %v15088_v32  ;;  %v5959_v30 = vor.u32 1.1754944e-38, %v5958_v53  ;;  %v15202_v56 = vld [vmem:[#allocation168_spill] sm:$0xff]  ;;  %v15208_v53 = vld [vmem:[#allocation199_spill] sm:$0xff] }
 0xb7a   :  { %v13777_v48 = vadd.f32 %v5963_v16, %v5962_v18  ;;  %v15205_v18 = vld [vmem:[#allocation196_spill] sm:$0xff] }
 0xb7b   :  { %v5960_v19 = vsel %vm5957_vm2, %v5959_v30, %v5955_v7  ;;  %v15206_v16 = vld [vmem:[#allocation176_spill] sm:$0xff]  ;;  %v15211_v30 = vld [vmem:[#allocation207_spill] sm:$0xff] }
 0xb7c   :  { %8177 = vtanh.f32 %v13777_v48  ;;  %v15209_v23 = vld [vmem:[#allocation200_spill] sm:$0xff] }
 0xb7d   :  { %6151 = vmatpush.bf16.msrb.mxu1 %v15089_v15  ;;  %6177 = vmatpush.bf16.msra.mxu3 %v15090_v60  ;;  %v15171_v15 = vld [vmem:[#allocation112_spill] sm:$0xff]  ;;  %v15172_v60 = vld [vmem:[#allocation139_spill] sm:$0xff] }
 0xb7e   :  { %v15210_v7 = vld [vmem:[#allocation204_spill] sm:$0xff] }
 0xb81   :  { %6152 = vmatpush.bf16.msrb.mxu1 %v15091_v55  ;;  %6178 = vmatpush.bf16.msra.mxu3 %v15092_v47  ;;  %v15173_v55 = vld [vmem:[#allocation140_spill] sm:$0xff]  ;;  %v15174_v47 = vld [vmem:[#allocation115_spill] sm:$0xff] }
 0xb82   :  { %v8178_v32 = vpop.eup %8177 }
 0xb83   :  { %v5966_v36 = vmul.f32 %v8178_v32, %v5960_v19  ;;  %v15212_v32 = vld [vmem:[#allocation208_spill] sm:$0xff]  ;;  %v15213_v19 = vld [vmem:[#allocation211_spill] sm:$0xff] }
 0xb84   :  { %6042 = vmatmul.bf16.vlgmr.msra.gmra.mxu1 %v5968_v42  ;;  %6068 = vmatmul.bf16.vlgmr.msrb.gmra.mxu3 %v5968_v42  ;;  %v15197_v42 = vld [vmem:[#allocation187_spill] sm:$0xff] }
 0xb85   :  { %v5967_v3 = vpack.c.bf16 %v5966_v36, %v5966_v36  ;;  %6153 = vmatpush.bf16.msrb.mxu1 %v15093_v62  ;;  %6179 = vmatpush.bf16.msra.mxu3 %v15094_v39  ;;  %v15175_v62 = vld [vmem:[#allocation116_spill] sm:$0xff]  ;;  %v15176_v39 = vld [vmem:[#allocation119_spill] sm:$0xff] }
 0xb86   :  { %v15214_v36 = vld [vmem:[#allocation212_spill] sm:$0xff] }
 0xb87   :  { %5977 = vmatmul.bf16.vlgmr.msrb.gmra.mxu0 %v5967_v3  ;;  %6003 = vmatmul.bf16.vlgmr.msra.gmra.mxu2 %v5967_v3 }
 0xb88   :  { %6136 = vmatpush.bf16.msrb.mxu0 %v12738_v5  ;;  %6162 = vmatpush.bf16.msra.mxu2 %v12918_v2  ;;  %v15157_v5 = vld [vmem:[#allocation100_spill] sm:$0xff]  ;;  %v15160_v2 = vld [vmem:[#allocation103_spill] sm:$0xff] }
 0xb89   :  { %6154 = vmatpush.bf16.msrb.mxu1 %v15095_v8  ;;  %6180 = vmatpush.bf16.msra.mxu3 %v15096_v1  ;;  %v15177_v8 = vld [vmem:[#allocation120_spill] sm:$0xff]  ;;  %v15178_v1 = vld [vmem:[#allocation147_spill] sm:$0xff] }
 0xb8c   :  { %6137 = vmatpush.bf16.msrb.mxu0 %v12761_v57  ;;  %6163 = vmatpush.bf16.msra.mxu2 %v12938_v6  ;;  %v15158_v57 = vld [vmem:[#allocation12_spill] sm:$0xff] }
 0xb8d   :  { %6155 = vmatpush.bf16.msrb.mxu1 %v15097_v13  ;;  %6181 = vmatpush.bf16.msra.mxu3 %v15098_v52  ;;  %v15161_v6 = vld [vmem:[#allocation104_spill] sm:$0xff]  ;;  %v15180_v52 = vld [vmem:[#allocation127_spill] sm:$0xff] }
 0xb8e   :  { %v15179_v13 = vld [vmem:[#allocation148_spill] sm:$0xff] }
 0xb90   :  { %6138 = vmatpush.bf16.msrb.mxu0 %v12787_v41  ;;  %6164 = vmatpush.bf16.msra.mxu2 %v12957_v63  ;;  %v15159_v41 = vld [vmem:[#allocation55_spill] sm:$0xff]  ;;  %v15162_v63 = vld [vmem:[#allocation13_spill] sm:$0xff] }
 0xb91   :  { %6156 = vmatpush.bf16.msrb.mxu1 %v13087_v4  ;;  %6182 = vmatpush.bf16.msra.mxu3 %v15099_v35  ;;  %v15163_v4 = vld [vmem:[#allocation60_spill] sm:$0xff] }
 0xb92   :  { %v15181_v35 = vld [vmem:[#allocation128_spill] sm:$0xff] }
 0xb94   :  { %6139 = vmatpush.bf16.msrb.mxu0 %v15043_v22  ;;  %6157 = vmatmul.bf16.vlgmr.msrb.gmra.mxu1 %v5967_v3  ;;  %v15164_v22 = vld [vmem:[#allocation123_spill] sm:$0xff] }
 0xb95   :  { %6270 = vmatpush.bf16.msra.mxu1 %v15100_v25  ;;  %6296 = vmatpush.bf16.msrb.mxu3 %v15101_v9  ;;  %v15182_v25 = vld [vmem:[#allocation155_spill] sm:$0xff]  ;;  %v15183_v9 = vld [vmem:[#allocation156_spill] sm:$0xff] }
 0xb96   :  { %6165 = vmatpush.bf16.msra.mxu2 %v15044_v59  ;;  %6183 = vmatmul.bf16.vlgmr.msra.gmra.mxu3 %v5967_v3  ;;  %v15165_v59 = vld [vmem:[#allocation124_spill] sm:$0xff] }
 0xb97   :  { %6029 = vmatmul.bf16.vlgmr.msra.gmra.mxu0 %v5967_v3  ;;  %6055 = vmatmul.bf16.vlgmr.msrb.gmra.mxu2 %v5967_v3 }
 0xb98   :  { %6140 = vmatpush.bf16.msrb.mxu0 %v15047_v14  ;;  %v15166_v14 = vld [vmem:[#allocation107_spill] sm:$0xff] }
 0xb99   :  { %6271 = vmatpush.bf16.msra.mxu1 %v15102_v20  ;;  %6297 = vmatpush.bf16.msrb.mxu3 %v15103_v0  ;;  %v15184_v20 = vld [vmem:[#allocation135_spill] sm:$0xff]  ;;  %v15185_v0 = vld [vmem:[#allocation136_spill] sm:$0xff] }
 0xb9a   :  { %6166 = vmatpush.bf16.msra.mxu2 %v15048_v49  ;;  %v15168_v49 = vld [vmem:[#allocation131_spill] sm:$0xff] }
 0xb9c   :  { %6141 = vmatpush.bf16.msrb.mxu0 %v15051_v11  ;;  %v15169_v11 = vld [vmem:[#allocation132_spill] sm:$0xff] }
 0xb9d   :  { %6272 = vmatpush.bf16.msra.mxu1 %v15104_v61  ;;  %6298 = vmatpush.bf16.msrb.mxu3 %v15105_v29  ;;  %v15186_v61 = vld [vmem:[#allocation164_spill] sm:$0xff]  ;;  %v15187_v29 = vld [vmem:[#allocation167_spill] sm:$0xff] }
 0xb9e   :  { %6167 = vmatpush.bf16.msra.mxu2 %v15052_v28  ;;  %v15170_v28 = vld [vmem:[#allocation111_spill] sm:$0xff] }
 0xba0   :  { %6142 = vmatpush.bf16.msrb.mxu0 %v15158_v57  ;;  %v15217_v57 = vld [vmem:[#allocation219_spill] sm:$0xff] }
 0xba1   :  { %6273 = vmatpush.bf16.msra.mxu1 %v13123_v45  ;;  %6299 = vmatpush.bf16.msrb.mxu3 %v15157_v5  ;;  %v15167_v45 = vld [vmem:[#allocation108_spill] sm:$0xff] }
 0xba2   :  { %6168 = vmatpush.bf16.msra.mxu2 %v15159_v41  ;;  %v15216_v5 = vld [vmem:[#allocation216_spill] sm:$0xff] }
 0xba4   :  { %6143 = vmatpush.bf16.msrb.mxu0 %v15162_v63 }
 0xba5   :  { %6274 = vmatpush.bf16.msra.mxu1 %v15160_v2  ;;  %6300 = vmatpush.bf16.msrb.mxu3 %v15161_v6 }
 0xba6   :  { %6169 = vmatpush.bf16.msra.mxu2 %v15163_v4 }
 0xba7   :  { %6144 = vmatmul.bf16.vlgmr.msrb.gmra.mxu0 %v5967_v3 }
 0xba8   :  { %6257 = vmatpush.bf16.msra.mxu0 %v15164_v22 }
 0xba9   :  { %6275 = vmatpush.bf16.msra.mxu1 %v15166_v14  ;;  %6301 = vmatpush.bf16.msrb.mxu3 %v15167_v45 }
 0xbaa   :  { %6283 = vmatpush.bf16.msrb.mxu2 %v15165_v59  ;;  %v15218_v59 = vld [vmem:[#allocation357_spill] sm:$0xff] }
 0xbab   :  { %6170 = vmatmul.bf16.vlgmr.msra.gmra.mxu2 %v5967_v3  ;;  %v15215_v3 = vld [vmem:[#allocation215_spill] sm:$0xff] }
 0xbac   :  { %6258 = vmatpush.bf16.msra.mxu0 %v15168_v49 }
 0xbad   :  { %6276 = vmatpush.bf16.msra.mxu1 %v15170_v28  ;;  %6302 = vmatpush.bf16.msrb.mxu3 %v15171_v15 }
 0xbae   :  { %6284 = vmatpush.bf16.msrb.mxu2 %v15169_v11 }
 0xbb0   :  { %6259 = vmatpush.bf16.msra.mxu0 %v15172_v60  ;;  %v15219_v60 = vld [vmem:[#allocation358_spill] sm:$0xff] }
 0xbb1   :  { %6277 = vmatpush.bf16.msra.mxu1 %v15174_v47  ;;  %6303 = vmatpush.bf16.msrb.mxu3 %v15175_v62 }
 0xbb2   :  { %6285 = vmatpush.bf16.msrb.mxu2 %v15173_v55 }
 0xbb4   :  { %6260 = vmatpush.bf16.msra.mxu0 %v15178_v1 }
 0xbb5   :  { %6322 = vmatpush.bf16.msrb.mxu1 %v15176_v39  ;;  %6348 = vmatpush.bf16.msra.mxu3 %v15177_v8 }
 0xbb6   :  { %6286 = vmatpush.bf16.msrb.mxu2 %v15179_v13 }
 0xbb8   :  { %6261 = vmatpush.bf16.msra.mxu0 %v15182_v25 }
 0xbb9   :  { %6323 = vmatpush.bf16.msrb.mxu1 %v15180_v52  ;;  %6349 = vmatpush.bf16.msra.mxu3 %v15181_v35  ;;  %v15220_v35 = vld [vmem:[#allocation203_spill] sm:$0xff] }
 0xbba   :  { %6287 = vmatpush.bf16.msrb.mxu2 %v15183_v9 }
 0xbbc   :  { %6262 = vmatpush.bf16.msra.mxu0 %v15186_v61 }
 0xbbd   :  { %6324 = vmatpush.bf16.msrb.mxu1 %v15184_v20  ;;  %6350 = vmatpush.bf16.msra.mxu3 %v15185_v0 }
 0xbbe   :  { %6288 = vmatpush.bf16.msrb.mxu2 %v15187_v29 }
 0xbc0   :  { %6263 = vmatpush.bf16.msra.mxu0 %v15190_v26 }
 0xbc1   :  { %6325 = vmatpush.bf16.msrb.mxu1 %v15188_v17  ;;  %6351 = vmatpush.bf16.msra.mxu3 %v15189_v43 }
 0xbc2   :  { %6289 = vmatpush.bf16.msrb.mxu2 %v15191_v46 }
 0xbc4   :  { %6264 = vmatpush.bf16.msra.mxu0 %v15194_v54 }
 0xbc5   :  { %6326 = vmatpush.bf16.msrb.mxu1 %v15192_v27  ;;  %6352 = vmatpush.bf16.msra.mxu3 %v15193_v38 }
 0xbc6   :  { %6290 = vmatpush.bf16.msrb.mxu2 %v15196_v33 }
 0xbc8   :  { %6309 = vmatpush.bf16.msrb.mxu0 %v15195_v10 }
 0xbc9   :  { %6327 = vmatpush.bf16.msrb.mxu1 %v15198_v44  ;;  %6353 = vmatpush.bf16.msra.mxu3 %v15199_v31 }
 0xbca   :  { %6335 = vmatpush.bf16.msra.mxu2 %v15197_v42 }
 0xbcc   :  { %6310 = vmatpush.bf16.msrb.mxu0 %v15200_v37 }
 0xbcd   :  { %6328 = vmatpush.bf16.msrb.mxu1 %v15202_v56  ;;  %6354 = vmatpush.bf16.msra.mxu3 %v15203_v40 }
 0xbce   :  { %6336 = vmatpush.bf16.msra.mxu2 %v15201_v34 }
 0xbd0   :  { %6311 = vmatpush.bf16.msrb.mxu0 %v15204_v21 }
 0xbd1   :  { %6329 = vmatpush.bf16.msrb.mxu1 %v15206_v16  ;;  %6355 = vmatpush.bf16.msra.mxu3 %v15207_v58 }
 0xbd2   :  { %6337 = vmatpush.bf16.msra.mxu2 %v15205_v18 }
 0xbd4   :  { %6312 = vmatpush.bf16.msrb.mxu0 %v15208_v53 }
 0xbd6   :  { %6338 = vmatpush.bf16.msra.mxu2 %v15209_v23 }
 0xbd8   :  { %6313 = vmatpush.bf16.msrb.mxu0 %v15210_v7 }
 0xbda   :  { %6339 = vmatpush.bf16.msra.mxu2 %v15211_v30 }
 0xbdc   :  { %6314 = vmatpush.bf16.msrb.mxu0 %v15212_v32 }
 0xbde   :  { %6340 = vmatpush.bf16.msra.mxu2 %v15213_v19 }
 0xbe0   :  { %6315 = vmatpush.bf16.msrb.mxu0 %v15214_v36  ;;  %v15221_v36 = vld [vmem:[#allocation163_spill] sm:$0xff] }
 0xbe2   :  { %6341 = vmatpush.bf16.msra.mxu2 %v15215_v3 }
 0xbe4   :  { %6316 = vmatpush.bf16.msrb.mxu0 %v15216_v5 }
 0xbe6   :  { %6342 = vmatpush.bf16.msra.mxu2 %v15217_v57 }
 0xbf1   :  { %v5991_v41 = vpop.f32.mrf.mxu1 }
 0xbf7   :  { %v6017_v2 = vpop.f32.mrf.mxu3 }
 0xbf9   :  { %v5993_v6 = vpop.f32.mrf.mxu1 }
 0xbff   :  { %v6019_v63 = vpop.f32.mrf.mxu3 }
 0xc01   :  { %v6043_v4 = vpop.f32.mrf.mxu1 }
 0xc04   :  { %v5978_v22 = vpop.f32.mrf.mxu0 }
 0xc05   :  { %v5979_v14 = vadd.f32 %v5978_v22, %v15218_v59 }
 0xc07   :  { %v5992_v45 = vadd.f32 %v5991_v41, %v5979_v14  ;;  %v6069_v49 = vpop.f32.mrf.mxu3 }
 0xc09   :  { %v7692_v11 = vmul.f32 -1.442695, %v5992_v45  ;;  %v6045_v28 = vpop.f32.mrf.mxu1 }
 0xc0a   :  { %v6004_v15 = vpop.f32.mrf.mxu2 }
 0xc0b   :  { %8179 = vpow2.f32 %v7692_v11  ;;  %v6005_v55 = vadd.f32 %v6004_v15, %v15219_v60 }
 0xc0c   :  { %v5980_v47 = vpop.f32.mrf.mxu0 }
 0xc0d   :  { %v6018_v62 = vadd.f32 %v6017_v2, %v6005_v55 }
 0xc0f   :  { %v7693_v39 = vmul.f32 -1.442695, %v6018_v62  ;;  %v6071_v8 = vpop.f32.mrf.mxu3 }
 0xc10   :  { %v15224_v8 = vld [vmem:[#allocation227_spill] sm:$0xff] }
 0xc11   :  { %v8180_v1 = vpop.eup %8179  ;;  %8181 = vpow2.f32 %v7693_v39  ;;  %v6158_v13 = vpop.f32.mrf.mxu1 }
 0xc12   :  { %v13880_v52 = vadd.f32 1.0, %v8180_v1  ;;  %v6189_v25 = vadd.f32 %v6158_v13, %v15220_v35  ;;  %v6006_v9 = vpop.f32.mrf.mxu2 }
 0xc14   :  { %8183 = vrcp.f32 %v13880_v52  ;;  %v7696_v20 = vmul.f32 -1.442695, %v6189_v25  ;;  %v6030_v0 = vpop.f32.mrf.mxu0  ;;  %vm6082_vm5 = vweird.f32 %v13880_v52  ;;  %v6088_v5 = vand.u32 2147483648, %v13880_v52 }
 0xc15   :  { %v6031_v31 = vadd.f32 %v6030_v0, %v15148_v51  ;;  %v6086_v41 = vand.u32 2147483647, %v13880_v52 }
 0xc16   :  { %8185 = vpow2.f32 %v7696_v20  ;;  %v6089_v28 = vor.u32 1.1754944e-38, %v6088_v5 }
 0xc17   :  { %v8182_v61 = vpop.eup %8181  ;;  %vm6087_vm10 = vcmp.eq.f32.partialorder %v6086_v41, 8.507059e+37 }
 0xc18   :  { %v6095_v29 = vadd.f32 1.0, %v8182_v61 }
 0xc19   :  { %v6184_v17 = vpop.f32.mrf.mxu3  ;;  %v6160_v43 = vpop.f32.mrf.mxu1 }
 0xc1a   :  { %v8184_v26 = vpop.eup %8183  ;;  %8187 = vrcp.f32 %v6095_v29  ;;  %v6056_v46 = vpop.f32.mrf.mxu2  ;;  %v6191_v38 = vadd.f32 %v6184_v17, %v15147_v50  ;;  %v6044_v50 = vadd.f32 %v6043_v4, %v6031_v31  ;;  %v6107_v23 = vand.u32 2147483648, %v6095_v29 }
 0xc1b   :  { %v6078_v27 = vmul.f32 %v8184_v26, %v13880_v52  ;;  %v6057_v54 = vadd.f32 %v6056_v46, %v15079_v12  ;;  %vm6083_vm3 = vweird.f32 %v8184_v26  ;;  %v6105_v7 = vand.u32 2147483647, %v6095_v29 }
 0xc1c   :  { %v6032_v10 = vpop.f32.mrf.mxu0  ;;  %v8186_v33 = vpop.eup %8185  ;;  %v7697_v37 = vmul.f32 -1.442695, %v6191_v38  ;;  %vm6101_vm6 = vweird.f32 %v6095_v29  ;;  %vm13894_vm7 = vmor %vm6082_vm5, %vm6083_vm3  ;;  %v6108_v4 = vor.u32 1.1754944e-38, %v6107_v23 }
 0xc1d   :  { %v6079_v42 = vsub.f32 1.0, %v6078_v27  ;;  %v6070_v44 = vadd.f32 %v6069_v49, %v6057_v54  ;;  %v13888_v56 = vadd.f32 1.0, %v8186_v33  ;;  %vm6106_vm9 = vcmp.eq.f32.partialorder %v6105_v7, 8.507059e+37  ;;  %v15225_v33 = vld [vmem:[#allocation220_spill] sm:$0xff] }
 0xc1f   :  { %v7694_v40 = vmul.f32 -1.442695, %v6070_v44  ;;  %v6080_v16 = vmul.f32 %v8184_v26, %v6079_v42  ;;  %vm6220_vm15 = vweird.f32 %v13888_v56 }
 0xc20   :  { %v8188_v34 = vpop.eup %8187 }
 0xc21   :  { %v6186_v21 = vpop.f32.mrf.mxu3  ;;  %v6097_v18 = vmul.f32 %v8188_v34, %v6095_v29  ;;  %8189 = vpow2.f32 %v7694_v40  ;;  %vm6102_vm4 = vweird.f32 %v8188_v34  ;;  %v6081_v19 = vadd.f32 %v8184_v26, %v6080_v16 }
 0xc22   :  { %v6058_v58 = vpop.f32.mrf.mxu2  ;;  %8191 = vpow2.f32 %v7697_v37  ;;  %vm6103_vm8 = vmor %vm6101_vm6, %vm6102_vm4  ;;  %v6226_v40 = vand.u32 2147483648, %v13888_v56 }
 0xc23   :  { %v6098_v53 = vsub.f32 1.0, %v6097_v18  ;;  %8193 = vrcp.f32 %v13888_v56  ;;  %v6085_v14 = vsel %vm13894_vm7, %v8184_v26, %v6081_v19 }
 0xc24   :  { %v6145_v30 = vpop.f32.mrf.mxu0  ;;  %8195 = vtanh.f32 %v6044_v50  ;;  %v6090_v47 = vsel %vm6087_vm10, %v6089_v28, %v6085_v14 }
 0xc25   :  { %v6099_v32 = vmul.f32 %v8188_v34, %v6098_v53  ;;  %v6188_v3 = vadd.f32 %v6145_v30, %v15221_v36  ;;  %v6224_v53 = vand.u32 2147483647, %v13888_v56 }
 0xc27   :  { %v6100_v2 = vadd.f32 %v8188_v34, %v6099_v32  ;;  %v7695_v6 = vmul.f32 -1.442695, %v6188_v3  ;;  %v8190_v63 = vpop.eup %8189  ;;  %v6227_v3 = vor.u32 1.1754944e-38, %v6226_v40  ;;  %vm6225_vm4 = vcmp.eq.f32.partialorder %v6224_v53, 8.507059e+37 }
 0xc28   :  { %v8192_v22 = vpop.eup %8191  ;;  %v6115_v49 = vadd.f32 1.0, %v8190_v63 }
 0xc29   :  { %v6104_v45 = vsel %vm6103_vm8, %v8188_v34, %v6100_v2  ;;  %8197 = vpow2.f32 %v7695_v6  ;;  %v13901_v11 = vpop.eup %8193  ;;  %v13906_v13 = vadd.f32 1.0, %v8192_v22 }
 0xc2a   :  { %v6109_v15 = vsel %vm6106_vm9, %v6108_v4, %v6104_v45  ;;  %8199 = vrcp.f32 %v6115_v49  ;;  %v6216_v39 = vmul.f32 %v13901_v11, %v13888_v56  ;;  %v8196_v52 = vpop.eup %8195  ;;  %v6127_v46 = vand.u32 2147483648, %v6115_v49 }
 0xc2b   :  { %v6131_v1 = vmul.f32 %v6109_v15, %v15224_v8  ;;  %v6132_v25 = vmul.f32 %v8196_v52, %v6090_v47  ;;  %8201 = vrcp.f32 %v13906_v13  ;;  %v6125_v38 = vand.u32 2147483647, %v6115_v49  ;;  %v8006_v52 = vld [vmem:[%s13983_s8 + $0x28] sm:$0xff] }
 0xc2c   :  { %v6147_v62 = vpop.f32.mrf.mxu0  ;;  %v6217_v0 = vsub.f32 1.0, %v6216_v39  ;;  %vm6121_vm11 = vweird.f32 %v6115_v49  ;;  %vm6221_vm12 = vweird.f32 %v13901_v11  ;;  %v6128_v31 = vor.u32 1.1754944e-38, %v6127_v46 }
 0xc2d   :  { %v13908_v61 = vadd.f32 %v6132_v25, %v6131_v1  ;;  %vm6126_vm14 = vcmp.eq.f32.partialorder %v6125_v38, 8.507059e+37  ;;  %vm13920_vm0 = vmor %vm6220_vm15, %vm6221_vm12  ;;  %v6246_v28 = vand.u32 2147483648, %v13906_v13  ;;  %vm6240_vm8 = vweird.f32 %v13906_v13  ;;  %v8004_v25 = vld [vmem:[%s13983_s8 + $0x18] sm:$0xff] }
 0xc2e   :  { %v6171_v55 = vpop.f32.mrf.mxu2  ;;  %v6218_v26 = vmul.f32 %v13901_v11, %v6217_v0  ;;  %v6244_v15 = vand.u32 2147483647, %v13906_v13  ;;  %v8001_v0 = vld [vmem:[%s13983_s8] sm:$0xff] }
 0xc2f   :  { %v8198_v35 = vpop.eup %8197  ;;  %v6190_v42 = vadd.f32 %v6171_v55, %v15225_v33  ;;  %v6247_v47 = vor.u32 1.1754944e-38, %v6246_v28 }
 0xc30   :  { %v6195_v9 = vadd.f32 1.0, %v8198_v35  ;;  %v8200_v20 = vpop.eup %8199  ;;  %v6219_v34 = vadd.f32 %v13901_v11, %v6218_v26  ;;  %vm6245_vm10 = vcmp.eq.f32.partialorder %v6244_v15, 8.507059e+37  ;;  %v8005_v35 = vld [vmem:[%s13983_s8 + $0x20] sm:$0xff] }
 0xc31   :  { %v6117_v29 = vmul.f32 %v8200_v20, %v6115_v49  ;;  %vm6122_vm1 = vweird.f32 %v8200_v20  ;;  %v8202_v54 = vpop.eup %8201 }
 0xc32   :  { %8203 = vrcp.f32 %v6195_v9  ;;  %vm6123_vm13 = vmor %vm6121_vm11, %vm6122_vm1  ;;  %v6236_v21 = vmul.f32 %v8202_v54, %v13906_v13  ;;  %v6207_v7 = vand.u32 2147483648, %v6195_v9  ;;  %v6205_v19 = vand.u32 2147483647, %v6195_v9  ;;  %v8007_v13 = vld [vmem:[%s13983_s8 + $0x30] sm:$0xff] }
 0xc33   :  { %v6118_v43 = vsub.f32 1.0, %v6117_v29  ;;  %8205 = vtanh.f32 %v13908_v61  ;;  %v6223_v36 = vsel %vm13920_vm0, %v13901_v11, %v6219_v34  ;;  %vm6201_vm3 = vweird.f32 %v6195_v9  ;;  %v15228_v29 = vld [vmem:[#allocation224_spill] sm:$0xff] }
 0xc34   :  { %8207 = vtanh.f32 %v6190_v42  ;;  %v6237_v5 = vsub.f32 1.0, %v6236_v21  ;;  %v6208_v41 = vor.u32 1.1754944e-38, %v6207_v7  ;;  %v6228_v2 = vsel %vm6225_vm4, %v6227_v3, %v6223_v36 }
 0xc35   :  { %v6119_v27 = vmul.f32 %v8200_v20, %v6118_v43  ;;  %vm6206_vm6 = vcmp.eq.f32.partialorder %v6205_v19, 8.507059e+37  ;;  %v6250_v14 = vmul.f32 %v6228_v2, %v13777_v48  ;;  %vm6241_vm7 = vweird.f32 %v8202_v54  ;;  %v8008_v48 = vld [vmem:[%s13983_s8 + $0x38] sm:$0xff] }
 0xc36   :  { %v6173_v17 = vpop.f32.mrf.mxu2  ;;  %v6238_v22 = vmul.f32 %v8202_v54, %v6237_v5  ;;  %vm6242_vm9 = vmor %vm6240_vm8, %vm6241_vm7 }
 0xc37   :  { %v6120_v44 = vadd.f32 %v8200_v20, %v6119_v27  ;;  %v6424_v17 = vpack.c.bf16 %v13764_v24, %v15228_v29 }
 0xc38   :  { %v8204_v10 = vpop.eup %8203  ;;  %v6239_v11 = vadd.f32 %v8202_v54, %v6238_v22 }
 0xc39   :  { %v6197_v37 = vmul.f32 %v8204_v10, %v6195_v9  ;;  %v6124_v18 = vsel %vm6123_vm13, %v8200_v20, %v6120_v44  ;;  %v8206_v16 = vpop.eup %8205  ;;  %vm6202_vm2 = vweird.f32 %v8204_v10  ;;  %v8003_v9 = vld [vmem:[%s13983_s8 + $0x10] sm:$0xff]  ;;  %v8002_v20 = vld [vmem:[%s13983_s8 + $0x8] sm:$0xff] }
 0xc3a   :  { %v6129_v50 = vsel %vm6126_vm14, %v6128_v31, %v6124_v18  ;;  %vm6203_vm5 = vmor %vm6201_vm3, %vm6202_vm2  ;;  %v8208_v63 = vpop.eup %8207  ;;  %v6243_v55 = vsel %vm6242_vm9, %v8202_v54, %v6239_v11 }
 0xc3b   :  { %v6198_v58 = vsub.f32 1.0, %v6197_v37  ;;  %v13924_v30 = vmul.f32 %v8206_v16, %v6129_v50  ;;  %v6248_v39 = vsel %vm6245_vm10, %v6247_v47, %v6243_v55 }
 0xc3d   :  { %v6199_v32 = vmul.f32 %v8204_v10, %v6198_v58  ;;  %v6256_v56 = vpack.c.bf16 %v13924_v30, %v13924_v30 }
 0xc3f   :  { %v6200_v57 = vadd.f32 %v8204_v10, %v6199_v32  ;;  %6278 = vmatmul.bf16.vlgmr.msra.gmra.mxu1 %v6256_v56  ;;  %6304 = vmatmul.bf16.vlgmr.msrb.gmra.mxu3 %v6256_v56 }
 0xc41   :  { %v6204_v6 = vsel %vm6203_vm5, %v8204_v10, %v6200_v57 }
 0xc42   :  { %v6209_v4 = vsel %vm6206_vm6, %v6208_v41, %v6204_v6 }
 0xc43   :  { %v6251_v45 = vmul.f32 %v8208_v63, %v6209_v4  ;;  %v8098_v63 = vld [vmem:[%s13984_s9] ss:$0 sm:$0xff] }
 0xc45   :  { %v6252_v49 = vadd.f32 %v6251_v45, %v6250_v14 }
 0xc47   :  { %8209 = vtanh.f32 %v6252_v49 }
 0xc4d   :  { %v8210_v62 = vpop.eup %8209 }
 0xc4e   :  { %v6254_v8 = vmul.f32 %v8210_v62, %v6248_v39 }
 0xc4f   :  { %6330 = vmatmul.bf16.vlgmr.msrb.gmra.mxu1 %v6256_v56  ;;  %6356 = vmatmul.bf16.vlgmr.msra.gmra.mxu3 %v6256_v56 }
 0xc50   :  { %v6255_v1 = vpack.c.bf16 %v6254_v8, %v6254_v8 }
 0xc52   :  { %6265 = vmatmul.bf16.vlgmr.msra.gmra.mxu0 %v6255_v1  ;;  %6291 = vmatmul.bf16.vlgmr.msrb.gmra.mxu2 %v6255_v1 }
 0xc53   :  { %6494 = vmatpush.bf16.msra.mxu0 %v8008_v48 }
 0xc57   :  { %6495 = vmatpush.bf16.msra.mxu0 %v8007_v13 }
 0xc5b   :  { %6496 = vmatpush.bf16.msra.mxu0 %v8006_v52 }
 0xc5f   :  { %6497 = vmatpush.bf16.msra.mxu0 %v8005_v35 }
 0xc62   :  { %6317 = vmatmul.bf16.vlgmr.msrb.gmra.mxu0 %v6255_v1  ;;  %6343 = vmatmul.bf16.vlgmr.msra.gmra.mxu2 %v6255_v1 }
 0xc63   :  { %6498 = vmatpush.bf16.msra.mxu0 %v8004_v25 }
 0xc67   :  { %6499 = vmatpush.bf16.msra.mxu0 %v8003_v9 }
 0xc6b   :  { %6500 = vmatpush.bf16.msra.mxu0 %v8002_v20 }
 0xc6f   :  { %6501 = vmatpush.bf16.msra.mxu0 %v8001_v0 }
 0xc72   :  { %6502 = vmatmul.bf16.vlgmr.msra.gmra.mxu0 %v6424_v17 }
 0xcbc   :  { %v6279_v43 = vpop.f32.mrf.mxu1 }
 0xcc2   :  { %v6305_v26 = vpop.f32.mrf.mxu3 }
 0xcc4   :  { %v6281_v46 = vpop.f32.mrf.mxu1 }
 0xcca   :  { %v6307_v27 = vpop.f32.mrf.mxu3 }
 0xccc   :  { %v6331_v38 = vpop.f32.mrf.mxu1 }
 0xccf   :  { %v6266_v54 = vpop.f32.mrf.mxu0 }
 0xcd0   :  { %v6267_v10 = vadd.f32 %v6266_v54, %v15218_v59 }
 0xcd2   :  { %v6280_v33 = vadd.f32 %v6279_v43, %v6267_v10  ;;  %v6357_v42 = vpop.f32.mrf.mxu3 }
 0xcd4   :  { %v7698_v44 = vmul.f32 -1.442695, %v6280_v33  ;;  %v6333_v31 = vpop.f32.mrf.mxu1 }
 0xcd5   :  { %v6292_v37 = vpop.f32.mrf.mxu2 }
 0xcd6   :  { %8211 = vpow2.f32 %v7698_v44  ;;  %v6293_v34 = vadd.f32 %v6292_v37, %v15219_v60 }
 0xcd7   :  { %v6268_v40 = vpop.f32.mrf.mxu0 }
 0xcd8   :  { %v6306_v21 = vadd.f32 %v6305_v26, %v6293_v34 }
 0xcda   :  { %v7699_v24 = vmul.f32 -1.442695, %v6306_v21  ;;  %v6359_v18 = vpop.f32.mrf.mxu3 }
 0xcdc   :  { %v8212_v16 = vpop.eup %8211  ;;  %8213 = vpow2.f32 %v7699_v24 }
 0xcdd   :  { %v6364_v58 = vadd.f32 1.0, %v8212_v16  ;;  %v6294_v53 = vpop.f32.mrf.mxu2 }
 0xcdf   :  { %8215 = vrcp.f32 %v6364_v58  ;;  %v6318_v50 = vpop.f32.mrf.mxu0  ;;  %vm6370_vm12 = vweird.f32 %v6364_v58  ;;  %v6374_v55 = vand.u32 2147483647, %v6364_v58 }
 0xce0   :  { %v6319_v56 = vadd.f32 %v6318_v50, %v15148_v51 }
 0xce1   :  { %vm6375_vm2 = vcmp.eq.f32.partialorder %v6374_v55, 8.507059e+37 }
 0xce2   :  { %v8214_v23 = vpop.eup %8213  ;;  %v6332_v14 = vadd.f32 %v6331_v38, %v6319_v56 }
 0xce3   :  { %v6383_v59 = vadd.f32 1.0, %v8214_v23 }
 0xce5   :  { %v8216_v7 = vpop.eup %8215  ;;  %8217 = vrcp.f32 %v6383_v59  ;;  %v6344_v32 = vpop.f32.mrf.mxu2  ;;  %v6395_v45 = vand.u32 2147483648, %v6383_v59  ;;  %v6393_v51 = vand.u32 2147483647, %v6383_v59  ;;  %vm6389_vm13 = vweird.f32 %v6383_v59 }
 0xce6   :  { %v6366_v19 = vmul.f32 %v8216_v7, %v6364_v58  ;;  %v6345_v36 = vadd.f32 %v6344_v32, %v15079_v12  ;;  %vm6371_vm1 = vweird.f32 %v8216_v7  ;;  %v6376_v12 = vand.u32 2147483648, %v6364_v58 }
 0xce7   :  { %v6320_v3 = vpop.f32.mrf.mxu0  ;;  %vm6372_vm14 = vmor %vm6370_vm12, %vm6371_vm1  ;;  %v6396_v39 = vor.u32 1.1754944e-38, %v6395_v45  ;;  %vm6394_vm0 = vcmp.eq.f32.partialorder %v6393_v51, 8.507059e+37 }
 0xce8   :  { %v6367_v60 = vsub.f32 1.0, %v6366_v19  ;;  %v6358_v5 = vadd.f32 %v6357_v42, %v6345_v36  ;;  %v6377_v1 = vor.u32 1.1754944e-38, %v6376_v12 }
 0xcea   :  { %v7700_v57 = vmul.f32 -1.442695, %v6358_v5  ;;  %v6368_v2 = vmul.f32 %v8216_v7, %v6367_v60 }
 0xceb   :  { %v8218_v41 = vpop.eup %8217 }
 0xcec   :  { %v6385_v6 = vmul.f32 %v8218_v41, %v6383_v59  ;;  %8219 = vpow2.f32 %v7700_v57  ;;  %v6369_v49 = vadd.f32 %v8216_v7, %v6368_v2  ;;  %vm6390_vm11 = vweird.f32 %v8218_v41 }
 0xced   :  { %v6346_v4 = vpop.f32.mrf.mxu2  ;;  %8221 = vtanh.f32 %v6332_v14  ;;  %vm6391_vm15 = vmor %vm6389_vm13, %vm6390_vm11 }
 0xcee   :  { %v6386_v22 = vsub.f32 1.0, %v6385_v6  ;;  %v6373_v8 = vsel %vm6372_vm14, %v8216_v7, %v6369_v49 }
 0xcef   :  { %v6503_v11 = vpop.f32.mrf.mxu0  ;;  %v6378_v35 = vsel %vm6375_vm2, %v6377_v1, %v6373_v8 }
 0xcf0   :  { %v6387_v28 = vmul.f32 %v8218_v41, %v6386_v22  ;;  %v6504_v15 = vadd.f32 %v8098_v63, %v6503_v11 }
 0xcf2   :  { %v8220_v47 = vpop.eup %8219  ;;  %v6388_v62 = vadd.f32 %v8218_v41, %v6387_v28  ;;  %6513 = vst [vmem:[%s13985_s10] sm:$0xff] %v6504_v15 }
 0xcf3   :  { %v6403_v48 = vadd.f32 1.0, %v8220_v47  ;;  %v8222_v20 = vpop.eup %8221 }
 0xcf4   :  { %v6392_v13 = vsel %vm6391_vm15, %v8218_v41, %v6388_v62  ;;  %v6420_v29 = vmul.f32 %v8222_v20, %v6378_v35 }
 0xcf5   :  { %v6397_v52 = vsel %vm6394_vm0, %v6396_v39, %v6392_v13  ;;  %8223 = vrcp.f32 %v6403_v48  ;;  %v6415_v27 = vand.u32 2147483648, %v6403_v48  ;;  %v6413_v54 = vand.u32 2147483647, %v6403_v48 }
 0xcf6   :  { %v6419_v25 = vmul.f32 %v6397_v52, %v13908_v61  ;;  %vm6409_vm4 = vweird.f32 %v6403_v48 }
 0xcf7   :  { %v6505_v9 = vpop.f32.mrf.mxu0  ;;  %v6416_v61 = vor.u32 1.1754944e-38, %v6415_v27  ;;  %vm6414_vm6 = vcmp.eq.f32.partialorder %v6413_v54, 8.507059e+37 }
 0xcf8   :  { %v6506_v0 = vadd.f32 %v8098_v63, %v6505_v9  ;;  %v6421_v43 = vadd.f32 %v6420_v29, %v6419_v25 }
 0xcfa   :  { %6514 = vst [vmem:[%s13985_s10 + $0x8] sm:$0xff] %v6506_v0  ;;  %8225 = vtanh.f32 %v6421_v43 }
 0xcfb   :  { %v8224_v17 = vpop.eup %8223 }
 0xcfc   :  { %v6405_v26 = vmul.f32 %v8224_v17, %v6403_v48  ;;  %vm6410_vm3 = vweird.f32 %v8224_v17 }
 0xcfd   :  { %vm6411_vm5 = vmor %vm6409_vm4, %vm6410_vm3 }
 0xcfe   :  { %v6406_v46 = vsub.f32 1.0, %v6405_v26 }
 0xd00   :  { %v6407_v38 = vmul.f32 %v8224_v17, %v6406_v46  ;;  %v8226_v42 = vpop.eup %8225 }
 0xd02   :  { %v6408_v10 = vadd.f32 %v8224_v17, %v6407_v38 }
 0xd04   :  { %v6412_v33 = vsel %vm6411_vm5, %v8224_v17, %v6408_v10 }
 0xd05   :  { %v6417_v44 = vsel %vm6414_vm6, %v6416_v61, %v6412_v33 }
 0xd06   :  { %v6423_v31 = vmul.f32 %v8226_v42, %v6417_v44 }
 0xd08   :  { %v6425_v37 = vpack.c.bf16 %v6423_v31, %v13924_v30 }
 0xd0a   :  { %6507 = vmatmul.bf16.gmra.mxu0 %v6425_v37 }
 0xd87   :  { %v6508_v34 = vpop.f32.mrf.mxu0 }
 0xd88   :  { %v6509_v40 = vadd.f32 %v8098_v63, %v6508_v34 }
 0xd8a   :  { %6515 = vst [vmem:[%s13985_s10 + $0x10] sm:$0xff] %v6509_v40 }
 0xd8f   :  { %v6510_v21 = vpop.f32.mrf.mxu0 }
 0xd90   :  { %v6511_v24 = vadd.f32 %v8098_v63, %v6510_v21 }
 0xd92   :  { %6516 = vst [vmem:[%s13985_s10 + $0x18] sm:$0xff] %v6511_v24 }

</bundles_post_ra>
